<compile_context>
chip_gen: v7x
topology: tpu7x:2x2x1
jax: 0.10.0
libtpu: 0.0.40
codegen_flags: <defaults>
</compile_context>

<pallas_src>
import jax
import jax.numpy as jnp
from jax.experimental import pallas as pl
from jax.experimental.pallas import tpu as pltpu

ROT = 8                      # nbr_rotations -> regular repr field size
BLOCK_DIMS = (2, 3, 4)       # small synthetic block_dims
C1, C2, C3 = (bd * ROT for bd in BLOCK_DIMS)     # 16, 24, 32 channels
C3_TRIV = BLOCK_DIMS[2]      # trivial-repr channels of layer3triv output (4)
BN_EPS = 1e-5
MXU_DTYPE = jnp.bfloat16     # MXU operand dtype (f32 accumulation); use jnp.float32 for exact


# ---------------------------------------------------------------------------
# In-kernel helpers (operate on lane-dense 2-D row slabs of shape (H, W*C))
# ---------------------------------------------------------------------------
def _conv_rows(x2d, t_ref, shift, ho, relu):
    """Stride-1 'valid' conv as KH row-band matmuls vs. Toeplitz-expanded weights."""
    kh = t_ref.shape[0]
    xc = x2d.astype(t_ref.dtype)                       # bf16 MXU operands, f32 acc
    acc = jnp.dot(xc[0:ho, :], t_ref[0], preferred_element_type=jnp.float32)
    for a in range(1, kh):
        acc = acc + jnp.dot(xc[a:a + ho, :], t_ref[a],
                            preferred_element_type=jnp.float32)
    if shift is not None:
        acc = acc + shift                              # folded BatchNorm shift (1, Wo*Cout)
    if relu:
        acc = jnp.maximum(acc, 0.0)
    return acc                                         # (ho, Wo*Cout) float32


def _block_stride1(xin, pad_ref, t1_ref, b1, t2_ref, b2, wo, c):
    """BasicBlock, stride 1:  relu(conv2(relu(conv1(pad x))) + x)."""
    ho = xin.shape[0]
    pad_ref[1:ho + 1, c:c + wo * c] = xin              # interior of zero-padded scratch
    y = _conv_rows(pad_ref[...], t1_ref, b1, ho, True)
    pad_ref[1:ho + 1, c:c + wo * c] = y
    z = _conv_rows(pad_ref[...], t2_ref, b2, ho, False)
    return jnp.maximum(z + xin, 0.0)


def _make_stem_layer1_kernel(ho, wo, c):
    """stem conv (space-to-depth'd 7x7 s2) + bn + relu + layer1 (2 blocks)."""
    def kernel(xs_ref, ts_ref, bs_ref, t11_ref, b11_ref, t12_ref, b12_ref,
               t21_ref, b21_ref, t22_ref, b22_ref, o_ref, pad_ref):
        pad_ref[...] = jnp.zeros_like(pad_ref)         # zero border (tiny; per step)
        x0 = _conv_rows(xs_ref[...], ts_ref, bs_ref[...], ho, True)
        z1 = _block_stride1(x0, pad_ref, t11_ref, b11_ref[...],
                            t12_ref, b12_ref[...], wo, c)
        z2 = _block_stride1(z1, pad_ref, t21_ref, b21_ref[...],
                            t22_ref, b22_ref[...], wo, c)
        o_ref[...] = z2                                # lane-dense (ho, wo*c) store
    return kernel


def _make_layer_kernel(ho, wo, c, with_head):
    """layer{2,3}: stride-2 block + stride-1 block (+ optional outconv/triv head)."""
    def kernel(*refs):
        if with_head:
            (xs_ref, xd_ref, t1_ref, b1_ref, td_ref, bd_ref, t2_ref, b2_ref,
             t3_ref, b3_ref, t4_ref, b4_ref, to_ref, tt_ref, o_ref, pad_ref) = refs
        else:
            (xs_ref, xd_ref, t1_ref, b1_ref, td_ref, bd_ref, t2_ref, b2_ref,
             t3_ref, b3_ref, t4_ref, b4_ref, o_ref, pad_ref) = refs
        pad_ref[...] = jnp.zeros_like(pad_ref)
        # --- block 1 (stride 2): conv1 on space-to-depth input + 1x1 downsample ---
        y = _conv_rows(xs_ref[...], t1_ref, b1_ref[...], ho, True)
        idn = _conv_rows(xd_ref[...], td_ref, bd_ref[...], ho, False)
        pad_ref[1:ho + 1, c:c + wo * c] = y
        z = _conv_rows(pad_ref[...], t2_ref, b2_ref[...], ho, False)
        z1 = jnp.maximum(z + idn, 0.0)
        # --- block 2 (stride 1) ---
        z2 = _block_stride1(z1, pad_ref, t3_ref, b3_ref[...],
                            t4_ref, b4_ref[...], wo, c)
        if with_head:                                  # layer3_outconv (1x1) + layer3triv (3x3)
            x3o = _conv_rows(z2, to_ref, None, ho, False)
            pad_ref[1:ho + 1, c:c + wo * c] = x3o
            out = _conv_rows(pad_ref[...], tt_ref, None, ho, False)
        else:
            out = z2
        o_ref[...] = out
    return kernel


# ---------------------------------------------------------------------------
# pallas_call wrapper (grid over batch, whole per-image slabs, VMEM scratch)
# ---------------------------------------------------------------------------
def _batched_spec(tail):
    nd = len(tail)
    return pl.BlockSpec((None,) + tuple(tail), lambda i: (i,) + (0,) * nd)


def _shared_spec(shape):
    nd = len(shape)
    return pl.BlockSpec(tuple(shape), lambda i: (0,) * nd)


def _call_fused(kernel, acts, weights, out_rows, out_cols, scratch_shape):
    n = acts[0].shape[0]
    in_specs = ([_batched_spec(a.shape[1:]) for a in acts]
                + [_shared_spec(t.shape) for t in weights])
    return pl.pallas_call(
        kernel,
        out_shape=jax.ShapeDtypeStruct((n, out_rows, out_cols), jnp.float32),
        grid=(n,),
        in_specs=in_specs,
        out_specs=pl.BlockSpec((None, out_rows, out_cols), lambda i: (i, 0, 0)),
        scratch_shapes=[pltpu.VMEM(scratch_shape, jnp.float32)],
        compiler_params=pltpu.CompilerParams(dimension_semantics=("parallel",)),
    )(*acts, *weights)


# ---------------------------------------------------------------------------
# One-time host-side weight preparation
# ---------------------------------------------------------------------------
def _fold(w, scale):
    return w * scale[None, None, None, :]


def _s2d_weights(w):
    """Rewrite a KxK stride-2 conv as a ceil(K/2)^2 stride-1 conv on the
    phase-stacked (space-to-depth) input.  Exact."""
    k, _, cin, cout = w.shape
    ka = (k + 1) // 2
    w2 = jnp.zeros((ka, ka, 4 * cin, cout), w.dtype)
    for idx, (i, j) in enumerate(((0, 0), (0, 1), (1, 0), (1, 1))):
        sub = w[i::2, j::2]
        w2 = w2.at[:sub.shape[0], :sub.shape[1], idx * cin:(idx + 1) * cin, :].set(sub)
    return w2


def _toeplitz(w, wp, wo):
    """(KH,KW,Cin,Cout) stride-1 weights -> KH banded matrices (wp*Cin, wo*Cout)
    so that  conv(xpad) == sum_a xpad_rows[a:a+Ho, :] @ T[a]."""
    kh, kw, cin, cout = w.shape
    assert wo + kw - 1 == wp, (wo, kw, wp)
    w2 = w.reshape(kh, kw * cin, cout)
    t = jnp.zeros((kh, wp * cin, wo * cout), jnp.float32)
    for x in range(wo):
        t = t.at[:, x * cin:(x + kw) * cin, x * cout:(x + 1) * cout].set(w2)
    return t.astype(MXU_DTYPE)


def _wide_shift(shift, wo):
    return jnp.tile(shift, wo).reshape(1, -1).astype(jnp.float32)


def _prep_block(p, stride, w_in):
    if stride == 1:
        wo = w_in
        t1 = _toeplitz(_fold(p['conv1_w'], p['bn1_scale']), wo + 2, wo)
        pre = (t1, _wide_shift(p['bn1_shift'], wo))
    else:
        wo = w_in // 2
        t1 = _toeplitz(_s2d_weights(_fold(p['conv1_w'], p['bn1_scale'])), wo + 1, wo)
        td = _toeplitz(_fold(p['ds_w'], p['ds_scale']), wo, wo)
        pre = (t1, _wide_shift(p['bn1_shift'], wo), td, _wide_shift(p['ds_shift'], wo))
    t2 = _toeplitz(_fold(p['conv2_w'], p['bn2_scale']), wo + 2, wo)
    return pre + (t2, _wide_shift(p['bn2_shift'], wo))


def prepare_params(P, img_hw):
    """Fold BN scale into weights, rewrite strided convs via space-to-depth,
    Toeplitz-expand for lane-dense row-band matmuls, cast to MXU dtype."""
    h, w = img_hw
    assert h % 8 == 0 and w % 8 == 0
    w_2, w_4, w_8 = w // 2, w // 4, w // 8
    stem = _s2d_weights(_fold(P['conv1_w'], P['bn1_scale']))        # 7x7 s2 -> 4x4 s1
    A = ((_toeplitz(stem, w_2 + 3, w_2), _wide_shift(P['bn1_shift'], w_2))
         + _prep_block(P['l1b1'], 1, w_2) + _prep_block(P['l1b2'], 1, w_2))
    B = _prep_block(P['l2b1'], 2, w_2) + _prep_block(P['l2b2'], 1, w_4)
    C = (_prep_block(P['l3b1'], 2, w_4) + _prep_block(P['l3b2'], 1, w_8)
         + (_toeplitz(P['l3out_w'], w_8, w_8), _toeplitz(P['l3triv_w'], w_8 + 2, w_8)))
    return {'A': A, 'B': B, 'C': C}


# ---------------------------------------------------------------------------
# Wrapper-side activation prep (cheap XLA ops between the 3 pallas_calls)
# ---------------------------------------------------------------------------
def _pad_hw(x, p):
    return jnp.pad(x, ((0, 0), (p, p), (p, p), (0, 0)))


def _space_to_depth2(xp, k):
    """Phase-stack a padded input of a KxK stride-2 conv (stride-1 equivalent)."""
    n, hp, wp, c = xp.shape
    ka = (k + 1) // 2
    hs = (hp - k) // 2 + 1 + ka - 1
    ws = (wp - k) // 2 + 1 + ka - 1
    phases = []
    for i in (0, 1):
        for j in (0, 1):
            ph = xp[:, i::2, j::2, :][:, :hs, :ws, :]
            ph = jnp.pad(ph, ((0, 0), (0, hs - ph.shape[1]),
                              (0, ws - ph.shape[2]), (0, 0)))
            phases.append(ph)
    return jnp.concatenate(phases, axis=-1)            # (N, Hs, Ws, 4C)


def _rows(x4d):
    n, h, w, c = x4d.shape
    return x4d.reshape(n, h, w * c)                    # lane-dense row slabs


def forward(x_nchw, PP):
    x = jnp.transpose(x_nchw, (0, 2, 3, 1)).astype(jnp.float32)     # NCHW -> NHWC
    n, h, w, _ = x.shape
    h2, w2 = h // 2, w // 2
    h4, w4 = h // 4, w // 4
    h8, w8 = h // 8, w // 8

    # ---- stage A: stem conv (7x7 s2) + bn + relu + layer1 (one pallas_call) ----
    xs = _rows(_space_to_depth2(_pad_hw(x, 3), 7))                  # (N, h2+3, (w2+3)*4)
    kA = _make_stem_layer1_kernel(h2, w2, C1)
    x1 = _call_fused(kA, [xs], list(PP['A']), h2, w2 * C1,
                     (h2 + 2, (w2 + 2) * C1))                       # (N, h2, w2*C1)
    x1_4d = x1.reshape(n, h2, w2, C1)

    # ---- stage B: layer2 (one pallas_call) ----
    x1s = _rows(_space_to_depth2(_pad_hw(x1_4d, 1), 3))             # (N, h4+1, (w4+1)*4*C1)
    x1sub = _rows(x1_4d[:, ::2, ::2, :])                            # (N, h4, w4*C1)
    kB = _make_layer_kernel(h4, w4, C2, with_head=False)
    x2 = _call_fused(kB, [x1s, x1sub], list(PP['B']), h4, w4 * C2,
                     (h4 + 2, (w4 + 2) * C2))
    x2_4d = x2.reshape(n, h4, w4, C2)

    # ---- stage C: layer3 + layer3_outconv + layer3triv (one pallas_call) ----
    x2s = _rows(_space_to_depth2(_pad_hw(x2_4d, 1), 3))
    x2sub = _rows(x2_4d[:, ::2, ::2, :])
    kC = _make_layer_kernel(h8, w8, C3, with_head=True)
    out = _call_fused(kC, [x2s, x2sub], list(PP['C']), h8, w8 * C3_TRIV,
                      (h8 + 2, (w8 + 2) * C3))
    out_4d = out.reshape(n, h8, w8, C3_TRIV)
    # NOTE: the FPN x2/x1 refinement branch (up3to2, layer2_outconv*, up2to1,
    # layer1_outconv*) is dead code w.r.t. the module's return value.
    return jnp.transpose(out_4d, (0, 3, 1, 2))                      # NHWC -> NCHW


# ---------------------------------------------------------------------------
# Deterministic synthetic parameters
# ---------------------------------------------------------------------------
def _conv_w(key, kh, kw, cin, cout):
    std = (kh * kw * cin) ** -0.5
    return jax.random.normal(key, (kh, kw, cin, cout), jnp.float32) * std


def _bn(key, cout, field_size=ROT):
    """InnerBatchNorm (eval mode): per-field params shared within each field."""
    nf = cout // field_size
    k1, k2, k3, k4 = jax.random.split(key, 4)
    gamma = jax.random.uniform(k1, (nf,), jnp.float32, 0.8, 1.2)
    beta = jax.random.normal(k2, (nf,), jnp.float32) * 0.1
    mean = jax.random.normal(k3, (nf,), jnp.float32) * 0.1
    var = jax.random.uniform(k4, (nf,), jnp.float32, 0.5, 1.5)
    gamma, beta, mean, var = (jnp.repeat(v, field_size) for v in (gamma, beta, mean, var))
    scale = gamma / jnp.sqrt(var + BN_EPS)
    shift = beta - mean * scale
    return scale, shift


def make_block_params(key, cin, cout, stride):
    ks = jax.random.split(key, 6)
    p = {'conv1_w': _conv_w(ks[0], 3, 3, cin, cout),
         'conv2_w': _conv_w(ks[1], 3, 3, cout, cout)}
    p['bn1_scale'], p['bn1_shift'] = _bn(ks[2], cout)
    p['bn2_scale'], p['bn2_shift'] = _bn(ks[3], cout)
    if stride != 1:
        p['ds_w'] = _conv_w(ks[4], 1, 1, cin, cout)
        p['ds_scale'], p['ds_shift'] = _bn(ks[5], cout)
    return p


def make_params(key):
    ks = jax.random.split(key, 10)
    P = {'conv1_w': _conv_w(ks[0], 7, 7, 1, C1)}
    P['bn1_scale'], P['bn1_shift'] = _bn(ks[1], C1)
    P['l1b1'] = make_block_params(ks[2], C1, C1, 1)
    P['l1b2'] = make_block_params(ks[3], C1, C1, 1)
    P['l2b1'] = make_block_params(ks[4], C1, C2, 2)
    P['l2b2'] = make_block_params(ks[5], C2, C2, 1)
    P['l3b1'] = make_block_params(ks[6], C2, C3, 2)
    P['l3b2'] = make_block_params(ks[7], C3, C3, 1)
    P['l3out_w'] = _conv_w(ks[8], 1, 1, C3, C3)
    P['l3triv_w'] = _conv_w(ks[9], 3, 3, C3, C3_TRIV)
    return P


# ---------------------------------------------------------------------------
# Pure-JAX reference (same math: folded BN, bf16 MXU operands, f32 accumulate)
# ---------------------------------------------------------------------------
def _ref_conv(x, w, shift, stride, padding, relu, residual=None):
    y = jax.lax.conv_general_dilated(
        x.astype(MXU_DTYPE), w.astype(MXU_DTYPE),
        (stride, stride), ((padding, padding), (padding, padding)),
        dimension_numbers=('NHWC', 'HWIO', 'NHWC'),
        preferred_element_type=jnp.float32)
    if shift is not None:
        y = y + shift[None, None, None, :]
    if residual is not None:
        y = y + residual
    if relu:
        y = jnp.maximum(y, 0.0)
    return y


def _ref_block(x, p, stride):
    y = _ref_conv(x, _fold(p['conv1_w'], p['bn1_scale']), p['bn1_shift'], stride, 1, True)
    if stride == 1:
        idn = x
    else:
        idn = _ref_conv(x, _fold(p['ds_w'], p['ds_scale']), p['ds_shift'], stride, 0, False)
    return _ref_conv(y, _fold(p['conv2_w'], p['bn2_scale']), p['bn2_shift'], 1, 1, True,
                     residual=idn)


def ref_forward(x_nchw, P):
    x = jnp.transpose(x_nchw, (0, 2, 3, 1)).astype(jnp.float32)
    x0 = _ref_conv(x, _fold(P['conv1_w'], P['bn1_scale']), P['bn1_shift'], 2, 3, True)
    x1 = _ref_block(_ref_block(x0, P['l1b1'], 1), P['l1b2'], 1)
    x2 = _ref_block(_ref_block(x1, P['l2b1'], 2), P['l2b2'], 1)
    x3 = _ref_block(_ref_block(x2, P['l3b1'], 2), P['l3b2'], 1)
    x3_out = _ref_conv(x3, P['l3out_w'], None, 1, 0, False)
    x3_inv = _ref_conv(x3_out, P['l3triv_w'], None, 1, 1, False)
    return jnp.transpose(x3_inv, (0, 3, 1, 2))


if __name__ == "__main__":
    key = jax.random.PRNGKey(0)
    kp, kx = jax.random.split(key)
    params = make_params(kp)
    # Input like the PyTorch module: NCHW with a single trivial-repr channel.
    x = jax.random.normal(kx, (2, 1, 32, 32), jnp.float32)

    prepped = prepare_params(params, (32, 32))          # one-time weight prep
    out = jax.jit(forward)(x, prepped)
    out = jax.block_until_ready(out)

    assert out.shape == (2, C3_TRIV, 4, 4), out.shape
    assert out.dtype == jnp.float32

    ref = ref_forward(x, params)
    err = float(jnp.max(jnp.abs(out - ref)))
    tol = 1e-3 + 1e-3 * float(jnp.max(jnp.abs(ref)))
    assert err < tol, f"Pallas vs reference mismatch: {err} (tol {tol})"

    print("KERNEL_OK")
</pallas_src>

<mosaic_0001>
module attributes {stable_mosaic.version = 11 : i64} {
  func.func @kernel(%arg0: i32, %arg1: memref<1x19x76xf32, #tpu.memory_space<vmem>>, %arg2: memref<4x76x256xbf16, #tpu.memory_space<vmem>>, %arg3: memref<1x256xf32, #tpu.memory_space<vmem>>, %arg4: memref<3x288x256xbf16, #tpu.memory_space<vmem>>, %arg5: memref<1x256xf32, #tpu.memory_space<vmem>>, %arg6: memref<3x288x256xbf16, #tpu.memory_space<vmem>>, %arg7: memref<1x256xf32, #tpu.memory_space<vmem>>, %arg8: memref<3x288x256xbf16, #tpu.memory_space<vmem>>, %arg9: memref<1x256xf32, #tpu.memory_space<vmem>>, %arg10: memref<3x288x256xbf16, #tpu.memory_space<vmem>>, %arg11: memref<1x256xf32, #tpu.memory_space<vmem>>, %arg12: memref<1x16x256xf32, #tpu.memory_space<vmem>>, %arg13: memref<18x288xf32, #tpu.memory_space<vmem>>) attributes {dimension_semantics = [#tpu.dimension_semantics<parallel>], iteration_bounds = array<i64: 2>, scalar_prefetch = 0 : i64, scratch_operands = 1 : i64, tpu.core_type = #tpu.core_type<tc>, window_params = [{transform_indices = @transform_0, window_bounds = array<i64: 1, 19, 76>}, {pipeline_mode = #tpu.pipeline_mode<synchronous>, transform_indices = @transform_1, window_bounds = array<i64: 4, 76, 256>}, {pipeline_mode = #tpu.pipeline_mode<synchronous>, transform_indices = @transform_2, window_bounds = array<i64: 1, 256>}, {pipeline_mode = #tpu.pipeline_mode<synchronous>, transform_indices = @transform_3, window_bounds = array<i64: 3, 288, 256>}, {pipeline_mode = #tpu.pipeline_mode<synchronous>, transform_indices = @transform_4, window_bounds = array<i64: 1, 256>}, {pipeline_mode = #tpu.pipeline_mode<synchronous>, transform_indices = @transform_5, window_bounds = array<i64: 3, 288, 256>}, {pipeline_mode = #tpu.pipeline_mode<synchronous>, transform_indices = @transform_6, window_bounds = array<i64: 1, 256>}, {pipeline_mode = #tpu.pipeline_mode<synchronous>, transform_indices = @transform_7, window_bounds = array<i64: 3, 288, 256>}, {pipeline_mode = #tpu.pipeline_mode<synchronous>, transform_indices = @transform_8, window_bounds = array<i64: 1, 256>}, {pipeline_mode = #tpu.pipeline_mode<synchronous>, transform_indices = @transform_9, window_bounds = array<i64: 3, 288, 256>}, {pipeline_mode = #tpu.pipeline_mode<synchronous>, transform_indices = @transform_10, window_bounds = array<i64: 1, 256>}, {transform_indices = @transform_11, window_bounds = array<i64: 1, 16, 256>}]} {
    %cst = arith.constant 0.000000e+00 : f32
    %0 = vector.broadcast %cst : f32 to vector<18x288xf32>
    %c0 = arith.constant 0 : index
    %c0_0 = arith.constant 0 : index
    %1 = vector.load %arg13[%c0, %c0_0] : memref<18x288xf32, #tpu.memory_space<vmem>>, vector<18x288xf32>
    tpu.vector_store %arg13[%c0, %c0_0], %0 {strides = array<i32>} : memref<18x288xf32, #tpu.memory_space<vmem>>, vector<18x288xf32>,
    %c0_1 = arith.constant 0 : index
    %c0_2 = arith.constant 0 : index
    %c0_3 = arith.constant 0 : index
    %2 = vector.load %arg1[%c0_1, %c0_2, %c0_3] : memref<1x19x76xf32, #tpu.memory_space<vmem>>, vector<1x19x76xf32>
    %3 = vector.shape_cast %2 : vector<1x19x76xf32> to vector<19x76xf32>
    %c0_4 = arith.constant 0 : index
    %c0_5 = arith.constant 0 : index
    %4 = vector.load %arg3[%c0_4, %c0_5] : memref<1x256xf32, #tpu.memory_space<vmem>>, vector<1x256xf32>
    %5 = arith.truncf %3 : vector<19x76xf32> to vector<19x76xbf16>
    %6 = vector.extract_strided_slice %5 {offsets = [0, 0], sizes = [16, 76], strides = [1, 1]} : vector<19x76xbf16> to vector<16x76xbf16>
    %c0_6 = arith.constant 0 : index
    %c0_7 = arith.constant 0 : index
    %c0_8 = arith.constant 0 : index
    %7 = vector.load %arg2[%c0_6, %c0_7, %c0_8] : memref<4x76x256xbf16, #tpu.memory_space<vmem>>, vector<1x76x256xbf16>
    %8 = vector.shape_cast %7 : vector<1x76x256xbf16> to vector<76x256xbf16>
    %cst_9 = arith.constant dense<0.000000e+00> : vector<16x256xf32>
    %9 = tpu.matmul %6, %8, %cst_9 {dimension_numbers = #tpu.dot_dimension_numbers<[1], [0], [0], [1], [0, 0, 1, 1], [], []>} : vector<16x76xbf16>, vector<76x256xbf16>, vector<16x256xf32> -> vector<16x256xf32>
    %10 = vector.extract_strided_slice %5 {offsets = [1, 0], sizes = [16, 76], strides = [1, 1]} : vector<19x76xbf16> to vector<16x76xbf16>
    %c1 = arith.constant 1 : index
    %c0_10 = arith.constant 0 : index
    %c0_11 = arith.constant 0 : index
    %11 = vector.load %arg2[%c1, %c0_10, %c0_11] : memref<4x76x256xbf16, #tpu.memory_space<vmem>>, vector<1x76x256xbf16>
    %12 = vector.shape_cast %11 : vector<1x76x256xbf16> to vector<76x256xbf16>
    %cst_12 = arith.constant dense<0.000000e+00> : vector<16x256xf32>
    %13 = tpu.matmul %10, %12, %cst_12 {dimension_numbers = #tpu.dot_dimension_numbers<[1], [0], [0], [1], [0, 0, 1, 1], [], []>} : vector<16x76xbf16>, vector<76x256xbf16>, vector<16x256xf32> -> vector<16x256xf32>
    %14 = arith.addf %9, %13 : vector<16x256xf32>
    %15 = vector.extract_strided_slice %5 {offsets = [2, 0], sizes = [16, 76], strides = [1, 1]} : vector<19x76xbf16> to vector<16x76xbf16>
    %c2 = arith.constant 2 : index
    %c0_13 = arith.constant 0 : index
    %c0_14 = arith.constant 0 : index
    %16 = vector.load %arg2[%c2, %c0_13, %c0_14] : memref<4x76x256xbf16, #tpu.memory_space<vmem>>, vector<1x76x256xbf16>
    %17 = vector.shape_cast %16 : vector<1x76x256xbf16> to vector<76x256xbf16>
    %cst_15 = arith.constant dense<0.000000e+00> : vector<16x256xf32>
    %18 = tpu.matmul %15, %17, %cst_15 {dimension_numbers = #tpu.dot_dimension_numbers<[1], [0], [0], [1], [0, 0, 1, 1], [], []>} : vector<16x76xbf16>, vector<76x256xbf16>, vector<16x256xf32> -> vector<16x256xf32>
    %19 = arith.addf %14, %18 : vector<16x256xf32>
    %20 = vector.extract_strided_slice %5 {offsets = [3, 0], sizes = [16, 76], strides = [1, 1]} : vector<19x76xbf16> to vector<16x76xbf16>
    %c3 = arith.constant 3 : index
    %c0_16 = arith.constant 0 : index
    %c0_17 = arith.constant 0 : index
    %21 = vector.load %arg2[%c3, %c0_16, %c0_17] : memref<4x76x256xbf16, #tpu.memory_space<vmem>>, vector<1x76x256xbf16>
    %22 = vector.shape_cast %21 : vector<1x76x256xbf16> to vector<76x256xbf16>
    %cst_18 = arith.constant dense<0.000000e+00> : vector<16x256xf32>
    %23 = tpu.matmul %20, %22, %cst_18 {dimension_numbers = #tpu.dot_dimension_numbers<[1], [0], [0], [1], [0, 0, 1, 1], [], []>} : vector<16x76xbf16>, vector<76x256xbf16>, vector<16x256xf32> -> vector<16x256xf32>
    %24 = arith.addf %19, %23 : vector<16x256xf32>
    %25 = vector.broadcast %4 : vector<1x256xf32> to vector<16x256xf32>
    %26 = arith.addf %24, %25 : vector<16x256xf32>
    %cst_19 = arith.constant 0.000000e+00 : f32
    %27 = vector.broadcast %cst_19 : f32 to vector<16x256xf32>
    %28 = arith.maximumf %26, %27 : vector<16x256xf32>
    %c0_20 = arith.constant 0 : index
    %c0_21 = arith.constant 0 : index
    %29 = vector.load %arg5[%c0_20, %c0_21] : memref<1x256xf32, #tpu.memory_space<vmem>>, vector<1x256xf32>
    %c0_22 = arith.constant 0 : index
    %c0_23 = arith.constant 0 : index
    %30 = vector.load %arg7[%c0_22, %c0_23] : memref<1x256xf32, #tpu.memory_space<vmem>>, vector<1x256xf32>
    %c1_24 = arith.constant 1 : index
    %c16 = arith.constant 16 : index
    %31 = vector.load %arg13[%c1_24, %c16] : memref<18x288xf32, #tpu.memory_space<vmem>>, vector<16x256xf32>
    tpu.vector_store %arg13[%c1_24, %c16], %28 {strides = array<i32>} : memref<18x288xf32, #tpu.memory_space<vmem>>, vector<16x256xf32>,
    %c0_25 = arith.constant 0 : index
    %c0_26 = arith.constant 0 : index
    %32 = vector.load %arg13[%c0_25, %c0_26] : memref<18x288xf32, #tpu.memory_space<vmem>>, vector<18x288xf32>
    %33 = arith.truncf %32 : vector<18x288xf32> to vector<18x288xbf16>
    %34 = vector.extract_strided_slice %33 {offsets = [0, 0], sizes = [16, 288], strides = [1, 1]} : vector<18x288xbf16> to vector<16x288xbf16>
    %c0_27 = arith.constant 0 : index
    %c0_28 = arith.constant 0 : index
    %c0_29 = arith.constant 0 : index
    %35 = vector.load %arg4[%c0_27, %c0_28, %c0_29] : memref<3x288x256xbf16, #tpu.memory_space<vmem>>, vector<1x288x256xbf16>
    %36 = vector.shape_cast %35 : vector<1x288x256xbf16> to vector<288x256xbf16>
    %cst_30 = arith.constant dense<0.000000e+00> : vector<16x256xf32>
    %37 = tpu.matmul %34, %36, %cst_30 {dimension_numbers = #tpu.dot_dimension_numbers<[1], [0], [0], [1], [0, 0, 1, 1], [], []>} : vector<16x288xbf16>, vector<288x256xbf16>, vector<16x256xf32> -> vector<16x256xf32>
    %38 = vector.extract_strided_slice %33 {offsets = [1, 0], sizes = [16, 288], strides = [1, 1]} : vector<18x288xbf16> to vector<16x288xbf16>
    %c1_31 = arith.constant 1 : index
    %c0_32 = arith.constant 0 : index
    %c0_33 = arith.constant 0 : index
    %39 = vector.load %arg4[%c1_31, %c0_32, %c0_33] : memref<3x288x256xbf16, #tpu.memory_space<vmem>>, vector<1x288x256xbf16>
    %40 = vector.shape_cast %39 : vector<1x288x256xbf16> to vector<288x256xbf16>
    %cst_34 = arith.constant dense<0.000000e+00> : vector<16x256xf32>
    %41 = tpu.matmul %38, %40, %cst_34 {dimension_numbers = #tpu.dot_dimension_numbers<[1], [0], [0], [1], [0, 0, 1, 1], [], []>} : vector<16x288xbf16>, vector<288x256xbf16>, vector<16x256xf32> -> vector<16x256xf32>
    %42 = arith.addf %37, %41 : vector<16x256xf32>
    %43 = vector.extract_strided_slice %33 {offsets = [2, 0], sizes = [16, 288], strides = [1, 1]} : vector<18x288xbf16> to vector<16x288xbf16>
    %c2_35 = arith.constant 2 : index
    %c0_36 = arith.constant 0 : index
    %c0_37 = arith.constant 0 : index
    %44 = vector.load %arg4[%c2_35, %c0_36, %c0_37] : memref<3x288x256xbf16, #tpu.memory_space<vmem>>, vector<1x288x256xbf16>
    %45 = vector.shape_cast %44 : vector<1x288x256xbf16> to vector<288x256xbf16>
    %cst_38 = arith.constant dense<0.000000e+00> : vector<16x256xf32>
    %46 = tpu.matmul %43, %45, %cst_38 {dimension_numbers = #tpu.dot_dimension_numbers<[1], [0], [0], [1], [0, 0, 1, 1], [], []>} : vector<16x288xbf16>, vector<288x256xbf16>, vector<16x256xf32> -> vector<16x256xf32>
    %47 = arith.addf %42, %46 : vector<16x256xf32>
    %48 = vector.broadcast %29 : vector<1x256xf32> to vector<16x256xf32>
    %49 = arith.addf %47, %48 : vector<16x256xf32>
    %cst_39 = arith.constant 0.000000e+00 : f32
    %50 = vector.broadcast %cst_39 : f32 to vector<16x256xf32>
    %51 = arith.maximumf %49, %50 : vector<16x256xf32>
    %c1_40 = arith.constant 1 : index
    %c16_41 = arith.constant 16 : index
    %52 = vector.load %arg13[%c1_40, %c16_41] : memref<18x288xf32, #tpu.memory_space<vmem>>, vector<16x256xf32>
    tpu.vector_store %arg13[%c1_40, %c16_41], %51 {strides = array<i32>} : memref<18x288xf32, #tpu.memory_space<vmem>>, vector<16x256xf32>,
    %c0_42 = arith.constant 0 : index
    %c0_43 = arith.constant 0 : index
    %53 = vector.load %arg13[%c0_42, %c0_43] : memref<18x288xf32, #tpu.memory_space<vmem>>, vector<18x288xf32>
    %54 = arith.truncf %53 : vector<18x288xf32> to vector<18x288xbf16>
    %55 = vector.extract_strided_slice %54 {offsets = [0, 0], sizes = [16, 288], strides = [1, 1]} : vector<18x288xbf16> to vector<16x288xbf16>
    %c0_44 = arith.constant 0 : index
    %c0_45 = arith.constant 0 : index
    %c0_46 = arith.constant 0 : index
    %56 = vector.load %arg6[%c0_44, %c0_45, %c0_46] : memref<3x288x256xbf16, #tpu.memory_space<vmem>>, vector<1x288x256xbf16>
    %57 = vector.shape_cast %56 : vector<1x288x256xbf16> to vector<288x256xbf16>
    %cst_47 = arith.constant dense<0.000000e+00> : vector<16x256xf32>
    %58 = tpu.matmul %55, %57, %cst_47 {dimension_numbers = #tpu.dot_dimension_numbers<[1], [0], [0], [1], [0, 0, 1, 1], [], []>} : vector<16x288xbf16>, vector<288x256xbf16>, vector<16x256xf32> -> vector<16x256xf32>
    %59 = vector.extract_strided_slice %54 {offsets = [1, 0], sizes = [16, 288], strides = [1, 1]} : vector<18x288xbf16> to vector<16x288xbf16>
    %c1_48 = arith.constant 1 : index
    %c0_49 = arith.constant 0 : index
    %c0_50 = arith.constant 0 : index
    %60 = vector.load %arg6[%c1_48, %c0_49, %c0_50] : memref<3x288x256xbf16, #tpu.memory_space<vmem>>, vector<1x288x256xbf16>
    %61 = vector.shape_cast %60 : vector<1x288x256xbf16> to vector<288x256xbf16>
    %cst_51 = arith.constant dense<0.000000e+00> : vector<16x256xf32>
    %62 = tpu.matmul %59, %61, %cst_51 {dimension_numbers = #tpu.dot_dimension_numbers<[1], [0], [0], [1], [0, 0, 1, 1], [], []>} : vector<16x288xbf16>, vector<288x256xbf16>, vector<16x256xf32> -> vector<16x256xf32>
    %63 = arith.addf %58, %62 : vector<16x256xf32>
    %64 = vector.extract_strided_slice %54 {offsets = [2, 0], sizes = [16, 288], strides = [1, 1]} : vector<18x288xbf16> to vector<16x288xbf16>
    %c2_52 = arith.constant 2 : index
    %c0_53 = arith.constant 0 : index
    %c0_54 = arith.constant 0 : index
    %65 = vector.load %arg6[%c2_52, %c0_53, %c0_54] : memref<3x288x256xbf16, #tpu.memory_space<vmem>>, vector<1x288x256xbf16>
    %66 = vector.shape_cast %65 : vector<1x288x256xbf16> to vector<288x256xbf16>
    %cst_55 = arith.constant dense<0.000000e+00> : vector<16x256xf32>
    %67 = tpu.matmul %64, %66, %cst_55 {dimension_numbers = #tpu.dot_dimension_numbers<[1], [0], [0], [1], [0, 0, 1, 1], [], []>} : vector<16x288xbf16>, vector<288x256xbf16>, vector<16x256xf32> -> vector<16x256xf32>
    %68 = arith.addf %63, %67 : vector<16x256xf32>
    %69 = vector.broadcast %30 : vector<1x256xf32> to vector<16x256xf32>
    %70 = arith.addf %68, %69 : vector<16x256xf32>
    %71 = arith.addf %70, %28 : vector<16x256xf32>
    %cst_56 = arith.constant 0.000000e+00 : f32
    %72 = vector.broadcast %cst_56 : f32 to vector<16x256xf32>
    %73 = arith.maximumf %71, %72 : vector<16x256xf32>
    %c0_57 = arith.constant 0 : index
    %c0_58 = arith.constant 0 : index
    %74 = vector.load %arg9[%c0_57, %c0_58] : memref<1x256xf32, #tpu.memory_space<vmem>>, vector<1x256xf32>
    %c0_59 = arith.constant 0 : index
    %c0_60 = arith.constant 0 : index
    %75 = vector.load %arg11[%c0_59, %c0_60] : memref<1x256xf32, #tpu.memory_space<vmem>>, vector<1x256xf32>
    %c1_61 = arith.constant 1 : index
    %c16_62 = arith.constant 16 : index
    %76 = vector.load %arg13[%c1_61, %c16_62] : memref<18x288xf32, #tpu.memory_space<vmem>>, vector<16x256xf32>
    tpu.vector_store %arg13[%c1_61, %c16_62], %73 {strides = array<i32>} : memref<18x288xf32, #tpu.memory_space<vmem>>, vector<16x256xf32>,
    %c0_63 = arith.constant 0 : index
    %c0_64 = arith.constant 0 : index
    %77 = vector.load %arg13[%c0_63, %c0_64] : memref<18x288xf32, #tpu.memory_space<vmem>>, vector<18x288xf32>
    %78 = arith.truncf %77 : vector<18x288xf32> to vector<18x288xbf16>
    %79 = vector.extract_strided_slice %78 {offsets = [0, 0], sizes = [16, 288], strides = [1, 1]} : vector<18x288xbf16> to vector<16x288xbf16>
    %c0_65 = arith.constant 0 : index
    %c0_66 = arith.constant 0 : index
    %c0_67 = arith.constant 0 : index
    %80 = vector.load %arg8[%c0_65, %c0_66, %c0_67] : memref<3x288x256xbf16, #tpu.memory_space<vmem>>, vector<1x288x256xbf16>
    %81 = vector.shape_cast %80 : vector<1x288x256xbf16> to vector<288x256xbf16>
    %cst_68 = arith.constant dense<0.000000e+00> : vector<16x256xf32>
    %82 = tpu.matmul %79, %81, %cst_68 {dimension_numbers = #tpu.dot_dimension_numbers<[1], [0], [0], [1], [0, 0, 1, 1], [], []>} : vector<16x288xbf16>, vector<288x256xbf16>, vector<16x256xf32> -> vector<16x256xf32>
    %83 = vector.extract_strided_slice %78 {offsets = [1, 0], sizes = [16, 288], strides = [1, 1]} : vector<18x288xbf16> to vector<16x288xbf16>
    %c1_69 = arith.constant 1 : index
    %c0_70 = arith.constant 0 : index
    %c0_71 = arith.constant 0 : index
    %84 = vector.load %arg8[%c1_69, %c0_70, %c0_71] : memref<3x288x256xbf16, #tpu.memory_space<vmem>>, vector<1x288x256xbf16>
    %85 = vector.shape_cast %84 : vector<1x288x256xbf16> to vector<288x256xbf16>
    %cst_72 = arith.constant dense<0.000000e+00> : vector<16x256xf32>
    %86 = tpu.matmul %83, %85, %cst_72 {dimension_numbers = #tpu.dot_dimension_numbers<[1], [0], [0], [1], [0, 0, 1, 1], [], []>} : vector<16x288xbf16>, vector<288x256xbf16>, vector<16x256xf32> -> vector<16x256xf32>
    %87 = arith.addf %82, %86 : vector<16x256xf32>
    %88 = vector.extract_strided_slice %78 {offsets = [2, 0], sizes = [16, 288], strides = [1, 1]} : vector<18x288xbf16> to vector<16x288xbf16>
    %c2_73 = arith.constant 2 : index
    %c0_74 = arith.constant 0 : index
    %c0_75 = arith.constant 0 : index
    %89 = vector.load %arg8[%c2_73, %c0_74, %c0_75] : memref<3x288x256xbf16, #tpu.memory_space<vmem>>, vector<1x288x256xbf16>
    %90 = vector.shape_cast %89 : vector<1x288x256xbf16> to vector<288x256xbf16>
    %cst_76 = arith.constant dense<0.000000e+00> : vector<16x256xf32>
    %91 = tpu.matmul %88, %90, %cst_76 {dimension_numbers = #tpu.dot_dimension_numbers<[1], [0], [0], [1], [0, 0, 1, 1], [], []>} : vector<16x288xbf16>, vector<288x256xbf16>, vector<16x256xf32> -> vector<16x256xf32>
    %92 = arith.addf %87, %91 : vector<16x256xf32>
    %93 = vector.broadcast %74 : vector<1x256xf32> to vector<16x256xf32>
    %94 = arith.addf %92, %93 : vector<16x256xf32>
    %cst_77 = arith.constant 0.000000e+00 : f32
    %95 = vector.broadcast %cst_77 : f32 to vector<16x256xf32>
    %96 = arith.maximumf %94, %95 : vector<16x256xf32>
    %c1_78 = arith.constant 1 : index
    %c16_79 = arith.constant 16 : index
    %97 = vector.load %arg13[%c1_78, %c16_79] : memref<18x288xf32, #tpu.memory_space<vmem>>, vector<16x256xf32>
    tpu.vector_store %arg13[%c1_78, %c16_79], %96 {strides = array<i32>} : memref<18x288xf32, #tpu.memory_space<vmem>>, vector<16x256xf32>,
    %c0_80 = arith.constant 0 : index
    %c0_81 = arith.constant 0 : index
    %98 = vector.load %arg13[%c0_80, %c0_81] : memref<18x288xf32, #tpu.memory_space<vmem>>, vector<18x288xf32>
    %99 = arith.truncf %98 : vector<18x288xf32> to vector<18x288xbf16>
    %100 = vector.extract_strided_slice %99 {offsets = [0, 0], sizes = [16, 288], strides = [1, 1]} : vector<18x288xbf16> to vector<16x288xbf16>
    %c0_82 = arith.constant 0 : index
    %c0_83 = arith.constant 0 : index
    %c0_84 = arith.constant 0 : index
    %101 = vector.load %arg10[%c0_82, %c0_83, %c0_84] : memref<3x288x256xbf16, #tpu.memory_space<vmem>>, vector<1x288x256xbf16>
    %102 = vector.shape_cast %101 : vector<1x288x256xbf16> to vector<288x256xbf16>
    %cst_85 = arith.constant dense<0.000000e+00> : vector<16x256xf32>
    %103 = tpu.matmul %100, %102, %cst_85 {dimension_numbers = #tpu.dot_dimension_numbers<[1], [0], [0], [1], [0, 0, 1, 1], [], []>} : vector<16x288xbf16>, vector<288x256xbf16>, vector<16x256xf32> -> vector<16x256xf32>
    %104 = vector.extract_strided_slice %99 {offsets = [1, 0], sizes = [16, 288], strides = [1, 1]} : vector<18x288xbf16> to vector<16x288xbf16>
    %c1_86 = arith.constant 1 : index
    %c0_87 = arith.constant 0 : index
    %c0_88 = arith.constant 0 : index
    %105 = vector.load %arg10[%c1_86, %c0_87, %c0_88] : memref<3x288x256xbf16, #tpu.memory_space<vmem>>, vector<1x288x256xbf16>
    %106 = vector.shape_cast %105 : vector<1x288x256xbf16> to vector<288x256xbf16>
    %cst_89 = arith.constant dense<0.000000e+00> : vector<16x256xf32>
    %107 = tpu.matmul %104, %106, %cst_89 {dimension_numbers = #tpu.dot_dimension_numbers<[1], [0], [0], [1], [0, 0, 1, 1], [], []>} : vector<16x288xbf16>, vector<288x256xbf16>, vector<16x256xf32> -> vector<16x256xf32>
    %108 = arith.addf %103, %107 : vector<16x256xf32>
    %109 = vector.extract_strided_slice %99 {offsets = [2, 0], sizes = [16, 288], strides = [1, 1]} : vector<18x288xbf16> to vector<16x288xbf16>
    %c2_90 = arith.constant 2 : index
    %c0_91 = arith.constant 0 : index
    %c0_92 = arith.constant 0 : index
    %110 = vector.load %arg10[%c2_90, %c0_91, %c0_92] : memref<3x288x256xbf16, #tpu.memory_space<vmem>>, vector<1x288x256xbf16>
    %111 = vector.shape_cast %110 : vector<1x288x256xbf16> to vector<288x256xbf16>
    %cst_93 = arith.constant dense<0.000000e+00> : vector<16x256xf32>
    %112 = tpu.matmul %109, %111, %cst_93 {dimension_numbers = #tpu.dot_dimension_numbers<[1], [0], [0], [1], [0, 0, 1, 1], [], []>} : vector<16x288xbf16>, vector<288x256xbf16>, vector<16x256xf32> -> vector<16x256xf32>
    %113 = arith.addf %108, %112 : vector<16x256xf32>
    %114 = vector.broadcast %75 : vector<1x256xf32> to vector<16x256xf32>
    %115 = arith.addf %113, %114 : vector<16x256xf32>
    %116 = arith.addf %115, %73 : vector<16x256xf32>
    %cst_94 = arith.constant 0.000000e+00 : f32
    %117 = vector.broadcast %cst_94 : f32 to vector<16x256xf32>
    %118 = arith.maximumf %116, %117 : vector<16x256xf32>
    %c0_95 = arith.constant 0 : index
    %c0_96 = arith.constant 0 : index
    %c0_97 = arith.constant 0 : index
    %119 = vector.load %arg12[%c0_95, %c0_96, %c0_97] : memref<1x16x256xf32, #tpu.memory_space<vmem>>, vector<1x16x256xf32>
    %120 = vector.shape_cast %119 : vector<1x16x256xf32> to vector<16x256xf32>
    %121 = vector.shape_cast %118 : vector<16x256xf32> to vector<1x16x256xf32>
    tpu.vector_store %arg12[%c0_95, %c0_96, %c0_97], %121 {strides = array<i32>} : memref<1x16x256xf32, #tpu.memory_space<vmem>>, vector<1x16x256xf32>,
    return
  }
  func.func @transform_0(%arg0: i32) -> (i32, i32, i32) {
    %c0_i32 = arith.constant 0 : i32
    %c0_i32_0 = arith.constant 0 : i32
    %c0_i32_1 = arith.constant 0 : i32
    return %arg0, %c0_i32, %c0_i32_0 : i32, i32, i32
  }
  func.func @transform_1(%arg0: i32) -> (i32, i32, i32) {
    %c0_i32 = arith.constant 0 : i32
    %c0_i32_0 = arith.constant 0 : i32
    %c0_i32_1 = arith.constant 0 : i32
    %c0_i32_2 = arith.constant 0 : i32
    return %c0_i32, %c0_i32_0, %c0_i32_1 : i32, i32, i32
  }
  func.func @transform_2(%arg0: i32) -> (i32, i32) {
    %c0_i32 = arith.constant 0 : i32
    %c0_i32_0 = arith.constant 0 : i32
    %c0_i32_1 = arith.constant 0 : i32
    return %c0_i32, %c0_i32_0 : i32, i32
  }
  func.func @transform_3(%arg0: i32) -> (i32, i32, i32) {
    %c0_i32 = arith.constant 0 : i32
    %c0_i32_0 = arith.constant 0 : i32
    %c0_i32_1 = arith.constant 0 : i32
    %c0_i32_2 = arith.constant 0 : i32
    return %c0_i32, %c0_i32_0, %c0_i32_1 : i32, i32, i32
  }
  func.func @transform_4(%arg0: i32) -> (i32, i32) {
    %c0_i32 = arith.constant 0 : i32
    %c0_i32_0 = arith.constant 0 : i32
    %c0_i32_1 = arith.constant 0 : i32
    return %c0_i32, %c0_i32_0 : i32, i32
  }
  func.func @transform_5(%arg0: i32) -> (i32, i32, i32) {
    %c0_i32 = arith.constant 0 : i32
    %c0_i32_0 = arith.constant 0 : i32
    %c0_i32_1 = arith.constant 0 : i32
    %c0_i32_2 = arith.constant 0 : i32
    return %c0_i32, %c0_i32_0, %c0_i32_1 : i32, i32, i32
  }
  func.func @transform_6(%arg0: i32) -> (i32, i32) {
    %c0_i32 = arith.constant 0 : i32
    %c0_i32_0 = arith.constant 0 : i32
    %c0_i32_1 = arith.constant 0 : i32
    return %c0_i32, %c0_i32_0 : i32, i32
  }
  func.func @transform_7(%arg0: i32) -> (i32, i32, i32) {
    %c0_i32 = arith.constant 0 : i32
    %c0_i32_0 = arith.constant 0 : i32
    %c0_i32_1 = arith.constant 0 : i32
    %c0_i32_2 = arith.constant 0 : i32
    return %c0_i32, %c0_i32_0, %c0_i32_1 : i32, i32, i32
  }
  func.func @transform_8(%arg0: i32) -> (i32, i32) {
    %c0_i32 = arith.constant 0 : i32
    %c0_i32_0 = arith.constant 0 : i32
    %c0_i32_1 = arith.constant 0 : i32
    return %c0_i32, %c0_i32_0 : i32, i32
  }
  func.func @transform_9(%arg0: i32) -> (i32, i32, i32) {
    %c0_i32 = arith.constant 0 : i32
    %c0_i32_0 = arith.constant 0 : i32
    %c0_i32_1 = arith.constant 0 : i32
    %c0_i32_2 = arith.constant 0 : i32
    return %c0_i32, %c0_i32_0, %c0_i32_1 : i32, i32, i32
  }
  func.func @transform_10(%arg0: i32) -> (i32, i32) {
    %c0_i32 = arith.constant 0 : i32
    %c0_i32_0 = arith.constant 0 : i32
    %c0_i32_1 = arith.constant 0 : i32
    return %c0_i32, %c0_i32_0 : i32, i32
  }
  func.func @transform_11(%arg0: i32) -> (i32, i32, i32) {
    %c0_i32 = arith.constant 0 : i32
    %c0_i32_0 = arith.constant 0 : i32
    %c0_i32_1 = arith.constant 0 : i32
    return %arg0, %c0_i32, %c0_i32_0 : i32, i32, i32
  }
}

module attributes {stable_mosaic.version = 11 : i64} {
  func.func @kernel(%arg0: i32, %arg1: memref<1x9x576xf32, #tpu.memory_space<vmem>>, %arg2: memref<1x8x128xf32, #tpu.memory_space<vmem>>, %arg3: memref<2x576x192xbf16, #tpu.memory_space<vmem>>, %arg4: memref<1x192xf32, #tpu.memory_space<vmem>>, %arg5: memref<1x128x192xbf16, #tpu.memory_space<vmem>>, %arg6: memref<1x192xf32, #tpu.memory_space<vmem>>, %arg7: memref<3x240x192xbf16, #tpu.memory_space<vmem>>, %arg8: memref<1x192xf32, #tpu.memory_space<vmem>>, %arg9: memref<3x240x192xbf16, #tpu.memory_space<vmem>>, %arg10: memref<1x192xf32, #tpu.memory_space<vmem>>, %arg11: memref<3x240x192xbf16, #tpu.memory_space<vmem>>, %arg12: memref<1x192xf32, #tpu.memory_space<vmem>>, %arg13: memref<1x8x192xf32, #tpu.memory_space<vmem>>, %arg14: memref<10x240xf32, #tpu.memory_space<vmem>>) attributes {dimension_semantics = [#tpu.dimension_semantics<parallel>], iteration_bounds = array<i64: 2>, scalar_prefetch = 0 : i64, scratch_operands = 1 : i64, tpu.core_type = #tpu.core_type<tc>, window_params = [{transform_indices = @transform_0, window_bounds = array<i64: 1, 9, 576>}, {transform_indices = @transform_1, window_bounds = array<i64: 1, 8, 128>}, {pipeline_mode = #tpu.pipeline_mode<synchronous>, transform_indices = @transform_2, window_bounds = array<i64: 2, 576, 192>}, {pipeline_mode = #tpu.pipeline_mode<synchronous>, transform_indices = @transform_3, window_bounds = array<i64: 1, 192>}, {pipeline_mode = #tpu.pipeline_mode<synchronous>, transform_indices = @transform_4, window_bounds = array<i64: 1, 128, 192>}, {pipeline_mode = #tpu.pipeline_mode<synchronous>, transform_indices = @transform_5, window_bounds = array<i64: 1, 192>}, {pipeline_mode = #tpu.pipeline_mode<synchronous>, transform_indices = @transform_6, window_bounds = array<i64: 3, 240, 192>}, {pipeline_mode = #tpu.pipeline_mode<synchronous>, transform_indices = @transform_7, window_bounds = array<i64: 1, 192>}, {pipeline_mode = #tpu.pipeline_mode<synchronous>, transform_indices = @transform_8, window_bounds = array<i64: 3, 240, 192>}, {pipeline_mode = #tpu.pipeline_mode<synchronous>, transform_indices = @transform_9, window_bounds = array<i64: 1, 192>}, {pipeline_mode = #tpu.pipeline_mode<synchronous>, transform_indices = @transform_10, window_bounds = array<i64: 3, 240, 192>}, {pipeline_mode = #tpu.pipeline_mode<synchronous>, transform_indices = @transform_11, window_bounds = array<i64: 1, 192>}, {transform_indices = @transform_12, window_bounds = array<i64: 1, 8, 192>}]} {
    %cst = arith.constant 0.000000e+00 : f32
    %0 = vector.broadcast %cst : f32 to vector<10x240xf32>
    %c0 = arith.constant 0 : index
    %c0_0 = arith.constant 0 : index
    %1 = vector.load %arg14[%c0, %c0_0] : memref<10x240xf32, #tpu.memory_space<vmem>>, vector<10x240xf32>
    tpu.vector_store %arg14[%c0, %c0_0], %0 {strides = array<i32>} : memref<10x240xf32, #tpu.memory_space<vmem>>, vector<10x240xf32>,
    %c0_1 = arith.constant 0 : index
    %c0_2 = arith.constant 0 : index
    %c0_3 = arith.constant 0 : index
    %2 = vector.load %arg1[%c0_1, %c0_2, %c0_3] : memref<1x9x576xf32, #tpu.memory_space<vmem>>, vector<1x9x576xf32>
    %3 = vector.shape_cast %2 : vector<1x9x576xf32> to vector<9x576xf32>
    %c0_4 = arith.constant 0 : index
    %c0_5 = arith.constant 0 : index
    %4 = vector.load %arg4[%c0_4, %c0_5] : memref<1x192xf32, #tpu.memory_space<vmem>>, vector<1x192xf32>
    %5 = arith.truncf %3 : vector<9x576xf32> to vector<9x576xbf16>
    %6 = vector.extract_strided_slice %5 {offsets = [0, 0], sizes = [8, 576], strides = [1, 1]} : vector<9x576xbf16> to vector<8x576xbf16>
    %c0_6 = arith.constant 0 : index
    %c0_7 = arith.constant 0 : index
    %c0_8 = arith.constant 0 : index
    %7 = vector.load %arg3[%c0_6, %c0_7, %c0_8] : memref<2x576x192xbf16, #tpu.memory_space<vmem>>, vector<1x576x192xbf16>
    %8 = vector.shape_cast %7 : vector<1x576x192xbf16> to vector<576x192xbf16>
    %cst_9 = arith.constant dense<0.000000e+00> : vector<8x192xf32>
    %9 = tpu.matmul %6, %8, %cst_9 {dimension_numbers = #tpu.dot_dimension_numbers<[1], [0], [0], [1], [0, 0, 1, 1], [], []>} : vector<8x576xbf16>, vector<576x192xbf16>, vector<8x192xf32> -> vector<8x192xf32>
    %10 = vector.extract_strided_slice %5 {offsets = [1, 0], sizes = [8, 576], strides = [1, 1]} : vector<9x576xbf16> to vector<8x576xbf16>
    %c1 = arith.constant 1 : index
    %c0_10 = arith.constant 0 : index
    %c0_11 = arith.constant 0 : index
    %11 = vector.load %arg3[%c1, %c0_10, %c0_11] : memref<2x576x192xbf16, #tpu.memory_space<vmem>>, vector<1x576x192xbf16>
    %12 = vector.shape_cast %11 : vector<1x576x192xbf16> to vector<576x192xbf16>
    %cst_12 = arith.constant dense<0.000000e+00> : vector<8x192xf32>
    %13 = tpu.matmul %10, %12, %cst_12 {dimension_numbers = #tpu.dot_dimension_numbers<[1], [0], [0], [1], [0, 0, 1, 1], [], []>} : vector<8x576xbf16>, vector<576x192xbf16>, vector<8x192xf32> -> vector<8x192xf32>
    %14 = arith.addf %9, %13 : vector<8x192xf32>
    %15 = vector.broadcast %4 : vector<1x192xf32> to vector<8x192xf32>
    %16 = arith.addf %14, %15 : vector<8x192xf32>
    %cst_13 = arith.constant 0.000000e+00 : f32
    %17 = vector.broadcast %cst_13 : f32 to vector<8x192xf32>
    %18 = arith.maximumf %16, %17 : vector<8x192xf32>
    %c0_14 = arith.constant 0 : index
    %c0_15 = arith.constant 0 : index
    %c0_16 = arith.constant 0 : index
    %19 = vector.load %arg2[%c0_14, %c0_15, %c0_16] : memref<1x8x128xf32, #tpu.memory_space<vmem>>, vector<1x8x128xf32>
    %20 = vector.shape_cast %19 : vector<1x8x128xf32> to vector<8x128xf32>
    %c0_17 = arith.constant 0 : index
    %c0_18 = arith.constant 0 : index
    %21 = vector.load %arg6[%c0_17, %c0_18] : memref<1x192xf32, #tpu.memory_space<vmem>>, vector<1x192xf32>
    %22 = arith.truncf %20 : vector<8x128xf32> to vector<8x128xbf16>
    %c0_19 = arith.constant 0 : index
    %c0_20 = arith.constant 0 : index
    %c0_21 = arith.constant 0 : index
    %23 = vector.load %arg5[%c0_19, %c0_20, %c0_21] : memref<1x128x192xbf16, #tpu.memory_space<vmem>>, vector<1x128x192xbf16>
    %24 = vector.shape_cast %23 : vector<1x128x192xbf16> to vector<128x192xbf16>
    %cst_22 = arith.constant dense<0.000000e+00> : vector<8x192xf32>
    %25 = tpu.matmul %22, %24, %cst_22 {dimension_numbers = #tpu.dot_dimension_numbers<[1], [0], [0], [1], [0, 0, 1, 1], [], []>} : vector<8x128xbf16>, vector<128x192xbf16>, vector<8x192xf32> -> vector<8x192xf32>
    %26 = vector.broadcast %21 : vector<1x192xf32> to vector<8x192xf32>
    %27 = arith.addf %25, %26 : vector<8x192xf32>
    %c1_23 = arith.constant 1 : index
    %c24 = arith.constant 24 : index
    %28 = vector.load %arg14[%c1_23, %c24] : memref<10x240xf32, #tpu.memory_space<vmem>>, vector<8x192xf32>
    tpu.vector_store %arg14[%c1_23, %c24], %18 {strides = array<i32>} : memref<10x240xf32, #tpu.memory_space<vmem>>, vector<8x192xf32>,
    %c0_24 = arith.constant 0 : index
    %c0_25 = arith.constant 0 : index
    %29 = vector.load %arg14[%c0_24, %c0_25] : memref<10x240xf32, #tpu.memory_space<vmem>>, vector<10x240xf32>
    %c0_26 = arith.constant 0 : index
    %c0_27 = arith.constant 0 : index
    %30 = vector.load %arg8[%c0_26, %c0_27] : memref<1x192xf32, #tpu.memory_space<vmem>>, vector<1x192xf32>
    %31 = arith.truncf %29 : vector<10x240xf32> to vector<10x240xbf16>
    %32 = vector.extract_strided_slice %31 {offsets = [0, 0], sizes = [8, 240], strides = [1, 1]} : vector<10x240xbf16> to vector<8x240xbf16>
    %c0_28 = arith.constant 0 : index
    %c0_29 = arith.constant 0 : index
    %c0_30 = arith.constant 0 : index
    %33 = vector.load %arg7[%c0_28, %c0_29, %c0_30] : memref<3x240x192xbf16, #tpu.memory_space<vmem>>, vector<1x240x192xbf16>
    %34 = vector.shape_cast %33 : vector<1x240x192xbf16> to vector<240x192xbf16>
    %cst_31 = arith.constant dense<0.000000e+00> : vector<8x192xf32>
    %35 = tpu.matmul %32, %34, %cst_31 {dimension_numbers = #tpu.dot_dimension_numbers<[1], [0], [0], [1], [0, 0, 1, 1], [], []>} : vector<8x240xbf16>, vector<240x192xbf16>, vector<8x192xf32> -> vector<8x192xf32>
    %36 = vector.extract_strided_slice %31 {offsets = [1, 0], sizes = [8, 240], strides = [1, 1]} : vector<10x240xbf16> to vector<8x240xbf16>
    %c1_32 = arith.constant 1 : index
    %c0_33 = arith.constant 0 : index
    %c0_34 = arith.constant 0 : index
    %37 = vector.load %arg7[%c1_32, %c0_33, %c0_34] : memref<3x240x192xbf16, #tpu.memory_space<vmem>>, vector<1x240x192xbf16>
    %38 = vector.shape_cast %37 : vector<1x240x192xbf16> to vector<240x192xbf16>
    %cst_35 = arith.constant dense<0.000000e+00> : vector<8x192xf32>
    %39 = tpu.matmul %36, %38, %cst_35 {dimension_numbers = #tpu.dot_dimension_numbers<[1], [0], [0], [1], [0, 0, 1, 1], [], []>} : vector<8x240xbf16>, vector<240x192xbf16>, vector<8x192xf32> -> vector<8x192xf32>
    %40 = arith.addf %35, %39 : vector<8x192xf32>
    %41 = vector.extract_strided_slice %31 {offsets = [2, 0], sizes = [8, 240], strides = [1, 1]} : vector<10x240xbf16> to vector<8x240xbf16>
    %c2 = arith.constant 2 : index
    %c0_36 = arith.constant 0 : index
    %c0_37 = arith.constant 0 : index
    %42 = vector.load %arg7[%c2, %c0_36, %c0_37] : memref<3x240x192xbf16, #tpu.memory_space<vmem>>, vector<1x240x192xbf16>
    %43 = vector.shape_cast %42 : vector<1x240x192xbf16> to vector<240x192xbf16>
    %cst_38 = arith.constant dense<0.000000e+00> : vector<8x192xf32>
    %44 = tpu.matmul %41, %43, %cst_38 {dimension_numbers = #tpu.dot_dimension_numbers<[1], [0], [0], [1], [0, 0, 1, 1], [], []>} : vector<8x240xbf16>, vector<240x192xbf16>, vector<8x192xf32> -> vector<8x192xf32>
    %45 = arith.addf %40, %44 : vector<8x192xf32>
    %46 = vector.broadcast %30 : vector<1x192xf32> to vector<8x192xf32>
    %47 = arith.addf %45, %46 : vector<8x192xf32>
    %48 = arith.addf %47, %27 : vector<8x192xf32>
    %cst_39 = arith.constant 0.000000e+00 : f32
    %49 = vector.broadcast %cst_39 : f32 to vector<8x192xf32>
    %50 = arith.maximumf %48, %49 : vector<8x192xf32>
    %c0_40 = arith.constant 0 : index
    %c0_41 = arith.constant 0 : index
    %51 = vector.load %arg10[%c0_40, %c0_41] : memref<1x192xf32, #tpu.memory_space<vmem>>, vector<1x192xf32>
    %c0_42 = arith.constant 0 : index
    %c0_43 = arith.constant 0 : index
    %52 = vector.load %arg12[%c0_42, %c0_43] : memref<1x192xf32, #tpu.memory_space<vmem>>, vector<1x192xf32>
    %c1_44 = arith.constant 1 : index
    %c24_45 = arith.constant 24 : index
    %53 = vector.load %arg14[%c1_44, %c24_45] : memref<10x240xf32, #tpu.memory_space<vmem>>, vector<8x192xf32>
    tpu.vector_store %arg14[%c1_44, %c24_45], %50 {strides = array<i32>} : memref<10x240xf32, #tpu.memory_space<vmem>>, vector<8x192xf32>,
    %c0_46 = arith.constant 0 : index
    %c0_47 = arith.constant 0 : index
    %54 = vector.load %arg14[%c0_46, %c0_47] : memref<10x240xf32, #tpu.memory_space<vmem>>, vector<10x240xf32>
    %55 = arith.truncf %54 : vector<10x240xf32> to vector<10x240xbf16>
    %56 = vector.extract_strided_slice %55 {offsets = [0, 0], sizes = [8, 240], strides = [1, 1]} : vector<10x240xbf16> to vector<8x240xbf16>
    %c0_48 = arith.constant 0 : index
    %c0_49 = arith.constant 0 : index
    %c0_50 = arith.constant 0 : index
    %57 = vector.load %arg9[%c0_48, %c0_49, %c0_50] : memref<3x240x192xbf16, #tpu.memory_space<vmem>>, vector<1x240x192xbf16>
    %58 = vector.shape_cast %57 : vector<1x240x192xbf16> to vector<240x192xbf16>
    %cst_51 = arith.constant dense<0.000000e+00> : vector<8x192xf32>
    %59 = tpu.matmul %56, %58, %cst_51 {dimension_numbers = #tpu.dot_dimension_numbers<[1], [0], [0], [1], [0, 0, 1, 1], [], []>} : vector<8x240xbf16>, vector<240x192xbf16>, vector<8x192xf32> -> vector<8x192xf32>
    %60 = vector.extract_strided_slice %55 {offsets = [1, 0], sizes = [8, 240], strides = [1, 1]} : vector<10x240xbf16> to vector<8x240xbf16>
    %c1_52 = arith.constant 1 : index
    %c0_53 = arith.constant 0 : index
    %c0_54 = arith.constant 0 : index
    %61 = vector.load %arg9[%c1_52, %c0_53, %c0_54] : memref<3x240x192xbf16, #tpu.memory_space<vmem>>, vector<1x240x192xbf16>
    %62 = vector.shape_cast %61 : vector<1x240x192xbf16> to vector<240x192xbf16>
    %cst_55 = arith.constant dense<0.000000e+00> : vector<8x192xf32>
    %63 = tpu.matmul %60, %62, %cst_55 {dimension_numbers = #tpu.dot_dimension_numbers<[1], [0], [0], [1], [0, 0, 1, 1], [], []>} : vector<8x240xbf16>, vector<240x192xbf16>, vector<8x192xf32> -> vector<8x192xf32>
    %64 = arith.addf %59, %63 : vector<8x192xf32>
    %65 = vector.extract_strided_slice %55 {offsets = [2, 0], sizes = [8, 240], strides = [1, 1]} : vector<10x240xbf16> to vector<8x240xbf16>
    %c2_56 = arith.constant 2 : index
    %c0_57 = arith.constant 0 : index
    %c0_58 = arith.constant 0 : index
    %66 = vector.load %arg9[%c2_56, %c0_57, %c0_58] : memref<3x240x192xbf16, #tpu.memory_space<vmem>>, vector<1x240x192xbf16>
    %67 = vector.shape_cast %66 : vector<1x240x192xbf16> to vector<240x192xbf16>
    %cst_59 = arith.constant dense<0.000000e+00> : vector<8x192xf32>
    %68 = tpu.matmul %65, %67, %cst_59 {dimension_numbers = #tpu.dot_dimension_numbers<[1], [0], [0], [1], [0, 0, 1, 1], [], []>} : vector<8x240xbf16>, vector<240x192xbf16>, vector<8x192xf32> -> vector<8x192xf32>
    %69 = arith.addf %64, %68 : vector<8x192xf32>
    %70 = vector.broadcast %51 : vector<1x192xf32> to vector<8x192xf32>
    %71 = arith.addf %69, %70 : vector<8x192xf32>
    %cst_60 = arith.constant 0.000000e+00 : f32
    %72 = vector.broadcast %cst_60 : f32 to vector<8x192xf32>
    %73 = arith.maximumf %71, %72 : vector<8x192xf32>
    %c1_61 = arith.constant 1 : index
    %c24_62 = arith.constant 24 : index
    %74 = vector.load %arg14[%c1_61, %c24_62] : memref<10x240xf32, #tpu.memory_space<vmem>>, vector<8x192xf32>
    tpu.vector_store %arg14[%c1_61, %c24_62], %73 {strides = array<i32>} : memref<10x240xf32, #tpu.memory_space<vmem>>, vector<8x192xf32>,
    %c0_63 = arith.constant 0 : index
    %c0_64 = arith.constant 0 : index
    %75 = vector.load %arg14[%c0_63, %c0_64] : memref<10x240xf32, #tpu.memory_space<vmem>>, vector<10x240xf32>
    %76 = arith.truncf %75 : vector<10x240xf32> to vector<10x240xbf16>
    %77 = vector.extract_strided_slice %76 {offsets = [0, 0], sizes = [8, 240], strides = [1, 1]} : vector<10x240xbf16> to vector<8x240xbf16>
    %c0_65 = arith.constant 0 : index
    %c0_66 = arith.constant 0 : index
    %c0_67 = arith.constant 0 : index
    %78 = vector.load %arg11[%c0_65, %c0_66, %c0_67] : memref<3x240x192xbf16, #tpu.memory_space<vmem>>, vector<1x240x192xbf16>
    %79 = vector.shape_cast %78 : vector<1x240x192xbf16> to vector<240x192xbf16>
    %cst_68 = arith.constant dense<0.000000e+00> : vector<8x192xf32>
    %80 = tpu.matmul %77, %79, %cst_68 {dimension_numbers = #tpu.dot_dimension_numbers<[1], [0], [0], [1], [0, 0, 1, 1], [], []>} : vector<8x240xbf16>, vector<240x192xbf16>, vector<8x192xf32> -> vector<8x192xf32>
    %81 = vector.extract_strided_slice %76 {offsets = [1, 0], sizes = [8, 240], strides = [1, 1]} : vector<10x240xbf16> to vector<8x240xbf16>
    %c1_69 = arith.constant 1 : index
    %c0_70 = arith.constant 0 : index
    %c0_71 = arith.constant 0 : index
    %82 = vector.load %arg11[%c1_69, %c0_70, %c0_71] : memref<3x240x192xbf16, #tpu.memory_space<vmem>>, vector<1x240x192xbf16>
    %83 = vector.shape_cast %82 : vector<1x240x192xbf16> to vector<240x192xbf16>
    %cst_72 = arith.constant dense<0.000000e+00> : vector<8x192xf32>
    %84 = tpu.matmul %81, %83, %cst_72 {dimension_numbers = #tpu.dot_dimension_numbers<[1], [0], [0], [1], [0, 0, 1, 1], [], []>} : vector<8x240xbf16>, vector<240x192xbf16>, vector<8x192xf32> -> vector<8x192xf32>
    %85 = arith.addf %80, %84 : vector<8x192xf32>
    %86 = vector.extract_strided_slice %76 {offsets = [2, 0], sizes = [8, 240], strides = [1, 1]} : vector<10x240xbf16> to vector<8x240xbf16>
    %c2_73 = arith.constant 2 : index
    %c0_74 = arith.constant 0 : index
    %c0_75 = arith.constant 0 : index
    %87 = vector.load %arg11[%c2_73, %c0_74, %c0_75] : memref<3x240x192xbf16, #tpu.memory_space<vmem>>, vector<1x240x192xbf16>
    %88 = vector.shape_cast %87 : vector<1x240x192xbf16> to vector<240x192xbf16>
    %cst_76 = arith.constant dense<0.000000e+00> : vector<8x192xf32>
    %89 = tpu.matmul %86, %88, %cst_76 {dimension_numbers = #tpu.dot_dimension_numbers<[1], [0], [0], [1], [0, 0, 1, 1], [], []>} : vector<8x240xbf16>, vector<240x192xbf16>, vector<8x192xf32> -> vector<8x192xf32>
    %90 = arith.addf %85, %89 : vector<8x192xf32>
    %91 = vector.broadcast %52 : vector<1x192xf32> to vector<8x192xf32>
    %92 = arith.addf %90, %91 : vector<8x192xf32>
    %93 = arith.addf %92, %50 : vector<8x192xf32>
    %cst_77 = arith.constant 0.000000e+00 : f32
    %94 = vector.broadcast %cst_77 : f32 to vector<8x192xf32>
    %95 = arith.maximumf %93, %94 : vector<8x192xf32>
    %c0_78 = arith.constant 0 : index
    %c0_79 = arith.constant 0 : index
    %c0_80 = arith.constant 0 : index
    %96 = vector.load %arg13[%c0_78, %c0_79, %c0_80] : memref<1x8x192xf32, #tpu.memory_space<vmem>>, vector<1x8x192xf32>
    %97 = vector.shape_cast %96 : vector<1x8x192xf32> to vector<8x192xf32>
    %98 = vector.shape_cast %95 : vector<8x192xf32> to vector<1x8x192xf32>
    tpu.vector_store %arg13[%c0_78, %c0_79, %c0_80], %98 {strides = array<i32>} : memref<1x8x192xf32, #tpu.memory_space<vmem>>, vector<1x8x192xf32>,
    return
  }
  func.func @transform_0(%arg0: i32) -> (i32, i32, i32) {
    %c0_i32 = arith.constant 0 : i32
    %c0_i32_0 = arith.constant 0 : i32
    %c0_i32_1 = arith.constant 0 : i32
    return %arg0, %c0_i32, %c0_i32_0 : i32, i32, i32
  }
  func.func @transform_1(%arg0: i32) -> (i32, i32, i32) {
    %c0_i32 = arith.constant 0 : i32
    %c0_i32_0 = arith.constant 0 : i32
    %c0_i32_1 = arith.constant 0 : i32
    return %arg0, %c0_i32, %c0_i32_0 : i32, i32, i32
  }
  func.func @transform_2(%arg0: i32) -> (i32, i32, i32) {
    %c0_i32 = arith.constant 0 : i32
    %c0_i32_0 = arith.constant 0 : i32
    %c0_i32_1 = arith.constant 0 : i32
    %c0_i32_2 = arith.constant 0 : i32
    return %c0_i32, %c0_i32_0, %c0_i32_1 : i32, i32, i32
  }
  func.func @transform_3(%arg0: i32) -> (i32, i32) {
    %c0_i32 = arith.constant 0 : i32
    %c0_i32_0 = arith.constant 0 : i32
    %c0_i32_1 = arith.constant 0 : i32
    return %c0_i32, %c0_i32_0 : i32, i32
  }
  func.func @transform_4(%arg0: i32) -> (i32, i32, i32) {
    %c0_i32 = arith.constant 0 : i32
    %c0_i32_0 = arith.constant 0 : i32
    %c0_i32_1 = arith.constant 0 : i32
    %c0_i32_2 = arith.constant 0 : i32
    return %c0_i32, %c0_i32_0, %c0_i32_1 : i32, i32, i32
  }
  func.func @transform_5(%arg0: i32) -> (i32, i32) {
    %c0_i32 = arith.constant 0 : i32
    %c0_i32_0 = arith.constant 0 : i32
    %c0_i32_1 = arith.constant 0 : i32
    return %c0_i32, %c0_i32_0 : i32, i32
  }
  func.func @transform_6(%arg0: i32) -> (i32, i32, i32) {
    %c0_i32 = arith.constant 0 : i32
    %c0_i32_0 = arith.constant 0 : i32
    %c0_i32_1 = arith.constant 0 : i32
    %c0_i32_2 = arith.constant 0 : i32
    return %c0_i32, %c0_i32_0, %c0_i32_1 : i32, i32, i32
  }
  func.func @transform_7(%arg0: i32) -> (i32, i32) {
    %c0_i32 = arith.constant 0 : i32
    %c0_i32_0 = arith.constant 0 : i32
    %c0_i32_1 = arith.constant 0 : i32
    return %c0_i32, %c0_i32_0 : i32, i32
  }
  func.func @transform_8(%arg0: i32) -> (i32, i32, i32) {
    %c0_i32 = arith.constant 0 : i32
    %c0_i32_0 = arith.constant 0 : i32
    %c0_i32_1 = arith.constant 0 : i32
    %c0_i32_2 = arith.constant 0 : i32
    return %c0_i32, %c0_i32_0, %c0_i32_1 : i32, i32, i32
  }
  func.func @transform_9(%arg0: i32) -> (i32, i32) {
    %c0_i32 = arith.constant 0 : i32
    %c0_i32_0 = arith.constant 0 : i32
    %c0_i32_1 = arith.constant 0 : i32
    return %c0_i32, %c0_i32_0 : i32, i32
  }
  func.func @transform_10(%arg0: i32) -> (i32, i32, i32) {
    %c0_i32 = arith.constant 0 : i32
    %c0_i32_0 = arith.constant 0 : i32
    %c0_i32_1 = arith.constant 0 : i32
    %c0_i32_2 = arith.constant 0 : i32
    return %c0_i32, %c0_i32_0, %c0_i32_1 : i32, i32, i32
  }
  func.func @transform_11(%arg0: i32) -> (i32, i32) {
    %c0_i32 = arith.constant 0 : i32
    %c0_i32_0 = arith.constant 0 : i32
    %c0_i32_1 = arith.constant 0 : i32
    return %c0_i32, %c0_i32_0 : i32, i32
  }
  func.func @transform_12(%arg0: i32) -> (i32, i32, i32) {
    %c0_i32 = arith.constant 0 : i32
    %c0_i32_0 = arith.constant 0 : i32
    %c0_i32_1 = arith.constant 0 : i32
    return %arg0, %c0_i32, %c0_i32_0 : i32, i32, i32
  }
}

module attributes {stable_mosaic.version = 11 : i64} {
  func.func @kernel(%arg0: i32, %arg1: memref<1x5x480xf32, #tpu.memory_space<vmem>>, %arg2: memref<1x4x96xf32, #tpu.memory_space<vmem>>, %arg3: memref<2x480x128xbf16, #tpu.memory_space<vmem>>, %arg4: memref<1x128xf32, #tpu.memory_space<vmem>>, %arg5: memref<1x96x128xbf16, #tpu.memory_space<vmem>>, %arg6: memref<1x128xf32, #tpu.memory_space<vmem>>, %arg7: memref<3x192x128xbf16, #tpu.memory_space<vmem>>, %arg8: memref<1x128xf32, #tpu.memory_space<vmem>>, %arg9: memref<3x192x128xbf16, #tpu.memory_space<vmem>>, %arg10: memref<1x128xf32, #tpu.memory_space<vmem>>, %arg11: memref<3x192x128xbf16, #tpu.memory_space<vmem>>, %arg12: memref<1x128xf32, #tpu.memory_space<vmem>>, %arg13: memref<1x128x128xbf16, #tpu.memory_space<vmem>>, %arg14: memref<3x192x16xbf16, #tpu.memory_space<vmem>>, %arg15: memref<1x4x16xf32, #tpu.memory_space<vmem>>, %arg16: memref<6x192xf32, #tpu.memory_space<vmem>>) attributes {dimension_semantics = [#tpu.dimension_semantics<parallel>], iteration_bounds = array<i64: 2>, scalar_prefetch = 0 : i64, scratch_operands = 1 : i64, tpu.core_type = #tpu.core_type<tc>, window_params = [{transform_indices = @transform_0, window_bounds = array<i64: 1, 5, 480>}, {transform_indices = @transform_1, window_bounds = array<i64: 1, 4, 96>}, {pipeline_mode = #tpu.pipeline_mode<synchronous>, transform_indices = @transform_2, window_bounds = array<i64: 2, 480, 128>}, {pipeline_mode = #tpu.pipeline_mode<synchronous>, transform_indices = @transform_3, window_bounds = array<i64: 1, 128>}, {pipeline_mode = #tpu.pipeline_mode<synchronous>, transform_indices = @transform_4, window_bounds = array<i64: 1, 96, 128>}, {pipeline_mode = #tpu.pipeline_mode<synchronous>, transform_indices = @transform_5, window_bounds = array<i64: 1, 128>}, {pipeline_mode = #tpu.pipeline_mode<synchronous>, transform_indices = @transform_6, window_bounds = array<i64: 3, 192, 128>}, {pipeline_mode = #tpu.pipeline_mode<synchronous>, transform_indices = @transform_7, window_bounds = array<i64: 1, 128>}, {pipeline_mode = #tpu.pipeline_mode<synchronous>, transform_indices = @transform_8, window_bounds = array<i64: 3, 192, 128>}, {pipeline_mode = #tpu.pipeline_mode<synchronous>, transform_indices = @transform_9, window_bounds = array<i64: 1, 128>}, {pipeline_mode = #tpu.pipeline_mode<synchronous>, transform_indices = @transform_10, window_bounds = array<i64: 3, 192, 128>}, {pipeline_mode = #tpu.pipeline_mode<synchronous>, transform_indices = @transform_11, window_bounds = array<i64: 1, 128>}, {pipeline_mode = #tpu.pipeline_mode<synchronous>, transform_indices = @transform_12, window_bounds = array<i64: 1, 128, 128>}, {pipeline_mode = #tpu.pipeline_mode<synchronous>, transform_indices = @transform_13, window_bounds = array<i64: 3, 192, 16>}, {transform_indices = @transform_14, window_bounds = array<i64: 1, 4, 16>}]} {
    %cst = arith.constant 0.000000e+00 : f32
    %0 = vector.broadcast %cst : f32 to vector<6x192xf32>
    %c0 = arith.constant 0 : index
    %c0_0 = arith.constant 0 : index
    %1 = vector.load %arg16[%c0, %c0_0] : memref<6x192xf32, #tpu.memory_space<vmem>>, vector<6x192xf32>
    tpu.vector_store %arg16[%c0, %c0_0], %0 {strides = array<i32>} : memref<6x192xf32, #tpu.memory_space<vmem>>, vector<6x192xf32>,
    %c0_1 = arith.constant 0 : index
    %c0_2 = arith.constant 0 : index
    %c0_3 = arith.constant 0 : index
    %2 = vector.load %arg1[%c0_1, %c0_2, %c0_3] : memref<1x5x480xf32, #tpu.memory_space<vmem>>, vector<1x5x480xf32>
    %3 = vector.shape_cast %2 : vector<1x5x480xf32> to vector<5x480xf32>
    %c0_4 = arith.constant 0 : index
    %c0_5 = arith.constant 0 : index
    %4 = vector.load %arg4[%c0_4, %c0_5] : memref<1x128xf32, #tpu.memory_space<vmem>>, vector<1x128xf32>
    %5 = arith.truncf %3 : vector<5x480xf32> to vector<5x480xbf16>
    %6 = vector.extract_strided_slice %5 {offsets = [0, 0], sizes = [4, 480], strides = [1, 1]} : vector<5x480xbf16> to vector<4x480xbf16>
    %c0_6 = arith.constant 0 : index
    %c0_7 = arith.constant 0 : index
    %c0_8 = arith.constant 0 : index
    %7 = vector.load %arg3[%c0_6, %c0_7, %c0_8] : memref<2x480x128xbf16, #tpu.memory_space<vmem>>, vector<1x480x128xbf16>
    %8 = vector.shape_cast %7 : vector<1x480x128xbf16> to vector<480x128xbf16>
    %cst_9 = arith.constant dense<0.000000e+00> : vector<4x128xf32>
    %9 = tpu.matmul %6, %8, %cst_9 {dimension_numbers = #tpu.dot_dimension_numbers<[1], [0], [0], [1], [0, 0, 1, 1], [], []>} : vector<4x480xbf16>, vector<480x128xbf16>, vector<4x128xf32> -> vector<4x128xf32>
    %10 = vector.extract_strided_slice %5 {offsets = [1, 0], sizes = [4, 480], strides = [1, 1]} : vector<5x480xbf16> to vector<4x480xbf16>
    %c1 = arith.constant 1 : index
    %c0_10 = arith.constant 0 : index
    %c0_11 = arith.constant 0 : index
    %11 = vector.load %arg3[%c1, %c0_10, %c0_11] : memref<2x480x128xbf16, #tpu.memory_space<vmem>>, vector<1x480x128xbf16>
    %12 = vector.shape_cast %11 : vector<1x480x128xbf16> to vector<480x128xbf16>
    %cst_12 = arith.constant dense<0.000000e+00> : vector<4x128xf32>
    %13 = tpu.matmul %10, %12, %cst_12 {dimension_numbers = #tpu.dot_dimension_numbers<[1], [0], [0], [1], [0, 0, 1, 1], [], []>} : vector<4x480xbf16>, vector<480x128xbf16>, vector<4x128xf32> -> vector<4x128xf32>
    %14 = arith.addf %9, %13 : vector<4x128xf32>
    %15 = vector.broadcast %4 : vector<1x128xf32> to vector<4x128xf32>
    %16 = arith.addf %14, %15 : vector<4x128xf32>
    %cst_13 = arith.constant 0.000000e+00 : f32
    %17 = vector.broadcast %cst_13 : f32 to vector<4x128xf32>
    %18 = arith.maximumf %16, %17 : vector<4x128xf32>
    %c0_14 = arith.constant 0 : index
    %c0_15 = arith.constant 0 : index
    %c0_16 = arith.constant 0 : index
    %19 = vector.load %arg2[%c0_14, %c0_15, %c0_16] : memref<1x4x96xf32, #tpu.memory_space<vmem>>, vector<1x4x96xf32>
    %20 = vector.shape_cast %19 : vector<1x4x96xf32> to vector<4x96xf32>
    %c0_17 = arith.constant 0 : index
    %c0_18 = arith.constant 0 : index
    %21 = vector.load %arg6[%c0_17, %c0_18] : memref<1x128xf32, #tpu.memory_space<vmem>>, vector<1x128xf32>
    %22 = arith.truncf %20 : vector<4x96xf32> to vector<4x96xbf16>
    %c0_19 = arith.constant 0 : index
    %c0_20 = arith.constant 0 : index
    %c0_21 = arith.constant 0 : index
    %23 = vector.load %arg5[%c0_19, %c0_20, %c0_21] : memref<1x96x128xbf16, #tpu.memory_space<vmem>>, vector<1x96x128xbf16>
    %24 = vector.shape_cast %23 : vector<1x96x128xbf16> to vector<96x128xbf16>
    %cst_22 = arith.constant dense<0.000000e+00> : vector<4x128xf32>
    %25 = tpu.matmul %22, %24, %cst_22 {dimension_numbers = #tpu.dot_dimension_numbers<[1], [0], [0], [1], [0, 0, 1, 1], [], []>} : vector<4x96xbf16>, vector<96x128xbf16>, vector<4x128xf32> -> vector<4x128xf32>
    %26 = vector.broadcast %21 : vector<1x128xf32> to vector<4x128xf32>
    %27 = arith.addf %25, %26 : vector<4x128xf32>
    %c1_23 = arith.constant 1 : index
    %c32 = arith.constant 32 : index
    %28 = vector.load %arg16[%c1_23, %c32] : memref<6x192xf32, #tpu.memory_space<vmem>>, vector<4x128xf32>
    tpu.vector_store %arg16[%c1_23, %c32], %18 {strides = array<i32>} : memref<6x192xf32, #tpu.memory_space<vmem>>, vector<4x128xf32>,
    %c0_24 = arith.constant 0 : index
    %c0_25 = arith.constant 0 : index
    %29 = vector.load %arg16[%c0_24, %c0_25] : memref<6x192xf32, #tpu.memory_space<vmem>>, vector<6x192xf32>
    %c0_26 = arith.constant 0 : index
    %c0_27 = arith.constant 0 : index
    %30 = vector.load %arg8[%c0_26, %c0_27] : memref<1x128xf32, #tpu.memory_space<vmem>>, vector<1x128xf32>
    %31 = arith.truncf %29 : vector<6x192xf32> to vector<6x192xbf16>
    %32 = vector.extract_strided_slice %31 {offsets = [0, 0], sizes = [4, 192], strides = [1, 1]} : vector<6x192xbf16> to vector<4x192xbf16>
    %c0_28 = arith.constant 0 : index
    %c0_29 = arith.constant 0 : index
    %c0_30 = arith.constant 0 : index
    %33 = vector.load %arg7[%c0_28, %c0_29, %c0_30] : memref<3x192x128xbf16, #tpu.memory_space<vmem>>, vector<1x192x128xbf16>
    %34 = vector.shape_cast %33 : vector<1x192x128xbf16> to vector<192x128xbf16>
    %cst_31 = arith.constant dense<0.000000e+00> : vector<4x128xf32>
    %35 = tpu.matmul %32, %34, %cst_31 {dimension_numbers = #tpu.dot_dimension_numbers<[1], [0], [0], [1], [0, 0, 1, 1], [], []>} : vector<4x192xbf16>, vector<192x128xbf16>, vector<4x128xf32> -> vector<4x128xf32>
    %36 = vector.extract_strided_slice %31 {offsets = [1, 0], sizes = [4, 192], strides = [1, 1]} : vector<6x192xbf16> to vector<4x192xbf16>
    %c1_32 = arith.constant 1 : index
    %c0_33 = arith.constant 0 : index
    %c0_34 = arith.constant 0 : index
    %37 = vector.load %arg7[%c1_32, %c0_33, %c0_34] : memref<3x192x128xbf16, #tpu.memory_space<vmem>>, vector<1x192x128xbf16>
    %38 = vector.shape_cast %37 : vector<1x192x128xbf16> to vector<192x128xbf16>
    %cst_35 = arith.constant dense<0.000000e+00> : vector<4x128xf32>
    %39 = tpu.matmul %36, %38, %cst_35 {dimension_numbers = #tpu.dot_dimension_numbers<[1], [0], [0], [1], [0, 0, 1, 1], [], []>} : vector<4x192xbf16>, vector<192x128xbf16>, vector<4x128xf32> -> vector<4x128xf32>
    %40 = arith.addf %35, %39 : vector<4x128xf32>
    %41 = vector.extract_strided_slice %31 {offsets = [2, 0], sizes = [4, 192], strides = [1, 1]} : vector<6x192xbf16> to vector<4x192xbf16>
    %c2 = arith.constant 2 : index
    %c0_36 = arith.constant 0 : index
    %c0_37 = arith.constant 0 : index
    %42 = vector.load %arg7[%c2, %c0_36, %c0_37] : memref<3x192x128xbf16, #tpu.memory_space<vmem>>, vector<1x192x128xbf16>
    %43 = vector.shape_cast %42 : vector<1x192x128xbf16> to vector<192x128xbf16>
    %cst_38 = arith.constant dense<0.000000e+00> : vector<4x128xf32>
    %44 = tpu.matmul %41, %43, %cst_38 {dimension_numbers = #tpu.dot_dimension_numbers<[1], [0], [0], [1], [0, 0, 1, 1], [], []>} : vector<4x192xbf16>, vector<192x128xbf16>, vector<4x128xf32> -> vector<4x128xf32>
    %45 = arith.addf %40, %44 : vector<4x128xf32>
    %46 = vector.broadcast %30 : vector<1x128xf32> to vector<4x128xf32>
    %47 = arith.addf %45, %46 : vector<4x128xf32>
    %48 = arith.addf %47, %27 : vector<4x128xf32>
    %cst_39 = arith.constant 0.000000e+00 : f32
    %49 = vector.broadcast %cst_39 : f32 to vector<4x128xf32>
    %50 = arith.maximumf %48, %49 : vector<4x128xf32>
    %c0_40 = arith.constant 0 : index
    %c0_41 = arith.constant 0 : index
    %51 = vector.load %arg10[%c0_40, %c0_41] : memref<1x128xf32, #tpu.memory_space<vmem>>, vector<1x128xf32>
    %c0_42 = arith.constant 0 : index
    %c0_43 = arith.constant 0 : index
    %52 = vector.load %arg12[%c0_42, %c0_43] : memref<1x128xf32, #tpu.memory_space<vmem>>, vector<1x128xf32>
    %c1_44 = arith.constant 1 : index
    %c32_45 = arith.constant 32 : index
    %53 = vector.load %arg16[%c1_44, %c32_45] : memref<6x192xf32, #tpu.memory_space<vmem>>, vector<4x128xf32>
    tpu.vector_store %arg16[%c1_44, %c32_45], %50 {strides = array<i32>} : memref<6x192xf32, #tpu.memory_space<vmem>>, vector<4x128xf32>,
    %c0_46 = arith.constant 0 : index
    %c0_47 = arith.constant 0 : index
    %54 = vector.load %arg16[%c0_46, %c0_47] : memref<6x192xf32, #tpu.memory_space<vmem>>, vector<6x192xf32>
    %55 = arith.truncf %54 : vector<6x192xf32> to vector<6x192xbf16>
    %56 = vector.extract_strided_slice %55 {offsets = [0, 0], sizes = [4, 192], strides = [1, 1]} : vector<6x192xbf16> to vector<4x192xbf16>
    %c0_48 = arith.constant 0 : index
    %c0_49 = arith.constant 0 : index
    %c0_50 = arith.constant 0 : index
    %57 = vector.load %arg9[%c0_48, %c0_49, %c0_50] : memref<3x192x128xbf16, #tpu.memory_space<vmem>>, vector<1x192x128xbf16>
    %58 = vector.shape_cast %57 : vector<1x192x128xbf16> to vector<192x128xbf16>
    %cst_51 = arith.constant dense<0.000000e+00> : vector<4x128xf32>
    %59 = tpu.matmul %56, %58, %cst_51 {dimension_numbers = #tpu.dot_dimension_numbers<[1], [0], [0], [1], [0, 0, 1, 1], [], []>} : vector<4x192xbf16>, vector<192x128xbf16>, vector<4x128xf32> -> vector<4x128xf32>
    %60 = vector.extract_strided_slice %55 {offsets = [1, 0], sizes = [4, 192], strides = [1, 1]} : vector<6x192xbf16> to vector<4x192xbf16>
    %c1_52 = arith.constant 1 : index
    %c0_53 = arith.constant 0 : index
    %c0_54 = arith.constant 0 : index
    %61 = vector.load %arg9[%c1_52, %c0_53, %c0_54] : memref<3x192x128xbf16, #tpu.memory_space<vmem>>, vector<1x192x128xbf16>
    %62 = vector.shape_cast %61 : vector<1x192x128xbf16> to vector<192x128xbf16>
    %cst_55 = arith.constant dense<0.000000e+00> : vector<4x128xf32>
    %63 = tpu.matmul %60, %62, %cst_55 {dimension_numbers = #tpu.dot_dimension_numbers<[1], [0], [0], [1], [0, 0, 1, 1], [], []>} : vector<4x192xbf16>, vector<192x128xbf16>, vector<4x128xf32> -> vector<4x128xf32>
    %64 = arith.addf %59, %63 : vector<4x128xf32>
    %65 = vector.extract_strided_slice %55 {offsets = [2, 0], sizes = [4, 192], strides = [1, 1]} : vector<6x192xbf16> to vector<4x192xbf16>
    %c2_56 = arith.constant 2 : index
    %c0_57 = arith.constant 0 : index
    %c0_58 = arith.constant 0 : index
    %66 = vector.load %arg9[%c2_56, %c0_57, %c0_58] : memref<3x192x128xbf16, #tpu.memory_space<vmem>>, vector<1x192x128xbf16>
    %67 = vector.shape_cast %66 : vector<1x192x128xbf16> to vector<192x128xbf16>
    %cst_59 = arith.constant dense<0.000000e+00> : vector<4x128xf32>
    %68 = tpu.matmul %65, %67, %cst_59 {dimension_numbers = #tpu.dot_dimension_numbers<[1], [0], [0], [1], [0, 0, 1, 1], [], []>} : vector<4x192xbf16>, vector<192x128xbf16>, vector<4x128xf32> -> vector<4x128xf32>
    %69 = arith.addf %64, %68 : vector<4x128xf32>
    %70 = vector.broadcast %51 : vector<1x128xf32> to vector<4x128xf32>
    %71 = arith.addf %69, %70 : vector<4x128xf32>
    %cst_60 = arith.constant 0.000000e+00 : f32
    %72 = vector.broadcast %cst_60 : f32 to vector<4x128xf32>
    %73 = arith.maximumf %71, %72 : vector<4x128xf32>
    %c1_61 = arith.constant 1 : index
    %c32_62 = arith.constant 32 : index
    %74 = vector.load %arg16[%c1_61, %c32_62] : memref<6x192xf32, #tpu.memory_space<vmem>>, vector<4x128xf32>
    tpu.vector_store %arg16[%c1_61, %c32_62], %73 {strides = array<i32>} : memref<6x192xf32, #tpu.memory_space<vmem>>, vector<4x128xf32>,
    %c0_63 = arith.constant 0 : index
    %c0_64 = arith.constant 0 : index
    %75 = vector.load %arg16[%c0_63, %c0_64] : memref<6x192xf32, #tpu.memory_space<vmem>>, vector<6x192xf32>
    %76 = arith.truncf %75 : vector<6x192xf32> to vector<6x192xbf16>
    %77 = vector.extract_strided_slice %76 {offsets = [0, 0], sizes = [4, 192], strides = [1, 1]} : vector<6x192xbf16> to vector<4x192xbf16>
    %c0_65 = arith.constant 0 : index
    %c0_66 = arith.constant 0 : index
    %c0_67 = arith.constant 0 : index
    %78 = vector.load %arg11[%c0_65, %c0_66, %c0_67] : memref<3x192x128xbf16, #tpu.memory_space<vmem>>, vector<1x192x128xbf16>
    %79 = vector.shape_cast %78 : vector<1x192x128xbf16> to vector<192x128xbf16>
    %cst_68 = arith.constant dense<0.000000e+00> : vector<4x128xf32>
    %80 = tpu.matmul %77, %79, %cst_68 {dimension_numbers = #tpu.dot_dimension_numbers<[1], [0], [0], [1], [0, 0, 1, 1], [], []>} : vector<4x192xbf16>, vector<192x128xbf16>, vector<4x128xf32> -> vector<4x128xf32>
    %81 = vector.extract_strided_slice %76 {offsets = [1, 0], sizes = [4, 192], strides = [1, 1]} : vector<6x192xbf16> to vector<4x192xbf16>
    %c1_69 = arith.constant 1 : index
    %c0_70 = arith.constant 0 : index
    %c0_71 = arith.constant 0 : index
    %82 = vector.load %arg11[%c1_69, %c0_70, %c0_71] : memref<3x192x128xbf16, #tpu.memory_space<vmem>>, vector<1x192x128xbf16>
    %83 = vector.shape_cast %82 : vector<1x192x128xbf16> to vector<192x128xbf16>
    %cst_72 = arith.constant dense<0.000000e+00> : vector<4x128xf32>
    %84 = tpu.matmul %81, %83, %cst_72 {dimension_numbers = #tpu.dot_dimension_numbers<[1], [0], [0], [1], [0, 0, 1, 1], [], []>} : vector<4x192xbf16>, vector<192x128xbf16>, vector<4x128xf32> -> vector<4x128xf32>
    %85 = arith.addf %80, %84 : vector<4x128xf32>
    %86 = vector.extract_strided_slice %76 {offsets = [2, 0], sizes = [4, 192], strides = [1, 1]} : vector<6x192xbf16> to vector<4x192xbf16>
    %c2_73 = arith.constant 2 : index
    %c0_74 = arith.constant 0 : index
    %c0_75 = arith.constant 0 : index
    %87 = vector.load %arg11[%c2_73, %c0_74, %c0_75] : memref<3x192x128xbf16, #tpu.memory_space<vmem>>, vector<1x192x128xbf16>
    %88 = vector.shape_cast %87 : vector<1x192x128xbf16> to vector<192x128xbf16>
    %cst_76 = arith.constant dense<0.000000e+00> : vector<4x128xf32>
    %89 = tpu.matmul %86, %88, %cst_76 {dimension_numbers = #tpu.dot_dimension_numbers<[1], [0], [0], [1], [0, 0, 1, 1], [], []>} : vector<4x192xbf16>, vector<192x128xbf16>, vector<4x128xf32> -> vector<4x128xf32>
    %90 = arith.addf %85, %89 : vector<4x128xf32>
    %91 = vector.broadcast %52 : vector<1x128xf32> to vector<4x128xf32>
    %92 = arith.addf %90, %91 : vector<4x128xf32>
    %93 = arith.addf %92, %50 : vector<4x128xf32>
    %cst_77 = arith.constant 0.000000e+00 : f32
    %94 = vector.broadcast %cst_77 : f32 to vector<4x128xf32>
    %95 = arith.maximumf %93, %94 : vector<4x128xf32>
    %96 = arith.truncf %95 : vector<4x128xf32> to vector<4x128xbf16>
    %c0_78 = arith.constant 0 : index
    %c0_79 = arith.constant 0 : index
    %c0_80 = arith.constant 0 : index
    %97 = vector.load %arg13[%c0_78, %c0_79, %c0_80] : memref<1x128x128xbf16, #tpu.memory_space<vmem>>, vector<1x128x128xbf16>
    %98 = vector.shape_cast %97 : vector<1x128x128xbf16> to vector<128x128xbf16>
    %cst_81 = arith.constant dense<0.000000e+00> : vector<4x128xf32>
    %99 = tpu.matmul %96, %98, %cst_81 {dimension_numbers = #tpu.dot_dimension_numbers<[1], [0], [0], [1], [0, 0, 1, 1], [], []>} : vector<4x128xbf16>, vector<128x128xbf16>, vector<4x128xf32> -> vector<4x128xf32>
    %c1_82 = arith.constant 1 : index
    %c32_83 = arith.constant 32 : index
    %100 = vector.load %arg16[%c1_82, %c32_83] : memref<6x192xf32, #tpu.memory_space<vmem>>, vector<4x128xf32>
    tpu.vector_store %arg16[%c1_82, %c32_83], %99 {strides = array<i32>} : memref<6x192xf32, #tpu.memory_space<vmem>>, vector<4x128xf32>,
    %c0_84 = arith.constant 0 : index
    %c0_85 = arith.constant 0 : index
    %101 = vector.load %arg16[%c0_84, %c0_85] : memref<6x192xf32, #tpu.memory_space<vmem>>, vector<6x192xf32>
    %102 = arith.truncf %101 : vector<6x192xf32> to vector<6x192xbf16>
    %103 = vector.extract_strided_slice %102 {offsets = [0, 0], sizes = [4, 192], strides = [1, 1]} : vector<6x192xbf16> to vector<4x192xbf16>
    %c0_86 = arith.constant 0 : index
    %c0_87 = arith.constant 0 : index
    %c0_88 = arith.constant 0 : index
    %104 = vector.load %arg14[%c0_86, %c0_87, %c0_88] : memref<3x192x16xbf16, #tpu.memory_space<vmem>>, vector<1x192x16xbf16>
    %105 = vector.shape_cast %104 : vector<1x192x16xbf16> to vector<192x16xbf16>
    %cst_89 = arith.constant dense<0.000000e+00> : vector<4x16xf32>
    %106 = tpu.matmul %103, %105, %cst_89 {dimension_numbers = #tpu.dot_dimension_numbers<[1], [0], [0], [1], [0, 0, 1, 1], [], []>} : vector<4x192xbf16>, vector<192x16xbf16>, vector<4x16xf32> -> vector<4x16xf32>
    %107 = vector.extract_strided_slice %102 {offsets = [1, 0], sizes = [4, 192], strides = [1, 1]} : vector<6x192xbf16> to vector<4x192xbf16>
    %c1_90 = arith.constant 1 : index
    %c0_91 = arith.constant 0 : index
    %c0_92 = arith.constant 0 : index
    %108 = vector.load %arg14[%c1_90, %c0_91, %c0_92] : memref<3x192x16xbf16, #tpu.memory_space<vmem>>, vector<1x192x16xbf16>
    %109 = vector.shape_cast %108 : vector<1x192x16xbf16> to vector<192x16xbf16>
    %cst_93 = arith.constant dense<0.000000e+00> : vector<4x16xf32>
    %110 = tpu.matmul %107, %109, %cst_93 {dimension_numbers = #tpu.dot_dimension_numbers<[1], [0], [0], [1], [0, 0, 1, 1], [], []>} : vector<4x192xbf16>, vector<192x16xbf16>, vector<4x16xf32> -> vector<4x16xf32>
    %111 = arith.addf %106, %110 : vector<4x16xf32>
    %112 = vector.extract_strided_slice %102 {offsets = [2, 0], sizes = [4, 192], strides = [1, 1]} : vector<6x192xbf16> to vector<4x192xbf16>
    %c2_94 = arith.constant 2 : index
    %c0_95 = arith.constant 0 : index
    %c0_96 = arith.constant 0 : index
    %113 = vector.load %arg14[%c2_94, %c0_95, %c0_96] : memref<3x192x16xbf16, #tpu.memory_space<vmem>>, vector<1x192x16xbf16>
    %114 = vector.shape_cast %113 : vector<1x192x16xbf16> to vector<192x16xbf16>
    %cst_97 = arith.constant dense<0.000000e+00> : vector<4x16xf32>
    %115 = tpu.matmul %112, %114, %cst_97 {dimension_numbers = #tpu.dot_dimension_numbers<[1], [0], [0], [1], [0, 0, 1, 1], [], []>} : vector<4x192xbf16>, vector<192x16xbf16>, vector<4x16xf32> -> vector<4x16xf32>
    %116 = arith.addf %111, %115 : vector<4x16xf32>
    %c0_98 = arith.constant 0 : index
    %c0_99 = arith.constant 0 : index
    %c0_100 = arith.constant 0 : index
    %117 = vector.load %arg15[%c0_98, %c0_99, %c0_100] : memref<1x4x16xf32, #tpu.memory_space<vmem>>, vector<1x4x16xf32>
    %118 = vector.shape_cast %117 : vector<1x4x16xf32> to vector<4x16xf32>
    %119 = vector.shape_cast %116 : vector<4x16xf32> to vector<1x4x16xf32>
    tpu.vector_store %arg15[%c0_98, %c0_99, %c0_100], %119 {strides = array<i32>} : memref<1x4x16xf32, #tpu.memory_space<vmem>>, vector<1x4x16xf32>,
    return
  }
  func.func @transform_0(%arg0: i32) -> (i32, i32, i32) {
    %c0_i32 = arith.constant 0 : i32
    %c0_i32_0 = arith.constant 0 : i32
    %c0_i32_1 = arith.constant 0 : i32
    return %arg0, %c0_i32, %c0_i32_0 : i32, i32, i32
  }
  func.func @transform_1(%arg0: i32) -> (i32, i32, i32) {
    %c0_i32 = arith.constant 0 : i32
    %c0_i32_0 = arith.constant 0 : i32
    %c0_i32_1 = arith.constant 0 : i32
    return %arg0, %c0_i32, %c0_i32_0 : i32, i32, i32
  }
  func.func @transform_2(%arg0: i32) -> (i32, i32, i32) {
    %c0_i32 = arith.constant 0 : i32
    %c0_i32_0 = arith.constant 0 : i32
    %c0_i32_1 = arith.constant 0 : i32
    %c0_i32_2 = arith.constant 0 : i32
    return %c0_i32, %c0_i32_0, %c0_i32_1 : i32, i32, i32
  }
  func.func @transform_3(%arg0: i32) -> (i32, i32) {
    %c0_i32 = arith.constant 0 : i32
    %c0_i32_0 = arith.constant 0 : i32
    %c0_i32_1 = arith.constant 0 : i32
    return %c0_i32, %c0_i32_0 : i32, i32
  }
  func.func @transform_4(%arg0: i32) -> (i32, i32, i32) {
    %c0_i32 = arith.constant 0 : i32
    %c0_i32_0 = arith.constant 0 : i32
    %c0_i32_1 = arith.constant 0 : i32
    %c0_i32_2 = arith.constant 0 : i32
    return %c0_i32, %c0_i32_0, %c0_i32_1 : i32, i32, i32
  }
  func.func @transform_5(%arg0: i32) -> (i32, i32) {
    %c0_i32 = arith.constant 0 : i32
    %c0_i32_0 = arith.constant 0 : i32
    %c0_i32_1 = arith.constant 0 : i32
    return %c0_i32, %c0_i32_0 : i32, i32
  }
  func.func @transform_6(%arg0: i32) -> (i32, i32, i32) {
    %c0_i32 = arith.constant 0 : i32
    %c0_i32_0 = arith.constant 0 : i32
    %c0_i32_1 = arith.constant 0 : i32
    %c0_i32_2 = arith.constant 0 : i32
    return %c0_i32, %c0_i32_0, %c0_i32_1 : i32, i32, i32
  }
  func.func @transform_7(%arg0: i32) -> (i32, i32) {
    %c0_i32 = arith.constant 0 : i32
    %c0_i32_0 = arith.constant 0 : i32
    %c0_i32_1 = arith.constant 0 : i32
    return %c0_i32, %c0_i32_0 : i32, i32
  }
  func.func @transform_8(%arg0: i32) -> (i32, i32, i32) {
    %c0_i32 = arith.constant 0 : i32
    %c0_i32_0 = arith.constant 0 : i32
    %c0_i32_1 = arith.constant 0 : i32
    %c0_i32_2 = arith.constant 0 : i32
    return %c0_i32, %c0_i32_0, %c0_i32_1 : i32, i32, i32
  }
  func.func @transform_9(%arg0: i32) -> (i32, i32) {
    %c0_i32 = arith.constant 0 : i32
    %c0_i32_0 = arith.constant 0 : i32
    %c0_i32_1 = arith.constant 0 : i32
    return %c0_i32, %c0_i32_0 : i32, i32
  }
  func.func @transform_10(%arg0: i32) -> (i32, i32, i32) {
    %c0_i32 = arith.constant 0 : i32
    %c0_i32_0 = arith.constant 0 : i32
    %c0_i32_1 = arith.constant 0 : i32
    %c0_i32_2 = arith.constant 0 : i32
    return %c0_i32, %c0_i32_0, %c0_i32_1 : i32, i32, i32
  }
  func.func @transform_11(%arg0: i32) -> (i32, i32) {
    %c0_i32 = arith.constant 0 : i32
    %c0_i32_0 = arith.constant 0 : i32
    %c0_i32_1 = arith.constant 0 : i32
    return %c0_i32, %c0_i32_0 : i32, i32
  }
  func.func @transform_12(%arg0: i32) -> (i32, i32, i32) {
    %c0_i32 = arith.constant 0 : i32
    %c0_i32_0 = arith.constant 0 : i32
    %c0_i32_1 = arith.constant 0 : i32
    %c0_i32_2 = arith.constant 0 : i32
    return %c0_i32, %c0_i32_0, %c0_i32_1 : i32, i32, i32
  }
  func.func @transform_13(%arg0: i32) -> (i32, i32, i32) {
    %c0_i32 = arith.constant 0 : i32
    %c0_i32_0 = arith.constant 0 : i32
    %c0_i32_1 = arith.constant 0 : i32
    %c0_i32_2 = arith.constant 0 : i32
    return %c0_i32, %c0_i32_0, %c0_i32_1 : i32, i32, i32
  }
  func.func @transform_14(%arg0: i32) -> (i32, i32, i32) {
    %c0_i32 = arith.constant 0 : i32
    %c0_i32_0 = arith.constant 0 : i32
    %c0_i32_1 = arith.constant 0 : i32
    return %arg0, %c0_i32, %c0_i32_0 : i32, i32, i32
  }
}

</mosaic_0001>

<bundles_post_ra>
// kernel: forward.3
= control target key start
LH: loop header
LB: loop body
LE: loop exit
PB: predicated region body
PF: predicated region fallthrough
CT: control target
= control target key end

     0   :  { %16 = vsyncpa [#allocation4], 0  ;;  %s8090_s0 = inlined_call_operand.vmem [shape: f32[2,19,76], index: 0, kind: input, shape index: {}]   ;;  %s8091_s1 = inlined_call_operand.vmem [shape: bf16[4,76,256], index: 1, kind: input, shape index: {}]   ;;  %s8092_s2 = inlined_call_operand.vmem [shape: f32[1,256], index: 2, kind: input, shape index: {}]   ;;  %s8093_s3 = inlined_call_operand.vmem [shape: bf16[3,288,256], index: 3, kind: input, shape index: {}]   ;;  %s8094_s4 = inlined_call_operand.vmem [shape: f32[1,256], index: 4, kind: input, shape index: {}]   ;;  %s8095_s5 = inlined_call_operand.vmem [shape: bf16[3,288,256], index: 5, kind: input, shape index: {}]   ;;  %s8096_s6 = inlined_call_operand.vmem [shape: f32[1,256], index: 6, kind: input, shape index: {}]   ;;  %s8097_s7 = inlined_call_operand.hbm [shape: bf16[3,288,256], index: 7, kind: input, shape index: {}]   ;;  %s8098_s8 = inlined_call_operand.vmem [shape: f32[1,256], index: 8, kind: input, shape index: {}]   ;;  %s8099_s9 = inlined_call_operand.hbm [shape: bf16[3,288,256], index: 9, kind: input, shape index: {}]   ;;  %s8100_s10 = inlined_call_operand.vmem [shape: f32[1,256], index: 10, kind: input, shape index: {}]   ;;  %s8101_s11 = inlined_call_operand.vmem [shape: f32[2,16,256], index: 11, kind: output, shape index: {}]  }
   0x1   :  { %17 = vsyncpa [#allocation6], 0  ;;  %s6898_s17 = smov 0  }
   0x2 LB: > { %s6904_s18 = sadd.s32 4294967295, %s6829_s17   ;;  %p5245_p0 = scmp.ge.s32.totalorder %s6829_s17, 1  ;;  %s6829_s17 = sphi %s6898_s17, %s23_s17  }
   0x3   : > { %p290_p1 = scmp.lt.s32.totalorder %s6829_s17, 3  ;;  %s6831_s19 = smov [#allocation3]  }
   0x4   : > { %s320_s20 = sshll.u32 %s6831_s19, 4  ;;  %p8102_p3 = scmp.eq.s32.totalorder %s6904_s18, 0  ;;  %s321_s20 = int_to_ptr.vmem [resolvable:$true] %s320_s20 }
   0x5   : > { %p6908_p2 = pnand %p5245_p0, %p290_p1  ;;  %s6832_s22 = smov [#allocation5]  }
   0x6   : > { %s336_s23 = sshll.u32 %s6832_s22, 4  ;;  %s6759_s27 = scalar_lea.hbm %s8097_s7, 13824  ;;  %s6921_s23 = int_to_ptr.vmem [resolvable:$true] %s336_s23 }
   0x7   : > { %s8104_s21 = scalar_select %p6908_p2, 1, 0 }
   0x8   : > { %p6025_p4 = pneg %p6908_p2  ;;  %p6760_p6 = scmp.ne.s32.totalorder %s8097_s7, %s6759_s27 }
   0x9   : > { %p6766_p10 = scmp.lt.u32.totalorder %s6759_s27, %s8097_s7 }
   0xa   : > { %p6917_p5 = pnand %p8102_p3, %p6025_p4 }
   0xc   : > { %p6761_p7 = pneg %p6917_p5 }
   0xe   : > { %p6762_p8 = pnand %p6761_p7, %p6760_p6 }
  0x10   : > { %p6763_p9 = pneg %p6762_p8 }
  0x12   : > { %p6768_p11 = pnand %p6766_p10, %p6763_p9 }
  0x14   : > { %6771 = shalt.err (!%p6768_p11)
}
  0x15   : > { %s6772_s13 = scalar_lea.vmem %s321_s20, 13824  ;;  %p6780_p1 = scmp.lt.s32.totalorder %s321_s20, %s321_s20 }
  0x16   : > { %p6773_p12 = scmp.ne.s32.totalorder %s321_s20, %s6772_s13  ;;  %p6781_p4 = scmp.lt.s32.totalorder %s6772_s13, %s6772_s13 }
  0x18   : > { %p6775_p13 = pnand %p6773_p12, %p6761_p7  ;;  %p6782_p3 = por %p6781_p4, %p6780_p1 }
  0x1a   : > { %p6776_p0 = pneg %p6775_p13 }
  0x1c   : > { %p6783_p2 = pnand %p6782_p3, %p6776_p0 }
  0x1e   : > { %6786 = shalt.err (!%p6783_p2)
}
  0x1f   : > { %s6833_s14 = smov 128   ;;  %s6834_s15 = smov 8  }
  0x20   : > { %6028 = dma.hbm_to_vmem [thread:$0]  (!%p6917_p5), %s8097_s7, 13824, %s321_s20, [#allocation4], %s6833_s14, %s6833_s14, %s6834_s15  }
  0x21   : > { %s6787_s26 = scalar_lea.hbm %s8099_s9, 13824 }
  0x22   : > { %p6788_p6 = scmp.ne.s32.totalorder %s8099_s9, %s6787_s26  ;;  %p6794_p8 = scmp.lt.u32.totalorder %s6787_s26, %s8099_s9 }
  0x24   : > { %p6790_p2 = pnand %p6788_p6, %p6761_p7 }
  0x26   : > { %p6791_p3 = pneg %p6790_p2 }
  0x28   : > { %p6796_p9 = pnand %p6794_p8, %p6791_p3 }
  0x2a   : > { %6799 = shalt.err (!%p6796_p9)
}
  0x2b   : > { %s6800_s20 = scalar_lea.vmem %s6921_s23, 13824  ;;  %p6808_p13 = scmp.lt.s32.totalorder %s6921_s23, %s6921_s23 }
  0x2c   : > { %p6801_p10 = scmp.ne.s32.totalorder %s6921_s23, %s6800_s20  ;;  %p6809_p0 = scmp.lt.s32.totalorder %s6800_s20, %s6800_s20 }
  0x2e   : > { %p6803_p11 = pnand %p6801_p10, %p6761_p7  ;;  %p6810_p1 = por %p6809_p0, %p6808_p13 }
  0x30   : > { %p6804_p12 = pneg %p6803_p11 }
  0x32   : > { %p6811_p4 = pnand %p6810_p1, %p6804_p12 }
  0x34   : > { %6814 = shalt.err (!%p6811_p4)
}
  0x35   : > { %6031 = dma.hbm_to_vmem [thread:$0]  (!%p6917_p5), %s8099_s9, 13824, %s6921_s23, [#allocation6], %s6833_s14, %s6833_s14, %s6834_s15  }
  0x36   : > { %p8106_p6 = scmp.ne.s32.totalorder %s8104_s21, 0 }
  0x37   : > { %p8107_p2 = scmp.eq.s32.totalorder (!%p8106_p6), %s6904_s18, 0 }
  0x38   : > { %363 = sbr.rel (%p8106_p6) target bundleno = 2430 (0x97e), region = 64 }
  0x3f   : > { %6820 = dma.done.wait (%p8107_p2), [#allocation4], 13824   ;;  %p8108_p7 = pmov %p8107_p2 }
  0x40   : > { %p8109_p3 = pmov %p8107_p2 }
  0x41   : > { %6822 = vsyncadd (%p8108_p7), [#allocation4], 4294953472 }
  0x42   : > { %6824 = dma.done.wait (%p8109_p3), [#allocation6], 13824   ;;  %p8110_p8 = pmov %p8107_p2 }
  0x43   : > { %v6835_v0 = vmov 0   ;;  %v6051_v1 = vld [vmem:[%s8091_s1 + $0x54] ss:$8 sps:$4 sm:$0xff]   ;;  %v6053_v2 = vld [vmem:[%s8091_s1 + $0xa4] ss:$8 sps:$4 sm:$0xff]   ;;  %p407_p5 = scmp.lt.s32.totalorder %s6904_s18, 1 }
  0x44   : > { %6826 = vsyncadd (%p8110_p8), [#allocation6], 4294953472  ;;  %560 = vmatprep.mubr.bf16.mxu1 %v6835_v0  ;;  %776 = vmatprep.mubr.bf16.mxu0 %v6835_v0  ;;  %v6055_v3 = vld [vmem:[%s8091_s1 + $0x50] ss:$8 sps:$4 sm:$0xff]   ;;  %v6056_v4 = vld [vmem:[%s8091_s1 + $0xa0] ss:$8 sps:$4 sm:$0xff]  }
  0x45   : > { %528 = vmatprep.subr.bf16.mxu1 %v6051_v1  ;;  %744 = vmatprep.subr.bf16.mxu0 %v6053_v2  ;;  %v6057_v5 = vld [vmem:[%s8091_s1 + $0x64] ss:$8 sps:$4 sm:$0xff]   ;;  %v6059_v6 = vld [vmem:[%s8091_s1 + $0xb4] ss:$8 sps:$4 sm:$0xff]   ;;  %v6061_v7 = vld [vmem:[%s8091_s1 + $0x60] ss:$8 sps:$4 sm:$0xff]  }
  0x46   : > { %529 = vmatpush1.bf16.msra.mxu1 %v6055_v3  ;;  %745 = vmatpush1.bf16.msra.mxu0 %v6056_v4  ;;  %v6062_v8 = vld [vmem:[%s8091_s1 + $0xb0] ss:$8 sps:$4 sm:$0xff]   ;;  %s8112_s18 = smov (!%p407_p5, %s6904_s18), 1  ;;  %v6063_v9 = vld [vmem:[%s8091_s1 + $0x74] ss:$8 sps:$4 sm:$0xff]   ;;  %vm521_vm0 = vcmask 1045504  }
  0x47   : > { %530 = vmatprep.subr.bf16.mxu1 %v6057_v5  ;;  %746 = vmatprep.subr.bf16.mxu0 %v6059_v6  ;;  %v6065_v10 = vld [vmem:[%s8091_s1 + $0xc4] ss:$8 sps:$4 sm:$0xff]   ;;  %v6067_v11 = vld [vmem:[%s8091_s1 + $0x70] ss:$8 sps:$4 sm:$0xff]   ;;  %v6068_v12 = vld [vmem:[%s8091_s1 + $0xc0] ss:$8 sps:$4 sm:$0xff]  }
  0x48   : > { %v6069_v13 = vld [vmem:[%s8091_s1 + $0x84] ss:$8 sps:$4 sm:$0xff]   ;;  %v6071_v14 = vld [vmem:[%s8091_s1 + $0xd4] ss:$8 sps:$4 sm:$0xff]   ;;  %s6016_s28 = smul.u32 24, %s8112_s18  ;;  %vm517_vm1 = vcmask 621568  }
  0x49   : > { %v6073_v15 = vld [vmem:[%s8091_s1 + $0x80] ss:$8 sps:$4 sm:$0xff]   ;;  %v6074_v16 = vld [vmem:[%s8091_s1 + $0xd0] ss:$8 sps:$4 sm:$0xff]   ;;  %v6083_v21 = vld [vmem:[%s8091_s1 + $0x4] ss:$8 sps:$4 sm:$0xff]  }
  0x4a   : > { %531 = vmatpush1.bf16.msra.mxu1 %v6061_v7  ;;  %747 = vmatpush1.bf16.msra.mxu0 %v6062_v8  ;;  %v6075_v17 = vld [vmem:[%s8091_s1 + $0x94] ss:$8 sps:$4 sm:$0x3f]   ;;  %v6077_v18 = vld [vmem:[%s8091_s1 + $0xe4] ss:$8 sps:$4 sm:$0x3f]   ;;  %s411_s26 = scalar_lea.vmem %s8090_s0, %s6016_s28 }
  0x4b   : > { %532 = vmatprep.subr.bf16.mxu1 %v6063_v9  ;;  %748 = vmatprep.subr.bf16.mxu0 %v6065_v10  ;;  %v6079_v19 = vld [vmem:[%s8091_s1 + $0x90] ss:$8 sps:$4 sm:$0x3f]   ;;  %v6080_v20 = vld [vmem:[%s8091_s1 + $0xe0] ss:$8 sps:$4 sm:$0x3f]  }
  0x4c   : > { %v6086_v22 = vld [vmem:[%s8091_s1 + $0xf4] ss:$8 sps:$4 sm:$0xff]   ;;  %v429_v23 = vld [vmem:[%s411_s26] sm:$0xff]  ;;  %v430_v24 = vld [vmem:[%s411_s26 + $0x8] sm:$0xff]  ;;  %v523_v25 = vsel %vm521_vm0, %v6079_v19, 0  ;;  %v739_v26 = vsel %vm521_vm0, %v6080_v20, 0 }
  0x4d   : > { %v431_v27 = vld [vmem:[%s411_s26 + $0x10] sm:$0x7]  ;;  %v7060_v28 = vpack.c.bf16 %v430_v24, %v429_v23  ;;  %vm683_vm2 = vcmask 1046528   ;;  %v6092_v37 = vld [vmem:[%s8091_s1 + $0x104] ss:$8 sps:$4 sm:$0xff]   ;;  %v917_v24 = vlaneseq  ;;  %vm420_vm5 = vcmask 261120  }
  0x4e   : > { %533 = vmatpush1.bf16.msra.mxu1 %v6067_v11  ;;  %749 = vmatpush1.bf16.msra.mxu0 %v6068_v12  ;;  %v434_v29 = vpack.c.bf16 %v431_v27, %v431_v27  ;;  %v6084_v33 = vld [vmem:[%s8091_s1 + $0xf0] ss:$8 sps:$4 sm:$0xff]   ;;  %vm456_vm3 = vsmask.f32 7424  ;;  %v6081_v40 = vld [vmem:[%s8091_s1] ss:$8 sps:$4 sm:$0xff]  }
  0x4f   : > { %534 = vmatprep.subr.bf16.mxu1 %v6069_v13  ;;  %750 = vmatprep.subr.bf16.mxu0 %v6071_v14  ;;  %v458_v30 = vshrl.u32 %v7060_v28, 16  ;;  %v460_v31 = vshll.u32 %v7060_v28, 16  ;;  %v684_v32 = vrot.slane %v7060_v28, 1  ;;  %v6089_v42 = vld [vmem:[%s8091_s1 + $0x14] ss:$8 sps:$4 sm:$0xff]   ;;  %v6836_v12 = vmov 0.0  }
  0x50   : > { %v465_v34 = vshll.u32 %v434_v29, 16  ;;  %v685_v35 = vrot.slane %v434_v29, 1  ;;  %v6090_v43 = vld [vmem:[%s8091_s1 + $0x100] ss:$8 sps:$4 sm:$0xff]   ;;  %v6098_v45 = vld [vmem:[%s8091_s1 + $0x114] ss:$8 sps:$4 sm:$0xff]  }
  0x51   : > { %v462_v36 = vrot.slane %v460_v31, 1  ;;  %v6087_v46 = vld [vmem:[%s8091_s1 + $0x10] ss:$8 sps:$4 sm:$0xff]   ;;  %v6095_v47 = vld [vmem:[%s8091_s1 + $0x24] ss:$8 sps:$4 sm:$0xff]   ;;  %v806_v50 = vshrl.u32 %v434_v29, 16 }
  0x52   : > { %535 = vmatpush1.bf16.msra.mxu1 %v6073_v15  ;;  %751 = vmatpush1.bf16.msra.mxu0 %v6074_v16  ;;  %v467_v38 = vrot.slane %v465_v34, 1  ;;  %v686_v39 = vsel %vm683_vm2, %v684_v32, %v685_v35  ;;  %v6096_v48 = vld [vmem:[%s8091_s1 + $0x110] ss:$8 sps:$4 sm:$0xff]   ;;  %v6104_v49 = vld [vmem:[%s8091_s1 + $0x124] ss:$8 sps:$4 sm:$0xff]   ;;  %v803_v54 = vrot.slane %v458_v30, 1 }
  0x53   : > { %5275 = vmatprep.subr.msk.bf16.mxu1 %vm521_vm0, %v6075_v17  ;;  %5309 = vmatprep.subr.msk.bf16.mxu0 %vm521_vm0, %v6077_v18  ;;  %v463_v41 = vor.u32 %v462_v36, %v458_v30  ;;  %v6093_v51 = vld [vmem:[%s8091_s1 + $0x20] ss:$8 sps:$4 sm:$0xff]   ;;  %v6101_v52 = vld [vmem:[%s8091_s1 + $0x34] ss:$8 sps:$4 sm:$0xff]   ;;  %v809_v57 = vrot.slane %v465_v34, 2  ;;  %v804_v58 = vrot.slane %v460_v31, 2 }
  0x54   : > { %v6102_v53 = vld [vmem:[%s8091_s1 + $0x120] ss:$8 sps:$4 sm:$0xff]   ;;  %v6107_v55 = vld [vmem:[%s8091_s1 + $0x134] ss:$8 sps:$4 sm:$0x3f]   ;;  %v808_v59 = vrot.slane %v806_v50, 1 }
  0x55   : > { %v468_v44 = vsel %vm456_vm3, %v463_v41, %v467_v38  ;;  %v6110_v56 = vld [vmem:[%s8091_s1 + $0x130] ss:$8 sps:$4 sm:$0x3f]   ;;  %v6105_v61 = vld [vmem:[%s8091_s1 + $0x44] ss:$8 sps:$4 sm:$0x3f]   ;;  %v805_v63 = vor.u32 %v804_v58, %v803_v54 }
  0x56   : > { %537 = vmatpush1.bf16.msra.mxu1 %v523_v25  ;;  %753 = vmatpush1.bf16.msra.mxu0 %v739_v26  ;;  %v6099_v60 = vld [vmem:[%s8091_s1 + $0x30] ss:$8 sps:$4 sm:$0xff]   ;;  %v6109_v62 = vld [vmem:[%s8091_s1 + $0x40] ss:$8 sps:$4 sm:$0x3f]   ;;  %v810_v1 = vor.u32 %v809_v57, %v808_v59  ;;  %v864_v2 = vsel %vm521_vm0, %v6110_v56, 0 }
  0x57   : > { %627 = vmatprep.subr.bf16.mxu1 %v6083_v21  ;;  %869 = vmatprep.subr.bf16.mxu0 %v6086_v22  ;;  %vm802_vm4 = vsmask.f32 6400  ;;  %v622_v3 = vsel %vm521_vm0, %v6109_v62, 0  ;;  %v6111_v5 = vld [vmem:[%s8093_s3 + $0x120] ss:$8 sps:$4 sm:$0xff]   ;;  %418 = vst [vmem:[#allocation2] sm:$0xff] %v6836_v12 }
  0x58   : > { %v811_v4 = vsel %vm802_vm4, %v805_v63, %v810_v1  ;;  %v6113_v6 = vld [vmem:[%s8093_s3 + $0x124] ss:$8 sps:$4 sm:$0xff]   ;;  %v6116_v7 = vld [vmem:[%s8093_s3 + $0x134] ss:$8 sps:$4 sm:$0xff]   ;;  %v6114_v8 = vld [vmem:[%s8093_s3 + $0x130] ss:$8 sps:$4 sm:$0xff]  }
  0x59   : > { %5310 = vmatmul.mubr.msk.bf16.vlgmr.msra.gmra.mrb[0].mxu0 %vm517_vm1, %v686_v39  ;;  %5276 = vmatmul.mubr.msk.bf16.vlgmr.msra.gmra.mrb[0].mxu1 %vm517_vm1, %v468_v44  ;;  %v6119_v9 = vld [vmem:[%s8093_s3 + $0x144] ss:$8 sps:$4 sm:$0xff]   ;;  %v6117_v10 = vld [vmem:[%s8093_s3 + $0x140] ss:$8 sps:$4 sm:$0xff]   ;;  %v6122_v11 = vld [vmem:[%s8093_s3 + $0x154] ss:$8 sps:$4 sm:$0xff]  }
  0x5a   : > { %870 = vmatpush1.bf16.msra.mxu0 %v6084_v33  ;;  %901 = vmatprep.mubr.bf16.mxu0 %v6835_v0  ;;  %419 = vst [vmem:[#allocation2 + $0x8] sm:$0xff] %v6836_v12  ;;  %422 = vst [vmem:[#allocation2 + $0x18] sm:$0xff] %v6836_v12  ;;  %v6120_v13 = vld [vmem:[%s8093_s3 + $0x150] ss:$8 sps:$4 sm:$0xff]   ;;  %v6125_v14 = vld [vmem:[%s8093_s3 + $0x164] ss:$8 sps:$4 sm:$0xff]  }
  0x5b   : > { %871 = vmatprep.subr.bf16.mxu0 %v6092_v37  ;;  %628 = vmatpush1.bf16.msra.mxu1 %v6081_v40  ;;  %425 = vst [vmem:[#allocation2 + $0x30] sm:$0x3] %v6836_v12  ;;  %426 = vst [vmem:[#allocation2 + $0x38] sm:$0x3] %v6836_v12  ;;  %v6123_v15 = vld [vmem:[%s8093_s3 + $0x160] ss:$8 sps:$4 sm:$0xff]  }
  0x5c   : > { %659 = vmatprep.mubr.bf16.mxu1 %v6835_v0  ;;  %629 = vmatprep.subr.bf16.mxu1 %v6089_v42  ;;  %v6128_v16 = vld [vmem:[%s8093_s3 + $0x174] ss:$8 sps:$4 sm:$0xff]   ;;  %v6126_v17 = vld [vmem:[%s8093_s3 + $0x170] ss:$8 sps:$4 sm:$0xff]   ;;  %v6131_v18 = vld [vmem:[%s8093_s3 + $0x184] ss:$8 sps:$4 sm:$0xff]  }
  0x5d   : > { %v6129_v19 = vld [vmem:[%s8093_s3 + $0x180] ss:$8 sps:$4 sm:$0xff]   ;;  %v6134_v20 = vld [vmem:[%s8093_s3 + $0x194] ss:$8 sps:$4 sm:$0xff]   ;;  %v6132_v21 = vld [vmem:[%s8093_s3 + $0x190] ss:$8 sps:$4 sm:$0xff]  }
  0x5e   : > { %872 = vmatpush1.bf16.msra.mxu0 %v6090_v43  ;;  %v6137_v22 = vld [vmem:[%s8093_s3 + $0x1a4] ss:$8 sps:$4 sm:$0xff]   ;;  %v6135_v23 = vld [vmem:[%s8093_s3 + $0x1a0] ss:$8 sps:$4 sm:$0xff]   ;;  %v918_v25 = vshrl.u32 %v917_v24, 7  ;;  %421 = vst.msk [vmem:[#allocation2 + $0x10] sm:$0xff] %vm420_vm5, %v6836_v12 }
  0x5f   : > { %873 = vmatprep.subr.bf16.mxu0 %v6098_v45  ;;  %630 = vmatpush1.bf16.msra.mxu1 %v6087_v46  ;;  %v6140_v26 = vld [vmem:[%s8093_s3 + $0x1b4] ss:$8 sps:$4 sm:$0xff]   ;;  %v432_v29 = vld [vmem:[%s8092_s2] sm:$0x3]  ;;  %v6143_v33 = vld [vmem:[%s8093_s3 + $0x1c4] ss:$8 sps:$4 sm:$0xff]  }
  0x60   : > { %631 = vmatprep.subr.bf16.mxu1 %v6095_v47  ;;  %v7194_v27 = vsub.s32 0, %v918_v25  ;;  %v7202_v30 = vsub.s32 1, %v918_v25  ;;  %424 = vst.msk [vmem:[#allocation2 + $0x28] sm:$0xff] %vm420_vm5, %v6836_v12  ;;  %v6141_v36 = vld [vmem:[%s8093_s3 + $0x1c0] ss:$8 sps:$4 sm:$0xff]   ;;  %vm427_vm6 = vcmask 254976  }
  0x61   : > { %v6146_v44 = vld [vmem:[%s8093_s3 + $0x1d4] ss:$8 sps:$4 sm:$0xff]   ;;  %428 = vst.msk [vmem:[#allocation2 + $0x40] sm:$0x3] %vm427_vm6, %v6836_v12  ;;  %v6149_v54 = vld [vmem:[%s8093_s3 + $0x1e4] ss:$8 sps:$4 sm:$0xff]  }
  0x62   : > { %874 = vmatpush1.bf16.msra.mxu0 %v6096_v48  ;;  %v920_v34 = vrot.slane %v432_v29, %v7194_v27  ;;  %v924_v38 = vrot.slane %v432_v29, %v7202_v30  ;;  %v6144_v48 = vld [vmem:[%s8093_s3 + $0x1d0] ss:$8 sps:$4 sm:$0xff]   ;;  %v6147_v58 = vld [vmem:[%s8093_s3 + $0x1e0] ss:$8 sps:$4 sm:$0xff]   ;;  %vm941_vm7 = vcmask 1040384   ;;  %s6837_s15 = smov 16  }
  0x63   : > { %875 = vmatprep.subr.bf16.mxu0 %v6104_v49  ;;  %632 = vmatpush1.bf16.msra.mxu1 %v6093_v51  ;;  %v6150_v62 = vld [vmem:[%s8093_s3 + $0x1f0] ss:$8 sps:$4 sm:$0xff]   ;;  %v6155_v63 = vld [vmem:[%s8093_s3 + $0x204] ss:$8 sps:$4 sm:$0xff]   ;;  %vm973_vm8 = vcmask 1047681   ;;  %vm978_vm9 = vcmask 1047680  }
  0x64   : > { %633 = vmatprep.subr.bf16.mxu1 %v6101_v52  ;;  %vm960_vm10 = vcmask 130048   ;;  %vm976_vm11 = vcmask 130049   ;;  %vm982_vm12 = vcmask 1040512   ;;  %vm985_vm13 = vcmask 122880   ;;  %s5923_s19 = sshll.u32 %s8112_s18, 5 }
  0x65   : > { %s416_s26 = scalar_lea.vmem %s8101_s11, %s5923_s19 }
  0x66   : > { %876 = vmatpush1.bf16.msra.mxu0 %v6102_v53 }
  0x67   : > { %5331 = vmatprep.subr.msk.bf16.mxu0 %vm521_vm0, %v6107_v55  ;;  %634 = vmatpush1.bf16.msra.mxu1 %v6099_v60  ;;  %v6152_v60 = vld [vmem:[%s8093_s3 + $0x1f4] ss:$8 sps:$4 sm:$0xff]  }
  0x68   : > { %5287 = vmatprep.subr.msk.bf16.mxu1 %vm521_vm0, %v6105_v61 }
  0x6a   : > { %878 = vmatpush1.bf16.msra.mxu0 %v864_v2 }
  0x6b   : > { %636 = vmatpush1.bf16.msra.mxu1 %v622_v3 }
  0x6c   : > { %1296 = vmatprep.subr.bf16.mxu1 %v6113_v6 }
  0x6d   : > { %5332 = vmatmul.mubr.msk.bf16.vlgmr.msra.gmra.mrb[0].mxu0 %vm517_vm1, %v811_v4  ;;  %v6153_v4 = vld [vmem:[%s8093_s3 + $0x200] ss:$8 sps:$4 sm:$0xff]  }
  0x6e   : > { %5288 = vmatmul.mubr.msk.bf16.vlgmr.msra.gmra.mrb[0].mxu1 %vm517_vm1, %v7060_v28  ;;  %v6138_v28 = vld [vmem:[%s8093_s3 + $0x1b0] ss:$8 sps:$4 sm:$0xff]  }
  0x6f   : > { %1297 = vmatpush1.bf16.msra.mxu1 %v6111_v5  ;;  %v6158_v5 = vld [vmem:[%s8093_s3 + $0x214] ss:$8 sps:$4 sm:$0xff]  }
  0x70   : > { %1298 = vmatprep.subr.bf16.mxu1 %v6116_v7  ;;  %v6156_v7 = vld [vmem:[%s8093_s3 + $0x210] ss:$8 sps:$4 sm:$0xff]  }
  0x73   : > { %1299 = vmatpush1.bf16.msra.mxu1 %v6114_v8  ;;  %v6161_v8 = vld [vmem:[%s8093_s3 + $0x224] ss:$8 sps:$4 sm:$0xff]  }
  0x74   : > { %1300 = vmatprep.subr.bf16.mxu1 %v6119_v9 }
  0x77   : > { %1301 = vmatpush1.bf16.msra.mxu1 %v6117_v10 }
  0x78   : > { %1302 = vmatprep.subr.bf16.mxu1 %v6122_v11 }
  0x7b   : > { %1303 = vmatpush1.bf16.msra.mxu1 %v6120_v13 }
  0x7c   : > { %1304 = vmatprep.subr.bf16.mxu1 %v6125_v14 }
  0x7f   : > { %1305 = vmatpush1.bf16.msra.mxu1 %v6123_v15 }
  0x80   : > { %1306 = vmatprep.subr.bf16.mxu1 %v6128_v16 }
  0x83   : > { %1307 = vmatpush1.bf16.msra.mxu1 %v6126_v17 }
  0x84   : > { %1308 = vmatprep.subr.bf16.mxu1 %v6131_v18 }
  0x87   : > { %1309 = vmatpush1.bf16.msra.mxu1 %v6129_v19 }
  0x88   : > { %1310 = vmatprep.subr.bf16.mxu1 %v6134_v20 }
  0x8b   : > { %1311 = vmatpush1.bf16.msra.mxu1 %v6132_v21 }
  0x8c   : > { %1312 = vmatprep.subr.bf16.mxu1 %v6137_v22 }
  0x8f   : > { %1313 = vmatpush1.bf16.msra.mxu1 %v6135_v23 }
  0x90   : > { %1314 = vmatprep.subr.bf16.mxu1 %v6140_v26 }
  0x93   : > { %1315 = vmatpush1.bf16.msra.mxu1 %v6138_v28 }
  0x94   : > { %1316 = vmatprep.subr.bf16.mxu1 %v6143_v33 }
  0x97   : > { %1317 = vmatpush1.bf16.msra.mxu1 %v6141_v36 }
  0x98   : > { %1318 = vmatprep.subr.bf16.mxu1 %v6146_v44 }
  0x9b   : > { %1319 = vmatpush1.bf16.msra.mxu1 %v6144_v48  ;;  %v6159_v48 = vld [vmem:[%s8093_s3 + $0x220] ss:$8 sps:$4 sm:$0xff]  }
  0x9c   : > { %1320 = vmatprep.subr.bf16.mxu1 %v6149_v54 }
  0x9f   : > { %1321 = vmatpush1.bf16.msra.mxu1 %v6147_v58 }
  0xa0   : > { %1322 = vmatprep.subr.bf16.mxu1 %v6152_v60 }
  0xa3   : > { %1323 = vmatpush1.bf16.msra.mxu1 %v6150_v62 }
  0xa4   : > { %1324 = vmatprep.subr.bf16.mxu1 %v6155_v63  ;;  %v6167_v63 = vld [vmem:[%s8093_s3 + $0x4] ss:$8 sps:$4 sm:$0xff]  }
  0xa7   : > { %1325 = vmatpush1.bf16.msra.mxu1 %v6153_v4 }
  0xa8   : > { %1326 = vmatprep.subr.bf16.mxu1 %v6158_v5  ;;  %v6165_v5 = vld [vmem:[%s8093_s3] ss:$8 sps:$4 sm:$0xff]  }
  0xab   : > { %1327 = vmatpush1.bf16.msra.mxu1 %v6156_v7  ;;  %v6170_v7 = vld [vmem:[%s8093_s3 + $0x14] ss:$8 sps:$4 sm:$0xff]  }
  0xac   : > { %1339 = vmatprep.subr.bf16.mxu1 %v6161_v8 }
 0x140   : > { %v903_v31 = vpop.f32.mrb[0].mxu0 }
 0x141   : > { %v905_v32 = vpop.f32.mrb[1].mxu0  ;;  %v661_v37 = vpop.f32.mrb[0].mxu1 }
 0x142   : > { %v907_v35 = vpop.f32.mrb[2].mxu0  ;;  %v5924_v40 = vadd.f32 %v903_v31, %v661_v37  ;;  %v663_v41 = vpop.f32.mrb[1].mxu1 }
 0x143   : > { %v909_v39 = vpop.f32.mrb[3].mxu0  ;;  %v5925_v42 = vadd.f32 %v905_v32, %v663_v41  ;;  %v665_v43 = vpop.f32.mrb[2].mxu1 }
 0x144   : > { %v7219_v45 = vadd.f32 %v5924_v40, %v920_v34  ;;  %v5926_v46 = vadd.f32 %v907_v35, %v665_v43  ;;  %v667_v47 = vpop.f32.mrb[3].mxu1 }
 0x145   : > { %v7224_v49 = vadd.f32 %v5925_v42, %v924_v38  ;;  %v5927_v50 = vadd.f32 %v909_v39, %v667_v47 }
 0x146   : > { %v931_v51 = vmax.f32 %v7219_v45, 0.0  ;;  %v7227_v52 = vadd.f32 %v5926_v46, %v920_v34 }
 0x147   : > { %v7230_v53 = vadd.f32 %v5927_v50, %v924_v38  ;;  %v932_v55 = vmax.f32 %v7224_v49, 0.0 }
 0x148   : > { %v933_v56 = vmax.f32 %v7227_v52, 0.0  ;;  %v942_v57 = vrot.slane %v931_v51, 7 }
 0x149   : > { %v934_v59 = vmax.f32 %v7230_v53, 0.0  ;;  %v943_v3 = vrot.slane %v932_v55, 7 }
 0x14a   : > { %948 = vrot.lane.b32.xlu0 %v942_v57, %s6837_s15  ;;  %v944_v61 = vrot.slane %v933_v56, 7 }
 0x14b   : > { %v946_v1 = vrot.slane %v934_v59, 7 }
 0x14c   : > { %v945_v2 = vsel %vm941_vm7, %v942_v57, %v944_v61  ;;  %v6164_v57 = vld [vmem:[%s8093_s3 + $0x234] ss:$8 sps:$4 sm:$0xff]  }
 0x14d   : > { %952 = vrot.lane.b32.xlu1 %v945_v2, %s6837_s15  ;;  %v947_v6 = vsel %vm941_vm7, %v943_v3, %v946_v1 }
 0x14e   : > { %950 = vrot.lane.b32.xlu0 %v943_v3, %s6837_s15 }
 0x151   : > { %954 = vrot.lane.b32.xlu1 %v947_v6, %s6837_s15 }
 0x152   : > { %956 = vrot.lane.b32.xlu0 %v944_v61, %s6837_s15  ;;  %v6162_v61 = vld [vmem:[%s8093_s3 + $0x230] ss:$8 sps:$4 sm:$0xff]  }
 0x155   : > { %958 = vrot.lane.b32.xlu1 %v946_v1, %s6837_s15 }
 0x1bc   : > { %v949_v9 = vpop.permute.xlu0 %948 }
 0x1bd   : > { %974 = vst.msk [vmem:[#allocation2] sm:$0xfe] %vm973_vm8, %v949_v9 }
 0x1bf   : > { %v953_v10 = vpop.permute.xlu1 %952 }
 0x1c0   : > { %979 = vst.msk [vmem:[#allocation2 + $0x18] sm:$0xff] %vm978_vm9, %v953_v10  ;;  %v951_v11 = vpop.permute.xlu0 %950 }
 0x1c1   : > { %v961_v12 = vsel %vm960_vm10, %v949_v9, %v951_v11  ;;  %977 = vst.msk [vmem:[#allocation2 + $0x10] sm:$0xfe] %vm976_vm11, %v951_v11  ;;  %v6168_v9 = vld [vmem:[%s8093_s3 + $0x10] ss:$8 sps:$4 sm:$0xff]   ;;  %v6171_v11 = vld [vmem:[%s8093_s3 + $0x20] ss:$8 sps:$4 sm:$0xff]  }
 0x1c2   : > { %975 = vst [vmem:[#allocation2 + $0x8] sm:$0xfe] %v961_v12  ;;  %v6176_v12 = vld [vmem:[%s8093_s3 + $0x34] ss:$8 sps:$4 sm:$0xff]  }
 0x1c3   : > { %v955_v13 = vpop.permute.xlu1 %954 }
 0x1c4   : > { %981 = vst.msk [vmem:[#allocation2 + $0x28] sm:$0xff] %vm960_vm10, %v955_v13  ;;  %v957_v14 = vpop.permute.xlu0 %956  ;;  %v962_v18 = vsel %vm960_vm10, %v953_v10, %v955_v13  ;;  %v987_v20 = vld [vmem:[#allocation2] sm:$0xff]  ;;  %v6174_v13 = vld [vmem:[%s8093_s3 + $0x30] ss:$8 sps:$4 sm:$0xff]  }
 0x1c5   : > { %983 = vst.msk [vmem:[#allocation2 + $0x30] sm:$0x1] %vm982_vm12, %v957_v14  ;;  %v6173_v10 = vld [vmem:[%s8093_s3 + $0x24] ss:$8 sps:$4 sm:$0xff]  }
 0x1c7   : > { %v959_v15 = vpop.permute.xlu1 %958  ;;  %v990_v16 = vld [vmem:[#allocation2 + $0x18] sm:$0xff] }
 0x1c8   : > { %v963_v17 = vsel %vm960_vm10, %v957_v14, %v959_v15  ;;  %986 = vst.msk [vmem:[#allocation2 + $0x40] sm:$0x1] %vm985_vm13, %v959_v15  ;;  %v7287_v22 = vpack.c.bf16 %v990_v16, %v987_v20  ;;  %v989_v43 = vld [vmem:[#allocation2 + $0x10] sm:$0xff]  ;;  %v6179_v14 = vld [vmem:[%s8093_s3 + $0x44] ss:$8 sps:$4 sm:$0xff]  }
 0x1c9   : > { %984 = vst [vmem:[#allocation2 + $0x38] sm:$0x1] %v963_v17  ;;  %v988_v19 = vld [vmem:[#allocation2 + $0x8] sm:$0xff]  ;;  %v6182_v16 = vld [vmem:[%s8093_s3 + $0x54] ss:$8 sps:$4 sm:$0xff]  }
 0x1ca   : > { %v997_v21 = vpack.c.bf16 %v962_v18, %v988_v19  ;;  %v1078_v26 = vshll.u32 %v7287_v22, 16  ;;  %v1076_v39 = vshrl.u32 %v7287_v22, 16  ;;  %v6177_v15 = vld [vmem:[%s8093_s3 + $0x40] ss:$8 sps:$4 sm:$0xff]   ;;  %v6180_v17 = vld [vmem:[%s8093_s3 + $0x50] ss:$8 sps:$4 sm:$0xff]  }
 0x1cb   : > { %v992_v36 = vld [vmem:[#allocation2 + $0x28] sm:$0xff]  ;;  %v6188_v20 = vld [vmem:[%s8093_s3 + $0x74] ss:$8 sps:$4 sm:$0xff]  }
 0x1cc   : > { %v993_v23 = vld [vmem:[#allocation2 + $0x30] sm:$0x3]  ;;  %v1090_v24 = vshll.u32 %v997_v21, 16  ;;  %v1080_v33 = vrot.slane %v1078_v26, 1  ;;  %v1088_v34 = vshrl.u32 %v997_v21, 16  ;;  %v1696_v37 = vrot.slane %v997_v21, 1 }
 0x1cd   : > { %v7289_v25 = vpack.c.bf16 %v993_v23, %v993_v23  ;;  %v7300_v50 = vpack.c.bf16 %v992_v36, %v989_v43  ;;  %v6185_v18 = vld [vmem:[%s8093_s3 + $0x64] ss:$8 sps:$4 sm:$0xff]   ;;  %v6183_v19 = vld [vmem:[%s8093_s3 + $0x60] ss:$8 sps:$4 sm:$0xff]   ;;  %v6194_v26 = vld [vmem:[%s8093_s3 + $0x94] ss:$8 sps:$4 sm:$0xff]  }
 0x1ce   : > { %v1092_v32 = vrot.slane %v1090_v24, 1  ;;  %v1081_v47 = vor.u32 %v1080_v33, %v1076_v39  ;;  %v6191_v23 = vld [vmem:[%s8093_s3 + $0x84] ss:$8 sps:$4 sm:$0xff]   ;;  %v6189_v24 = vld [vmem:[%s8093_s3 + $0x80] ss:$8 sps:$4 sm:$0xff]  }
 0x1cf   : > { %v1083_v29 = vshll.u32 %v7289_v25, 16  ;;  %v995_v44 = vld [vmem:[#allocation2 + $0x40] sm:$0x3]  ;;  %v1102_v62 = vshll.u32 %v7300_v50, 16  ;;  %v1100_v3 = vshrl.u32 %v7300_v50, 16 }
 0x1d0   : > { %v994_v28 = vld [vmem:[#allocation2 + $0x38] sm:$0x3]  ;;  %v1093_v41 = vor.u32 %v1092_v32, %v1088_v34  ;;  %v7307_v60 = vpack.c.bf16 %v995_v44, %v995_v44  ;;  %v6200_v32 = vld [vmem:[%s8093_s3 + $0xb4] ss:$8 sps:$4 sm:$0xff]   ;;  %v6203_v34 = vld [vmem:[%s8093_s3 + $0xc4] ss:$8 sps:$4 sm:$0xff]  }
 0x1d1   : > { %v1000_v31 = vpack.c.bf16 %v994_v28, %v994_v28  ;;  %v1085_v40 = vrot.slane %v1083_v29, 1  ;;  %v1104_v2 = vrot.slane %v1102_v62, 1  ;;  %v6192_v28 = vld [vmem:[%s8093_s3 + $0x90] ss:$8 sps:$4 sm:$0xff]   ;;  %v6197_v29 = vld [vmem:[%s8093_s3 + $0xa4] ss:$8 sps:$4 sm:$0xff]  }
 0x1d2   : > { %v1107_v1 = vshll.u32 %v7307_v60, 16  ;;  %v6198_v33 = vld [vmem:[%s8093_s3 + $0xb0] ss:$8 sps:$4 sm:$0xff]   ;;  %v6206_v36 = vld [vmem:[%s8093_s3 + $0xd4] ss:$8 sps:$4 sm:$0xff]  }
 0x1d3   : > { %v1095_v35 = vshll.u32 %v1000_v31, 16  ;;  %v1697_v38 = vrot.slane %v1000_v31, 1  ;;  %v1086_v58 = vsel %vm456_vm3, %v1081_v47, %v1085_v40  ;;  %v1105_v6 = vor.u32 %v1104_v2, %v1100_v3  ;;  %v6195_v31 = vld [vmem:[%s8093_s3 + $0xa0] ss:$8 sps:$4 sm:$0xff]   ;;  %v6212_v40 = vld [vmem:[%s8093_s3 + $0xf4] ss:$8 sps:$4 sm:$0xff]  }
 0x1d4   : > { %v1109_v4 = vrot.slane %v1107_v1, 1  ;;  %v6207_v39 = vld [vmem:[%s8093_s3 + $0xe0] ss:$8 sps:$4 sm:$0xff]   ;;  %v6218_v44 = vld [vmem:[%s8093_s3 + $0x114] ss:$8 sps:$4 sm:$0xff]  }
 0x1d5   : > { %v1097_v42 = vrot.slane %v1095_v35, 1  ;;  %v7295_v46 = vsel %vm683_vm2, %v1696_v37, %v1697_v38  ;;  %v6201_v35 = vld [vmem:[%s8093_s3 + $0xc0] ss:$8 sps:$4 sm:$0xff]   ;;  %v6204_v37 = vld [vmem:[%s8093_s3 + $0xd0] ss:$8 sps:$4 sm:$0xff]  }
 0x1d6   : > { %v1110_v8 = vsel %vm456_vm3, %v1105_v6, %v1109_v4  ;;  %v6209_v38 = vld [vmem:[%s8093_s3 + $0xe4] ss:$8 sps:$4 sm:$0xff]   ;;  %v6213_v43 = vld [vmem:[%s8093_s3 + $0x100] ss:$8 sps:$4 sm:$0xff]   ;;  %v6216_v47 = vld [vmem:[%s8093_s3 + $0x110] ss:$8 sps:$4 sm:$0xff]  }
 0x1d7   : > { %v1098_v54 = vsel %vm456_vm3, %v1093_v41, %v1097_v42  ;;  %v6210_v41 = vld [vmem:[%s8093_s3 + $0xf0] ss:$8 sps:$4 sm:$0xff]   ;;  %v6215_v42 = vld [vmem:[%s8093_s3 + $0x104] ss:$8 sps:$4 sm:$0xff]   ;;  %v6225_v62 = vld [vmem:[%s8093_s3 + $0x260] ss:$8 sps:$4 sm:$0xff]  }
 0x1d8   : > { %1328 = vmatprep.mubr.bf16.mxu1 %v1098_v54  ;;  %v6219_v54 = vld [vmem:[%s8093_s3 + $0x240] ss:$8 sps:$4 sm:$0xff]   ;;  %v6233_v1 = vld [vmem:[%s8093_s3 + $0x284] ss:$8 sps:$4 sm:$0xff]   ;;  %v6236_v3 = vld [vmem:[%s8093_s3 + $0x294] ss:$8 sps:$4 sm:$0xff]  }
 0x1d9   : > { %1329 = vmatmul.mubr.bf16.vlgmr.msra.gmra.mrb[4].mxu1 %v1086_v58  ;;  %v6222_v58 = vld [vmem:[%s8093_s3 + $0x250] ss:$8 sps:$4 sm:$0xff]   ;;  %v6231_v2 = vld [vmem:[%s8093_s3 + $0x280] ss:$8 sps:$4 sm:$0xff]  }
 0x1da   : > { %1340 = vmatpush1.bf16.msra.mxu1 %v6159_v48  ;;  %1371 = vmatprep.mubr.bf16.mxu1 %v6835_v0  ;;  %v6221_v48 = vld [vmem:[%s8093_s3 + $0x244] ss:$8 sps:$4 sm:$0xff]   ;;  %v6234_v4 = vld [vmem:[%s8093_s3 + $0x290] ss:$8 sps:$4 sm:$0xff]   ;;  %v6237_v6 = vld [vmem:[%s8093_s3 + $0x2a0] ss:$8 sps:$4 sm:$0xff]  }
 0x1db   : > { %1341 = vmatprep.subr.bf16.mxu1 %v6164_v57  ;;  %v6224_v57 = vld [vmem:[%s8093_s3 + $0x254] ss:$8 sps:$4 sm:$0xff]  }
 0x1de   : > { %1342 = vmatpush1.bf16.msra.mxu1 %v6162_v61  ;;  %v6227_v61 = vld [vmem:[%s8093_s3 + $0x264] ss:$8 sps:$4 sm:$0xff]  }
 0x1df   : > { %1564 = vmatprep.subr.bf16.mxu1 %v6167_v63  ;;  %v6230_v63 = vld [vmem:[%s8093_s3 + $0x274] ss:$8 sps:$4 sm:$0xff]  }
 0x1e5   : > { %5405 = vmatmul.mubr.msk.bf16.vlgmr.msra.gmra.mrb[4].mxu1 %vm420_vm5, %v1110_v8  ;;  %v6240_v8 = vld [vmem:[%s8093_s3 + $0x2b0] ss:$8 sps:$4 sm:$0xff]  }
 0x1e6   : > { %1565 = vmatpush1.bf16.msra.mxu1 %v6165_v5  ;;  %1596 = vmatprep.mubr.bf16.mxu1 %v997_v21  ;;  %v6186_v21 = vld [vmem:[%s8093_s3 + $0x70] ss:$8 sps:$4 sm:$0xff]   ;;  %v6239_v5 = vld [vmem:[%s8093_s3 + $0x2a4] ss:$8 sps:$4 sm:$0xff]  }
 0x1e7   : > { %1566 = vmatprep.subr.bf16.mxu1 %v6170_v7  ;;  %v6242_v7 = vld [vmem:[%s8093_s3 + $0x2b4] ss:$8 sps:$4 sm:$0xff]  }
 0x1ea   : > { %1567 = vmatpush1.bf16.msra.mxu1 %v6168_v9  ;;  %v6245_v9 = vld [vmem:[%s8093_s3 + $0x2c4] ss:$8 sps:$4 sm:$0xff]  }
 0x1eb   : > { %1568 = vmatprep.subr.bf16.mxu1 %v6173_v10  ;;  %v6243_v10 = vld [vmem:[%s8093_s3 + $0x2c0] ss:$8 sps:$4 sm:$0xff]  }
 0x1ee   : > { %1569 = vmatpush1.bf16.msra.mxu1 %v6171_v11  ;;  %v6248_v11 = vld [vmem:[%s8093_s3 + $0x2d4] ss:$8 sps:$4 sm:$0xff]  }
 0x1ef   : > { %1570 = vmatprep.subr.bf16.mxu1 %v6176_v12  ;;  %v6246_v12 = vld [vmem:[%s8093_s3 + $0x2d0] ss:$8 sps:$4 sm:$0xff]  }
 0x1f2   : > { %1571 = vmatpush1.bf16.msra.mxu1 %v6174_v13  ;;  %v6251_v13 = vld [vmem:[%s8093_s3 + $0x2e4] ss:$8 sps:$4 sm:$0xff]  }
 0x1f3   : > { %1572 = vmatprep.subr.bf16.mxu1 %v6179_v14  ;;  %v6249_v14 = vld [vmem:[%s8093_s3 + $0x2e0] ss:$8 sps:$4 sm:$0xff]  }
 0x1f6   : > { %1573 = vmatpush1.bf16.msra.mxu1 %v6177_v15  ;;  %v6254_v15 = vld [vmem:[%s8093_s3 + $0x2f4] ss:$8 sps:$4 sm:$0xff]  }
 0x1f7   : > { %1574 = vmatprep.subr.bf16.mxu1 %v6182_v16  ;;  %v6252_v16 = vld [vmem:[%s8093_s3 + $0x2f0] ss:$8 sps:$4 sm:$0xff]  }
 0x1fa   : > { %1575 = vmatpush1.bf16.msra.mxu1 %v6180_v17  ;;  %v6257_v17 = vld [vmem:[%s8093_s3 + $0x304] ss:$8 sps:$4 sm:$0xff]  }
 0x1fb   : > { %1576 = vmatprep.subr.bf16.mxu1 %v6185_v18  ;;  %v6255_v18 = vld [vmem:[%s8093_s3 + $0x300] ss:$8 sps:$4 sm:$0xff]  }
 0x1fe   : > { %1577 = vmatpush1.bf16.msra.mxu1 %v6183_v19  ;;  %v6260_v19 = vld [vmem:[%s8093_s3 + $0x314] ss:$8 sps:$4 sm:$0xff]  }
 0x1ff   : > { %1578 = vmatprep.subr.bf16.mxu1 %v6188_v20  ;;  %v6258_v20 = vld [vmem:[%s8093_s3 + $0x310] ss:$8 sps:$4 sm:$0xff]  }
 0x202   : > { %1579 = vmatpush1.bf16.msra.mxu1 %v6186_v21  ;;  %v6263_v21 = vld [vmem:[%s8093_s3 + $0x324] ss:$8 sps:$4 sm:$0xff]  }
 0x203   : > { %1580 = vmatprep.subr.bf16.mxu1 %v6191_v23  ;;  %v6261_v23 = vld [vmem:[%s8093_s3 + $0x320] ss:$8 sps:$4 sm:$0xff]  }
 0x206   : > { %1581 = vmatpush1.bf16.msra.mxu1 %v6189_v24  ;;  %v6266_v24 = vld [vmem:[%s8093_s3 + $0x334] ss:$8 sps:$4 sm:$0xff]  }
 0x207   : > { %1582 = vmatprep.subr.bf16.mxu1 %v6194_v26  ;;  %v6264_v26 = vld [vmem:[%s8093_s3 + $0x330] ss:$8 sps:$4 sm:$0xff]  }
 0x20a   : > { %1583 = vmatpush1.bf16.msra.mxu1 %v6192_v28  ;;  %v6269_v28 = vld [vmem:[%s8093_s3 + $0x344] ss:$8 sps:$4 sm:$0xff]  }
 0x20b   : > { %1584 = vmatprep.subr.bf16.mxu1 %v6197_v29  ;;  %v1694_v29 = vrot.slane %v7289_v25, 1  ;;  %v6270_v25 = vld [vmem:[%s8093_s3 + $0x350] ss:$8 sps:$4 sm:$0xff]  }
 0x20e   : > { %1585 = vmatpush1.bf16.msra.mxu1 %v6195_v31  ;;  %v1693_v31 = vrot.slane %v7287_v22, 1 }
 0x20f   : > { %1586 = vmatprep.subr.bf16.mxu1 %v6200_v32  ;;  %v6267_v32 = vld [vmem:[%s8093_s3 + $0x340] ss:$8 sps:$4 sm:$0xff]  }
 0x212   : > { %1587 = vmatpush1.bf16.msra.mxu1 %v6198_v33  ;;  %v6272_v33 = vld [vmem:[%s8093_s3 + $0x354] ss:$8 sps:$4 sm:$0xff]  }
 0x213   : > { %1588 = vmatprep.subr.bf16.mxu1 %v6203_v34  ;;  %v1695_v34 = vsel %vm683_vm2, %v1693_v31, %v1694_v29  ;;  %v6317_v31 = vld [vmem:[%s8095_s5 + $0x204] ss:$8 sps:$4 sm:$0xff]  }
 0x216   : > { %1589 = vmatpush1.bf16.msra.mxu1 %v6201_v35  ;;  %v1699_v35 = vrot.slane %v7300_v50, 1 }
 0x217   : > { %1590 = vmatprep.subr.bf16.mxu1 %v6206_v36 }
 0x21a   : > { %1591 = vmatpush1.bf16.msra.mxu1 %v6204_v37  ;;  %v6273_v37 = vld [vmem:[%s8095_s5 + $0x120] ss:$8 sps:$4 sm:$0xff]  }
 0x21b   : > { %1592 = vmatprep.subr.bf16.mxu1 %v6209_v38  ;;  %v6275_v38 = vld [vmem:[%s8095_s5 + $0x124] ss:$8 sps:$4 sm:$0xff]  }
 0x21c   : > { %2348 = vmatprep.subr.bf16.mxu0 %v6275_v38 }
 0x21d   : > { %2349 = vmatpush1.bf16.msra.mxu0 %v6273_v37  ;;  %v6323_v37 = vld [vmem:[%s8095_s5 + $0x224] ss:$8 sps:$4 sm:$0xff]  }
 0x21e   : > { %1593 = vmatpush1.bf16.msra.mxu1 %v6207_v39  ;;  %v6278_v39 = vld [vmem:[%s8095_s5 + $0x134] ss:$8 sps:$4 sm:$0xff]  }
 0x21f   : > { %1594 = vmatprep.subr.bf16.mxu1 %v6212_v40  ;;  %2350 = vmatprep.subr.bf16.mxu0 %v6278_v39  ;;  %v6279_v40 = vld [vmem:[%s8095_s5 + $0x140] ss:$8 sps:$4 sm:$0xff]  }
 0x222   : > { %1595 = vmatpush1.bf16.msra.mxu1 %v6210_v41  ;;  %v6284_v41 = vld [vmem:[%s8095_s5 + $0x154] ss:$8 sps:$4 sm:$0xff]  }
 0x223   : > { %1607 = vmatprep.subr.bf16.mxu1 %v6215_v42  ;;  %v6282_v42 = vld [vmem:[%s8095_s5 + $0x150] ss:$8 sps:$4 sm:$0xff]  }
 0x225   : > { %1597 = vmatmul.mubr.bf16.vlgmr.msra.gmra.mrb[4].mxu1 %v7287_v22  ;;  %v1700_v22 = vrot.slane %v7307_v60, 1  ;;  %v6281_v60 = vld [vmem:[%s8095_s5 + $0x144] ss:$8 sps:$4 sm:$0xff]  }
 0x226   : > { %1608 = vmatpush1.bf16.msra.mxu1 %v6213_v43  ;;  %1639 = vmatprep.mubr.bf16.mxu1 %v6835_v0  ;;  %v6287_v43 = vld [vmem:[%s8095_s5 + $0x164] ss:$8 sps:$4 sm:$0xff]  }
 0x227   : > { %1609 = vmatprep.subr.bf16.mxu1 %v6218_v44  ;;  %v1701_v36 = vsel %vm683_vm2, %v1699_v35, %v1700_v22  ;;  %v6285_v44 = vld [vmem:[%s8095_s5 + $0x160] ss:$8 sps:$4 sm:$0xff]   ;;  %v6320_v35 = vld [vmem:[%s8095_s5 + $0x214] ss:$8 sps:$4 sm:$0xff]  }
 0x22a   : > { %1610 = vmatpush1.bf16.msra.mxu1 %v6216_v47  ;;  %v6290_v47 = vld [vmem:[%s8095_s5 + $0x174] ss:$8 sps:$4 sm:$0xff]  }
 0x22b   : > { %1887 = vmatprep.subr.bf16.mxu1 %v6221_v48  ;;  %v6288_v48 = vld [vmem:[%s8095_s5 + $0x170] ss:$8 sps:$4 sm:$0xff]  }
 0x231   : > { %5442 = vmatmul.mubr.msk.bf16.vlgmr.msra.gmra.mrb[4].mxu1 %vm420_vm5, %v7300_v50  ;;  %v6276_v50 = vld [vmem:[%s8095_s5 + $0x130] ss:$8 sps:$4 sm:$0xff]  }
 0x232   : > { %1888 = vmatpush1.bf16.msra.mxu1 %v6219_v54  ;;  %1919 = vmatprep.mubr.bf16.mxu1 %v7295_v46  ;;  %v6228_v46 = vld [vmem:[%s8093_s3 + $0x270] ss:$8 sps:$4 sm:$0xff]   ;;  %v6293_v54 = vld [vmem:[%s8095_s5 + $0x184] ss:$8 sps:$4 sm:$0xff]  }
 0x233   : > { %1889 = vmatprep.subr.bf16.mxu1 %v6224_v57  ;;  %2351 = vmatpush1.bf16.msra.mxu0 %v6276_v50  ;;  %v6291_v57 = vld [vmem:[%s8095_s5 + $0x180] ss:$8 sps:$4 sm:$0xff]  }
 0x234   : > { %2352 = vmatprep.subr.bf16.mxu0 %v6281_v60 }
 0x236   : > { %1890 = vmatpush1.bf16.msra.mxu1 %v6222_v58  ;;  %v6296_v58 = vld [vmem:[%s8095_s5 + $0x194] ss:$8 sps:$4 sm:$0xff]  }
 0x237   : > { %1891 = vmatprep.subr.bf16.mxu1 %v6227_v61  ;;  %2353 = vmatpush1.bf16.msra.mxu0 %v6279_v40  ;;  %v6294_v61 = vld [vmem:[%s8095_s5 + $0x190] ss:$8 sps:$4 sm:$0xff]  }
 0x238   : > { %2354 = vmatprep.subr.bf16.mxu0 %v6284_v41 }
 0x23a   : > { %1892 = vmatpush1.bf16.msra.mxu1 %v6225_v62  ;;  %v6299_v62 = vld [vmem:[%s8095_s5 + $0x1a4] ss:$8 sps:$4 sm:$0xff]  }
 0x23b   : > { %1893 = vmatprep.subr.bf16.mxu1 %v6230_v63  ;;  %2355 = vmatpush1.bf16.msra.mxu0 %v6282_v42  ;;  %v6297_v63 = vld [vmem:[%s8095_s5 + $0x1a0] ss:$8 sps:$4 sm:$0xff]  }
 0x23c   : > { %2356 = vmatprep.subr.bf16.mxu0 %v6287_v43 }
 0x23e   : > { %1894 = vmatpush1.bf16.msra.mxu1 %v6228_v46  ;;  %v6302_v46 = vld [vmem:[%s8095_s5 + $0x1b4] ss:$8 sps:$4 sm:$0xff]  }
 0x23f   : > { %1895 = vmatprep.subr.bf16.mxu1 %v6233_v1  ;;  %2357 = vmatpush1.bf16.msra.mxu0 %v6285_v44  ;;  %v6300_v1 = vld [vmem:[%s8095_s5 + $0x1b0] ss:$8 sps:$4 sm:$0xff]  }
 0x240   : > { %2358 = vmatprep.subr.bf16.mxu0 %v6290_v47 }
 0x242   : > { %1896 = vmatpush1.bf16.msra.mxu1 %v6231_v2  ;;  %v935_v2 = vld [vmem:[%s8094_s4] sm:$0x3] }
 0x243   : > { %1897 = vmatprep.subr.bf16.mxu1 %v6236_v3  ;;  %2359 = vmatpush1.bf16.msra.mxu0 %v6288_v48  ;;  %v6305_v3 = vld [vmem:[%s8095_s5 + $0x1c4] ss:$8 sps:$4 sm:$0xff]  }
 0x244   : > { %2360 = vmatprep.subr.bf16.mxu0 %v6293_v54 }
 0x246   : > { %1898 = vmatpush1.bf16.msra.mxu1 %v6234_v4  ;;  %v6303_v4 = vld [vmem:[%s8095_s5 + $0x1c0] ss:$8 sps:$4 sm:$0xff]  }
 0x247   : > { %1899 = vmatprep.subr.bf16.mxu1 %v6239_v5  ;;  %2361 = vmatpush1.bf16.msra.mxu0 %v6291_v57  ;;  %v1981_v5 = vrot.slane %v935_v2, %v7194_v27 }
 0x248   : > { %2362 = vmatprep.subr.bf16.mxu0 %v6296_v58 }
 0x24a   : > { %1900 = vmatpush1.bf16.msra.mxu1 %v6237_v6  ;;  %v1985_v6 = vrot.slane %v935_v2, %v7202_v30 }
 0x24b   : > { %1901 = vmatprep.subr.bf16.mxu1 %v6242_v7  ;;  %2363 = vmatpush1.bf16.msra.mxu0 %v6294_v61  ;;  %v6308_v7 = vld [vmem:[%s8095_s5 + $0x1d4] ss:$8 sps:$4 sm:$0xff]  }
 0x24c   : > { %2364 = vmatprep.subr.bf16.mxu0 %v6299_v62 }
 0x24e   : > { %1902 = vmatpush1.bf16.msra.mxu1 %v6240_v8  ;;  %v6306_v8 = vld [vmem:[%s8095_s5 + $0x1d0] ss:$8 sps:$4 sm:$0xff]  }
 0x24f   : > { %1903 = vmatprep.subr.bf16.mxu1 %v6245_v9  ;;  %2365 = vmatpush1.bf16.msra.mxu0 %v6297_v63 }
 0x250   : > { %2366 = vmatprep.subr.bf16.mxu0 %v6302_v46 }
 0x252   : > { %1904 = vmatpush1.bf16.msra.mxu1 %v6243_v10 }
 0x253   : > { %1905 = vmatprep.subr.bf16.mxu1 %v6248_v11  ;;  %2367 = vmatpush1.bf16.msra.mxu0 %v6300_v1 }
 0x254   : > { %2368 = vmatprep.subr.bf16.mxu0 %v6305_v3 }
 0x256   : > { %1906 = vmatpush1.bf16.msra.mxu1 %v6246_v12 }
 0x257   : > { %1907 = vmatprep.subr.bf16.mxu1 %v6251_v13  ;;  %2369 = vmatpush1.bf16.msra.mxu0 %v6303_v4 }
 0x258   : > { %2370 = vmatprep.subr.bf16.mxu0 %v6308_v7 }
 0x25a   : > { %1908 = vmatpush1.bf16.msra.mxu1 %v6249_v14  ;;  %v6311_v14 = vld [vmem:[%s8095_s5 + $0x1e4] ss:$8 sps:$4 sm:$0xff]  }
 0x25b   : > { %1909 = vmatprep.subr.bf16.mxu1 %v6254_v15  ;;  %2371 = vmatpush1.bf16.msra.mxu0 %v6306_v8 }
 0x25c   : > { %2372 = vmatprep.subr.bf16.mxu0 %v6311_v14 }
 0x25e   : > { %1910 = vmatpush1.bf16.msra.mxu1 %v6252_v16 }
 0x25f   : > { %1911 = vmatprep.subr.bf16.mxu1 %v6257_v17 }
 0x262   : > { %1912 = vmatpush1.bf16.msra.mxu1 %v6255_v18  ;;  %v6309_v18 = vld [vmem:[%s8095_s5 + $0x1e0] ss:$8 sps:$4 sm:$0xff]  }
 0x263   : > { %1913 = vmatprep.subr.bf16.mxu1 %v6260_v19  ;;  %2373 = vmatpush1.bf16.msra.mxu0 %v6309_v18 }
 0x266   : > { %1914 = vmatpush1.bf16.msra.mxu1 %v6258_v20 }
 0x267   : > { %1915 = vmatprep.subr.bf16.mxu1 %v6263_v21  ;;  %v6314_v21 = vld [vmem:[%s8095_s5 + $0x1f4] ss:$8 sps:$4 sm:$0xff]  }
 0x268   : > { %2374 = vmatprep.subr.bf16.mxu0 %v6314_v21 }
 0x26a   : > { %1916 = vmatpush1.bf16.msra.mxu1 %v6261_v23 }
 0x26b   : > { %1917 = vmatprep.subr.bf16.mxu1 %v6266_v24 }
 0x26e   : > { %1918 = vmatpush1.bf16.msra.mxu1 %v6264_v26  ;;  %v6312_v26 = vld [vmem:[%s8095_s5 + $0x1f0] ss:$8 sps:$4 sm:$0xff]  }
 0x26f   : > { %1930 = vmatprep.subr.bf16.mxu1 %v6269_v28  ;;  %2375 = vmatpush1.bf16.msra.mxu0 %v6312_v26 }
 0x270   : > { %2376 = vmatprep.subr.bf16.mxu0 %v6317_v31  ;;  %v6329_v31 = vld [vmem:[%s8095_s5 + $0x4] ss:$8 sps:$4 sm:$0xff]  }
 0x271   : > { %1920 = vmatmul.mubr.bf16.vlgmr.msra.gmra.mrb[4].mxu1 %v1695_v34 }
 0x272   : > { %1931 = vmatpush1.bf16.msra.mxu1 %v6267_v32  ;;  %1962 = vmatprep.mubr.bf16.mxu1 %v6835_v0 }
 0x273   : > { %1932 = vmatprep.subr.bf16.mxu1 %v6272_v33 }
 0x276   : > { %1933 = vmatpush1.bf16.msra.mxu1 %v6270_v25  ;;  %v6315_v25 = vld [vmem:[%s8095_s5 + $0x200] ss:$8 sps:$4 sm:$0xff]  }
 0x277   : > { %2377 = vmatpush1.bf16.msra.mxu0 %v6315_v25 }
 0x278   : > { %2378 = vmatprep.subr.bf16.mxu0 %v6320_v35 }
 0x27d   : > { %5515 = vmatmul.mubr.msk.bf16.vlgmr.msra.gmra.mrb[4].mxu1 %vm420_vm5, %v1701_v36  ;;  %v6318_v36 = vld [vmem:[%s8095_s5 + $0x210] ss:$8 sps:$4 sm:$0xff]  }
 0x27e   : > { %2379 = vmatpush1.bf16.msra.mxu0 %v6318_v36  ;;  %v6332_v36 = vld [vmem:[%s8095_s5 + $0x14] ss:$8 sps:$4 sm:$0xff]  }
 0x27f   : > { %2391 = vmatprep.subr.bf16.mxu0 %v6323_v37 }
 0x350   : > { %v1964_v9 = vpop.f32.mrb[4].mxu1 }
 0x351   : > { %v1988_v10 = vadd.f32 %v1981_v5, %v1964_v9  ;;  %v1966_v11 = vpop.f32.mrb[5].mxu1 }
 0x352   : > { %v1989_v12 = vadd.f32 %v1985_v6, %v1966_v11  ;;  %v1968_v13 = vpop.f32.mrb[6].mxu1 }
 0x353   : > { %v1992_v15 = vmax.f32 %v1988_v10, 0.0  ;;  %v1990_v16 = vadd.f32 %v1981_v5, %v1968_v13  ;;  %v1970_v17 = vpop.f32.mrb[7].mxu1 }
 0x354   : > { %v1993_v19 = vmax.f32 %v1989_v12, 0.0  ;;  %v1991_v20 = vadd.f32 %v1985_v6, %v1970_v17 }
 0x355   : > { %v2000_v23 = vrot.slane %v1992_v15, 7  ;;  %v1994_v24 = vmax.f32 %v1990_v16, 0.0 }
 0x356   : > { %v2001_v28 = vrot.slane %v1993_v19, 7  ;;  %v1995_v29 = vmax.f32 %v1991_v20, 0.0  ;;  %v6321_v19 = vld [vmem:[%s8095_s5 + $0x220] ss:$8 sps:$4 sm:$0xff]  }
 0x357   : > { %v2002_v32 = vrot.slane %v1994_v24, 7  ;;  %2006 = vrot.lane.b32.xlu0 %v2000_v23, %s6837_s15 }
 0x358   : > { %v2004_v33 = vrot.slane %v1995_v29, 7  ;;  %2008 = vrot.lane.b32.xlu1 %v2001_v28, %s6837_s15 }
 0x359   : > { %v2003_v34 = vsel %vm941_vm7, %v2000_v23, %v2002_v32  ;;  %v6326_v23 = vld [vmem:[%s8095_s5 + $0x234] ss:$8 sps:$4 sm:$0xff]  }
 0x35a   : > { %v2005_v22 = vsel %vm941_vm7, %v2001_v28, %v2004_v33  ;;  %v6324_v28 = vld [vmem:[%s8095_s5 + $0x230] ss:$8 sps:$4 sm:$0xff]  }
 0x35b   : > { %2010 = vrot.lane.b32.xlu0 %v2003_v34, %s6837_s15 }
 0x35c   : > { %2012 = vrot.lane.b32.xlu1 %v2005_v22, %s6837_s15  ;;  %v6327_v22 = vld [vmem:[%s8095_s5] ss:$8 sps:$4 sm:$0xff]  }
 0x35f   : > { %2014 = vrot.lane.b32.xlu0 %v2002_v32, %s6837_s15 }
 0x360   : > { %2016 = vrot.lane.b32.xlu1 %v2004_v33, %s6837_s15 }
 0x3c9   : > { %v2007_v38 = vpop.permute.xlu0 %2006 }
 0x3ca   : > { %2030 = vst.msk [vmem:[#allocation2] sm:$0xfe] %vm973_vm8, %v2007_v38  ;;  %v2009_v39 = vpop.permute.xlu1 %2008 }
 0x3cb   : > { %v2018_v50 = vsel %vm960_vm10, %v2007_v38, %v2009_v39  ;;  %2032 = vst.msk [vmem:[#allocation2 + $0x10] sm:$0xfe] %vm976_vm11, %v2009_v39  ;;  %v6330_v38 = vld [vmem:[%s8095_s5 + $0x10] ss:$8 sps:$4 sm:$0xff]   ;;  %v6335_v39 = vld [vmem:[%s8095_s5 + $0x24] ss:$8 sps:$4 sm:$0xff]  }
 0x3cc   : > { %2031 = vst [vmem:[#allocation2 + $0x8] sm:$0xfe] %v2018_v50  ;;  %v6333_v50 = vld [vmem:[%s8095_s5 + $0x20] ss:$8 sps:$4 sm:$0xff]  }
 0x3cd   : > { %v2011_v60 = vpop.permute.xlu0 %2010 }
 0x3ce   : > { %2033 = vst.msk [vmem:[#allocation2 + $0x18] sm:$0xff] %vm978_vm9, %v2011_v60  ;;  %v2013_v40 = vpop.permute.xlu1 %2012 }
 0x3cf   : > { %2035 = vst.msk [vmem:[#allocation2 + $0x28] sm:$0xff] %vm960_vm10, %v2013_v40  ;;  %v2019_v43 = vsel %vm960_vm10, %v2011_v60, %v2013_v40  ;;  %v6338_v60 = vld [vmem:[%s8095_s5 + $0x34] ss:$8 sps:$4 sm:$0xff]   ;;  %v6336_v40 = vld [vmem:[%s8095_s5 + $0x30] ss:$8 sps:$4 sm:$0xff]  }
 0x3d1   : > { %v2015_v41 = vpop.permute.xlu0 %2014  ;;  %v2039_v54 = vld [vmem:[#allocation2] sm:$0xff] }
 0x3d2   : > { %2036 = vst.msk [vmem:[#allocation2 + $0x30] sm:$0x1] %vm982_vm12, %v2015_v41  ;;  %v2017_v42 = vpop.permute.xlu1 %2016  ;;  %v2041_v15 = vld [vmem:[#allocation2 + $0x10] sm:$0xff] }
 0x3d3   : > { %v2020_v44 = vsel %vm960_vm10, %v2015_v41, %v2017_v42  ;;  %2038 = vst.msk [vmem:[#allocation2 + $0x40] sm:$0x1] %vm985_vm13, %v2017_v42  ;;  %v2040_v47 = vld [vmem:[#allocation2 + $0x8] sm:$0xff] }
 0x3d4   : > { %2037 = vst [vmem:[#allocation2 + $0x38] sm:$0x1] %v2020_v44  ;;  %v2049_v48 = vpack.c.bf16 %v2019_v43, %v2040_v47  ;;  %v6341_v41 = vld [vmem:[%s8095_s5 + $0x44] ss:$8 sps:$4 sm:$0xff]   ;;  %v6339_v42 = vld [vmem:[%s8095_s5 + $0x40] ss:$8 sps:$4 sm:$0xff]  }
 0x3d5   : > { %v2042_v57 = vld [vmem:[#allocation2 + $0x18] sm:$0xff]  ;;  %v6347_v47 = vld [vmem:[%s8095_s5 + $0x64] ss:$8 sps:$4 sm:$0xff]  }
 0x3d6   : > { %v7668_v58 = vpack.c.bf16 %v2042_v57, %v2039_v54  ;;  %v2142_v61 = vshll.u32 %v2049_v48, 16  ;;  %v2140_v6 = vshrl.u32 %v2049_v48, 16  ;;  %v2044_v8 = vld [vmem:[#allocation2 + $0x28] sm:$0xff]  ;;  %v2748_v9 = vrot.slane %v2049_v48, 1  ;;  %v6344_v43 = vld [vmem:[%s8095_s5 + $0x54] ss:$8 sps:$4 sm:$0xff]  }
 0x3d7   : > { %v7681_v20 = vpack.c.bf16 %v2044_v8, %v2041_v15  ;;  %v6342_v44 = vld [vmem:[%s8095_s5 + $0x50] ss:$8 sps:$4 sm:$0xff]   ;;  %v6350_v54 = vld [vmem:[%s8095_s5 + $0x74] ss:$8 sps:$4 sm:$0xff]   ;;  %v6375_v15 = vld [vmem:[%s8095_s5 + $0x100] ss:$8 sps:$4 sm:$0xff]  }
 0x3d8   : > { %v2130_v63 = vshll.u32 %v7668_v58, 16  ;;  %v2144_v3 = vrot.slane %v2142_v61, 1  ;;  %v2128_v11 = vshrl.u32 %v7668_v58, 16  ;;  %v6348_v57 = vld [vmem:[%s8095_s5 + $0x70] ss:$8 sps:$4 sm:$0xff]  }
 0x3d9   : > { %v2045_v62 = vld [vmem:[#allocation2 + $0x30] sm:$0x3]  ;;  %v2154_v29 = vshll.u32 %v7681_v20, 16  ;;  %v2152_v34 = vshrl.u32 %v7681_v20, 16  ;;  %v6353_v61 = vld [vmem:[%s8095_s5 + $0x84] ss:$8 sps:$4 sm:$0xff]  }
 0x3da   : > { %v7671_v46 = vpack.c.bf16 %v2045_v62, %v2045_v62  ;;  %v2132_v5 = vrot.slane %v2130_v63, 1  ;;  %v2145_v13 = vor.u32 %v2144_v3, %v2140_v6  ;;  %v2047_v16 = vld [vmem:[#allocation2 + $0x40] sm:$0x3]  ;;  %v6356_v63 = vld [vmem:[%s8095_s5 + $0x94] ss:$8 sps:$4 sm:$0xff]  }
 0x3db   : > { %v2046_v1 = vld [vmem:[#allocation2 + $0x38] sm:$0x3]  ;;  %v7688_v26 = vpack.c.bf16 %v2047_v16, %v2047_v16  ;;  %v2156_v33 = vrot.slane %v2154_v29, 1  ;;  %v6351_v62 = vld [vmem:[%s8095_s5 + $0x80] ss:$8 sps:$4 sm:$0xff]  }
 0x3dc   : > { %v2052_v2 = vpack.c.bf16 %v2046_v1, %v2046_v1  ;;  %v2135_v4 = vshll.u32 %v7671_v46, 16  ;;  %v2133_v18 = vor.u32 %v2132_v5, %v2128_v11  ;;  %v6354_v1 = vld [vmem:[%s8095_s5 + $0x90] ss:$8 sps:$4 sm:$0xff]   ;;  %v6357_v3 = vld [vmem:[%s8095_s5 + $0xa0] ss:$8 sps:$4 sm:$0xff]  }
 0x3dd   : > { %v2159_v32 = vshll.u32 %v7688_v26, 16  ;;  %v2157_v35 = vor.u32 %v2156_v33, %v2152_v34  ;;  %v6360_v5 = vld [vmem:[%s8095_s5 + $0xb0] ss:$8 sps:$4 sm:$0xff]   ;;  %v6365_v6 = vld [vmem:[%s8095_s5 + $0xc4] ss:$8 sps:$4 sm:$0xff]  }
 0x3de   : > { %v2147_v7 = vshll.u32 %v2052_v2, 16  ;;  %v2749_v10 = vrot.slane %v2052_v2, 1  ;;  %v2137_v12 = vrot.slane %v2135_v4, 1  ;;  %v6359_v2 = vld [vmem:[%s8095_s5 + $0xa4] ss:$8 sps:$4 sm:$0xff]  }
 0x3df   : > { %v2161_v25 = vrot.slane %v2159_v32, 1  ;;  %v6362_v4 = vld [vmem:[%s8095_s5 + $0xb4] ss:$8 sps:$4 sm:$0xff]   ;;  %v6369_v11 = vld [vmem:[%s8095_s5 + $0xe0] ss:$8 sps:$4 sm:$0xff]  }
 0x3e0   : > { %v2149_v14 = vrot.slane %v2147_v7, 1  ;;  %v7676_v17 = vsel %vm683_vm2, %v2748_v9, %v2749_v10  ;;  %v2138_v24 = vsel %vm456_vm3, %v2133_v18, %v2137_v12  ;;  %v6363_v7 = vld [vmem:[%s8095_s5 + $0xc0] ss:$8 sps:$4 sm:$0xff]   ;;  %v6368_v8 = vld [vmem:[%s8095_s5 + $0xd4] ss:$8 sps:$4 sm:$0xff]  }
 0x3e1   : > { %v2162_v37 = vsel %vm456_vm3, %v2157_v35, %v2161_v25  ;;  %v6366_v9 = vld [vmem:[%s8095_s5 + $0xd0] ss:$8 sps:$4 sm:$0xff]   ;;  %v6371_v10 = vld [vmem:[%s8095_s5 + $0xe4] ss:$8 sps:$4 sm:$0xff]   ;;  %v6374_v12 = vld [vmem:[%s8095_s5 + $0xf4] ss:$8 sps:$4 sm:$0xff]  }
 0x3e2   : > { %v2150_v21 = vsel %vm456_vm3, %v2145_v13, %v2149_v14  ;;  %v6372_v13 = vld [vmem:[%s8095_s5 + $0xf0] ss:$8 sps:$4 sm:$0xff]   ;;  %v6377_v14 = vld [vmem:[%s8095_s5 + $0x104] ss:$8 sps:$4 sm:$0xff]   ;;  %v6380_v16 = vld [vmem:[%s8095_s5 + $0x114] ss:$8 sps:$4 sm:$0xff]  }
 0x3e3   : > { %2380 = vmatprep.mubr.bf16.mxu0 %v2150_v21  ;;  %v6378_v18 = vld [vmem:[%s8095_s5 + $0x110] ss:$8 sps:$4 sm:$0xff]   ;;  %v6381_v21 = vld [vmem:[%s8095_s5 + $0x240] ss:$8 sps:$4 sm:$0xff]   ;;  %v6395_v32 = vld [vmem:[%s8095_s5 + $0x284] ss:$8 sps:$4 sm:$0xff]  }
 0x3e4   : > { %2381 = vmatmul.mubr.bf16.vlgmr.msra.gmra.mrb[4].mxu0 %v2138_v24  ;;  %v6384_v24 = vld [vmem:[%s8095_s5 + $0x250] ss:$8 sps:$4 sm:$0xff]   ;;  %v6387_v29 = vld [vmem:[%s8095_s5 + $0x260] ss:$8 sps:$4 sm:$0xff]   ;;  %v6398_v34 = vld [vmem:[%s8095_s5 + $0x294] ss:$8 sps:$4 sm:$0xff]  }
 0x3e5   : > { %2392 = vmatpush1.bf16.msra.mxu0 %v6321_v19  ;;  %2423 = vmatprep.mubr.bf16.mxu0 %v6835_v0  ;;  %v6383_v19 = vld [vmem:[%s8095_s5 + $0x244] ss:$8 sps:$4 sm:$0xff]   ;;  %v6393_v33 = vld [vmem:[%s8095_s5 + $0x280] ss:$8 sps:$4 sm:$0xff]   ;;  %v6396_v25 = vld [vmem:[%s8095_s5 + $0x290] ss:$8 sps:$4 sm:$0xff]  }
 0x3e6   : > { %2393 = vmatprep.subr.bf16.mxu0 %v6326_v23  ;;  %v6386_v23 = vld [vmem:[%s8095_s5 + $0x254] ss:$8 sps:$4 sm:$0xff]   ;;  %v6399_v35 = vld [vmem:[%s8095_s5 + $0x2a0] ss:$8 sps:$4 sm:$0xff]  }
 0x3e9   : > { %2394 = vmatpush1.bf16.msra.mxu0 %v6324_v28  ;;  %v6389_v28 = vld [vmem:[%s8095_s5 + $0x264] ss:$8 sps:$4 sm:$0xff]  }
 0x3ea   : > { %2616 = vmatprep.subr.bf16.mxu0 %v6329_v31  ;;  %v6392_v31 = vld [vmem:[%s8095_s5 + $0x274] ss:$8 sps:$4 sm:$0xff]  }
 0x3f0   : > { %5588 = vmatmul.mubr.msk.bf16.vlgmr.msra.gmra.mrb[4].mxu0 %vm420_vm5, %v2162_v37  ;;  %v6402_v37 = vld [vmem:[%s8095_s5 + $0x2b0] ss:$8 sps:$4 sm:$0xff]  }
 0x3f1   : > { %2617 = vmatpush1.bf16.msra.mxu0 %v6327_v22  ;;  %2648 = vmatprep.mubr.bf16.mxu0 %v2049_v48  ;;  %v6345_v48 = vld [vmem:[%s8095_s5 + $0x60] ss:$8 sps:$4 sm:$0xff]   ;;  %v6401_v22 = vld [vmem:[%s8095_s5 + $0x2a4] ss:$8 sps:$4 sm:$0xff]  }
 0x3f2   : > { %2618 = vmatprep.subr.bf16.mxu0 %v6332_v36  ;;  %v6404_v36 = vld [vmem:[%s8095_s5 + $0x2b4] ss:$8 sps:$4 sm:$0xff]  }
 0x3f5   : > { %2619 = vmatpush1.bf16.msra.mxu0 %v6330_v38  ;;  %v6407_v38 = vld [vmem:[%s8095_s5 + $0x2c4] ss:$8 sps:$4 sm:$0xff]  }
 0x3f6   : > { %2620 = vmatprep.subr.bf16.mxu0 %v6335_v39  ;;  %v6405_v39 = vld [vmem:[%s8095_s5 + $0x2c0] ss:$8 sps:$4 sm:$0xff]  }
 0x3f9   : > { %2621 = vmatpush1.bf16.msra.mxu0 %v6333_v50  ;;  %v6410_v50 = vld [vmem:[%s8095_s5 + $0x2d4] ss:$8 sps:$4 sm:$0xff]  }
 0x3fa   : > { %2622 = vmatprep.subr.bf16.mxu0 %v6338_v60  ;;  %v6408_v60 = vld [vmem:[%s8095_s5 + $0x2d0] ss:$8 sps:$4 sm:$0xff]  }
 0x3fd   : > { %2623 = vmatpush1.bf16.msra.mxu0 %v6336_v40  ;;  %v6413_v40 = vld [vmem:[%s8095_s5 + $0x2e4] ss:$8 sps:$4 sm:$0xff]  }
 0x3fe   : > { %2624 = vmatprep.subr.bf16.mxu0 %v6341_v41  ;;  %v6411_v41 = vld [vmem:[%s8095_s5 + $0x2e0] ss:$8 sps:$4 sm:$0xff]  }
 0x401   : > { %2625 = vmatpush1.bf16.msra.mxu0 %v6339_v42  ;;  %v6416_v42 = vld [vmem:[%s8095_s5 + $0x2f4] ss:$8 sps:$4 sm:$0xff]  }
 0x402   : > { %2626 = vmatprep.subr.bf16.mxu0 %v6344_v43  ;;  %v6414_v43 = vld [vmem:[%s8095_s5 + $0x2f0] ss:$8 sps:$4 sm:$0xff]  }
 0x405   : > { %2627 = vmatpush1.bf16.msra.mxu0 %v6342_v44  ;;  %v6419_v44 = vld [vmem:[%s8095_s5 + $0x304] ss:$8 sps:$4 sm:$0xff]  }
 0x406   : > { %2628 = vmatprep.subr.bf16.mxu0 %v6347_v47  ;;  %v6417_v47 = vld [vmem:[%s8095_s5 + $0x300] ss:$8 sps:$4 sm:$0xff]  }
 0x409   : > { %2629 = vmatpush1.bf16.msra.mxu0 %v6345_v48  ;;  %v6422_v48 = vld [vmem:[%s8095_s5 + $0x314] ss:$8 sps:$4 sm:$0xff]  }
 0x40a   : > { %2630 = vmatprep.subr.bf16.mxu0 %v6350_v54  ;;  %v6420_v54 = vld [vmem:[%s8095_s5 + $0x310] ss:$8 sps:$4 sm:$0xff]  }
 0x40d   : > { %2631 = vmatpush1.bf16.msra.mxu0 %v6348_v57  ;;  %v6425_v57 = vld [vmem:[%s8095_s5 + $0x324] ss:$8 sps:$4 sm:$0xff]  }
 0x40e   : > { %2632 = vmatprep.subr.bf16.mxu0 %v6353_v61  ;;  %v6423_v61 = vld [vmem:[%s8095_s5 + $0x320] ss:$8 sps:$4 sm:$0xff]  }
 0x411   : > { %2633 = vmatpush1.bf16.msra.mxu0 %v6351_v62  ;;  %v6428_v62 = vld [vmem:[%s8095_s5 + $0x334] ss:$8 sps:$4 sm:$0xff]  }
 0x412   : > { %2634 = vmatprep.subr.bf16.mxu0 %v6356_v63  ;;  %v6426_v63 = vld [vmem:[%s8095_s5 + $0x330] ss:$8 sps:$4 sm:$0xff]  }
 0x415   : > { %2635 = vmatpush1.bf16.msra.mxu0 %v6354_v1  ;;  %v6431_v1 = vld [vmem:[%s8095_s5 + $0x344] ss:$8 sps:$4 sm:$0xff]  }
 0x416   : > { %2636 = vmatprep.subr.bf16.mxu0 %v6359_v2  ;;  %v2746_v2 = vrot.slane %v7671_v46, 1  ;;  %v6432_v46 = vld [vmem:[%s8095_s5 + $0x350] ss:$8 sps:$4 sm:$0xff]  }
 0x419   : > { %2637 = vmatpush1.bf16.msra.mxu0 %v6357_v3  ;;  %v2745_v3 = vrot.slane %v7668_v58, 1 }
 0x41a   : > { %2638 = vmatprep.subr.bf16.mxu0 %v6362_v4  ;;  %v6429_v4 = vld [vmem:[%s8095_s5 + $0x340] ss:$8 sps:$4 sm:$0xff]  }
 0x41d   : > { %2639 = vmatpush1.bf16.msra.mxu0 %v6360_v5  ;;  %v6434_v5 = vld [vmem:[%s8095_s5 + $0x354] ss:$8 sps:$4 sm:$0xff]  }
 0x41e   : > { %2640 = vmatprep.subr.bf16.mxu0 %v6365_v6  ;;  %v2747_v6 = vsel %vm683_vm2, %v2745_v3, %v2746_v2  ;;  %v6477_v3 = vld [vmem:[#allocation3 + $0x200] ss:$8 sps:$4 sm:$0xff]  }
 0x421   : > { %2641 = vmatpush1.bf16.msra.mxu0 %v6363_v7  ;;  %v2751_v7 = vrot.slane %v7681_v20, 1 }
 0x422   : > { %2642 = vmatprep.subr.bf16.mxu0 %v6368_v8 }
 0x425   : > { %2643 = vmatpush1.bf16.msra.mxu0 %v6366_v9  ;;  %v6435_v9 = vld [vmem:[#allocation3 + $0x120] ss:$8 sps:$4 sm:$0xff]  }
 0x426   : > { %2644 = vmatprep.subr.bf16.mxu0 %v6371_v10  ;;  %v6437_v10 = vld [vmem:[#allocation3 + $0x124] ss:$8 sps:$4 sm:$0xff]  }
 0x427   : > { %3406 = vmatprep.subr.bf16.mxu1 %v6437_v10 }
 0x428   : > { %3407 = vmatpush1.bf16.msra.mxu1 %v6435_v9 }
 0x429   : > { %2645 = vmatpush1.bf16.msra.mxu0 %v6369_v11  ;;  %v6440_v11 = vld [vmem:[#allocation3 + $0x134] ss:$8 sps:$4 sm:$0xff]  }
 0x42a   : > { %2646 = vmatprep.subr.bf16.mxu0 %v6374_v12  ;;  %v6438_v12 = vld [vmem:[#allocation3 + $0x130] ss:$8 sps:$4 sm:$0xff]   ;;  %3408 = vmatprep.subr.bf16.mxu1 %v6440_v11 }
 0x42c   : > { %3409 = vmatpush1.bf16.msra.mxu1 %v6438_v12 }
 0x42d   : > { %2647 = vmatpush1.bf16.msra.mxu0 %v6372_v13  ;;  %v6443_v13 = vld [vmem:[#allocation3 + $0x144] ss:$8 sps:$4 sm:$0xff]  }
 0x42e   : > { %2659 = vmatprep.subr.bf16.mxu0 %v6377_v14  ;;  %v6441_v14 = vld [vmem:[#allocation3 + $0x140] ss:$8 sps:$4 sm:$0xff]   ;;  %3410 = vmatprep.subr.bf16.mxu1 %v6443_v13 }
 0x430   : > { %2649 = vmatmul.mubr.bf16.vlgmr.msra.gmra.mrb[4].mxu0 %v7668_v58  ;;  %v2752_v58 = vrot.slane %v7688_v26, 1  ;;  %3411 = vmatpush1.bf16.msra.mxu1 %v6441_v14  ;;  %v6444_v26 = vld [vmem:[#allocation3 + $0x150] ss:$8 sps:$4 sm:$0xff]  }
 0x431   : > { %2660 = vmatpush1.bf16.msra.mxu0 %v6375_v15  ;;  %2691 = vmatprep.mubr.bf16.mxu0 %v6835_v0  ;;  %v6446_v15 = vld [vmem:[#allocation3 + $0x154] ss:$8 sps:$4 sm:$0xff]  }
 0x432   : > { %2661 = vmatprep.subr.bf16.mxu0 %v6380_v16  ;;  %v2753_v8 = vsel %vm683_vm2, %v2751_v7, %v2752_v58  ;;  %3412 = vmatprep.subr.bf16.mxu1 %v6446_v15  ;;  %v6447_v16 = vld [vmem:[#allocation3 + $0x160] ss:$8 sps:$4 sm:$0xff]  }
 0x434   : > { %3413 = vmatpush1.bf16.msra.mxu1 %v6444_v26 }
 0x435   : > { %2662 = vmatpush1.bf16.msra.mxu0 %v6378_v18  ;;  %v6452_v18 = vld [vmem:[#allocation3 + $0x174] ss:$8 sps:$4 sm:$0xff]  }
 0x436   : > { %2939 = vmatprep.subr.bf16.mxu0 %v6383_v19  ;;  %v6450_v19 = vld [vmem:[#allocation3 + $0x170] ss:$8 sps:$4 sm:$0xff]  }
 0x43c   : > { %5625 = vmatmul.mubr.msk.bf16.vlgmr.msra.gmra.mrb[4].mxu0 %vm420_vm5, %v7681_v20  ;;  %v6449_v20 = vld [vmem:[#allocation3 + $0x164] ss:$8 sps:$4 sm:$0xff]  }
 0x43d   : > { %2940 = vmatpush1.bf16.msra.mxu0 %v6381_v21  ;;  %2971 = vmatprep.mubr.bf16.mxu0 %v7676_v17  ;;  %v6390_v17 = vld [vmem:[%s8095_s5 + $0x270] ss:$8 sps:$4 sm:$0xff]   ;;  %v6455_v21 = vld [vmem:[#allocation3 + $0x184] ss:$8 sps:$4 sm:$0xff]  }
 0x43e   : > { %2941 = vmatprep.subr.bf16.mxu0 %v6386_v23  ;;  %3414 = vmatprep.subr.bf16.mxu1 %v6449_v20  ;;  %v6453_v23 = vld [vmem:[#allocation3 + $0x180] ss:$8 sps:$4 sm:$0xff]  }
 0x43f   : > { %3415 = vmatpush1.bf16.msra.mxu1 %v6447_v16 }
 0x440   : > { %3416 = vmatprep.subr.bf16.mxu1 %v6452_v18 }
 0x441   : > { %2942 = vmatpush1.bf16.msra.mxu0 %v6384_v24  ;;  %v6458_v24 = vld [vmem:[#allocation3 + $0x194] ss:$8 sps:$4 sm:$0xff]  }
 0x442   : > { %2943 = vmatprep.subr.bf16.mxu0 %v6389_v28  ;;  %v6456_v28 = vld [vmem:[#allocation3 + $0x190] ss:$8 sps:$4 sm:$0xff]  }
 0x443   : > { %3417 = vmatpush1.bf16.msra.mxu1 %v6450_v19 }
 0x444   : > { %3418 = vmatprep.subr.bf16.mxu1 %v6455_v21 }
 0x445   : > { %2944 = vmatpush1.bf16.msra.mxu0 %v6387_v29  ;;  %v6461_v29 = vld [vmem:[#allocation3 + $0x1a4] ss:$8 sps:$4 sm:$0xff]  }
 0x446   : > { %2945 = vmatprep.subr.bf16.mxu0 %v6392_v31  ;;  %v6459_v31 = vld [vmem:[#allocation3 + $0x1a0] ss:$8 sps:$4 sm:$0xff]  }
 0x447   : > { %3419 = vmatpush1.bf16.msra.mxu1 %v6453_v23 }
 0x448   : > { %3420 = vmatprep.subr.bf16.mxu1 %v6458_v24 }
 0x449   : > { %2946 = vmatpush1.bf16.msra.mxu0 %v6390_v17  ;;  %v6464_v17 = vld [vmem:[#allocation3 + $0x1b4] ss:$8 sps:$4 sm:$0xff]  }
 0x44a   : > { %2947 = vmatprep.subr.bf16.mxu0 %v6395_v32  ;;  %v6462_v32 = vld [vmem:[#allocation3 + $0x1b0] ss:$8 sps:$4 sm:$0xff]  }
 0x44b   : > { %3421 = vmatpush1.bf16.msra.mxu1 %v6456_v28 }
 0x44c   : > { %3422 = vmatprep.subr.bf16.mxu1 %v6461_v29 }
 0x44d   : > { %2948 = vmatpush1.bf16.msra.mxu0 %v6393_v33  ;;  %v936_v33 = vld [vmem:[%s8096_s6] sm:$0x3] }
 0x44e   : > { %2949 = vmatprep.subr.bf16.mxu0 %v6398_v34  ;;  %v6467_v34 = vld [vmem:[#allocation3 + $0x1c4] ss:$8 sps:$4 sm:$0xff]  }
 0x44f   : > { %3423 = vmatpush1.bf16.msra.mxu1 %v6459_v31 }
 0x450   : > { %3424 = vmatprep.subr.bf16.mxu1 %v6464_v17 }
 0x451   : > { %2950 = vmatpush1.bf16.msra.mxu0 %v6396_v25  ;;  %v3033_v25 = vrot.slane %v936_v33, %v7194_v27 }
 0x452   : > { %2951 = vmatprep.subr.bf16.mxu0 %v6401_v22  ;;  %v6465_v22 = vld [vmem:[#allocation3 + $0x1c0] ss:$8 sps:$4 sm:$0xff]  }
 0x453   : > { %3425 = vmatpush1.bf16.msra.mxu1 %v6462_v32 }
 0x454   : > { %3426 = vmatprep.subr.bf16.mxu1 %v6467_v34 }
 0x455   : > { %2952 = vmatpush1.bf16.msra.mxu0 %v6399_v35  ;;  %v3037_v35 = vrot.slane %v936_v33, %v7202_v30 }
 0x456   : > { %2953 = vmatprep.subr.bf16.mxu0 %v6404_v36 }
 0x457   : > { %3427 = vmatpush1.bf16.msra.mxu1 %v6465_v22 }
 0x459   : > { %2954 = vmatpush1.bf16.msra.mxu0 %v6402_v37  ;;  %v6470_v37 = vld [vmem:[#allocation3 + $0x1d4] ss:$8 sps:$4 sm:$0xff]  }
 0x45a   : > { %2955 = vmatprep.subr.bf16.mxu0 %v6407_v38  ;;  %3428 = vmatprep.subr.bf16.mxu1 %v6470_v37 }
 0x45d   : > { %2956 = vmatpush1.bf16.msra.mxu0 %v6405_v39 }
 0x45e   : > { %2957 = vmatprep.subr.bf16.mxu0 %v6410_v50  ;;  %v6468_v50 = vld [vmem:[#allocation3 + $0x1d0] ss:$8 sps:$4 sm:$0xff]  }
 0x45f   : > { %3429 = vmatpush1.bf16.msra.mxu1 %v6468_v50 }
 0x461   : > { %2958 = vmatpush1.bf16.msra.mxu0 %v6408_v60 }
 0x462   : > { %2959 = vmatprep.subr.bf16.mxu0 %v6413_v40 }
 0x465   : > { %2960 = vmatpush1.bf16.msra.mxu0 %v6411_v41 }
 0x466   : > { %2961 = vmatprep.subr.bf16.mxu0 %v6416_v42 }
 0x469   : > { %2962 = vmatpush1.bf16.msra.mxu0 %v6414_v43 }
 0x46a   : > { %2963 = vmatprep.subr.bf16.mxu0 %v6419_v44 }
 0x46d   : > { %2964 = vmatpush1.bf16.msra.mxu0 %v6417_v47 }
 0x46e   : > { %2965 = vmatprep.subr.bf16.mxu0 %v6422_v48  ;;  %v6473_v48 = vld [vmem:[#allocation3 + $0x1e4] ss:$8 sps:$4 sm:$0xff]  }
 0x46f   : > { %3430 = vmatprep.subr.bf16.mxu1 %v6473_v48 }
 0x471   : > { %2966 = vmatpush1.bf16.msra.mxu0 %v6420_v54 }
 0x472   : > { %2967 = vmatprep.subr.bf16.mxu0 %v6425_v57 }
 0x475   : > { %2968 = vmatpush1.bf16.msra.mxu0 %v6423_v61  ;;  %v6471_v61 = vld [vmem:[#allocation3 + $0x1e0] ss:$8 sps:$4 sm:$0xff]  }
 0x476   : > { %2969 = vmatprep.subr.bf16.mxu0 %v6428_v62  ;;  %v6476_v62 = vld [vmem:[#allocation3 + $0x1f4] ss:$8 sps:$4 sm:$0xff]   ;;  %3431 = vmatpush1.bf16.msra.mxu1 %v6471_v61 }
 0x477   : > { %3432 = vmatprep.subr.bf16.mxu1 %v6476_v62  ;;  %v6488_v61 = vld [vmem:[#allocation3 + $0x234] ss:$8 sps:$4 sm:$0xff]  }
 0x479   : > { %2970 = vmatpush1.bf16.msra.mxu0 %v6426_v63  ;;  %v6474_v63 = vld [vmem:[#allocation3 + $0x1f0] ss:$8 sps:$4 sm:$0xff]  }
 0x47a   : > { %2982 = vmatprep.subr.bf16.mxu0 %v6431_v1  ;;  %v6479_v1 = vld [vmem:[#allocation3 + $0x204] ss:$8 sps:$4 sm:$0xff]   ;;  %3433 = vmatpush1.bf16.msra.mxu1 %v6474_v63  ;;  %v6486_v63 = vld [vmem:[#allocation3 + $0x230] ss:$8 sps:$4 sm:$0xff]  }
 0x47b   : > { %3434 = vmatprep.subr.bf16.mxu1 %v6479_v1  ;;  %v6491_v1 = vld [vmem:[#allocation3 + $0x4] ss:$8 sps:$4 sm:$0xff]  }
 0x47c   : > { %2972 = vmatmul.mubr.bf16.vlgmr.msra.gmra.mrb[4].mxu0 %v2747_v6  ;;  %v6480_v6 = vld [vmem:[#allocation3 + $0x210] ss:$8 sps:$4 sm:$0xff]  }
 0x47d   : > { %2983 = vmatpush1.bf16.msra.mxu0 %v6429_v4  ;;  %3014 = vmatprep.mubr.bf16.mxu0 %v6835_v0 }
 0x47e   : > { %2984 = vmatprep.subr.bf16.mxu0 %v6434_v5  ;;  %v6482_v5 = vld [vmem:[#allocation3 + $0x214] ss:$8 sps:$4 sm:$0xff]   ;;  %3435 = vmatpush1.bf16.msra.mxu1 %v6477_v3 }
 0x47f   : > { %3436 = vmatprep.subr.bf16.mxu1 %v6482_v5 }
 0x481   : > { %2985 = vmatpush1.bf16.msra.mxu0 %v6432_v46  ;;  %v6485_v46 = vld [vmem:[#allocation3 + $0x224] ss:$8 sps:$4 sm:$0xff]  }
 0x482   : > { %3437 = vmatpush1.bf16.msra.mxu1 %v6480_v6  ;;  %v6494_v6 = vld [vmem:[#allocation3 + $0x14] ss:$8 sps:$4 sm:$0xff]  }
 0x483   : > { %3449 = vmatprep.subr.bf16.mxu1 %v6485_v46 }
 0x488   : > { %5698 = vmatmul.mubr.msk.bf16.vlgmr.msra.gmra.mrb[4].mxu0 %vm420_vm5, %v2753_v8 }
 0x55b   : > { %v3016_v36 = vpop.f32.mrb[4].mxu0 }
 0x55c   : > { %v3040_v38 = vadd.f32 %v3033_v25, %v3016_v36  ;;  %v3018_v39 = vpop.f32.mrb[5].mxu0 }
 0x55d   : > { %v3041_v60 = vadd.f32 %v3037_v35, %v3018_v39  ;;  %v3020_v40 = vpop.f32.mrb[6].mxu0 }
 0x55e   : > { %v7935_v41 = vadd.f32 %v3040_v38, %v931_v51  ;;  %v3042_v42 = vadd.f32 %v3033_v25, %v3020_v40  ;;  %v3022_v43 = vpop.f32.mrb[7].mxu0 }
 0x55f   : > { %v7939_v44 = vadd.f32 %v3041_v60, %v932_v55  ;;  %v3043_v47 = vadd.f32 %v3037_v35, %v3022_v43  ;;  %v6483_v43 = vld [vmem:[#allocation3 + $0x220] ss:$8 sps:$4 sm:$0xff]  }
 0x560   : > { %v3048_v54 = vmax.f32 %v7935_v41, 0.0  ;;  %v7944_v57 = vadd.f32 %v3042_v42, %v933_v56 }
 0x561   : > { %v3049_v45 = vmax.f32 %v7939_v44, 0.0  ;;  %v7949_v51 = vadd.f32 %v3043_v47, %v934_v59 }
 0x562   : > { %v3050_v49 = vmax.f32 %v7944_v57, 0.0  ;;  %v3058_v55 = vrot.slane %v3048_v54, 7 }
 0x563   : > { %v3051_v52 = vmax.f32 %v7949_v51, 0.0  ;;  %v3059_v56 = vrot.slane %v3049_v45, 7 }
 0x564   : > { %v3060_v53 = vrot.slane %v3050_v49, 7  ;;  %3064 = vrot.lane.b32.xlu0 %v3058_v55, %s6837_s15 }
 0x565   : > { %v3062_v59 = vrot.slane %v3051_v52, 7  ;;  %3066 = vrot.lane.b32.xlu1 %v3059_v56, %s6837_s15 }
 0x566   : > { %v3061_v2 = vsel %vm941_vm7, %v3058_v55, %v3060_v53 }
 0x567   : > { %v3063_v4 = vsel %vm941_vm7, %v3059_v56, %v3062_v59 }
 0x568   : > { %3068 = vrot.lane.b32.xlu0 %v3061_v2, %s6837_s15 }
 0x569   : > { %3070 = vrot.lane.b32.xlu1 %v3063_v4, %s6837_s15  ;;  %v6489_v4 = vld [vmem:[#allocation3] ss:$8 sps:$4 sm:$0xff]  }
 0x56c   : > { %3072 = vrot.lane.b32.xlu0 %v3060_v53, %s6837_s15 }
 0x56d   : > { %3074 = vrot.lane.b32.xlu1 %v3062_v59, %s6837_s15 }
 0x5d6   : > { %v3065_v58 = vpop.permute.xlu0 %3064 }
 0x5d7   : > { %3088 = vst.msk [vmem:[#allocation2] sm:$0xfe] %vm973_vm8, %v3065_v58  ;;  %v3067_v7 = vpop.permute.xlu1 %3066 }
 0x5d8   : > { %v3076_v8 = vsel %vm960_vm10, %v3065_v58, %v3067_v7  ;;  %3090 = vst.msk [vmem:[#allocation2 + $0x10] sm:$0xfe] %vm976_vm11, %v3067_v7  ;;  %v6492_v58 = vld [vmem:[#allocation3 + $0x10] ss:$8 sps:$4 sm:$0xff]   ;;  %v6497_v7 = vld [vmem:[#allocation3 + $0x24] ss:$8 sps:$4 sm:$0xff]  }
 0x5d9   : > { %3089 = vst [vmem:[#allocation2 + $0x8] sm:$0xfe] %v3076_v8  ;;  %v6495_v8 = vld [vmem:[#allocation3 + $0x20] ss:$8 sps:$4 sm:$0xff]  }
 0x5da   : > { %v3069_v9 = vpop.permute.xlu0 %3068 }
 0x5db   : > { %3091 = vst.msk [vmem:[#allocation2 + $0x18] sm:$0xff] %vm978_vm9, %v3069_v9  ;;  %v3071_v10 = vpop.permute.xlu1 %3070 }
 0x5dc   : > { %3093 = vst.msk [vmem:[#allocation2 + $0x28] sm:$0xff] %vm960_vm10, %v3071_v10  ;;  %v3077_v13 = vsel %vm960_vm10, %v3069_v9, %v3071_v10  ;;  %v6500_v9 = vld [vmem:[#allocation3 + $0x34] ss:$8 sps:$4 sm:$0xff]   ;;  %v6498_v10 = vld [vmem:[#allocation3 + $0x30] ss:$8 sps:$4 sm:$0xff]  }
 0x5de   : > { %v3073_v11 = vpop.permute.xlu0 %3072  ;;  %v3097_v20 = vld [vmem:[#allocation2] sm:$0xff] }
 0x5df   : > { %3094 = vst.msk [vmem:[#allocation2 + $0x30] sm:$0x1] %vm982_vm12, %v3073_v11  ;;  %v3075_v12 = vpop.permute.xlu1 %3074  ;;  %v3099_v50 = vld [vmem:[#allocation2 + $0x10] sm:$0xff] }
 0x5e0   : > { %v3078_v14 = vsel %vm960_vm10, %v3073_v11, %v3075_v12  ;;  %3096 = vst.msk [vmem:[#allocation2 + $0x40] sm:$0x1] %vm985_vm13, %v3075_v12  ;;  %v3098_v15 = vld [vmem:[#allocation2 + $0x8] sm:$0xff] }
 0x5e1   : > { %3095 = vst [vmem:[#allocation2 + $0x38] sm:$0x1] %v3078_v14  ;;  %v3107_v26 = vpack.c.bf16 %v3077_v13, %v3098_v15  ;;  %v6503_v11 = vld [vmem:[#allocation3 + $0x44] ss:$8 sps:$4 sm:$0xff]   ;;  %v6501_v12 = vld [vmem:[#allocation3 + $0x40] ss:$8 sps:$4 sm:$0xff]  }
 0x5e2   : > { %v3100_v16 = vld [vmem:[#allocation2 + $0x18] sm:$0xff]  ;;  %v6509_v15 = vld [vmem:[#allocation3 + $0x64] ss:$8 sps:$4 sm:$0xff]  }
 0x5e3   : > { %v7978_v18 = vpack.c.bf16 %v3100_v16, %v3097_v20  ;;  %v3200_v19 = vshll.u32 %v3107_v26, 16  ;;  %v3198_v33 = vshrl.u32 %v3107_v26, 16  ;;  %v3102_v25 = vld [vmem:[#allocation2 + $0x28] sm:$0xff]  ;;  %v3806_v22 = vrot.slane %v3107_v26, 1  ;;  %v6506_v13 = vld [vmem:[#allocation3 + $0x54] ss:$8 sps:$4 sm:$0xff]  }
 0x5e4   : > { %v7988_v47 = vpack.c.bf16 %v3102_v25, %v3099_v50  ;;  %v6504_v14 = vld [vmem:[#allocation3 + $0x50] ss:$8 sps:$4 sm:$0xff]   ;;  %v6512_v20 = vld [vmem:[#allocation3 + $0x74] ss:$8 sps:$4 sm:$0xff]   ;;  %v6537_v50 = vld [vmem:[#allocation3 + $0x100] ss:$8 sps:$4 sm:$0xff]  }
 0x5e5   : > { %v3188_v23 = vshll.u32 %v7978_v18, 16  ;;  %v3202_v31 = vrot.slane %v3200_v19, 1  ;;  %v3186_v36 = vshrl.u32 %v7978_v18, 16  ;;  %v6510_v16 = vld [vmem:[#allocation3 + $0x70] ss:$8 sps:$4 sm:$0xff]  }
 0x5e6   : > { %v3103_v21 = vld [vmem:[#allocation2 + $0x30] sm:$0x3]  ;;  %v3212_v56 = vshll.u32 %v7988_v47, 16  ;;  %v3210_v2 = vshrl.u32 %v7988_v47, 16  ;;  %v6515_v19 = vld [vmem:[#allocation3 + $0x84] ss:$8 sps:$4 sm:$0xff]  }
 0x5e7   : > { %v7981_v24 = vpack.c.bf16 %v3103_v21, %v3103_v21  ;;  %v3190_v32 = vrot.slane %v3188_v23, 1  ;;  %v3203_v38 = vor.u32 %v3202_v31, %v3198_v33  ;;  %v3105_v60 = vld [vmem:[#allocation2 + $0x40] sm:$0x3]  ;;  %v6513_v21 = vld [vmem:[#allocation3 + $0x80] ss:$8 sps:$4 sm:$0xff]  }
 0x5e8   : > { %v3104_v28 = vld [vmem:[#allocation2 + $0x38] sm:$0x3]  ;;  %v7992_v55 = vpack.c.bf16 %v3105_v60, %v3105_v60  ;;  %v3214_v59 = vrot.slane %v3212_v56, 1  ;;  %v6518_v23 = vld [vmem:[#allocation3 + $0x94] ss:$8 sps:$4 sm:$0xff]  }
 0x5e9   : > { %v3110_v29 = vpack.c.bf16 %v3104_v28, %v3104_v28  ;;  %v3193_v17 = vshll.u32 %v7981_v24, 16  ;;  %v3191_v42 = vor.u32 %v3190_v32, %v3186_v36  ;;  %v6516_v28 = vld [vmem:[#allocation3 + $0x90] ss:$8 sps:$4 sm:$0xff]   ;;  %v6519_v31 = vld [vmem:[#allocation3 + $0xa0] ss:$8 sps:$4 sm:$0xff]  }
 0x5ea   : > { %v3217_v53 = vshll.u32 %v7992_v55, 16  ;;  %v3215_v5 = vor.u32 %v3214_v59, %v3210_v2  ;;  %v6522_v32 = vld [vmem:[#allocation3 + $0xb0] ss:$8 sps:$4 sm:$0xff]   ;;  %v6527_v33 = vld [vmem:[#allocation3 + $0xc4] ss:$8 sps:$4 sm:$0xff]  }
 0x5eb   : > { %v3205_v34 = vshll.u32 %v3110_v29, 16  ;;  %v3807_v35 = vrot.slane %v3110_v29, 1  ;;  %v3195_v37 = vrot.slane %v3193_v17, 1  ;;  %v6521_v29 = vld [vmem:[#allocation3 + $0xa4] ss:$8 sps:$4 sm:$0xff]  }
 0x5ec   : > { %v3219_v3 = vrot.slane %v3217_v53, 1  ;;  %v6524_v17 = vld [vmem:[#allocation3 + $0xb4] ss:$8 sps:$4 sm:$0xff]   ;;  %v6531_v36 = vld [vmem:[#allocation3 + $0xe0] ss:$8 sps:$4 sm:$0xff]  }
 0x5ed   : > { %v3207_v39 = vrot.slane %v3205_v34, 1  ;;  %v7986_v40 = vsel %vm683_vm2, %v3806_v22, %v3807_v35  ;;  %v3196_v62 = vsel %vm456_vm3, %v3191_v42, %v3195_v37  ;;  %v6525_v34 = vld [vmem:[#allocation3 + $0xc0] ss:$8 sps:$4 sm:$0xff]   ;;  %v6530_v25 = vld [vmem:[#allocation3 + $0xd4] ss:$8 sps:$4 sm:$0xff]  }
 0x5ee   : > { %v3220_v46 = vsel %vm456_vm3, %v3215_v5, %v3219_v3  ;;  %v6528_v22 = vld [vmem:[#allocation3 + $0xd0] ss:$8 sps:$4 sm:$0xff]   ;;  %v6533_v35 = vld [vmem:[#allocation3 + $0xe4] ss:$8 sps:$4 sm:$0xff]   ;;  %v6536_v37 = vld [vmem:[#allocation3 + $0xf4] ss:$8 sps:$4 sm:$0xff]  }
 0x5ef   : > { %v3208_v48 = vsel %vm456_vm3, %v3203_v38, %v3207_v39  ;;  %v6534_v38 = vld [vmem:[#allocation3 + $0xf0] ss:$8 sps:$4 sm:$0xff]   ;;  %v6539_v39 = vld [vmem:[#allocation3 + $0x104] ss:$8 sps:$4 sm:$0xff]   ;;  %v6542_v60 = vld [vmem:[#allocation3 + $0x114] ss:$8 sps:$4 sm:$0xff]  }
 0x5f0   : > { %3438 = vmatprep.mubr.bf16.mxu1 %v3208_v48  ;;  %v6540_v42 = vld [vmem:[#allocation3 + $0x110] ss:$8 sps:$4 sm:$0xff]   ;;  %v6543_v48 = vld [vmem:[#allocation3 + $0x240] ss:$8 sps:$4 sm:$0xff]   ;;  %v6557_v59 = vld [vmem:[#allocation3 + $0x284] ss:$8 sps:$4 sm:$0xff]  }
 0x5f1   : > { %3439 = vmatmul.mubr.bf16.vlgmr.msra.gmra.mrb[8].mxu1 %v3196_v62  ;;  %v6546_v62 = vld [vmem:[#allocation3 + $0x250] ss:$8 sps:$4 sm:$0xff]   ;;  %v6549_v56 = vld [vmem:[#allocation3 + $0x260] ss:$8 sps:$4 sm:$0xff]   ;;  %v6560_v3 = vld [vmem:[#allocation3 + $0x294] ss:$8 sps:$4 sm:$0xff]  }
 0x5f2   : > { %3450 = vmatpush1.bf16.msra.mxu1 %v6483_v43  ;;  %3481 = vmatprep.mubr.bf16.mxu1 %v6835_v0  ;;  %v6545_v43 = vld [vmem:[#allocation3 + $0x244] ss:$8 sps:$4 sm:$0xff]   ;;  %v6552_v53 = vld [vmem:[#allocation3 + $0x270] ss:$8 sps:$4 sm:$0xff]   ;;  %v6555_v2 = vld [vmem:[#allocation3 + $0x280] ss:$8 sps:$4 sm:$0xff]  }
 0x5f3   : > { %3451 = vmatprep.subr.bf16.mxu1 %v6488_v61  ;;  %v6548_v61 = vld [vmem:[#allocation3 + $0x254] ss:$8 sps:$4 sm:$0xff]   ;;  %v6563_v5 = vld [vmem:[#allocation3 + $0x2a4] ss:$8 sps:$4 sm:$0xff]  }
 0x5f6   : > { %3452 = vmatpush1.bf16.msra.mxu1 %v6486_v63  ;;  %v6551_v63 = vld [vmem:[#allocation3 + $0x264] ss:$8 sps:$4 sm:$0xff]  }
 0x5f7   : > { %3674 = vmatprep.subr.bf16.mxu1 %v6491_v1  ;;  %v6554_v1 = vld [vmem:[#allocation3 + $0x274] ss:$8 sps:$4 sm:$0xff]  }
 0x5fd   : > { %5735 = vmatmul.mubr.msk.bf16.vlgmr.msra.gmra.mrb[8].mxu1 %vm420_vm5, %v3220_v46  ;;  %v6564_v46 = vld [vmem:[#allocation3 + $0x2b0] ss:$8 sps:$4 sm:$0xff]  }
 0x5fe   : > { %3675 = vmatpush1.bf16.msra.mxu1 %v6489_v4  ;;  %3706 = vmatprep.mubr.bf16.mxu1 %v3107_v26  ;;  %v6507_v26 = vld [vmem:[#allocation3 + $0x60] ss:$8 sps:$4 sm:$0xff]   ;;  %v6558_v4 = vld [vmem:[#allocation3 + $0x290] ss:$8 sps:$4 sm:$0xff]  }
 0x5ff   : > { %3676 = vmatprep.subr.bf16.mxu1 %v6494_v6  ;;  %v6566_v6 = vld [vmem:[#allocation3 + $0x2b4] ss:$8 sps:$4 sm:$0xff]  }
 0x602   : > { %3677 = vmatpush1.bf16.msra.mxu1 %v6492_v58  ;;  %v6569_v58 = vld [vmem:[#allocation3 + $0x2c4] ss:$8 sps:$4 sm:$0xff]  }
 0x603   : > { %3678 = vmatprep.subr.bf16.mxu1 %v6497_v7  ;;  %v6567_v7 = vld [vmem:[#allocation3 + $0x2c0] ss:$8 sps:$4 sm:$0xff]  }
 0x606   : > { %3679 = vmatpush1.bf16.msra.mxu1 %v6495_v8  ;;  %v6572_v8 = vld [vmem:[#allocation3 + $0x2d4] ss:$8 sps:$4 sm:$0xff]  }
 0x607   : > { %3680 = vmatprep.subr.bf16.mxu1 %v6500_v9  ;;  %v6570_v9 = vld [vmem:[#allocation3 + $0x2d0] ss:$8 sps:$4 sm:$0xff]  }
 0x60a   : > { %3681 = vmatpush1.bf16.msra.mxu1 %v6498_v10  ;;  %v6575_v10 = vld [vmem:[#allocation3 + $0x2e4] ss:$8 sps:$4 sm:$0xff]  }
 0x60b   : > { %3682 = vmatprep.subr.bf16.mxu1 %v6503_v11  ;;  %v6573_v11 = vld [vmem:[#allocation3 + $0x2e0] ss:$8 sps:$4 sm:$0xff]  }
 0x60e   : > { %3683 = vmatpush1.bf16.msra.mxu1 %v6501_v12  ;;  %v6578_v12 = vld [vmem:[#allocation3 + $0x2f4] ss:$8 sps:$4 sm:$0xff]  }
 0x60f   : > { %3684 = vmatprep.subr.bf16.mxu1 %v6506_v13  ;;  %v6576_v13 = vld [vmem:[#allocation3 + $0x2f0] ss:$8 sps:$4 sm:$0xff]  }
 0x612   : > { %3685 = vmatpush1.bf16.msra.mxu1 %v6504_v14  ;;  %v6581_v14 = vld [vmem:[#allocation3 + $0x304] ss:$8 sps:$4 sm:$0xff]  }
 0x613   : > { %3686 = vmatprep.subr.bf16.mxu1 %v6509_v15  ;;  %v6579_v15 = vld [vmem:[#allocation3 + $0x300] ss:$8 sps:$4 sm:$0xff]  }
 0x616   : > { %3687 = vmatpush1.bf16.msra.mxu1 %v6507_v26  ;;  %v6584_v26 = vld [vmem:[#allocation3 + $0x314] ss:$8 sps:$4 sm:$0xff]  }
 0x617   : > { %3688 = vmatprep.subr.bf16.mxu1 %v6512_v20  ;;  %v6582_v20 = vld [vmem:[#allocation3 + $0x310] ss:$8 sps:$4 sm:$0xff]  }
 0x61a   : > { %3689 = vmatpush1.bf16.msra.mxu1 %v6510_v16  ;;  %v6587_v16 = vld [vmem:[#allocation3 + $0x324] ss:$8 sps:$4 sm:$0xff]  }
 0x61b   : > { %3690 = vmatprep.subr.bf16.mxu1 %v6515_v19  ;;  %v6585_v19 = vld [vmem:[#allocation3 + $0x320] ss:$8 sps:$4 sm:$0xff]  }
 0x61e   : > { %3691 = vmatpush1.bf16.msra.mxu1 %v6513_v21  ;;  %v6590_v21 = vld [vmem:[#allocation3 + $0x334] ss:$8 sps:$4 sm:$0xff]  }
 0x61f   : > { %3692 = vmatprep.subr.bf16.mxu1 %v6518_v23  ;;  %v6588_v23 = vld [vmem:[#allocation3 + $0x330] ss:$8 sps:$4 sm:$0xff]  }
 0x622   : > { %3693 = vmatpush1.bf16.msra.mxu1 %v6516_v28  ;;  %v6593_v28 = vld [vmem:[#allocation3 + $0x344] ss:$8 sps:$4 sm:$0xff]  }
 0x623   : > { %3694 = vmatprep.subr.bf16.mxu1 %v6521_v29  ;;  %v3804_v29 = vrot.slane %v7981_v24, 1 }
 0x626   : > { %3695 = vmatpush1.bf16.msra.mxu1 %v6519_v31  ;;  %v3803_v31 = vrot.slane %v7978_v18, 1 }
 0x627   : > { %3696 = vmatprep.subr.bf16.mxu1 %v6524_v17  ;;  %v6591_v17 = vld [vmem:[#allocation3 + $0x340] ss:$8 sps:$4 sm:$0xff]  }
 0x62a   : > { %3697 = vmatpush1.bf16.msra.mxu1 %v6522_v32  ;;  %v6596_v32 = vld [vmem:[#allocation3 + $0x354] ss:$8 sps:$4 sm:$0xff]  }
 0x62b   : > { %3698 = vmatprep.subr.bf16.mxu1 %v6527_v33  ;;  %v3805_v33 = vsel %vm683_vm2, %v3803_v31, %v3804_v29  ;;  %v6641_v31 = vld [vmem:[#allocation5 + $0x204] ss:$8 sps:$4 sm:$0xff]  }
 0x62e   : > { %3699 = vmatpush1.bf16.msra.mxu1 %v6525_v34  ;;  %v6594_v34 = vld [vmem:[#allocation3 + $0x350] ss:$8 sps:$4 sm:$0xff]  }
 0x62f   : > { %3700 = vmatprep.subr.bf16.mxu1 %v6530_v25  ;;  %v3810_v25 = vrot.slane %v7992_v55, 1  ;;  %v6606_v55 = vld [vmem:[#allocation5 + $0x150] ss:$8 sps:$4 sm:$0xff]  }
 0x632   : > { %3701 = vmatpush1.bf16.msra.mxu1 %v6528_v22  ;;  %v3809_v22 = vrot.slane %v7988_v47, 1 }
 0x633   : > { %3702 = vmatprep.subr.bf16.mxu1 %v6533_v35  ;;  %v6599_v35 = vld [vmem:[#allocation5 + $0x124] ss:$8 sps:$4 sm:$0xff]  }
 0x634   : > { %v3811_v24 = vsel %vm683_vm2, %v3809_v22, %v3810_v25  ;;  %4458 = vmatprep.subr.bf16.mxu0 %v6599_v35  ;;  %v6644_v22 = vld [vmem:[#allocation5 + $0x214] ss:$8 sps:$4 sm:$0xff]  }
 0x636   : > { %3703 = vmatpush1.bf16.msra.mxu1 %v6531_v36  ;;  %v6602_v36 = vld [vmem:[#allocation5 + $0x134] ss:$8 sps:$4 sm:$0xff]  }
 0x637   : > { %3704 = vmatprep.subr.bf16.mxu1 %v6536_v37  ;;  %v6600_v37 = vld [vmem:[#allocation5 + $0x130] ss:$8 sps:$4 sm:$0xff]  }
 0x63a   : > { %3705 = vmatpush1.bf16.msra.mxu1 %v6534_v38  ;;  %v6605_v38 = vld [vmem:[#allocation5 + $0x144] ss:$8 sps:$4 sm:$0xff]  }
 0x63b   : > { %3717 = vmatprep.subr.bf16.mxu1 %v6539_v39  ;;  %v6603_v39 = vld [vmem:[#allocation5 + $0x140] ss:$8 sps:$4 sm:$0xff]  }
 0x63d   : > { %3707 = vmatmul.mubr.bf16.vlgmr.msra.gmra.mrb[8].mxu1 %v7978_v18  ;;  %v6597_v18 = vld [vmem:[#allocation5 + $0x120] ss:$8 sps:$4 sm:$0xff]  }
 0x63e   : > { %3718 = vmatpush1.bf16.msra.mxu1 %v6537_v50  ;;  %3749 = vmatprep.mubr.bf16.mxu1 %v6835_v0  ;;  %v6608_v50 = vld [vmem:[#allocation5 + $0x154] ss:$8 sps:$4 sm:$0xff]  }
 0x63f   : > { %3719 = vmatprep.subr.bf16.mxu1 %v6542_v60  ;;  %4459 = vmatpush1.bf16.msra.mxu0 %v6597_v18  ;;  %v6609_v60 = vld [vmem:[#allocation5 + $0x160] ss:$8 sps:$4 sm:$0xff]   ;;  %v6647_v18 = vld [vmem:[#allocation5 + $0x224] ss:$8 sps:$4 sm:$0xff]  }
 0x640   : > { %4460 = vmatprep.subr.bf16.mxu0 %v6602_v36 }
 0x642   : > { %3720 = vmatpush1.bf16.msra.mxu1 %v6540_v42  ;;  %v6614_v42 = vld [vmem:[#allocation5 + $0x174] ss:$8 sps:$4 sm:$0xff]  }
 0x643   : > { %3997 = vmatprep.subr.bf16.mxu1 %v6545_v43  ;;  %4461 = vmatpush1.bf16.msra.mxu0 %v6600_v37  ;;  %v6612_v43 = vld [vmem:[#allocation5 + $0x170] ss:$8 sps:$4 sm:$0xff]  }
 0x644   : > { %4462 = vmatprep.subr.bf16.mxu0 %v6605_v38 }
 0x647   : > { %4463 = vmatpush1.bf16.msra.mxu0 %v6603_v39 }
 0x648   : > { %4464 = vmatprep.subr.bf16.mxu0 %v6608_v50 }
 0x649   : > { %5772 = vmatmul.mubr.msk.bf16.vlgmr.msra.gmra.mrb[8].mxu1 %vm420_vm5, %v7988_v47  ;;  %v6611_v47 = vld [vmem:[#allocation5 + $0x164] ss:$8 sps:$4 sm:$0xff]  }
 0x64a   : > { %3998 = vmatpush1.bf16.msra.mxu1 %v6543_v48  ;;  %4029 = vmatprep.mubr.bf16.mxu1 %v7986_v40  ;;  %v6561_v40 = vld [vmem:[#allocation3 + $0x2a0] ss:$8 sps:$4 sm:$0xff]   ;;  %v6617_v48 = vld [vmem:[#allocation5 + $0x184] ss:$8 sps:$4 sm:$0xff]  }
 0x64b   : > { %3999 = vmatprep.subr.bf16.mxu1 %v6548_v61  ;;  %4465 = vmatpush1.bf16.msra.mxu0 %v6606_v55  ;;  %v6615_v61 = vld [vmem:[#allocation5 + $0x180] ss:$8 sps:$4 sm:$0xff]  }
 0x64c   : > { %4466 = vmatprep.subr.bf16.mxu0 %v6611_v47 }
 0x64e   : > { %4000 = vmatpush1.bf16.msra.mxu1 %v6546_v62  ;;  %v6620_v62 = vld [vmem:[#allocation5 + $0x194] ss:$8 sps:$4 sm:$0xff]  }
 0x64f   : > { %4001 = vmatprep.subr.bf16.mxu1 %v6551_v63  ;;  %4467 = vmatpush1.bf16.msra.mxu0 %v6609_v60  ;;  %v6618_v63 = vld [vmem:[#allocation5 + $0x190] ss:$8 sps:$4 sm:$0xff]  }
 0x650   : > { %4468 = vmatprep.subr.bf16.mxu0 %v6614_v42 }
 0x652   : > { %4002 = vmatpush1.bf16.msra.mxu1 %v6549_v56  ;;  %v6623_v56 = vld [vmem:[#allocation5 + $0x1a4] ss:$8 sps:$4 sm:$0xff]  }
 0x653   : > { %4003 = vmatprep.subr.bf16.mxu1 %v6554_v1  ;;  %4469 = vmatpush1.bf16.msra.mxu0 %v6612_v43  ;;  %v6621_v1 = vld [vmem:[#allocation5 + $0x1a0] ss:$8 sps:$4 sm:$0xff]  }
 0x654   : > { %4470 = vmatprep.subr.bf16.mxu0 %v6617_v48 }
 0x656   : > { %4004 = vmatpush1.bf16.msra.mxu1 %v6552_v53  ;;  %v6626_v53 = vld [vmem:[#allocation5 + $0x1b4] ss:$8 sps:$4 sm:$0xff]  }
 0x657   : > { %4005 = vmatprep.subr.bf16.mxu1 %v6557_v59  ;;  %4471 = vmatpush1.bf16.msra.mxu0 %v6615_v61  ;;  %v6624_v59 = vld [vmem:[#allocation5 + $0x1b0] ss:$8 sps:$4 sm:$0xff]  }
 0x658   : > { %4472 = vmatprep.subr.bf16.mxu0 %v6620_v62 }
 0x65a   : > { %4006 = vmatpush1.bf16.msra.mxu1 %v6555_v2  ;;  %v3052_v2 = vld [vmem:[%s8098_s8] sm:$0x3] }
 0x65b   : > { %4007 = vmatprep.subr.bf16.mxu1 %v6560_v3  ;;  %4473 = vmatpush1.bf16.msra.mxu0 %v6618_v63  ;;  %v6629_v3 = vld [vmem:[#allocation5 + $0x1c4] ss:$8 sps:$4 sm:$0xff]  }
 0x65c   : > { %4474 = vmatprep.subr.bf16.mxu0 %v6623_v56 }
 0x65e   : > { %4008 = vmatpush1.bf16.msra.mxu1 %v6558_v4  ;;  %v6627_v4 = vld [vmem:[#allocation5 + $0x1c0] ss:$8 sps:$4 sm:$0xff]  }
 0x65f   : > { %4009 = vmatprep.subr.bf16.mxu1 %v6563_v5  ;;  %4475 = vmatpush1.bf16.msra.mxu0 %v6621_v1  ;;  %v4091_v5 = vrot.slane %v3052_v2, %v7194_v27 }
 0x660   : > { %4476 = vmatprep.subr.bf16.mxu0 %v6626_v53 }
 0x662   : > { %4010 = vmatpush1.bf16.msra.mxu1 %v6561_v40  ;;  %v4095_v40 = vrot.slane %v3052_v2, %v7202_v30 }
 0x663   : > { %4011 = vmatprep.subr.bf16.mxu1 %v6566_v6  ;;  %4477 = vmatpush1.bf16.msra.mxu0 %v6624_v59  ;;  %v6632_v6 = vld [vmem:[#allocation5 + $0x1d4] ss:$8 sps:$4 sm:$0xff]  }
 0x664   : > { %4478 = vmatprep.subr.bf16.mxu0 %v6629_v3 }
 0x666   : > { %4012 = vmatpush1.bf16.msra.mxu1 %v6564_v46  ;;  %v6630_v46 = vld [vmem:[#allocation5 + $0x1d0] ss:$8 sps:$4 sm:$0xff]  }
 0x667   : > { %4013 = vmatprep.subr.bf16.mxu1 %v6569_v58  ;;  %4479 = vmatpush1.bf16.msra.mxu0 %v6627_v4 }
 0x668   : > { %4480 = vmatprep.subr.bf16.mxu0 %v6632_v6 }
 0x66a   : > { %4014 = vmatpush1.bf16.msra.mxu1 %v6567_v7 }
 0x66b   : > { %4015 = vmatprep.subr.bf16.mxu1 %v6572_v8  ;;  %4481 = vmatpush1.bf16.msra.mxu0 %v6630_v46 }
 0x66e   : > { %4016 = vmatpush1.bf16.msra.mxu1 %v6570_v9 }
 0x66f   : > { %4017 = vmatprep.subr.bf16.mxu1 %v6575_v10 }
 0x672   : > { %4018 = vmatpush1.bf16.msra.mxu1 %v6573_v11  ;;  %v6635_v11 = vld [vmem:[#allocation5 + $0x1e4] ss:$8 sps:$4 sm:$0xff]  }
 0x673   : > { %4019 = vmatprep.subr.bf16.mxu1 %v6578_v12  ;;  %4482 = vmatprep.subr.bf16.mxu0 %v6635_v11 }
 0x676   : > { %4020 = vmatpush1.bf16.msra.mxu1 %v6576_v13 }
 0x677   : > { %4021 = vmatprep.subr.bf16.mxu1 %v6581_v14 }
 0x67a   : > { %4022 = vmatpush1.bf16.msra.mxu1 %v6579_v15  ;;  %v6633_v15 = vld [vmem:[#allocation5 + $0x1e0] ss:$8 sps:$4 sm:$0xff]  }
 0x67b   : > { %4023 = vmatprep.subr.bf16.mxu1 %v6584_v26  ;;  %4483 = vmatpush1.bf16.msra.mxu0 %v6633_v15 }
 0x67e   : > { %4024 = vmatpush1.bf16.msra.mxu1 %v6582_v20 }
 0x67f   : > { %4025 = vmatprep.subr.bf16.mxu1 %v6587_v16  ;;  %v6638_v16 = vld [vmem:[#allocation5 + $0x1f4] ss:$8 sps:$4 sm:$0xff]  }
 0x680   : > { %4484 = vmatprep.subr.bf16.mxu0 %v6638_v16 }
 0x682   : > { %4026 = vmatpush1.bf16.msra.mxu1 %v6585_v19 }
 0x683   : > { %4027 = vmatprep.subr.bf16.mxu1 %v6590_v21 }
 0x686   : > { %4028 = vmatpush1.bf16.msra.mxu1 %v6588_v23  ;;  %v6636_v23 = vld [vmem:[#allocation5 + $0x1f0] ss:$8 sps:$4 sm:$0xff]  }
 0x687   : > { %4040 = vmatprep.subr.bf16.mxu1 %v6593_v28  ;;  %4485 = vmatpush1.bf16.msra.mxu0 %v6636_v23 }
 0x688   : > { %4486 = vmatprep.subr.bf16.mxu0 %v6641_v31  ;;  %v6653_v31 = vld [vmem:[#allocation5 + $0x4] ss:$8 sps:$4 sm:$0xff]  }
 0x689   : > { %4030 = vmatmul.mubr.bf16.vlgmr.msra.gmra.mrb[8].mxu1 %v3805_v33 }
 0x68a   : > { %4041 = vmatpush1.bf16.msra.mxu1 %v6591_v17  ;;  %4072 = vmatprep.mubr.bf16.mxu1 %v6835_v0 }
 0x68b   : > { %4042 = vmatprep.subr.bf16.mxu1 %v6596_v32 }
 0x68e   : > { %4043 = vmatpush1.bf16.msra.mxu1 %v6594_v34  ;;  %v6639_v34 = vld [vmem:[#allocation5 + $0x200] ss:$8 sps:$4 sm:$0xff]  }
 0x68f   : > { %4487 = vmatpush1.bf16.msra.mxu0 %v6639_v34 }
 0x690   : > { %4488 = vmatprep.subr.bf16.mxu0 %v6644_v22 }
 0x695   : > { %5809 = vmatmul.mubr.msk.bf16.vlgmr.msra.gmra.mrb[8].mxu1 %vm420_vm5, %v3811_v24  ;;  %v6642_v24 = vld [vmem:[#allocation5 + $0x210] ss:$8 sps:$4 sm:$0xff]  }
 0x696   : > { %4489 = vmatpush1.bf16.msra.mxu0 %v6642_v24  ;;  %v6656_v24 = vld [vmem:[#allocation5 + $0x14] ss:$8 sps:$4 sm:$0xff]  }
 0x697   : > { %4501 = vmatprep.subr.bf16.mxu0 %v6647_v18 }
 0x768   : > { %v4074_v58 = vpop.f32.mrb[8].mxu1 }
 0x769   : > { %v4098_v7 = vadd.f32 %v4091_v5, %v4074_v58  ;;  %v4076_v8 = vpop.f32.mrb[9].mxu1 }
 0x76a   : > { %v4099_v9 = vadd.f32 %v4095_v40, %v4076_v8  ;;  %v4078_v10 = vpop.f32.mrb[10].mxu1 }
 0x76b   : > { %v4102_v12 = vmax.f32 %v4098_v7, 0.0  ;;  %v4100_v13 = vadd.f32 %v4091_v5, %v4078_v10  ;;  %v4080_v14 = vpop.f32.mrb[11].mxu1 }
 0x76c   : > { %v4103_v26 = vmax.f32 %v4099_v9, 0.0  ;;  %v4101_v20 = vadd.f32 %v4095_v40, %v4080_v14 }
 0x76d   : > { %v4110_v19 = vrot.slane %v4102_v12, 7  ;;  %v4104_v21 = vmax.f32 %v4100_v13, 0.0 }
 0x76e   : > { %v4111_v28 = vrot.slane %v4103_v26, 7  ;;  %v4105_v29 = vmax.f32 %v4101_v20, 0.0  ;;  %v6645_v26 = vld [vmem:[#allocation5 + $0x220] ss:$8 sps:$4 sm:$0xff]  }
 0x76f   : > { %v4112_v17 = vrot.slane %v4104_v21, 7  ;;  %4116 = vrot.lane.b32.xlu0 %v4110_v19, %s6837_s15 }
 0x770   : > { %v4114_v32 = vrot.slane %v4105_v29, 7  ;;  %4118 = vrot.lane.b32.xlu1 %v4111_v28, %s6837_s15 }
 0x771   : > { %v4113_v33 = vsel %vm941_vm7, %v4110_v19, %v4112_v17  ;;  %v6650_v19 = vld [vmem:[#allocation5 + $0x234] ss:$8 sps:$4 sm:$0xff]  }
 0x772   : > { %v4115_v25 = vsel %vm941_vm7, %v4111_v28, %v4114_v32  ;;  %v6648_v28 = vld [vmem:[#allocation5 + $0x230] ss:$8 sps:$4 sm:$0xff]  }
 0x773   : > { %4120 = vrot.lane.b32.xlu0 %v4113_v33, %s6837_s15 }
 0x774   : > { %4122 = vrot.lane.b32.xlu1 %v4115_v25, %s6837_s15  ;;  %v6651_v25 = vld [vmem:[#allocation5] ss:$8 sps:$4 sm:$0xff]  }
 0x777   : > { %4124 = vrot.lane.b32.xlu0 %v4112_v17, %s6837_s15 }
 0x778   : > { %4126 = vrot.lane.b32.xlu1 %v4114_v32, %s6837_s15 }
 0x7e1   : > { %v4117_v35 = vpop.permute.xlu0 %4116 }
 0x7e2   : > { %4140 = vst.msk [vmem:[#allocation2] sm:$0xfe] %vm973_vm8, %v4117_v35  ;;  %v4119_v36 = vpop.permute.xlu1 %4118 }
 0x7e3   : > { %v4128_v37 = vsel %vm960_vm10, %v4117_v35, %v4119_v36  ;;  %4142 = vst.msk [vmem:[#allocation2 + $0x10] sm:$0xfe] %vm976_vm11, %v4119_v36  ;;  %v6654_v35 = vld [vmem:[#allocation5 + $0x10] ss:$8 sps:$4 sm:$0xff]   ;;  %v6659_v36 = vld [vmem:[#allocation5 + $0x24] ss:$8 sps:$4 sm:$0xff]  }
 0x7e4   : > { %4141 = vst [vmem:[#allocation2 + $0x8] sm:$0xfe] %v4128_v37  ;;  %v6657_v37 = vld [vmem:[#allocation5 + $0x20] ss:$8 sps:$4 sm:$0xff]  }
 0x7e5   : > { %v4121_v38 = vpop.permute.xlu0 %4120 }
 0x7e6   : > { %4143 = vst.msk [vmem:[#allocation2 + $0x18] sm:$0xff] %vm978_vm9, %v4121_v38  ;;  %v4123_v39 = vpop.permute.xlu1 %4122 }
 0x7e7   : > { %v4129_v50 = vsel %vm960_vm10, %v4121_v38, %v4123_v39  ;;  %4145 = vst.msk [vmem:[#allocation2 + $0x28] sm:$0xff] %vm960_vm10, %v4123_v39  ;;  %v6662_v38 = vld [vmem:[#allocation5 + $0x34] ss:$8 sps:$4 sm:$0xff]   ;;  %v6660_v39 = vld [vmem:[#allocation5 + $0x30] ss:$8 sps:$4 sm:$0xff]  }
 0x7e9   : > { %v4125_v55 = vpop.permute.xlu0 %4124  ;;  %v4149_v48 = vld [vmem:[#allocation2] sm:$0xff] }
 0x7ea   : > { %4146 = vst.msk [vmem:[#allocation2 + $0x30] sm:$0x1] %vm982_vm12, %v4125_v55  ;;  %v4127_v47 = vpop.permute.xlu1 %4126  ;;  %v4151_v12 = vld [vmem:[#allocation2 + $0x10] sm:$0xff] }
 0x7eb   : > { %v4130_v60 = vsel %vm960_vm10, %v4125_v55, %v4127_v47  ;;  %4148 = vst.msk [vmem:[#allocation2 + $0x40] sm:$0x1] %vm985_vm13, %v4127_v47  ;;  %v4150_v42 = vld [vmem:[#allocation2 + $0x8] sm:$0xff]  ;;  %v6668_v47 = vld [vmem:[#allocation5 + $0x54] ss:$8 sps:$4 sm:$0xff]  }
 0x7ec   : > { %4147 = vst [vmem:[#allocation2 + $0x38] sm:$0x1] %v4130_v60  ;;  %v4159_v43 = vpack.c.bf16 %v4129_v50, %v4150_v42  ;;  %v6665_v50 = vld [vmem:[#allocation5 + $0x44] ss:$8 sps:$4 sm:$0xff]   ;;  %v6663_v55 = vld [vmem:[#allocation5 + $0x40] ss:$8 sps:$4 sm:$0xff]  }
 0x7ed   : > { %v4152_v61 = vld [vmem:[#allocation2 + $0x18] sm:$0xff]  ;;  %v6671_v42 = vld [vmem:[#allocation5 + $0x64] ss:$8 sps:$4 sm:$0xff]  }
 0x7ee   : > { %v8035_v62 = vpack.c.bf16 %v4152_v61, %v4149_v48  ;;  %v4252_v63 = vshll.u32 %v4159_v43, 16  ;;  %v4250_v40 = vshrl.u32 %v4159_v43, 16  ;;  %v4154_v46 = vld [vmem:[#allocation2 + $0x28] sm:$0xff]  ;;  %v4858_v58 = vrot.slane %v4159_v43, 1  ;;  %v6666_v60 = vld [vmem:[#allocation5 + $0x50] ss:$8 sps:$4 sm:$0xff]  }
 0x7ef   : > { %v8045_v20 = vpack.c.bf16 %v4154_v46, %v4151_v12  ;;  %v6674_v48 = vld [vmem:[#allocation5 + $0x74] ss:$8 sps:$4 sm:$0xff]   ;;  %v6672_v61 = vld [vmem:[#allocation5 + $0x70] ss:$8 sps:$4 sm:$0xff]   ;;  %v6699_v12 = vld [vmem:[#allocation5 + $0x100] ss:$8 sps:$4 sm:$0xff]  }
 0x7f0   : > { %v4240_v1 = vshll.u32 %v8035_v62, 16  ;;  %v4254_v3 = vrot.slane %v4252_v63, 1  ;;  %v4238_v8 = vshrl.u32 %v8035_v62, 16  ;;  %v6677_v63 = vld [vmem:[#allocation5 + $0x84] ss:$8 sps:$4 sm:$0xff]  }
 0x7f1   : > { %v4155_v56 = vld [vmem:[#allocation2 + $0x30] sm:$0x3]  ;;  %v4264_v29 = vshll.u32 %v8045_v20, 16  ;;  %v4262_v33 = vshrl.u32 %v8045_v20, 16  ;;  %v6692_v46 = vld [vmem:[#allocation5 + $0xd4] ss:$8 sps:$4 sm:$0xff]  }
 0x7f2   : > { %v8038_v53 = vpack.c.bf16 %v4155_v56, %v4155_v56  ;;  %v4242_v5 = vrot.slane %v4240_v1, 1  ;;  %v4255_v10 = vor.u32 %v4254_v3, %v4250_v40  ;;  %v4157_v13 = vld [vmem:[#allocation2 + $0x40] sm:$0x3]  ;;  %v6675_v56 = vld [vmem:[#allocation5 + $0x80] ss:$8 sps:$4 sm:$0xff]  }
 0x7f3   : > { %v4156_v59 = vld [vmem:[#allocation2 + $0x38] sm:$0x3]  ;;  %v8049_v23 = vpack.c.bf16 %v4157_v13, %v4157_v13  ;;  %v4266_v32 = vrot.slane %v4264_v29, 1  ;;  %v6680_v1 = vld [vmem:[#allocation5 + $0x94] ss:$8 sps:$4 sm:$0xff]  }
 0x7f4   : > { %v4162_v2 = vpack.c.bf16 %v4156_v59, %v4156_v59  ;;  %v4245_v4 = vshll.u32 %v8038_v53, 16  ;;  %v4243_v15 = vor.u32 %v4242_v5, %v4238_v8  ;;  %v6678_v59 = vld [vmem:[#allocation5 + $0x90] ss:$8 sps:$4 sm:$0xff]   ;;  %v6681_v3 = vld [vmem:[#allocation5 + $0xa0] ss:$8 sps:$4 sm:$0xff]  }
 0x7f5   : > { %v4269_v17 = vshll.u32 %v8049_v23, 16  ;;  %v4267_v22 = vor.u32 %v4266_v32, %v4262_v33  ;;  %v6684_v5 = vld [vmem:[#allocation5 + $0xb0] ss:$8 sps:$4 sm:$0xff]   ;;  %v6689_v40 = vld [vmem:[#allocation5 + $0xc4] ss:$8 sps:$4 sm:$0xff]  }
 0x7f6   : > { %v4257_v6 = vshll.u32 %v4162_v2, 16  ;;  %v4859_v7 = vrot.slane %v4162_v2, 1  ;;  %v4247_v9 = vrot.slane %v4245_v4, 1  ;;  %v6683_v2 = vld [vmem:[#allocation5 + $0xa4] ss:$8 sps:$4 sm:$0xff]  }
 0x7f7   : > { %v4271_v34 = vrot.slane %v4269_v17, 1  ;;  %v6686_v4 = vld [vmem:[#allocation5 + $0xb4] ss:$8 sps:$4 sm:$0xff]   ;;  %v6693_v8 = vld [vmem:[#allocation5 + $0xe0] ss:$8 sps:$4 sm:$0xff]  }
 0x7f8   : > { %v4259_v11 = vrot.slane %v4257_v6, 1  ;;  %v8043_v14 = vsel %vm683_vm2, %v4858_v58, %v4859_v7  ;;  %v4248_v21 = vsel %vm456_vm3, %v4243_v15, %v4247_v9  ;;  %v6687_v6 = vld [vmem:[#allocation5 + $0xc0] ss:$8 sps:$4 sm:$0xff]   ;;  %v6690_v58 = vld [vmem:[#allocation5 + $0xd0] ss:$8 sps:$4 sm:$0xff]  }
 0x7f9   : > { %v4272_v18 = vsel %vm456_vm3, %v4267_v22, %v4271_v34  ;;  %v6695_v7 = vld [vmem:[#allocation5 + $0xe4] ss:$8 sps:$4 sm:$0xff]   ;;  %v6698_v9 = vld [vmem:[#allocation5 + $0xf4] ss:$8 sps:$4 sm:$0xff]   ;;  %v6702_v15 = vld [vmem:[#allocation5 + $0x110] ss:$8 sps:$4 sm:$0xff]  }
 0x7fa   : > { %v4260_v16 = vsel %vm456_vm3, %v4255_v10, %v4259_v11  ;;  %v6696_v10 = vld [vmem:[#allocation5 + $0xf0] ss:$8 sps:$4 sm:$0xff]   ;;  %v6701_v11 = vld [vmem:[#allocation5 + $0x104] ss:$8 sps:$4 sm:$0xff]   ;;  %v6704_v13 = vld [vmem:[#allocation5 + $0x114] ss:$8 sps:$4 sm:$0xff]  }
 0x7fb   : > { %4490 = vmatprep.mubr.bf16.mxu0 %v4260_v16  ;;  %v6705_v16 = vld [vmem:[#allocation5 + $0x240] ss:$8 sps:$4 sm:$0xff]   ;;  %v6714_v17 = vld [vmem:[#allocation5 + $0x270] ss:$8 sps:$4 sm:$0xff]   ;;  %v6719_v32 = vld [vmem:[#allocation5 + $0x284] ss:$8 sps:$4 sm:$0xff]  }
 0x7fc   : > { %4491 = vmatmul.mubr.bf16.vlgmr.msra.gmra.mrb[8].mxu0 %v4248_v21  ;;  %v6708_v21 = vld [vmem:[#allocation5 + $0x250] ss:$8 sps:$4 sm:$0xff]   ;;  %v6711_v29 = vld [vmem:[#allocation5 + $0x260] ss:$8 sps:$4 sm:$0xff]   ;;  %v6722_v34 = vld [vmem:[#allocation5 + $0x294] ss:$8 sps:$4 sm:$0xff]  }
 0x7fd   : > { %4502 = vmatpush1.bf16.msra.mxu0 %v6645_v26  ;;  %4533 = vmatprep.mubr.bf16.mxu0 %v6835_v0  ;;  %v6707_v26 = vld [vmem:[#allocation5 + $0x244] ss:$8 sps:$4 sm:$0xff]   ;;  %v6717_v33 = vld [vmem:[#allocation5 + $0x280] ss:$8 sps:$4 sm:$0xff]  }
 0x7fe   : > { %4503 = vmatprep.subr.bf16.mxu0 %v6650_v19  ;;  %v6710_v19 = vld [vmem:[#allocation5 + $0x254] ss:$8 sps:$4 sm:$0xff]   ;;  %v6725_v22 = vld [vmem:[#allocation5 + $0x2a4] ss:$8 sps:$4 sm:$0xff]  }
 0x801   : > { %4504 = vmatpush1.bf16.msra.mxu0 %v6648_v28  ;;  %v6713_v28 = vld [vmem:[#allocation5 + $0x264] ss:$8 sps:$4 sm:$0xff]  }
 0x802   : > { %4726 = vmatprep.subr.bf16.mxu0 %v6653_v31  ;;  %v6716_v31 = vld [vmem:[#allocation5 + $0x274] ss:$8 sps:$4 sm:$0xff]  }
 0x808   : > { %5846 = vmatmul.mubr.msk.bf16.vlgmr.msra.gmra.mrb[8].mxu0 %vm420_vm5, %v4272_v18  ;;  %v6726_v18 = vld [vmem:[#allocation5 + $0x2b0] ss:$8 sps:$4 sm:$0xff]  }
 0x809   : > { %4727 = vmatpush1.bf16.msra.mxu0 %v6651_v25  ;;  %4758 = vmatprep.mubr.bf16.mxu0 %v4159_v43  ;;  %v6669_v43 = vld [vmem:[#allocation5 + $0x60] ss:$8 sps:$4 sm:$0xff]   ;;  %v6720_v25 = vld [vmem:[#allocation5 + $0x290] ss:$8 sps:$4 sm:$0xff]  }
 0x80a   : > { %4728 = vmatprep.subr.bf16.mxu0 %v6656_v24  ;;  %v6728_v24 = vld [vmem:[#allocation5 + $0x2b4] ss:$8 sps:$4 sm:$0xff]  }
 0x80d   : > { %4729 = vmatpush1.bf16.msra.mxu0 %v6654_v35  ;;  %v6731_v35 = vld [vmem:[#allocation5 + $0x2c4] ss:$8 sps:$4 sm:$0xff]  }
 0x80e   : > { %4730 = vmatprep.subr.bf16.mxu0 %v6659_v36  ;;  %v6729_v36 = vld [vmem:[#allocation5 + $0x2c0] ss:$8 sps:$4 sm:$0xff]  }
 0x811   : > { %4731 = vmatpush1.bf16.msra.mxu0 %v6657_v37  ;;  %v6734_v37 = vld [vmem:[#allocation5 + $0x2d4] ss:$8 sps:$4 sm:$0xff]  }
 0x812   : > { %4732 = vmatprep.subr.bf16.mxu0 %v6662_v38  ;;  %v6732_v38 = vld [vmem:[#allocation5 + $0x2d0] ss:$8 sps:$4 sm:$0xff]  }
 0x815   : > { %4733 = vmatpush1.bf16.msra.mxu0 %v6660_v39  ;;  %v6737_v39 = vld [vmem:[#allocation5 + $0x2e4] ss:$8 sps:$4 sm:$0xff]  }
 0x816   : > { %4734 = vmatprep.subr.bf16.mxu0 %v6665_v50  ;;  %v6735_v50 = vld [vmem:[#allocation5 + $0x2e0] ss:$8 sps:$4 sm:$0xff]  }
 0x819   : > { %4735 = vmatpush1.bf16.msra.mxu0 %v6663_v55  ;;  %v6740_v55 = vld [vmem:[#allocation5 + $0x2f4] ss:$8 sps:$4 sm:$0xff]  }
 0x81a   : > { %4736 = vmatprep.subr.bf16.mxu0 %v6668_v47  ;;  %v6738_v47 = vld [vmem:[#allocation5 + $0x2f0] ss:$8 sps:$4 sm:$0xff]  }
 0x81d   : > { %4737 = vmatpush1.bf16.msra.mxu0 %v6666_v60  ;;  %v6743_v60 = vld [vmem:[#allocation5 + $0x304] ss:$8 sps:$4 sm:$0xff]  }
 0x81e   : > { %4738 = vmatprep.subr.bf16.mxu0 %v6671_v42  ;;  %v6741_v42 = vld [vmem:[#allocation5 + $0x300] ss:$8 sps:$4 sm:$0xff]  }
 0x821   : > { %4739 = vmatpush1.bf16.msra.mxu0 %v6669_v43  ;;  %v6746_v43 = vld [vmem:[#allocation5 + $0x314] ss:$8 sps:$4 sm:$0xff]  }
 0x822   : > { %4740 = vmatprep.subr.bf16.mxu0 %v6674_v48  ;;  %v6744_v48 = vld [vmem:[#allocation5 + $0x310] ss:$8 sps:$4 sm:$0xff]  }
 0x825   : > { %4741 = vmatpush1.bf16.msra.mxu0 %v6672_v61  ;;  %v6749_v61 = vld [vmem:[#allocation5 + $0x324] ss:$8 sps:$4 sm:$0xff]  }
 0x826   : > { %4742 = vmatprep.subr.bf16.mxu0 %v6677_v63  ;;  %v6747_v63 = vld [vmem:[#allocation5 + $0x320] ss:$8 sps:$4 sm:$0xff]  }
 0x829   : > { %4743 = vmatpush1.bf16.msra.mxu0 %v6675_v56  ;;  %v6752_v56 = vld [vmem:[#allocation5 + $0x334] ss:$8 sps:$4 sm:$0xff]  }
 0x82a   : > { %4744 = vmatprep.subr.bf16.mxu0 %v6680_v1  ;;  %v6750_v1 = vld [vmem:[#allocation5 + $0x330] ss:$8 sps:$4 sm:$0xff]  }
 0x82d   : > { %4745 = vmatpush1.bf16.msra.mxu0 %v6678_v59  ;;  %v6755_v59 = vld [vmem:[#allocation5 + $0x344] ss:$8 sps:$4 sm:$0xff]  }
 0x82e   : > { %4746 = vmatprep.subr.bf16.mxu0 %v6683_v2  ;;  %v4856_v2 = vrot.slane %v8038_v53, 1  ;;  %v4861_v53 = vrot.slane %v8045_v20, 1 }
 0x831   : > { %4747 = vmatpush1.bf16.msra.mxu0 %v6681_v3  ;;  %v4855_v3 = vrot.slane %v8035_v62, 1 }
 0x832   : > { %4748 = vmatprep.subr.bf16.mxu0 %v6686_v4  ;;  %v6753_v4 = vld [vmem:[#allocation5 + $0x340] ss:$8 sps:$4 sm:$0xff]  }
 0x835   : > { %4749 = vmatpush1.bf16.msra.mxu0 %v6684_v5  ;;  %v6758_v5 = vld [vmem:[#allocation5 + $0x354] ss:$8 sps:$4 sm:$0xff]  }
 0x836   : > { %4750 = vmatprep.subr.bf16.mxu0 %v6689_v40  ;;  %v4857_v40 = vsel %vm683_vm2, %v4855_v3, %v4856_v2 }
 0x839   : > { %4751 = vmatpush1.bf16.msra.mxu0 %v6687_v6  ;;  %v6756_v6 = vld [vmem:[#allocation5 + $0x350] ss:$8 sps:$4 sm:$0xff]  }
 0x83a   : > { %4752 = vmatprep.subr.bf16.mxu0 %v6692_v46  ;;  %v4862_v46 = vrot.slane %v8049_v23, 1 }
 0x83d   : > { %4753 = vmatpush1.bf16.msra.mxu0 %v6690_v58  ;;  %v4863_v58 = vsel %vm683_vm2, %v4861_v53, %v4862_v46 }
 0x83e   : > { %4754 = vmatprep.subr.bf16.mxu0 %v6695_v7 }
 0x841   : > { %4755 = vmatpush1.bf16.msra.mxu0 %v6693_v8 }
 0x842   : > { %4756 = vmatprep.subr.bf16.mxu0 %v6698_v9 }
 0x845   : > { %4757 = vmatpush1.bf16.msra.mxu0 %v6696_v10 }
 0x846   : > { %4769 = vmatprep.subr.bf16.mxu0 %v6701_v11 }
 0x848   : > { %4759 = vmatmul.mubr.bf16.vlgmr.msra.gmra.mrb[8].mxu0 %v8035_v62  ;;  %v3053_v62 = vld [vmem:[%s8100_s10] sm:$0x3] }
 0x849   : > { %4770 = vmatpush1.bf16.msra.mxu0 %v6699_v12  ;;  %4801 = vmatprep.mubr.bf16.mxu0 %v6835_v0  ;;  %v5143_v7 = vrot.slane %v3053_v62, %v7194_v27  ;;  %v5147_v8 = vrot.slane %v3053_v62, %v7202_v30 }
 0x84a   : > { %4771 = vmatprep.subr.bf16.mxu0 %v6704_v13 }
 0x84d   : > { %4772 = vmatpush1.bf16.msra.mxu0 %v6702_v15 }
 0x84e   : > { %5049 = vmatprep.subr.bf16.mxu0 %v6707_v26 }
 0x854   : > { %5883 = vmatmul.mubr.msk.bf16.vlgmr.msra.gmra.mrb[8].mxu0 %vm420_vm5, %v8045_v20 }
 0x855   : > { %5050 = vmatpush1.bf16.msra.mxu0 %v6705_v16  ;;  %5081 = vmatprep.mubr.bf16.mxu0 %v8043_v14  ;;  %v6723_v14 = vld [vmem:[#allocation5 + $0x2a0] ss:$8 sps:$4 sm:$0xff]  }
 0x856   : > { %5051 = vmatprep.subr.bf16.mxu0 %v6710_v19 }
 0x859   : > { %5052 = vmatpush1.bf16.msra.mxu0 %v6708_v21 }
 0x85a   : > { %5053 = vmatprep.subr.bf16.mxu0 %v6713_v28 }
 0x85d   : > { %5054 = vmatpush1.bf16.msra.mxu0 %v6711_v29 }
 0x85e   : > { %5055 = vmatprep.subr.bf16.mxu0 %v6716_v31 }
 0x861   : > { %5056 = vmatpush1.bf16.msra.mxu0 %v6714_v17 }
 0x862   : > { %5057 = vmatprep.subr.bf16.mxu0 %v6719_v32 }
 0x865   : > { %5058 = vmatpush1.bf16.msra.mxu0 %v6717_v33 }
 0x866   : > { %5059 = vmatprep.subr.bf16.mxu0 %v6722_v34 }
 0x869   : > { %5060 = vmatpush1.bf16.msra.mxu0 %v6720_v25 }
 0x86a   : > { %5061 = vmatprep.subr.bf16.mxu0 %v6725_v22 }
 0x86d   : > { %5062 = vmatpush1.bf16.msra.mxu0 %v6723_v14 }
 0x86e   : > { %5063 = vmatprep.subr.bf16.mxu0 %v6728_v24 }
 0x871   : > { %5064 = vmatpush1.bf16.msra.mxu0 %v6726_v18 }
 0x872   : > { %5065 = vmatprep.subr.bf16.mxu0 %v6731_v35 }
 0x875   : > { %5066 = vmatpush1.bf16.msra.mxu0 %v6729_v36 }
 0x876   : > { %5067 = vmatprep.subr.bf16.mxu0 %v6734_v37 }
 0x879   : > { %5068 = vmatpush1.bf16.msra.mxu0 %v6732_v38 }
 0x87a   : > { %5069 = vmatprep.subr.bf16.mxu0 %v6737_v39 }
 0x87d   : > { %5070 = vmatpush1.bf16.msra.mxu0 %v6735_v50 }
 0x87e   : > { %5071 = vmatprep.subr.bf16.mxu0 %v6740_v55 }
 0x881   : > { %5072 = vmatpush1.bf16.msra.mxu0 %v6738_v47 }
 0x882   : > { %5073 = vmatprep.subr.bf16.mxu0 %v6743_v60 }
 0x885   : > { %5074 = vmatpush1.bf16.msra.mxu0 %v6741_v42 }
 0x886   : > { %5075 = vmatprep.subr.bf16.mxu0 %v6746_v43 }
 0x889   : > { %5076 = vmatpush1.bf16.msra.mxu0 %v6744_v48 }
 0x88a   : > { %5077 = vmatprep.subr.bf16.mxu0 %v6749_v61 }
 0x88d   : > { %5078 = vmatpush1.bf16.msra.mxu0 %v6747_v63 }
 0x88e   : > { %5079 = vmatprep.subr.bf16.mxu0 %v6752_v56 }
 0x891   : > { %5080 = vmatpush1.bf16.msra.mxu0 %v6750_v1 }
 0x892   : > { %5092 = vmatprep.subr.bf16.mxu0 %v6755_v59 }
 0x894   : > { %5082 = vmatmul.mubr.bf16.vlgmr.msra.gmra.mrb[8].mxu0 %v4857_v40 }
 0x895   : > { %5093 = vmatpush1.bf16.msra.mxu0 %v6753_v4  ;;  %5124 = vmatprep.mubr.bf16.mxu0 %v6835_v0 }
 0x896   : > { %5094 = vmatprep.subr.bf16.mxu0 %v6758_v5 }
 0x899   : > { %5095 = vmatpush1.bf16.msra.mxu0 %v6756_v6 }
 0x8a0   : > { %5920 = vmatmul.mubr.msk.bf16.vlgmr.msra.gmra.mrb[8].mxu0 %vm420_vm5, %v4863_v58 }
 0x973   : > { %v5126_v9 = vpop.f32.mrb[8].mxu0 }
 0x974   : > { %v5150_v0 = vadd.f32 %v5143_v7, %v5126_v9  ;;  %v5128_v10 = vpop.f32.mrb[9].mxu0 }
 0x975   : > { %v5151_v11 = vadd.f32 %v5147_v8, %v5128_v10  ;;  %v5130_v23 = vpop.f32.mrb[10].mxu0 }
 0x976   : > { %v5154_v20 = vadd.f32 %v5150_v0, %v3048_v54  ;;  %v5152_v12 = vadd.f32 %v5143_v7, %v5130_v23  ;;  %v5132_v13 = vpop.f32.mrb[11].mxu0 }
 0x977   : > { %v5155_v27 = vadd.f32 %v5151_v11, %v3049_v45  ;;  %v5153_v15 = vadd.f32 %v5147_v8, %v5132_v13 }
 0x978   : > { %v5158_v30 = vmax.f32 %v5154_v20, 0.0  ;;  %v5156_v26 = vadd.f32 %v5152_v12, %v3050_v49 }
 0x979   : > { %v5159_v16 = vmax.f32 %v5155_v27, 0.0  ;;  %v5157_v19 = vadd.f32 %v5153_v15, %v3051_v52 }
 0x97a   : > { %5162 = vst [vmem:[%s416_s26] sm:$0xff] %v5158_v30  ;;  %v5160_v41 = vmax.f32 %v5156_v26, 0.0 }
 0x97b   : > { %5163 = vst [vmem:[%s416_s26 + $0x8] sm:$0xff] %v5159_v16  ;;  %v5161_v54 = vmax.f32 %v5157_v19, 0.0 }
 0x97c   : > { %5164 = vst [vmem:[%s416_s26 + $0x10] sm:$0xff] %v5160_v41 }
 0x97d   : > { %5165 = vst [vmem:[%s416_s26 + $0x18] sm:$0xff] %v5161_v54 }
 0x97e PF: > { %s23_s17 = sadd.s32 1, %s6829_s17  }
 0x97f   : > { %p20_p9 = scmp.ge.s32.totalorder %s23_s17, 4  }
 0x981   :  { %22 = sbr.rel (!%p20_p9) target bundleno = 2 (0x2), region = 114 }
 0x988   :  { %5187 = vsyncpa [#allocation4], 1 }
 0x989   :  { %5189 = vsyncpa [#allocation4 + $0x1], 1 }
 0x98a   :  { %5190 = vsyncpa [#allocation6], 1 }

// kernel: forward.4
= control target key start
LH: loop header
LB: loop body
LE: loop exit
PB: predicated region body
PF: predicated region fallthrough
CT: control target
= control target key end

     0   :  { %s5504_s21 = smov 0   ;;  %s6980_s0 = inlined_call_operand.vmem [shape: f32[2,9,576], index: 0, kind: input, shape index: {}]   ;;  %s6981_s1 = inlined_call_operand.vmem [shape: f32[2,8,128], index: 1, kind: input, shape index: {}]   ;;  %s6982_s2 = inlined_call_operand.vmem [shape: bf16[2,576,192], index: 2, kind: input, shape index: {}]   ;;  %s6983_s3 = inlined_call_operand.vmem [shape: f32[1,192], index: 3, kind: input, shape index: {}]   ;;  %s6984_s4 = inlined_call_operand.vmem [shape: bf16[1,128,192], index: 4, kind: input, shape index: {}]   ;;  %s6985_s5 = inlined_call_operand.vmem [shape: f32[1,192], index: 5, kind: input, shape index: {}]   ;;  %s6986_s6 = inlined_call_operand.vmem [shape: bf16[3,240,192], index: 6, kind: input, shape index: {}]   ;;  %s6987_s7 = inlined_call_operand.vmem [shape: f32[1,192], index: 7, kind: input, shape index: {}]   ;;  %s6988_s8 = inlined_call_operand.vmem [shape: bf16[3,240,192], index: 8, kind: input, shape index: {}]   ;;  %s6989_s9 = inlined_call_operand.vmem [shape: f32[1,192], index: 9, kind: input, shape index: {}]   ;;  %s6990_s10 = inlined_call_operand.vmem [shape: bf16[3,240,192], index: 10, kind: input, shape index: {}]   ;;  %s6991_s11 = inlined_call_operand.vmem [shape: f32[1,192], index: 11, kind: input, shape index: {}]   ;;  %s6992_s12 = inlined_call_operand.vmem [shape: f32[2,8,192], index: 12, kind: output, shape index: {}]  }
   0x1 LB: > { %s4050_s22 = sadd.s32 4294967295, %s5434_s21   ;;  %p4054_p0 = scmp.ge.s32.totalorder %s5434_s21, 1  ;;  %s5434_s21 = sphi %s5504_s21, %s22_s21  }
   0x2   : > { %p371_p1 = scmp.lt.s32.totalorder %s5434_s21, 3 }
   0x4   : > { %p372_p2 = pnand %p4054_p0, %p371_p1 }
   0x5   : > { %v4783_v0 = vld [vmem:[%s6982_s2 + $0x244] ss:$8 sps:$4 sm:$0xff] (!%p372_p2)   ;;  %v4787_v2 = vld [vmem:[%s6982_s2 + $0x240] ss:$8 sps:$4 sm:$0xff] (!%p372_p2)   ;;  %v4789_v4 = vld [vmem:[%s6982_s2 + $0x254] ss:$8 sps:$4 sm:$0xff] (!%p372_p2)  }
   0x6   : > { %375 = sbr.rel (%p372_p2) target bundleno = 1759 (0x6df), region = 68  ;;  %v4785_v1 = vld [vmem:[%s6982_s2 + $0x344] ss:$8 sps:$4 sm:$0xff] (!%p372_p2)   ;;  %1002 = vmatprep.subr.bf16.mxu0 (!%p372_p2), %v4783_v0  ;;  %v4788_v3 = vld [vmem:[%s6982_s2 + $0x340] ss:$8 sps:$4 sm:$0xff] (!%p372_p2)   ;;  %p417_p3 = scmp.lt.s32.totalorder (!%p372_p2), %s4050_s22, 1 }
   0x7   : > { %1043 = vmatprep.subr.bf16.mxu1 (!%p372_p2), %v4785_v1  ;;  %1003 = vmatpush1.bf16.msra.mxu0 (!%p372_p2), %v4787_v2  ;;  %v4791_v5 = vld [vmem:[%s6982_s2 + $0x354] ss:$8 sps:$4 sm:$0xff] (!%p372_p2)   ;;  %v4793_v6 = vld [vmem:[%s6982_s2 + $0x250] ss:$8 sps:$4 sm:$0xff] (!%p372_p2)   ;;  %v4795_v8 = vld [vmem:[%s6982_s2 + $0x264] ss:$8 sps:$4 sm:$0xff] (!%p372_p2)  }
   0x8   : > { %1044 = vmatpush1.bf16.msra.mxu1 (!%p372_p2), %v4788_v3  ;;  %1004 = vmatprep.subr.bf16.mxu0 (!%p372_p2), %v4789_v4  ;;  %v4794_v7 = vld [vmem:[%s6982_s2 + $0x350] ss:$8 sps:$4 sm:$0xff] (!%p372_p2)   ;;  %v4797_v9 = vld [vmem:[%s6982_s2 + $0x364] ss:$8 sps:$4 sm:$0xff] (!%p372_p2)   ;;  %v4799_v10 = vld [vmem:[%s6982_s2 + $0x260] ss:$8 sps:$4 sm:$0xff] (!%p372_p2)  }
   0x9   : > { %1045 = vmatprep.subr.bf16.mxu1 (!%p372_p2), %v4791_v5  ;;  %v4800_v11 = vld [vmem:[%s6982_s2 + $0x360] ss:$8 sps:$4 sm:$0xff] (!%p372_p2)   ;;  %v4801_v12 = vld [vmem:[%s6982_s2 + $0x274] ss:$8 sps:$4 sm:$0xff] (!%p372_p2)   ;;  %v4805_v14 = vld [vmem:[%s6982_s2 + $0x270] ss:$8 sps:$4 sm:$0xff] (!%p372_p2)  }
   0xa   : > { %v4803_v13 = vld [vmem:[%s6982_s2 + $0x374] ss:$8 sps:$4 sm:$0xff] (!%p372_p2)   ;;  %v4806_v15 = vld [vmem:[%s6982_s2 + $0x370] ss:$8 sps:$4 sm:$0xff] (!%p372_p2)   ;;  %v4807_v16 = vld [vmem:[%s6982_s2 + $0x284] ss:$8 sps:$4 sm:$0xff] (!%p372_p2)  }
   0xb   : > { %1005 = vmatpush1.bf16.msra.mxu0 (!%p372_p2), %v4793_v6  ;;  %v4809_v17 = vld [vmem:[%s6982_s2 + $0x384] ss:$8 sps:$4 sm:$0xff] (!%p372_p2)   ;;  %v4811_v18 = vld [vmem:[%s6982_s2 + $0x280] ss:$8 sps:$4 sm:$0xff] (!%p372_p2)   ;;  %v4813_v20 = vld [vmem:[%s6982_s2 + $0x294] ss:$8 sps:$4 sm:$0xff] (!%p372_p2)  }
   0xc   : > { %1046 = vmatpush1.bf16.msra.mxu1 (!%p372_p2), %v4794_v7  ;;  %1006 = vmatprep.subr.bf16.mxu0 (!%p372_p2), %v4795_v8  ;;  %v4812_v19 = vld [vmem:[%s6982_s2 + $0x380] ss:$8 sps:$4 sm:$0xff] (!%p372_p2)   ;;  %v4815_v21 = vld [vmem:[%s6982_s2 + $0x394] ss:$8 sps:$4 sm:$0xff] (!%p372_p2)   ;;  %v4817_v22 = vld [vmem:[%s6982_s2 + $0x290] ss:$8 sps:$4 sm:$0xff] (!%p372_p2)  }
   0xd   : > { %1047 = vmatprep.subr.bf16.mxu1 %v4797_v9  ;;  %v4818_v23 = vld [vmem:[%s6982_s2 + $0x390] ss:$8 sps:$4 sm:$0xff]   ;;  %v4819_v24 = vld [vmem:[%s6982_s2 + $0x2a4] ss:$8 sps:$4 sm:$0xff]   ;;  %v4823_v26 = vld [vmem:[%s6982_s2 + $0x2a0] ss:$8 sps:$4 sm:$0xff]  }
   0xe   : > { %v4821_v25 = vld [vmem:[%s6982_s2 + $0x3a4] ss:$8 sps:$4 sm:$0xff]   ;;  %v4824_v27 = vld [vmem:[%s6982_s2 + $0x3a0] ss:$8 sps:$4 sm:$0xff]   ;;  %v4825_v28 = vld [vmem:[%s6982_s2 + $0x2b4] ss:$8 sps:$4 sm:$0xff]  }
   0xf   : > { %1007 = vmatpush1.bf16.msra.mxu0 %v4799_v10  ;;  %v4827_v29 = vld [vmem:[%s6982_s2 + $0x3b4] ss:$8 sps:$4 sm:$0xff]   ;;  %v4829_v30 = vld [vmem:[%s6982_s2 + $0x2b0] ss:$8 sps:$4 sm:$0xff]   ;;  %v4831_v32 = vld [vmem:[%s6982_s2 + $0x2c4] ss:$8 sps:$4 sm:$0xff]  }
  0x10   : > { %1048 = vmatpush1.bf16.msra.mxu1 %v4800_v11  ;;  %1008 = vmatprep.subr.bf16.mxu0 %v4801_v12  ;;  %v4830_v31 = vld [vmem:[%s6982_s2 + $0x3b0] ss:$8 sps:$4 sm:$0xff]   ;;  %v4833_v33 = vld [vmem:[%s6982_s2 + $0x3c4] ss:$8 sps:$4 sm:$0xff]   ;;  %v4835_v34 = vld [vmem:[%s6982_s2 + $0x2c0] ss:$8 sps:$4 sm:$0xff]  }
  0x11   : > { %1049 = vmatprep.subr.bf16.mxu1 %v4803_v13  ;;  %v4836_v35 = vld [vmem:[%s6982_s2 + $0x3c0] ss:$8 sps:$4 sm:$0xff]   ;;  %s6994_s22 = smov (!%p417_p3, %s4050_s22), 1  ;;  %v4837_v36 = vld [vmem:[%s6982_s2 + $0x2d4] ss:$8 sps:$4 sm:$0xff]   ;;  %vm998_vm0 = vcmask 523264  }
  0x12   : > { %v4839_v37 = vld [vmem:[%s6982_s2 + $0x3d4] ss:$8 sps:$4 sm:$0xff]   ;;  %v4841_v38 = vld [vmem:[%s6982_s2 + $0x2d0] ss:$8 sps:$4 sm:$0xff]   ;;  %s4771_s19 = smul.u32 80, %s6994_s22  ;;  %s4056_s24 = sshll.u32 %s6994_s22, 3 }
  0x13   : > { %1009 = vmatpush1.bf16.msra.mxu0 %v4805_v14  ;;  %v4842_v39 = vld [vmem:[%s6982_s2 + $0x3d0] ss:$8 sps:$4 sm:$0xff]   ;;  %v4843_v40 = vld [vmem:[%s6982_s2 + $0x2e4] ss:$8 sps:$4 sm:$0xff]   ;;  %v4847_v42 = vld [vmem:[%s6982_s2 + $0x2e0] ss:$8 sps:$4 sm:$0xff]   ;;  %s425_s30 = scalar_lea.vmem %s6981_s1, %s4056_s24 }
  0x14   : > { %1050 = vmatpush1.bf16.msra.mxu1 %v4806_v15  ;;  %1010 = vmatprep.subr.bf16.mxu0 %v4807_v16  ;;  %v4845_v41 = vld [vmem:[%s6982_s2 + $0x3e4] ss:$8 sps:$4 sm:$0xff]   ;;  %v4848_v43 = vld [vmem:[%s6982_s2 + $0x3e0] ss:$8 sps:$4 sm:$0xff]   ;;  %s5654_s16 = scalar_lea.vmem %s6980_s0, %s4771_s19  ;;  %v4849_v44 = vld [vmem:[%s6982_s2 + $0x2f4] ss:$8 sps:$4 sm:$0xff]  }
  0x15   : > { %1051 = vmatprep.subr.bf16.mxu1 %v4809_v17  ;;  %v4851_v45 = vld [vmem:[%s6982_s2 + $0x3f4] ss:$8 sps:$4 sm:$0xff]   ;;  %v439_v46 = vld [vmem:[%s5654_s16 + $0x8] sm:$0xff]  ;;  %v444_v47 = vld [vmem:[%s5654_s16 + $0x30] sm:$0x1]  ;;  %vm433_vm1 = vcmask 916480  }
  0x16   : > { %v441_v48 = vld [vmem:[%s5654_s16 + $0x18] sm:$0xff]  ;;  %v446_v49 = vld [vmem:[%s5654_s16 + $0x40] sm:$0x1]  ;;  %v4855_v52 = vld [vmem:[%s6982_s2 + $0x304] ss:$8 sps:$4 sm:$0xff]   ;;  %v5675_v53 = vpack.c.bf16 %v444_v47, %v439_v46  ;;  %vm436_vm2 = vcmask 910336  }
  0x17   : > { %1011 = vmatpush1.bf16.msra.mxu0 %v4811_v18  ;;  %v4853_v50 = vld [vmem:[%s6982_s2 + $0x2f0] ss:$8 sps:$4 sm:$0xff]   ;;  %v5677_v54 = vpack.c.bf16 %v446_v49, %v441_v48  ;;  %v4857_v55 = vld [vmem:[%s6982_s2 + $0x404] ss:$8 sps:$4 sm:$0xff]   ;;  %v4859_v56 = vld [vmem:[%s6982_s2 + $0x300] ss:$8 sps:$4 sm:$0xff]  }
  0x18   : > { %1052 = vmatpush1.bf16.msra.mxu1 %v4812_v19  ;;  %1012 = vmatprep.subr.bf16.mxu0 %v4813_v20  ;;  %v4854_v51 = vld [vmem:[%s6982_s2 + $0x3f0] ss:$8 sps:$4 sm:$0xff]   ;;  %v4860_v57 = vld [vmem:[%s6982_s2 + $0x400] ss:$8 sps:$4 sm:$0xff]   ;;  %v607_v58 = vshrl.u32 %v5675_v53, 16  ;;  %v609_v59 = vshll.u32 %v5675_v53, 16 }
  0x19   : > { %1053 = vmatprep.subr.bf16.mxu1 %v4815_v21  ;;  %v621_v60 = vshrl.u32 %v5677_v54, 16  ;;  %v623_v61 = vshll.u32 %v5677_v54, 16  ;;  %v4861_v62 = vld [vmem:[%s6982_s2 + $0x314] ss:$8 sps:$4 sm:$0xff]   ;;  %v443_v0 = vld [vmem:[%s5654_s16 + $0x28] sm:$0x1] }
  0x1a   : > { %v4863_v63 = vld [vmem:[%s6982_s2 + $0x414] ss:$8 sps:$4 sm:$0xff]   ;;  %v611_v1 = vrot.slane %v609_v59, 1  ;;  %v438_v3 = vld [vmem:[%s5654_s16] sm:$0xff]  ;;  %v445_v5 = vld [vmem:[%s5654_s16 + $0x38] sm:$0x1] }
  0x1b   : > { %1013 = vmatpush1.bf16.msra.mxu0 %v4817_v22  ;;  %v625_v2 = vrot.slane %v623_v61, 1  ;;  %v440_v4 = vld [vmem:[%s5654_s16 + $0x10] sm:$0xff]  ;;  %v5705_v9 = vpack.c.bf16 %v443_v0, %v438_v3  ;;  %v4867_v12 = vld [vmem:[%s6982_s2 + $0x324] ss:$8 sps:$4 sm:$0xff]   ;;  %v4871_v16 = vld [vmem:[%s6982_s2 + $0x320] ss:$8 sps:$4 sm:$0xff]  }
  0x1c   : > { %1054 = vmatpush1.bf16.msra.mxu1 %v4818_v23  ;;  %1014 = vmatprep.subr.bf16.mxu0 %v4819_v24  ;;  %v612_v6 = vor.u32 %v611_v1, %v607_v58  ;;  %v4865_v8 = vld [vmem:[%s6982_s2 + $0x310] ss:$8 sps:$4 sm:$0xff]   ;;  %v5707_v10 = vpack.c.bf16 %v445_v5, %v440_v4  ;;  %v4869_v13 = vld [vmem:[%s6982_s2 + $0x424] ss:$8 sps:$4 sm:$0xff]   ;;  %v4872_v17 = vld [vmem:[%s6982_s2 + $0x420] ss:$8 sps:$4 sm:$0xff]  }
  0x1d   : > { %1055 = vmatprep.subr.bf16.mxu1 %v4821_v25  ;;  %v626_v7 = vor.u32 %v625_v2, %v621_v60  ;;  %v4866_v11 = vld [vmem:[%s6982_s2 + $0x410] ss:$8 sps:$4 sm:$0xff]   ;;  %v602_v14 = vshll.u32 %v5705_v9, 16  ;;  %v4873_v18 = vld [vmem:[%s6982_s2 + $0x334] ss:$8 sps:$4 sm:$0xff]   ;;  %v600_v21 = vshrl.u32 %v5705_v9, 16 }
  0x1e   : > { %1034 = vmatprep.mubr.bf16.mxu0 %v612_v6  ;;  %v616_v15 = vshll.u32 %v5707_v10, 16  ;;  %v4875_v19 = vld [vmem:[%s6982_s2 + $0x434] ss:$8 sps:$4 sm:$0xff]   ;;  %v4877_v20 = vld [vmem:[%s6982_s2 + $0x330] ss:$8 sps:$4 sm:$0xff]   ;;  %v614_v23 = vshrl.u32 %v5707_v10, 16 }
  0x1f   : > { %1015 = vmatpush1.bf16.msra.mxu0 %v4823_v26  ;;  %1075 = vmatprep.mubr.bf16.mxu1 %v626_v7  ;;  %v604_v22 = vrot.slane %v602_v14, 1  ;;  %v4878_v25 = vld [vmem:[%s6982_s2 + $0x430] ss:$8 sps:$4 sm:$0xff]   ;;  %v4881_v26 = vld [vmem:[%s6982_s2 + $0x444] ss:$8 sps:$4 sm:$0xff]   ;;  %s5438_s29 = smov 24  }
  0x20   : > { %1056 = vmatpush1.bf16.msra.mxu1 %v4824_v27  ;;  %1016 = vmatprep.subr.bf16.mxu0 %v4825_v28  ;;  %v618_v24 = vrot.slane %v616_v15, 1  ;;  %v4884_v27 = vld [vmem:[%s6982_s2 + $0x4] ss:$8 sps:$4 sm:$0xff]   ;;  %v4879_v28 = vld [vmem:[%s6982_s2 + $0x440] ss:$8 sps:$4 sm:$0xff]   ;;  %vm1788_vm3 = vcmask 1047745  }
  0x21   : > { %1057 = vmatprep.subr.bf16.mxu1 %v4827_v29  ;;  %v4882_v29 = vld [vmem:[%s6982_s2] ss:$8 sps:$4 sm:$0xff]   ;;  %v4902_v46 = vld [vmem:[%s6982_s2 + $0x34] ss:$8 sps:$4 sm:$0xff]   ;;  %v4897_v47 = vld [vmem:[%s6982_s2 + $0x470] ss:$8 sps:$4 sm:$0xff]  }
  0x22   : > { %v4914_v58 = vld [vmem:[%s6982_s2 + $0x114] ss:$8 sps:$4 sm:$0xff]   ;;  %v4909_v59 = vld [vmem:[%s6982_s2 + $0x50] ss:$8 sps:$4 sm:$0xff]   ;;  %v4917_v61 = vld [vmem:[%s6982_s2 + $0x64] ss:$8 sps:$4 sm:$0xff]  }
  0x23   : > { %1017 = vmatpush1.bf16.msra.mxu0 %v4829_v30  ;;  %v605_v30 = vor.u32 %v604_v22, %v600_v21  ;;  %v4912_v60 = vld [vmem:[%s6982_s2 + $0x110] ss:$8 sps:$4 sm:$0xff]   ;;  %v4918_v0 = vld [vmem:[%s6982_s2 + $0x120] ss:$8 sps:$4 sm:$0xff]   ;;  %v4923_v1 = vld [vmem:[%s6982_s2 + $0x74] ss:$8 sps:$4 sm:$0xff]  }
  0x24   : > { %1058 = vmatpush1.bf16.msra.mxu1 %v4830_v31  ;;  %1018 = vmatprep.subr.bf16.mxu0 %v4831_v32  ;;  %v619_v31 = vor.u32 %v618_v24, %v614_v23  ;;  %v442_v32 = vld [vmem:[%s5654_s16 + $0x20] sm:$0xff]  ;;  %v4921_v2 = vld [vmem:[%s6982_s2 + $0x70] ss:$8 sps:$4 sm:$0xff]   ;;  %vm1792_vm4 = vcmask 1040576   ;;  %vm1784_vm5 = vcmask 195584   ;;  %vm1790_vm6 = vcmask 719873  }
  0x25   : > { %1059 = vmatprep.subr.bf16.mxu1 %v4833_v33  ;;  %v447_v33 = vld [vmem:[%s5654_s16 + $0x48] sm:$0x1]  ;;  %v4924_v3 = vld [vmem:[%s6982_s2 + $0x130] ss:$8 sps:$4 sm:$0xff]   ;;  %v4929_v4 = vld [vmem:[%s6982_s2 + $0x84] ss:$8 sps:$4 sm:$0xff]  }
  0x26   : > { %v4932_v5 = vld [vmem:[%s6982_s2 + $0x144] ss:$8 sps:$4 sm:$0xff]   ;;  %v4927_v6 = vld [vmem:[%s6982_s2 + $0x80] ss:$8 sps:$4 sm:$0xff]   ;;  %v4948_v21 = vld [vmem:[%s6982_s2 + $0x170] ss:$8 sps:$4 sm:$0xff]  }
  0x27   : > { %1019 = vmatpush1.bf16.msra.mxu0 %v4835_v34  ;;  %v4887_v34 = vld [vmem:[%s6982_s2 + $0x454] ss:$8 sps:$4 sm:$0xff]   ;;  %v4930_v7 = vld [vmem:[%s6982_s2 + $0x140] ss:$8 sps:$4 sm:$0xff]   ;;  %v4941_v14 = vld [vmem:[%s6982_s2 + $0xa4] ss:$8 sps:$4 sm:$0xff]  }
  0x28   : > { %1060 = vmatpush1.bf16.msra.mxu1 %v4836_v35  ;;  %1020 = vmatprep.subr.bf16.mxu0 %v4837_v36  ;;  %v4890_v35 = vld [vmem:[%s6982_s2 + $0x14] ss:$8 sps:$4 sm:$0xff]   ;;  %v4885_v36 = vld [vmem:[%s6982_s2 + $0x450] ss:$8 sps:$4 sm:$0xff]   ;;  %v4944_v15 = vld [vmem:[%s6982_s2 + $0x164] ss:$8 sps:$4 sm:$0xff]  }
  0x29   : > { %1061 = vmatprep.subr.bf16.mxu1 %v4839_v37  ;;  %v5763_v37 = vpack.c.bf16 %v447_v33, %v442_v32  ;;  %v4953_v22 = vld [vmem:[%s6982_s2 + $0xc4] ss:$8 sps:$4 sm:$0xff]   ;;  %v4951_v24 = vld [vmem:[%s6982_s2 + $0xc0] ss:$8 sps:$4 sm:$0xff]   ;;  %vm1794_vm7 = vcmask 712704   ;;  %s4754_s20 = sshll.u32 %s6994_s22, 4 }
  0x2a   : > { %v4956_v23 = vld [vmem:[%s6982_s2 + $0x184] ss:$8 sps:$4 sm:$0xff]   ;;  %v4963_v32 = vld [vmem:[%s6982_s2 + $0xe0] ss:$8 sps:$4 sm:$0xff]   ;;  %s430_s24 = scalar_lea.vmem %s6992_s12, %s4754_s20 }
  0x2b   : > { %1021 = vmatpush1.bf16.msra.mxu0 %v4841_v38  ;;  %v4888_v38 = vld [vmem:[%s6982_s2 + $0x10] ss:$8 sps:$4 sm:$0xff]   ;;  %v628_v48 = vshrl.u32 %v5763_v37, 16  ;;  %v4966_v33 = vld [vmem:[%s6982_s2 + $0x1a0] ss:$8 sps:$4 sm:$0xff]  }
  0x2c   : > { %1062 = vmatpush1.bf16.msra.mxu1 %v4842_v39  ;;  %1022 = vmatprep.subr.bf16.mxu0 %v4843_v40  ;;  %v4893_v39 = vld [vmem:[%s6982_s2 + $0x464] ss:$8 sps:$4 sm:$0xff]  }
  0x2d   : > { %1063 = vmatprep.subr.bf16.mxu1 %v4845_v41  ;;  %v4896_v40 = vld [vmem:[%s6982_s2 + $0x24] ss:$8 sps:$4 sm:$0xff]   ;;  %v5436_v41 = vmov 0  }
  0x2f   : > { %1023 = vmatpush1.bf16.msra.mxu0 %v4847_v42  ;;  %v4891_v42 = vld [vmem:[%s6982_s2 + $0x460] ss:$8 sps:$4 sm:$0xff]  }
  0x30   : > { %1064 = vmatpush1.bf16.msra.mxu1 %v4848_v43  ;;  %1024 = vmatprep.subr.bf16.mxu0 %v4849_v44  ;;  %v630_v43 = vshll.u32 %v5763_v37, 16  ;;  %v4894_v44 = vld [vmem:[%s6982_s2 + $0x20] ss:$8 sps:$4 sm:$0xff]  }
  0x31   : > { %1065 = vmatprep.subr.bf16.mxu1 %v4851_v45  ;;  %v4899_v45 = vld [vmem:[%s6982_s2 + $0x474] ss:$8 sps:$4 sm:$0xff]  }
  0x32   : > { %v632_v49 = vrot.slane %v630_v43, 1  ;;  %v4978_v43 = vld [vmem:[%s6982_s2 + $0x1d0] ss:$8 sps:$4 sm:$0xff]  }
  0x33   : > { %1025 = vmatpush1.bf16.msra.mxu0 %v4853_v50  ;;  %v4900_v50 = vld [vmem:[%s6982_s2 + $0x30] ss:$8 sps:$4 sm:$0xff]  }
  0x34   : > { %1066 = vmatpush1.bf16.msra.mxu1 %v4854_v51  ;;  %1026 = vmatprep.subr.bf16.mxu0 %v4855_v52  ;;  %v4905_v51 = vld [vmem:[%s6982_s2 + $0x44] ss:$8 sps:$4 sm:$0xff]  }
  0x35   : > { %1067 = vmatprep.subr.bf16.mxu1 %v4857_v55  ;;  %v4908_v52 = vld [vmem:[%s6982_s2 + $0x104] ss:$8 sps:$4 sm:$0xff]   ;;  %v4903_v55 = vld [vmem:[%s6982_s2 + $0x40] ss:$8 sps:$4 sm:$0xff]  }
  0x37   : > { %1027 = vmatpush1.bf16.msra.mxu0 %v4859_v56  ;;  %v4906_v56 = vld [vmem:[%s6982_s2 + $0x100] ss:$8 sps:$4 sm:$0xff]  }
  0x38   : > { %1068 = vmatpush1.bf16.msra.mxu1 %v4860_v57  ;;  %1028 = vmatprep.subr.bf16.mxu0 %v4861_v62  ;;  %v4911_v57 = vld [vmem:[%s6982_s2 + $0x54] ss:$8 sps:$4 sm:$0xff]   ;;  %v4920_v62 = vld [vmem:[%s6982_s2 + $0x124] ss:$8 sps:$4 sm:$0xff]  }
  0x39   : > { %1069 = vmatprep.subr.bf16.mxu1 %v4863_v63  ;;  %v4915_v63 = vld [vmem:[%s6982_s2 + $0x60] ss:$8 sps:$4 sm:$0xff]  }
  0x3b   : > { %1029 = vmatpush1.bf16.msra.mxu0 %v4865_v8  ;;  %v4935_v8 = vld [vmem:[%s6982_s2 + $0x94] ss:$8 sps:$4 sm:$0xff]  }
  0x3c   : > { %1070 = vmatpush1.bf16.msra.mxu1 %v4866_v11  ;;  %1030 = vmatprep.subr.bf16.mxu0 %v4867_v12  ;;  %v4938_v11 = vld [vmem:[%s6982_s2 + $0x154] ss:$8 sps:$4 sm:$0xff]   ;;  %v4933_v12 = vld [vmem:[%s6982_s2 + $0x90] ss:$8 sps:$4 sm:$0xff]  }
  0x3d   : > { %1071 = vmatprep.subr.bf16.mxu1 %v4869_v13  ;;  %v4936_v13 = vld [vmem:[%s6982_s2 + $0x150] ss:$8 sps:$4 sm:$0xff]  }
  0x3f   : > { %1031 = vmatpush1.bf16.msra.mxu0 %v4871_v16  ;;  %v4939_v16 = vld [vmem:[%s6982_s2 + $0xa0] ss:$8 sps:$4 sm:$0xff]  }
  0x40   : > { %1072 = vmatpush1.bf16.msra.mxu1 %v4872_v17  ;;  %1032 = vmatprep.subr.bf16.mxu0 %v4873_v18  ;;  %v4942_v17 = vld [vmem:[%s6982_s2 + $0x160] ss:$8 sps:$4 sm:$0xff]   ;;  %v4947_v18 = vld [vmem:[%s6982_s2 + $0xb4] ss:$8 sps:$4 sm:$0xff]  }
  0x41   : > { %1073 = vmatprep.subr.bf16.mxu1 %v4875_v19  ;;  %v4950_v19 = vld [vmem:[%s6982_s2 + $0x174] ss:$8 sps:$4 sm:$0xff]  }
  0x43   : > { %1033 = vmatpush1.bf16.msra.mxu0 %v4877_v20  ;;  %v4945_v20 = vld [vmem:[%s6982_s2 + $0xb0] ss:$8 sps:$4 sm:$0xff]  }
  0x44   : > { %1074 = vmatpush1.bf16.msra.mxu1 %v4878_v25  ;;  %1084 = vmatprep.subr.bf16.mxu0 %v4881_v26  ;;  %v4954_v25 = vld [vmem:[%s6982_s2 + $0x180] ss:$8 sps:$4 sm:$0xff]   ;;  %v4959_v26 = vld [vmem:[%s6982_s2 + $0xd4] ss:$8 sps:$4 sm:$0xff]  }
  0x45   : > { %1487 = vmatprep.subr.bf16.mxu1 %v4884_v27  ;;  %v4962_v27 = vld [vmem:[%s6982_s2 + $0x194] ss:$8 sps:$4 sm:$0xff]  }
  0x46   : > { %1035 = vmatmul.mubr.bf16.vlgmr.msra.gmra.mrb[0].mxu0 %v605_v30  ;;  %v4965_v30 = vld [vmem:[%s6982_s2 + $0xe4] ss:$8 sps:$4 sm:$0xff]  }
  0x47   : > { %1076 = vmatmul.mubr.bf16.vlgmr.msra.gmra.mrb[0].mxu1 %v619_v31  ;;  %1085 = vmatpush1.bf16.msra.mxu0 %v4879_v28  ;;  %v4957_v28 = vld [vmem:[%s6982_s2 + $0xd0] ss:$8 sps:$4 sm:$0xff]   ;;  %v4968_v31 = vld [vmem:[%s6982_s2 + $0x1a4] ss:$8 sps:$4 sm:$0xff]  }
  0x48   : > { %1488 = vmatpush1.bf16.msra.mxu1 %v4882_v29  ;;  %1086 = vmatprep.subr.bf16.mxu0 %v4887_v34  ;;  %v4960_v29 = vld [vmem:[%s6982_s2 + $0x190] ss:$8 sps:$4 sm:$0xff]   ;;  %v4971_v34 = vld [vmem:[%s6982_s2 + $0xf4] ss:$8 sps:$4 sm:$0xff]  }
  0x49   : > { %1489 = vmatprep.subr.bf16.mxu1 %v4890_v35  ;;  %1116 = vmatprep.mubr.bf16.mxu0 %v5436_v41  ;;  %v4974_v35 = vld [vmem:[%s6982_s2 + $0x1b4] ss:$8 sps:$4 sm:$0xff]  }
  0x4a   : > { %1519 = vmatprep.mubr.bf16.mxu1 %v5675_v53  ;;  %v633_v53 = vor.u32 %v632_v49, %v628_v48  ;;  %v4987_v48 = vld [vmem:[%s6982_s2 + $0x200] ss:$8 sps:$4 sm:$0xff]   ;;  %v4992_v49 = vld [vmem:[%s6982_s2 + $0x214] ss:$8 sps:$4 sm:$0xff]  }
  0x4b   : > { %1087 = vmatpush1.bf16.msra.mxu0 %v4885_v36  ;;  %v4969_v36 = vld [vmem:[%s6982_s2 + $0xf0] ss:$8 sps:$4 sm:$0xff]  }
  0x4c   : > { %1490 = vmatpush1.bf16.msra.mxu1 %v4888_v38  ;;  %1088 = vmatprep.subr.bf16.mxu0 %v4893_v39  ;;  %v4972_v38 = vld [vmem:[%s6982_s2 + $0x1b0] ss:$8 sps:$4 sm:$0xff]   ;;  %v4977_v39 = vld [vmem:[%s6982_s2 + $0x1c4] ss:$8 sps:$4 sm:$0xff]  }
  0x4d   : > { %1491 = vmatprep.subr.bf16.mxu1 %v4896_v40  ;;  %v4975_v40 = vld [vmem:[%s6982_s2 + $0x1c0] ss:$8 sps:$4 sm:$0xff]  }
  0x4f   : > { %1089 = vmatpush1.bf16.msra.mxu0 %v4891_v42  ;;  %v4980_v42 = vld [vmem:[%s6982_s2 + $0x1d4] ss:$8 sps:$4 sm:$0xff]  }
  0x50   : > { %1492 = vmatpush1.bf16.msra.mxu1 %v4894_v44  ;;  %1090 = vmatprep.subr.bf16.mxu0 %v4899_v45  ;;  %v4983_v44 = vld [vmem:[%s6982_s2 + $0x1e4] ss:$8 sps:$4 sm:$0xff]   ;;  %v4981_v45 = vld [vmem:[%s6982_s2 + $0x1e0] ss:$8 sps:$4 sm:$0xff]  }
  0x51   : > { %1493 = vmatprep.subr.bf16.mxu1 %v4902_v46  ;;  %v4986_v46 = vld [vmem:[%s6982_s2 + $0x1f4] ss:$8 sps:$4 sm:$0xff]  }
  0x53   : > { %1091 = vmatpush1.bf16.msra.mxu0 %v4897_v47  ;;  %v4989_v47 = vld [vmem:[%s6982_s2 + $0x204] ss:$8 sps:$4 sm:$0xff]  }
  0x54   : > { %1494 = vmatpush1.bf16.msra.mxu1 %v4900_v50  ;;  %1528 = vmatprep.subr.bf16.mxu0 %v4908_v52  ;;  %v4990_v50 = vld [vmem:[%s6982_s2 + $0x210] ss:$8 sps:$4 sm:$0xff]   ;;  %v4993_v52 = vld [vmem:[%s6982_s2 + $0x220] ss:$8 sps:$4 sm:$0xff]  }
  0x55   : > { %1495 = vmatprep.subr.bf16.mxu1 %v4905_v51  ;;  %v4995_v51 = vld [vmem:[%s6982_s2 + $0x224] ss:$8 sps:$4 sm:$0xff]  }
  0x56   : > { %4203 = vmatmul.mubr.msk.bf16.vlgmr.msra.gmra.mrb[4].mxu0 %vm998_vm0, %v633_v53  ;;  %v4998_v53 = vld [vmem:[%s6982_s2 + $0x234] ss:$8 sps:$4 sm:$0xff]  }
  0x57   : > { %1529 = vmatpush1.bf16.msra.mxu0 %v4906_v56  ;;  %1560 = vmatprep.mubr.bf16.mxu0 %v5677_v54  ;;  %v4926_v54 = vld [vmem:[%s6982_s2 + $0x134] ss:$8 sps:$4 sm:$0xff]   ;;  %v5001_v56 = vld [vmem:[%s6984_s4 + $0x4] ss:$8 sps:$4 sm:$0xff]  }
  0x58   : > { %1496 = vmatpush1.bf16.msra.mxu1 %v4903_v55  ;;  %1530 = vmatprep.subr.bf16.mxu0 %v4914_v58  ;;  %v4999_v55 = vld [vmem:[%s6984_s4] ss:$8 sps:$4 sm:$0xff]  }
  0x59   : > { %1497 = vmatprep.subr.bf16.mxu1 %v4911_v57  ;;  %v5004_v57 = vld [vmem:[%s6984_s4 + $0x14] ss:$8 sps:$4 sm:$0xff]   ;;  %v5005_v58 = vld [vmem:[%s6984_s4 + $0x20] ss:$8 sps:$4 sm:$0xff]  }
  0x5b   : > { %1531 = vmatpush1.bf16.msra.mxu0 %v4912_v60  ;;  %v5010_v60 = vld [vmem:[%s6984_s4 + $0x34] ss:$8 sps:$4 sm:$0xff]  }
  0x5c   : > { %1498 = vmatpush1.bf16.msra.mxu1 %v4909_v59  ;;  %1532 = vmatprep.subr.bf16.mxu0 %v4920_v62  ;;  %v5437_v59 = vmov 0.0   ;;  %v5013_v62 = vld [vmem:[%s6984_s4 + $0x44] ss:$8 sps:$4 sm:$0xff]  }
  0x5d   : > { %1499 = vmatprep.subr.bf16.mxu1 %v4917_v61  ;;  %432 = vst [vmem:[#allocation2] sm:$0xff] %v5437_v59  ;;  %435 = vst [vmem:[#allocation2 + $0x10] sm:$0x3] %v5437_v59  ;;  %v5008_v61 = vld [vmem:[%s6984_s4 + $0x30] ss:$8 sps:$4 sm:$0xff]  }
  0x5e   : > { %434 = vst.msk [vmem:[#allocation2 + $0x8] sm:$0xff] %vm433_vm1, %v5437_v59 }
  0x5f   : > { %1533 = vmatpush1.bf16.msra.mxu0 %v4918_v0  ;;  %v5016_v0 = vld [vmem:[%s6984_s4 + $0x54] ss:$8 sps:$4 sm:$0xff]   ;;  %437 = vst.msk [vmem:[#allocation2 + $0x18] sm:$0x3] %vm436_vm2, %v5437_v59 }
  0x60   : > { %1500 = vmatpush1.bf16.msra.mxu1 %v4915_v63  ;;  %1534 = vmatprep.subr.bf16.mxu0 %v4926_v54  ;;  %v5011_v63 = vld [vmem:[%s6984_s4 + $0x40] ss:$8 sps:$4 sm:$0xff]   ;;  %v5061_v59 = vld [vmem:[%s6986_s6 + $0x1b4] ss:$8 sps:$4 sm:$0xff]  }
  0x61   : > { %1501 = vmatprep.subr.bf16.mxu1 %v4923_v1 }
  0x63   : > { %1535 = vmatpush1.bf16.msra.mxu0 %v4924_v3 }
  0x64   : > { %1502 = vmatpush1.bf16.msra.mxu1 %v4921_v2  ;;  %1536 = vmatprep.subr.bf16.mxu0 %v4932_v5  ;;  %v5014_v2 = vld [vmem:[%s6984_s4 + $0x50] ss:$8 sps:$4 sm:$0xff]  }
  0x65   : > { %1503 = vmatprep.subr.bf16.mxu1 %v4929_v4 }
  0x67   : > { %1537 = vmatpush1.bf16.msra.mxu0 %v4930_v7 }
  0x68   : > { %1504 = vmatpush1.bf16.msra.mxu1 %v4927_v6  ;;  %1538 = vmatprep.subr.bf16.mxu0 %v4938_v11  ;;  %v5019_v6 = vld [vmem:[%s6984_s4 + $0x64] ss:$8 sps:$4 sm:$0xff]  }
  0x69   : > { %1505 = vmatprep.subr.bf16.mxu1 %v4935_v8 }
  0x6b   : > { %1539 = vmatpush1.bf16.msra.mxu0 %v4936_v13 }
  0x6c   : > { %1506 = vmatpush1.bf16.msra.mxu1 %v4933_v12  ;;  %1540 = vmatprep.subr.bf16.mxu0 %v4944_v15  ;;  %v5022_v15 = vld [vmem:[%s6984_s4 + $0x74] ss:$8 sps:$4 sm:$0xff]  }
  0x6d   : > { %1507 = vmatprep.subr.bf16.mxu1 %v4941_v14  ;;  %v5017_v14 = vld [vmem:[%s6984_s4 + $0x60] ss:$8 sps:$4 sm:$0xff]  }
  0x6f   : > { %1541 = vmatpush1.bf16.msra.mxu0 %v4942_v17  ;;  %v1625_v17 = vld [vmem:[%s425_s30] sm:$0xff] }
  0x70   : > { %1508 = vmatpush1.bf16.msra.mxu1 %v4939_v16  ;;  %1542 = vmatprep.subr.bf16.mxu0 %v4950_v19  ;;  %v5020_v16 = vld [vmem:[%s6984_s4 + $0x70] ss:$8 sps:$4 sm:$0xff]   ;;  %v1627_v19 = vpack.c.bf16 %v1625_v17, %v1625_v17 }
  0x71   : > { %1509 = vmatprep.subr.bf16.mxu1 %v4947_v18  ;;  %v5025_v18 = vld [vmem:[%s6986_s6 + $0xf4] ss:$8 sps:$4 sm:$0xff]  }
  0x73   : > { %1543 = vmatpush1.bf16.msra.mxu0 %v4948_v21  ;;  %v5028_v21 = vld [vmem:[%s6986_s6 + $0x104] ss:$8 sps:$4 sm:$0xff]  }
  0x74   : > { %1510 = vmatpush1.bf16.msra.mxu1 %v4945_v20  ;;  %1544 = vmatprep.subr.bf16.mxu0 %v4956_v23  ;;  %v5023_v20 = vld [vmem:[%s6986_s6 + $0xf0] ss:$8 sps:$4 sm:$0xff]   ;;  %v5026_v23 = vld [vmem:[%s6986_s6 + $0x100] ss:$8 sps:$4 sm:$0xff]  }
  0x75   : > { %1511 = vmatprep.subr.bf16.mxu1 %v4953_v22 }
  0x77   : > { %1545 = vmatpush1.bf16.msra.mxu0 %v4954_v25 }
  0x78   : > { %1512 = vmatpush1.bf16.msra.mxu1 %v4951_v24  ;;  %1546 = vmatprep.subr.bf16.mxu0 %v4962_v27 }
  0x79   : > { %1513 = vmatprep.subr.bf16.mxu1 %v4959_v26  ;;  %v5031_v26 = vld [vmem:[%s6986_s6 + $0x114] ss:$8 sps:$4 sm:$0xff]  }
  0x7b   : > { %1547 = vmatpush1.bf16.msra.mxu0 %v4960_v29 }
  0x7c   : > { %1514 = vmatpush1.bf16.msra.mxu1 %v4957_v28  ;;  %1548 = vmatprep.subr.bf16.mxu0 %v4968_v31  ;;  %v5034_v31 = vld [vmem:[%s6986_s6 + $0x124] ss:$8 sps:$4 sm:$0xff]  }
  0x7d   : > { %1515 = vmatprep.subr.bf16.mxu1 %v4965_v30  ;;  %v5029_v30 = vld [vmem:[%s6986_s6 + $0x110] ss:$8 sps:$4 sm:$0xff]  }
  0x7f   : > { %1549 = vmatpush1.bf16.msra.mxu0 %v4966_v33  ;;  %v5037_v33 = vld [vmem:[%s6986_s6 + $0x134] ss:$8 sps:$4 sm:$0xff]  }
  0x80   : > { %1516 = vmatpush1.bf16.msra.mxu1 %v4963_v32  ;;  %1550 = vmatprep.subr.bf16.mxu0 %v4974_v35  ;;  %v5032_v32 = vld [vmem:[%s6986_s6 + $0x120] ss:$8 sps:$4 sm:$0xff]   ;;  %v5040_v35 = vld [vmem:[%s6986_s6 + $0x144] ss:$8 sps:$4 sm:$0xff]  }
  0x81   : > { %1517 = vmatprep.subr.bf16.mxu1 %v4971_v34  ;;  %v5035_v34 = vld [vmem:[%s6986_s6 + $0x130] ss:$8 sps:$4 sm:$0xff]  }
  0x83   : > { %1551 = vmatpush1.bf16.msra.mxu0 %v4972_v38  ;;  %v5043_v38 = vld [vmem:[%s6986_s6 + $0x154] ss:$8 sps:$4 sm:$0xff]  }
  0x84   : > { %1518 = vmatpush1.bf16.msra.mxu1 %v4969_v36  ;;  %1552 = vmatprep.subr.bf16.mxu0 %v4977_v39  ;;  %v5038_v36 = vld [vmem:[%s6986_s6 + $0x140] ss:$8 sps:$4 sm:$0xff]   ;;  %v5041_v39 = vld [vmem:[%s6986_s6 + $0x150] ss:$8 sps:$4 sm:$0xff]  }
  0x87   : > { %1520 = vmatmul.mubr.bf16.vlgmr.msra.gmra.mrb[4].mxu1 %v5705_v9  ;;  %1553 = vmatpush1.bf16.msra.mxu0 %v4975_v40  ;;  %v4984_v9 = vld [vmem:[%s6982_s2 + $0x1f0] ss:$8 sps:$4 sm:$0xff]   ;;  %v5046_v40 = vld [vmem:[%s6986_s6 + $0x164] ss:$8 sps:$4 sm:$0xff]  }
  0x88   : > { %1554 = vmatprep.subr.bf16.mxu0 %v4980_v42  ;;  %v5044_v42 = vld [vmem:[%s6986_s6 + $0x160] ss:$8 sps:$4 sm:$0xff]  }
  0x8b   : > { %1555 = vmatpush1.bf16.msra.mxu0 %v4978_v43  ;;  %v5049_v43 = vld [vmem:[%s6986_s6 + $0x174] ss:$8 sps:$4 sm:$0xff]  }
  0x8c   : > { %1556 = vmatprep.subr.bf16.mxu0 %v4983_v44  ;;  %v5047_v44 = vld [vmem:[%s6986_s6 + $0x170] ss:$8 sps:$4 sm:$0xff]  }
  0x8f   : > { %1557 = vmatpush1.bf16.msra.mxu0 %v4981_v45  ;;  %v5052_v45 = vld [vmem:[%s6986_s6 + $0x184] ss:$8 sps:$4 sm:$0xff]  }
  0x90   : > { %1558 = vmatprep.subr.bf16.mxu0 %v4986_v46  ;;  %v5050_v46 = vld [vmem:[%s6986_s6 + $0x180] ss:$8 sps:$4 sm:$0xff]  }
  0x93   : > { %1559 = vmatpush1.bf16.msra.mxu0 %v4984_v9 }
  0x94   : > { %1569 = vmatprep.subr.bf16.mxu0 %v4989_v47 }
  0x96   : > { %1561 = vmatmul.mubr.bf16.vlgmr.msra.gmra.mrb[8].mxu0 %v5707_v10  ;;  %v4996_v10 = vld [vmem:[%s6982_s2 + $0x230] ss:$8 sps:$4 sm:$0xff]  }
  0x97   : > { %1570 = vmatpush1.bf16.msra.mxu0 %v4987_v48  ;;  %1601 = vmatprep.mubr.bf16.mxu0 %v5436_v41 }
  0x98   : > { %1571 = vmatprep.subr.bf16.mxu0 %v4992_v49 }
  0x9b   : > { %1572 = vmatpush1.bf16.msra.mxu0 %v4990_v50 }
  0x9c   : > { %1573 = vmatprep.subr.bf16.mxu0 %v4995_v51 }
  0x9f   : > { %1574 = vmatpush1.bf16.msra.mxu0 %v4993_v52 }
  0xa0   : > { %1575 = vmatprep.subr.bf16.mxu0 %v4998_v53 }
  0xa3   : > { %1576 = vmatpush1.bf16.msra.mxu0 %v4996_v10 }
  0xa4   : > { %1735 = vmatprep.subr.bf16.mxu0 %v5001_v56 }
  0xa6   : > { %4276 = vmatmul.mubr.msk.bf16.vlgmr.msra.gmra.mrb[12].mxu0 %vm998_vm0, %v5763_v37  ;;  %v5002_v37 = vld [vmem:[%s6984_s4 + $0x10] ss:$8 sps:$4 sm:$0xff]  }
  0xa7   : > { %1767 = vmatprep.mubr.bf16.mxu0 %v5436_v41  ;;  %1736 = vmatpush1.bf16.msra.mxu0 %v4999_v55  ;;  %v5007_v41 = vld [vmem:[%s6984_s4 + $0x24] ss:$8 sps:$4 sm:$0xff]  }
  0xa8   : > { %1737 = vmatprep.subr.bf16.mxu0 %v5004_v57 }
  0xab   : > { %1738 = vmatpush1.bf16.msra.mxu0 %v5002_v37  ;;  %v1611_v37 = vlaneseq }
  0xac   : > { %1739 = vmatprep.subr.bf16.mxu0 %v5007_v41 }
  0xad   : > { %v1612_v41 = vshrl.u32 %v1611_v37, 7  ;;  %v5097_v37 = vld [vmem:[%s6986_s6 + $0x94] ss:$8 sps:$4 sm:$0xff]  }
  0xaf   : > { %1740 = vmatpush1.bf16.msra.mxu0 %v5005_v58  ;;  %v448_v58 = vld [vmem:[%s6983_s3] sm:$0x3] }
  0xb0   : > { %1741 = vmatprep.subr.bf16.mxu0 %v5010_v60  ;;  %v6113_v60 = vsub.s32 0, %v1612_v41 }
  0xb3   : > { %1742 = vmatpush1.bf16.msra.mxu0 %v5008_v61  ;;  %v5055_v61 = vld [vmem:[%s6986_s6 + $0x194] ss:$8 sps:$4 sm:$0xff]  }
  0xb4   : > { %1743 = vmatprep.subr.bf16.mxu0 %v5013_v62  ;;  %v6118_v62 = vsub.s32 1, %v1612_v41  ;;  %v5095_v41 = vld [vmem:[%s6986_s6 + $0x90] ss:$8 sps:$4 sm:$0xff]  }
  0xb7   : > { %1744 = vmatpush1.bf16.msra.mxu0 %v5011_v63  ;;  %v5053_v63 = vld [vmem:[%s6986_s6 + $0x190] ss:$8 sps:$4 sm:$0xff]  }
  0xb8   : > { %1745 = vmatprep.subr.bf16.mxu0 %v5016_v0  ;;  %v1614_v0 = vrot.slane %v448_v58, %v6113_v60 }
  0xbb   : > { %1746 = vmatpush1.bf16.msra.mxu0 %v5014_v2  ;;  %v1618_v2 = vrot.slane %v448_v58, %v6118_v62  ;;  %v5100_v58 = vld [vmem:[%s6986_s6 + $0xa4] ss:$8 sps:$4 sm:$0xff]  }
  0xbc   : > { %1747 = vmatprep.subr.bf16.mxu0 %v5019_v6 }
  0xbf   : > { %1748 = vmatpush1.bf16.msra.mxu0 %v5017_v14 }
  0xc0   : > { %1749 = vmatprep.subr.bf16.mxu0 %v5022_v15 }
  0xc3   : > { %1750 = vmatpush1.bf16.msra.mxu0 %v5020_v16  ;;  %v5062_v16 = vld [vmem:[%s6986_s6 + $0x1c0] ss:$8 sps:$4 sm:$0xff]  }
  0xc4   : > { %2032 = vmatprep.subr.bf16.mxu0 %v5025_v18 }
  0xc6   : > { %1768 = vmatmul.mubr.bf16.vlgmr.msra.gmra.mrb[16].mxu0 %v1627_v19  ;;  %v5067_v19 = vld [vmem:[%s6986_s6 + $0x1d4] ss:$8 sps:$4 sm:$0xff]  }
  0xc7   : > { %2033 = vmatpush1.bf16.msra.mxu0 %v5023_v20  ;;  %v5065_v20 = vld [vmem:[%s6986_s6 + $0x1d0] ss:$8 sps:$4 sm:$0xff]  }
  0xc8   : > { %2034 = vmatprep.subr.bf16.mxu0 %v5028_v21 }
  0xcb   : > { %2035 = vmatpush1.bf16.msra.mxu0 %v5026_v23 }
  0xcc   : > { %2036 = vmatprep.subr.bf16.mxu0 %v5031_v26 }
  0xcf   : > { %2037 = vmatpush1.bf16.msra.mxu0 %v5029_v30 }
  0xd0   : > { %2038 = vmatprep.subr.bf16.mxu0 %v5034_v31 }
  0xd3   : > { %2039 = vmatpush1.bf16.msra.mxu0 %v5032_v32 }
  0xd4   : > { %2040 = vmatprep.subr.bf16.mxu0 %v5037_v33 }
  0xd7   : > { %2041 = vmatpush1.bf16.msra.mxu0 %v5035_v34 }
  0xd8   : > { %2042 = vmatprep.subr.bf16.mxu0 %v5040_v35 }
  0xdb   : > { %2043 = vmatpush1.bf16.msra.mxu0 %v5038_v36 }
  0xdc   : > { %2044 = vmatprep.subr.bf16.mxu0 %v5043_v38 }
  0xdf   : > { %2045 = vmatpush1.bf16.msra.mxu0 %v5041_v39 }
  0xe0   : > { %2046 = vmatprep.subr.bf16.mxu0 %v5046_v40  ;;  %v5068_v40 = vld [vmem:[%s6986_s6] ss:$8 sps:$4 sm:$0xff]  }
  0xe3   : > { %2047 = vmatpush1.bf16.msra.mxu0 %v5044_v42 }
  0xe4   : > { %2048 = vmatprep.subr.bf16.mxu0 %v5049_v43  ;;  %v5073_v43 = vld [vmem:[%s6986_s6 + $0x14] ss:$8 sps:$4 sm:$0xff]  }
  0xe7   : > { %2049 = vmatpush1.bf16.msra.mxu0 %v5047_v44  ;;  %v5071_v44 = vld [vmem:[%s6986_s6 + $0x10] ss:$8 sps:$4 sm:$0xff]  }
  0xe8   : > { %2050 = vmatprep.subr.bf16.mxu0 %v5052_v45  ;;  %v5076_v45 = vld [vmem:[%s6986_s6 + $0x24] ss:$8 sps:$4 sm:$0xff]  }
  0xeb   : > { %2051 = vmatpush1.bf16.msra.mxu0 %v5050_v46  ;;  %v5074_v46 = vld [vmem:[%s6986_s6 + $0x20] ss:$8 sps:$4 sm:$0xff]  }
  0xec   : > { %2052 = vmatprep.subr.bf16.mxu0 %v5055_v61  ;;  %v5098_v61 = vld [vmem:[%s6986_s6 + $0xa0] ss:$8 sps:$4 sm:$0xff]  }
  0xef   : > { %2053 = vmatpush1.bf16.msra.mxu0 %v5053_v63  ;;  %v5103_v63 = vld [vmem:[%s6986_s6 + $0xb4] ss:$8 sps:$4 sm:$0xff]  }
 0x119   : > { %v1036_v1 = vpop.f32.mrb[0].mxu0 }
 0x11a   : > { %v1077_v54 = vpop.f32.mrb[0].mxu1  ;;  %v1038_v4 = vpop.f32.mrb[1].mxu0 }
 0x11b   : > { %v1078_v3 = vadd.f32 %v1077_v54, %v1036_v1  ;;  %v1079_v5 = vpop.f32.mrb[1].mxu1  ;;  %v1040_v8 = vpop.f32.mrb[2].mxu0  ;;  %v5058_v1 = vld [vmem:[%s6986_s6 + $0x1a4] ss:$8 sps:$4 sm:$0xff]  }
 0x11c   : > { %v1080_v7 = vadd.f32 %v1079_v5, %v1038_v4  ;;  %v1081_v11 = vpop.f32.mrb[2].mxu1  ;;  %v1041_v12 = vpop.f32.mrb[3].mxu0  ;;  %2054 = vmatprep.subr.bf16.mxu0 %v5058_v1  ;;  %v5059_v8 = vld [vmem:[%s6986_s6 + $0x1b0] ss:$8 sps:$4 sm:$0xff]   ;;  %v5106_v1 = vld [vmem:[%s6986_s6 + $0xc4] ss:$8 sps:$4 sm:$0xff]  }
 0x11d   : > { %v1082_v13 = vpop.f32.mrb[3].mxu1 }
 0x11e   : > { %v5064_v13 = vld [vmem:[%s6986_s6 + $0x1c4] ss:$8 sps:$4 sm:$0xff]  }
 0x129   : > { %v1118_v22 = vpop.f32.mrb[4].mxu0 }
 0x12a   : > { %v1119_v24 = vadd.f32 %v1118_v22, %v1078_v3  ;;  %v1120_v25 = vpop.f32.mrb[5].mxu0  ;;  %v5056_v3 = vld [vmem:[%s6986_s6 + $0x1a0] ss:$8 sps:$4 sm:$0xff]   ;;  %v5070_v22 = vld [vmem:[%s6986_s6 + $0x4] ss:$8 sps:$4 sm:$0xff]  }
 0x12b   : > { %v1121_v27 = vadd.f32 %v1120_v25, %v1080_v7  ;;  %v1122_v28 = vpop.f32.mrb[6].mxu0  ;;  %2055 = vmatpush1.bf16.msra.mxu0 %v5056_v3  ;;  %v5107_v3 = vld [vmem:[%s6986_s6 + $0xd0] ss:$8 sps:$4 sm:$0xff]  }
 0x12c   : > { %v1123_v29 = vpop.f32.mrb[7].mxu0  ;;  %2056 = vmatprep.subr.bf16.mxu0 %v5061_v59  ;;  %v5115_v59 = vld [vmem:[%s6986_s6 + $0x1e4] ss:$8 sps:$4 sm:$0xff]  }
 0x12f   : > { %2057 = vmatpush1.bf16.msra.mxu0 %v5059_v8 }
 0x130   : > { %2058 = vmatprep.subr.bf16.mxu0 %v5064_v13  ;;  %v5119_v13 = vld [vmem:[%s6986_s6 + $0x200] ss:$8 sps:$4 sm:$0xff]  }
 0x133   : > { %2059 = vmatpush1.bf16.msra.mxu0 %v5062_v16  ;;  %v5127_v16 = vld [vmem:[%s6986_s6 + $0x224] ss:$8 sps:$4 sm:$0xff]  }
 0x134   : > { %2060 = vmatprep.subr.bf16.mxu0 %v5067_v19  ;;  %v5128_v19 = vld [vmem:[%s6986_s6 + $0x230] ss:$8 sps:$4 sm:$0xff]  }
 0x137   : > { %2061 = vmatpush1.bf16.msra.mxu0 %v5065_v20  ;;  %v5133_v20 = vld [vmem:[%s6986_s6 + $0x244] ss:$8 sps:$4 sm:$0xff]  }
 0x138   : > { %2225 = vmatprep.subr.bf16.mxu0 %v5070_v22  ;;  %v5136_v22 = vld [vmem:[%s6986_s6 + $0x254] ss:$8 sps:$4 sm:$0xff]  }
 0x15a   : > { %v1521_v9 = vpop.f32.mrb[4].mxu1 }
 0x15b   : > { %v1522_v47 = vadd.f32 %v1521_v9, %v1119_v24  ;;  %v1523_v48 = vpop.f32.mrb[5].mxu1  ;;  %v5079_v9 = vld [vmem:[%s6986_s6 + $0x34] ss:$8 sps:$4 sm:$0xff]  }
 0x15c   : > { %v1524_v49 = vadd.f32 %v1523_v48, %v1121_v27  ;;  %v1525_v50 = vpop.f32.mrb[6].mxu1  ;;  %v5082_v48 = vld [vmem:[%s6986_s6 + $0x44] ss:$8 sps:$4 sm:$0xff]  }
 0x15d   : > { %v1526_v51 = vpop.f32.mrb[7].mxu1  ;;  %v5085_v50 = vld [vmem:[%s6986_s6 + $0x54] ss:$8 sps:$4 sm:$0xff]  }
 0x15e   : > { %v5083_v51 = vld [vmem:[%s6986_s6 + $0x50] ss:$8 sps:$4 sm:$0xff]  }
 0x169   : > { %v1562_v52 = vpop.f32.mrb[8].mxu0 }
 0x16a   : > { %v1563_v53 = vadd.f32 %v1562_v52, %v1522_v47  ;;  %v1564_v10 = vpop.f32.mrb[9].mxu0  ;;  %v5077_v47 = vld [vmem:[%s6986_s6 + $0x30] ss:$8 sps:$4 sm:$0xff]   ;;  %v5088_v52 = vld [vmem:[%s6986_s6 + $0x64] ss:$8 sps:$4 sm:$0xff]  }
 0x16b   : > { %v1565_v55 = vadd.f32 %v1564_v10, %v1524_v49  ;;  %v1566_v56 = vpop.f32.mrb[10].mxu0  ;;  %v5080_v49 = vld [vmem:[%s6986_s6 + $0x40] ss:$8 sps:$4 sm:$0xff]   ;;  %v5091_v10 = vld [vmem:[%s6986_s6 + $0x74] ss:$8 sps:$4 sm:$0xff]  }
 0x16c   : > { %v1567_v57 = vpop.f32.mrb[11].mxu0  ;;  %v5094_v56 = vld [vmem:[%s6986_s6 + $0x84] ss:$8 sps:$4 sm:$0xff]  }
 0x16d   : > { %v5092_v57 = vld [vmem:[%s6986_s6 + $0x80] ss:$8 sps:$4 sm:$0xff]  }
 0x179   : > { %v1603_v54 = vpop.f32.mrb[12].mxu0 }
 0x17a   : > { %v1604_v4 = vadd.f32 %v1603_v54, %v1563_v53  ;;  %v1605_v5 = vpop.f32.mrb[13].mxu0  ;;  %v5086_v53 = vld [vmem:[%s6986_s6 + $0x60] ss:$8 sps:$4 sm:$0xff]  }
 0x17b   : > { %v1606_v6 = vadd.f32 %v1605_v5, %v1565_v55  ;;  %v1607_v7 = vpop.f32.mrb[14].mxu0  ;;  %v5089_v55 = vld [vmem:[%s6986_s6 + $0x70] ss:$8 sps:$4 sm:$0xff]   ;;  %v5104_v54 = vld [vmem:[%s6986_s6 + $0xc0] ss:$8 sps:$4 sm:$0xff]  }
 0x17c   : > { %v1608_v11 = vpop.f32.mrb[15].mxu0  ;;  %v1621_v12 = vadd.f32 %v1614_v0, %v1604_v4  ;;  %v5101_v0 = vld [vmem:[%s6986_s6 + $0xb0] ss:$8 sps:$4 sm:$0xff]   ;;  %v5112_v4 = vld [vmem:[%s6986_s6 + $0xe4] ss:$8 sps:$4 sm:$0xff]  }
 0x17d   : > { %v1622_v14 = vadd.f32 %v1618_v2, %v1606_v6  ;;  %v5109_v2 = vld [vmem:[%s6986_s6 + $0xd4] ss:$8 sps:$4 sm:$0xff]   ;;  %v5110_v5 = vld [vmem:[%s6986_s6 + $0xe0] ss:$8 sps:$4 sm:$0xff]   ;;  %v5116_v11 = vld [vmem:[%s6986_s6 + $0x1f0] ss:$8 sps:$4 sm:$0xff]  }
 0x17e   : > { %v1623_v15 = vmax.f32 %v1621_v12, 0.0  ;;  %v5113_v6 = vld [vmem:[%s6986_s6 + $0x1e0] ss:$8 sps:$4 sm:$0xff]   ;;  %v5118_v7 = vld [vmem:[%s6986_s6 + $0x1f4] ss:$8 sps:$4 sm:$0xff]  }
 0x17f   : > { %v1624_v17 = vmax.f32 %v1622_v14, 0.0  ;;  %v5121_v12 = vld [vmem:[%s6986_s6 + $0x204] ss:$8 sps:$4 sm:$0xff]   ;;  %v5124_v14 = vld [vmem:[%s6986_s6 + $0x214] ss:$8 sps:$4 sm:$0xff]  }
 0x180   : > { %v1778_v18 = vrot.slane %v1623_v15, 7  ;;  %v5122_v15 = vld [vmem:[%s6986_s6 + $0x210] ss:$8 sps:$4 sm:$0xff]  }
 0x181   : > { %v1779_v21 = vrot.slane %v1624_v17, 7  ;;  %v5125_v17 = vld [vmem:[%s6986_s6 + $0x220] ss:$8 sps:$4 sm:$0xff]  }
 0x182   : > { %1780 = vrot.lane.b32.xlu0 %v1778_v18, %s5438_s29  ;;  %v5130_v18 = vld [vmem:[%s6986_s6 + $0x234] ss:$8 sps:$4 sm:$0xff]  }
 0x186   : > { %1782 = vrot.lane.b32.xlu0 %v1779_v21, %s5438_s29  ;;  %v5131_v21 = vld [vmem:[%s6986_s6 + $0x240] ss:$8 sps:$4 sm:$0xff]  }
 0x1f4   : > { %v1781_v23 = vpop.permute.xlu0 %1780 }
 0x1f5   : > { %1789 = vst.msk [vmem:[#allocation2] sm:$0xfe] %vm1788_vm3, %v1781_v23 }
 0x1f6   : > { %1793 = vst.msk [vmem:[#allocation2 + $0x10] sm:$0x1] %vm1792_vm4, %v1781_v23 }
 0x1f8   : > { %v1783_v24 = vpop.permute.xlu0 %1782 }
 0x1f9   : > { %v1785_v25 = vsel %vm1784_vm5, %v1781_v23, %v1783_v24  ;;  %v5134_v23 = vld [vmem:[%s6986_s6 + $0x250] ss:$8 sps:$4 sm:$0xff]   ;;  %v5139_v24 = vld [vmem:[%s6986_s6 + $0x264] ss:$8 sps:$4 sm:$0xff]  }
 0x1fa   : > { %1791 = vst.msk [vmem:[#allocation2 + $0x8] sm:$0xfe] %vm1790_vm6, %v1785_v25 }
 0x1fb   : > { %1795 = vst.msk [vmem:[#allocation2 + $0x18] sm:$0x1] %vm1794_vm7, %v1785_v25  ;;  %v5137_v25 = vld [vmem:[%s6986_s6 + $0x260] ss:$8 sps:$4 sm:$0xff]  }
 0x1fc   : > { %v1796_v26 = vld [vmem:[#allocation2] sm:$0xff] }
 0x1fd   : > { %v1798_v27 = vld [vmem:[#allocation2 + $0x10] sm:$0x3] }
 0x1fe   : > { %v6162_v28 = vpack.c.bf16 %v1798_v27, %v1796_v26  ;;  %v5142_v26 = vld [vmem:[%s6986_s6 + $0x274] ss:$8 sps:$4 sm:$0xff]   ;;  %v5140_v27 = vld [vmem:[%s6986_s6 + $0x270] ss:$8 sps:$4 sm:$0xff]  }
 0x200   : > { %v1867_v31 = vshll.u32 %v6162_v28, 16  ;;  %v1865_v38 = vshrl.u32 %v6162_v28, 16 }
 0x201   : > { %v1797_v29 = vld [vmem:[#allocation2 + $0x8] sm:$0xff] }
 0x202   : > { %v1799_v30 = vld [vmem:[#allocation2 + $0x18] sm:$0x3]  ;;  %v1869_v34 = vrot.slane %v1867_v31, 1  ;;  %v5148_v31 = vld [vmem:[%s6986_s6 + $0x294] ss:$8 sps:$4 sm:$0xff]  }
 0x203   : > { %v6165_v32 = vpack.c.bf16 %v1799_v30, %v1797_v29  ;;  %v5145_v29 = vld [vmem:[%s6986_s6 + $0x284] ss:$8 sps:$4 sm:$0xff]   ;;  %v5143_v30 = vld [vmem:[%s6986_s6 + $0x280] ss:$8 sps:$4 sm:$0xff]  }
 0x204   : > { %v1870_v42 = vor.u32 %v1869_v34, %v1865_v38  ;;  %v5149_v34 = vld [vmem:[%s6986_s6 + $0x2a0] ss:$8 sps:$4 sm:$0xff]   ;;  %v5157_v38 = vld [vmem:[%s6986_s6 + $0x2c4] ss:$8 sps:$4 sm:$0xff]  }
 0x205   : > { %v1874_v33 = vshll.u32 %v6165_v32, 16  ;;  %v1872_v35 = vshrl.u32 %v6165_v32, 16  ;;  %v2300_v8 = vrot.slane %v6165_v32, 1 }
 0x207   : > { %v1876_v36 = vrot.slane %v1874_v33, 1  ;;  %v5151_v33 = vld [vmem:[%s6986_s6 + $0x2a4] ss:$8 sps:$4 sm:$0xff]  }
 0x209   : > { %v1877_v39 = vor.u32 %v1876_v36, %v1872_v35  ;;  %v5154_v35 = vld [vmem:[%s6986_s6 + $0x2b4] ss:$8 sps:$4 sm:$0xff]   ;;  %v5152_v36 = vld [vmem:[%s6986_s6 + $0x2b0] ss:$8 sps:$4 sm:$0xff]  }
 0x20b   : > { %4353 = vmatprep.mubr.msk.bf16.mxu0 %vm433_vm1, %v1877_v39  ;;  %v5155_v39 = vld [vmem:[%s6986_s6 + $0x2c0] ss:$8 sps:$4 sm:$0xff]  }
 0x20c   : > { %2065 = vmatmul.mubr.bf16.vlgmr.msra.gmra.mrb[16].mxu0 %v1870_v42  ;;  %v5158_v42 = vld [vmem:[%s6988_s8 + $0xf0] ss:$8 sps:$4 sm:$0xff]  }
 0x20d   : > { %2226 = vmatpush1.bf16.msra.mxu0 %v5068_v40  ;;  %4384 = vmatprep.mubr.msk.bf16.mxu0 %vm433_vm1, %v6165_v32  ;;  %v5146_v32 = vld [vmem:[%s6986_s6 + $0x290] ss:$8 sps:$4 sm:$0xff]   ;;  %v2299_v40 = vrot.slane %v6162_v28, 1 }
 0x20e   : > { %2227 = vmatprep.subr.bf16.mxu0 %v5073_v43  ;;  %v5160_v43 = vld [vmem:[%s6988_s8 + $0xf4] ss:$8 sps:$4 sm:$0xff]  }
 0x20f   : > { %2767 = vmatprep.subr.bf16.mxu1 %v5160_v43 }
 0x210   : > { %2768 = vmatpush1.bf16.msra.mxu1 %v5158_v42 }
 0x211   : > { %2228 = vmatpush1.bf16.msra.mxu0 %v5071_v44  ;;  %v5163_v44 = vld [vmem:[%s6988_s8 + $0x104] ss:$8 sps:$4 sm:$0xff]  }
 0x212   : > { %2229 = vmatprep.subr.bf16.mxu0 %v5076_v45  ;;  %v5161_v45 = vld [vmem:[%s6988_s8 + $0x100] ss:$8 sps:$4 sm:$0xff]   ;;  %2769 = vmatprep.subr.bf16.mxu1 %v5163_v44 }
 0x214   : > { %2770 = vmatpush1.bf16.msra.mxu1 %v5161_v45  ;;  %v5203_v45 = vld [vmem:[%s6988_s8] ss:$8 sps:$4 sm:$0xff]  }
 0x215   : > { %2230 = vmatpush1.bf16.msra.mxu0 %v5074_v46  ;;  %v5164_v46 = vld [vmem:[%s6988_s8 + $0x110] ss:$8 sps:$4 sm:$0xff]  }
 0x216   : > { %2231 = vmatprep.subr.bf16.mxu0 %v5079_v9  ;;  %v5169_v9 = vld [vmem:[%s6988_s8 + $0x124] ss:$8 sps:$4 sm:$0xff]  }
 0x219   : > { %2232 = vmatpush1.bf16.msra.mxu0 %v5077_v47  ;;  %v5167_v47 = vld [vmem:[%s6988_s8 + $0x120] ss:$8 sps:$4 sm:$0xff]  }
 0x21a   : > { %2233 = vmatprep.subr.bf16.mxu0 %v5082_v48  ;;  %v5172_v48 = vld [vmem:[%s6988_s8 + $0x134] ss:$8 sps:$4 sm:$0xff]  }
 0x21d   : > { %2234 = vmatpush1.bf16.msra.mxu0 %v5080_v49  ;;  %v5170_v49 = vld [vmem:[%s6988_s8 + $0x130] ss:$8 sps:$4 sm:$0xff]  }
 0x21e   : > { %2235 = vmatprep.subr.bf16.mxu0 %v5085_v50  ;;  %v5175_v50 = vld [vmem:[%s6988_s8 + $0x144] ss:$8 sps:$4 sm:$0xff]  }
 0x221   : > { %2236 = vmatpush1.bf16.msra.mxu0 %v5083_v51  ;;  %v5173_v51 = vld [vmem:[%s6988_s8 + $0x140] ss:$8 sps:$4 sm:$0xff]  }
 0x222   : > { %2237 = vmatprep.subr.bf16.mxu0 %v5088_v52  ;;  %v5178_v52 = vld [vmem:[%s6988_s8 + $0x154] ss:$8 sps:$4 sm:$0xff]  }
 0x225   : > { %2238 = vmatpush1.bf16.msra.mxu0 %v5086_v53  ;;  %v5176_v53 = vld [vmem:[%s6988_s8 + $0x150] ss:$8 sps:$4 sm:$0xff]  }
 0x226   : > { %2239 = vmatprep.subr.bf16.mxu0 %v5091_v10  ;;  %v5181_v10 = vld [vmem:[%s6988_s8 + $0x164] ss:$8 sps:$4 sm:$0xff]  }
 0x229   : > { %2240 = vmatpush1.bf16.msra.mxu0 %v5089_v55  ;;  %v5179_v55 = vld [vmem:[%s6988_s8 + $0x160] ss:$8 sps:$4 sm:$0xff]  }
 0x22a   : > { %2241 = vmatprep.subr.bf16.mxu0 %v5094_v56  ;;  %v5184_v56 = vld [vmem:[%s6988_s8 + $0x174] ss:$8 sps:$4 sm:$0xff]  }
 0x22d   : > { %2242 = vmatpush1.bf16.msra.mxu0 %v5092_v57  ;;  %v5182_v57 = vld [vmem:[%s6988_s8 + $0x170] ss:$8 sps:$4 sm:$0xff]  }
 0x22e   : > { %2243 = vmatprep.subr.bf16.mxu0 %v5097_v37  ;;  %v5187_v37 = vld [vmem:[%s6988_s8 + $0x184] ss:$8 sps:$4 sm:$0xff]  }
 0x231   : > { %2244 = vmatpush1.bf16.msra.mxu0 %v5095_v41  ;;  %v5185_v41 = vld [vmem:[%s6988_s8 + $0x180] ss:$8 sps:$4 sm:$0xff]  }
 0x232   : > { %2245 = vmatprep.subr.bf16.mxu0 %v5100_v58  ;;  %v1626_v58 = vld [vmem:[%s6985_s5] sm:$0x3] }
 0x235   : > { %2246 = vmatpush1.bf16.msra.mxu0 %v5098_v61  ;;  %v5190_v61 = vld [vmem:[%s6988_s8 + $0x194] ss:$8 sps:$4 sm:$0xff]  }
 0x236   : > { %2247 = vmatprep.subr.bf16.mxu0 %v5103_v63  ;;  %v1800_v63 = vld [vmem:[%s6987_s7] sm:$0x3] }
 0x239   : > { %2248 = vmatpush1.bf16.msra.mxu0 %v5101_v0  ;;  %v5188_v0 = vld [vmem:[%s6988_s8 + $0x190] ss:$8 sps:$4 sm:$0xff]  }
 0x23a   : > { %2249 = vmatprep.subr.bf16.mxu0 %v5106_v1  ;;  %v1648_v1 = vrot.slane %v1626_v58, %v6113_v60 }
 0x23d   : > { %2250 = vmatpush1.bf16.msra.mxu0 %v5104_v54  ;;  %v1652_v54 = vrot.slane %v1626_v58, %v6118_v62  ;;  %v5227_v58 = vld [vmem:[%s6988_s8 + $0x80] ss:$8 sps:$4 sm:$0xff]  }
 0x23e   : > { %2251 = vmatprep.subr.bf16.mxu0 %v5109_v2  ;;  %v2502_v2 = vrot.slane %v1800_v63, %v6113_v60 }
 0x241   : > { %2252 = vmatpush1.bf16.msra.mxu0 %v5107_v3  ;;  %v5193_v3 = vld [vmem:[%s6988_s8 + $0x1a4] ss:$8 sps:$4 sm:$0xff]  }
 0x242   : > { %2253 = vmatprep.subr.bf16.mxu0 %v5112_v4 }
 0x245   : > { %2254 = vmatpush1.bf16.msra.mxu0 %v5110_v5  ;;  %v2506_v5 = vrot.slane %v1800_v63, %v6118_v62  ;;  %v5230_v63 = vld [vmem:[%s6988_s8 + $0x90] ss:$8 sps:$4 sm:$0xff]  }
 0x246   : > { %2455 = vmatprep.subr.bf16.mxu0 %v5115_v59  ;;  %v5191_v59 = vld [vmem:[%s6988_s8 + $0x1a0] ss:$8 sps:$4 sm:$0xff]  }
 0x248   : > { %2258 = vmatmul.mubr.bf16.vlgmr.msra.gmra.mrb[16].mxu0 %v6162_v28  ;;  %v5166_v28 = vld [vmem:[%s6988_s8 + $0x114] ss:$8 sps:$4 sm:$0xff]  }
 0x249   : > { %2456 = vmatpush1.bf16.msra.mxu0 %v5113_v6  ;;  %4445 = vmatprep.mubr.msk.bf16.mxu0 %vm433_vm1, %v2300_v8  ;;  %v5196_v8 = vld [vmem:[%s6988_s8 + $0x1b4] ss:$8 sps:$4 sm:$0xff]  }
 0x24a   : > { %2457 = vmatprep.subr.bf16.mxu0 %v5118_v7  ;;  %2771 = vmatprep.subr.bf16.mxu1 %v5166_v28 }
 0x24b   : > { %2772 = vmatpush1.bf16.msra.mxu1 %v5164_v46  ;;  %v5208_v46 = vld [vmem:[%s6988_s8 + $0x14] ss:$8 sps:$4 sm:$0xff]  }
 0x24c   : > { %2773 = vmatprep.subr.bf16.mxu1 %v5169_v9  ;;  %v5206_v9 = vld [vmem:[%s6988_s8 + $0x10] ss:$8 sps:$4 sm:$0xff]  }
 0x24d   : > { %2458 = vmatpush1.bf16.msra.mxu0 %v5116_v11 }
 0x24e   : > { %2459 = vmatprep.subr.bf16.mxu0 %v5121_v12 }
 0x24f   : > { %2774 = vmatpush1.bf16.msra.mxu1 %v5167_v47  ;;  %v5211_v47 = vld [vmem:[%s6988_s8 + $0x24] ss:$8 sps:$4 sm:$0xff]  }
 0x250   : > { %2775 = vmatprep.subr.bf16.mxu1 %v5172_v48  ;;  %v5209_v48 = vld [vmem:[%s6988_s8 + $0x20] ss:$8 sps:$4 sm:$0xff]  }
 0x251   : > { %2460 = vmatpush1.bf16.msra.mxu0 %v5119_v13  ;;  %v5194_v13 = vld [vmem:[%s6988_s8 + $0x1b0] ss:$8 sps:$4 sm:$0xff]  }
 0x252   : > { %2461 = vmatprep.subr.bf16.mxu0 %v5124_v14 }
 0x253   : > { %2776 = vmatpush1.bf16.msra.mxu1 %v5170_v49  ;;  %v5214_v49 = vld [vmem:[%s6988_s8 + $0x34] ss:$8 sps:$4 sm:$0xff]  }
 0x254   : > { %2777 = vmatprep.subr.bf16.mxu1 %v5175_v50  ;;  %v5212_v50 = vld [vmem:[%s6988_s8 + $0x30] ss:$8 sps:$4 sm:$0xff]  }
 0x255   : > { %2462 = vmatpush1.bf16.msra.mxu0 %v5122_v15 }
 0x256   : > { %2463 = vmatprep.subr.bf16.mxu0 %v5127_v16  ;;  %v5199_v16 = vld [vmem:[%s6988_s8 + $0x1c4] ss:$8 sps:$4 sm:$0xff]  }
 0x257   : > { %2778 = vmatpush1.bf16.msra.mxu1 %v5173_v51  ;;  %v5217_v51 = vld [vmem:[%s6988_s8 + $0x44] ss:$8 sps:$4 sm:$0xff]  }
 0x258   : > { %2779 = vmatprep.subr.bf16.mxu1 %v5178_v52  ;;  %v5215_v52 = vld [vmem:[%s6988_s8 + $0x40] ss:$8 sps:$4 sm:$0xff]  }
 0x259   : > { %2464 = vmatpush1.bf16.msra.mxu0 %v5125_v17 }
 0x25a   : > { %2465 = vmatprep.subr.bf16.mxu0 %v5130_v18 }
 0x25b   : > { %2780 = vmatpush1.bf16.msra.mxu1 %v5176_v53  ;;  %v5220_v53 = vld [vmem:[%s6988_s8 + $0x54] ss:$8 sps:$4 sm:$0xff]  }
 0x25c   : > { %2781 = vmatprep.subr.bf16.mxu1 %v5181_v10  ;;  %v5218_v10 = vld [vmem:[%s6988_s8 + $0x50] ss:$8 sps:$4 sm:$0xff]  }
 0x25d   : > { %2466 = vmatpush1.bf16.msra.mxu0 %v5128_v19  ;;  %v5197_v19 = vld [vmem:[%s6988_s8 + $0x1c0] ss:$8 sps:$4 sm:$0xff]  }
 0x25e   : > { %2467 = vmatprep.subr.bf16.mxu0 %v5133_v20 }
 0x25f   : > { %2782 = vmatpush1.bf16.msra.mxu1 %v5179_v55  ;;  %v5223_v55 = vld [vmem:[%s6988_s8 + $0x64] ss:$8 sps:$4 sm:$0xff]  }
 0x260   : > { %2783 = vmatprep.subr.bf16.mxu1 %v5184_v56  ;;  %v5221_v56 = vld [vmem:[%s6988_s8 + $0x60] ss:$8 sps:$4 sm:$0xff]  }
 0x261   : > { %2468 = vmatpush1.bf16.msra.mxu0 %v5131_v21 }
 0x262   : > { %2469 = vmatprep.subr.bf16.mxu0 %v5136_v22  ;;  %v5202_v22 = vld [vmem:[%s6988_s8 + $0x1d4] ss:$8 sps:$4 sm:$0xff]  }
 0x263   : > { %2784 = vmatpush1.bf16.msra.mxu1 %v5182_v57  ;;  %v5226_v57 = vld [vmem:[%s6988_s8 + $0x74] ss:$8 sps:$4 sm:$0xff]  }
 0x264   : > { %2785 = vmatprep.subr.bf16.mxu1 %v5187_v37  ;;  %v5224_v37 = vld [vmem:[%s6988_s8 + $0x70] ss:$8 sps:$4 sm:$0xff]  }
 0x265   : > { %2470 = vmatpush1.bf16.msra.mxu0 %v5134_v23  ;;  %v5200_v23 = vld [vmem:[%s6988_s8 + $0x1d0] ss:$8 sps:$4 sm:$0xff]  }
 0x266   : > { %2471 = vmatprep.subr.bf16.mxu0 %v5139_v24 }
 0x267   : > { %2786 = vmatpush1.bf16.msra.mxu1 %v5185_v41  ;;  %v5229_v41 = vld [vmem:[%s6988_s8 + $0x84] ss:$8 sps:$4 sm:$0xff]  }
 0x268   : > { %2787 = vmatprep.subr.bf16.mxu1 %v5190_v61  ;;  %v5232_v61 = vld [vmem:[%s6988_s8 + $0x94] ss:$8 sps:$4 sm:$0xff]  }
 0x269   : > { %2472 = vmatpush1.bf16.msra.mxu0 %v5137_v25  ;;  %v5205_v25 = vld [vmem:[%s6988_s8 + $0x4] ss:$8 sps:$4 sm:$0xff]  }
 0x26a   : > { %2473 = vmatprep.subr.bf16.mxu0 %v5142_v26 }
 0x26b   : > { %2788 = vmatpush1.bf16.msra.mxu1 %v5188_v0  ;;  %v5235_v0 = vld [vmem:[%s6988_s8 + $0xa4] ss:$8 sps:$4 sm:$0xff]  }
 0x26c   : > { %2789 = vmatprep.subr.bf16.mxu1 %v5193_v3  ;;  %v5241_v3 = vld [vmem:[%s6988_s8 + $0xc4] ss:$8 sps:$4 sm:$0xff]  }
 0x26d   : > { %2474 = vmatpush1.bf16.msra.mxu0 %v5140_v27 }
 0x26e   : > { %2475 = vmatprep.subr.bf16.mxu0 %v5145_v29 }
 0x26f   : > { %2790 = vmatpush1.bf16.msra.mxu1 %v5191_v59  ;;  %v5242_v59 = vld [vmem:[%s6988_s8 + $0xd0] ss:$8 sps:$4 sm:$0xff]  }
 0x270   : > { %2791 = vmatprep.subr.bf16.mxu1 %v5196_v8  ;;  %v5250_v8 = vld [vmem:[%s6988_s8 + $0x1e4] ss:$8 sps:$4 sm:$0xff]  }
 0x271   : > { %2476 = vmatpush1.bf16.msra.mxu0 %v5143_v30 }
 0x272   : > { %2477 = vmatprep.subr.bf16.mxu0 %v5148_v31 }
 0x273   : > { %2792 = vmatpush1.bf16.msra.mxu1 %v5194_v13 }
 0x274   : > { %2793 = vmatprep.subr.bf16.mxu1 %v5199_v16  ;;  %v5256_v16 = vld [vmem:[%s6988_s8 + $0x204] ss:$8 sps:$4 sm:$0xff]  }
 0x275   : > { %2478 = vmatpush1.bf16.msra.mxu0 %v5146_v32 }
 0x276   : > { %2479 = vmatprep.subr.bf16.mxu0 %v5151_v33 }
 0x277   : > { %2794 = vmatpush1.bf16.msra.mxu1 %v5197_v19  ;;  %v5254_v19 = vld [vmem:[%s6988_s8 + $0x200] ss:$8 sps:$4 sm:$0xff]  }
 0x278   : > { %2795 = vmatprep.subr.bf16.mxu1 %v5202_v22  ;;  %v5257_v22 = vld [vmem:[%s6988_s8 + $0x210] ss:$8 sps:$4 sm:$0xff]  }
 0x279   : > { %2480 = vmatpush1.bf16.msra.mxu0 %v5149_v34 }
 0x27a   : > { %2481 = vmatprep.subr.bf16.mxu0 %v5154_v35 }
 0x27b   : > { %2796 = vmatpush1.bf16.msra.mxu1 %v5200_v23  ;;  %v5262_v23 = vld [vmem:[%s6988_s8 + $0x224] ss:$8 sps:$4 sm:$0xff]  }
 0x27c   : > { %2960 = vmatprep.subr.bf16.mxu1 %v5205_v25  ;;  %v5265_v25 = vld [vmem:[%s6988_s8 + $0x234] ss:$8 sps:$4 sm:$0xff]  }
 0x27d   : > { %2482 = vmatpush1.bf16.msra.mxu0 %v5152_v36 }
 0x27e   : > { %2483 = vmatprep.subr.bf16.mxu0 %v5157_v38 }
 0x281   : > { %2484 = vmatpush1.bf16.msra.mxu0 %v5155_v39 }
 0x284   : > { %2488 = vmatmul.mubr.bf16.vlgmr.msra.gmra.mrb[16].mxu0 %v2299_v40 }
 0x357   : > { %v2489_v4 = vpop.f32.mrb[16].mxu0 }
 0x358   : > { %v4755_v6 = vadd.f32 %v2489_v4, %v1648_v1  ;;  %v2491_v7 = vpop.f32.mrb[17].mxu0  ;;  %v5233_v1 = vld [vmem:[%s6988_s8 + $0xa0] ss:$8 sps:$4 sm:$0xff]  }
 0x359   : > { %v4757_v11 = vadd.f32 %v2491_v7, %v1652_v54  ;;  %v2493_v12 = vpop.f32.mrb[18].mxu0  ;;  %v5238_v54 = vld [vmem:[%s6988_s8 + $0xb4] ss:$8 sps:$4 sm:$0xff]   ;;  %v5239_v4 = vld [vmem:[%s6988_s8 + $0xc0] ss:$8 sps:$4 sm:$0xff]  }
 0x35a   : > { %v6442_v14 = vadd.f32 %v4755_v6, %v2502_v2  ;;  %v2494_v15 = vpop.f32.mrb[19].mxu0  ;;  %v5236_v2 = vld [vmem:[%s6988_s8 + $0xb0] ss:$8 sps:$4 sm:$0xff]   ;;  %v5247_v6 = vld [vmem:[%s6988_s8 + $0xe4] ss:$8 sps:$4 sm:$0xff]  }
 0x35b   : > { %v6447_v17 = vadd.f32 %v4757_v11, %v2506_v5  ;;  %v5244_v5 = vld [vmem:[%s6988_s8 + $0xd4] ss:$8 sps:$4 sm:$0xff]   ;;  %v5245_v7 = vld [vmem:[%s6988_s8 + $0xe0] ss:$8 sps:$4 sm:$0xff]   ;;  %v5251_v15 = vld [vmem:[%s6988_s8 + $0x1f0] ss:$8 sps:$4 sm:$0xff]  }
 0x35c   : > { %v2513_v18 = vmax.f32 %v6442_v14, 0.0  ;;  %v5248_v11 = vld [vmem:[%s6988_s8 + $0x1e0] ss:$8 sps:$4 sm:$0xff]   ;;  %v5253_v12 = vld [vmem:[%s6988_s8 + $0x1f4] ss:$8 sps:$4 sm:$0xff]  }
 0x35d   : > { %v2514_v20 = vmax.f32 %v6447_v17, 0.0 }
 0x35e   : > { %v2519_v21 = vrot.slane %v2513_v18, 7 }
 0x35f   : > { %v2520_v24 = vrot.slane %v2514_v20, 7 }
 0x360   : > { %2521 = vrot.lane.b32.xlu1 %v2519_v21, %s5438_s29  ;;  %v5259_v21 = vld [vmem:[%s6988_s8 + $0x214] ss:$8 sps:$4 sm:$0xff]  }
 0x364   : > { %2523 = vrot.lane.b32.xlu1 %v2520_v24, %s5438_s29  ;;  %v5260_v24 = vld [vmem:[%s6988_s8 + $0x220] ss:$8 sps:$4 sm:$0xff]  }
 0x3d2   : > { %v2522_v26 = vpop.permute.xlu1 %2521 }
 0x3d3   : > { %2528 = vst.msk [vmem:[#allocation2] sm:$0xfe] %vm1788_vm3, %v2522_v26 }
 0x3d4   : > { %2530 = vst.msk [vmem:[#allocation2 + $0x10] sm:$0x1] %vm1792_vm4, %v2522_v26 }
 0x3d6   : > { %v2524_v27 = vpop.permute.xlu1 %2523 }
 0x3d7   : > { %v2525_v29 = vsel %vm1784_vm5, %v2522_v26, %v2524_v27  ;;  %v5263_v26 = vld [vmem:[%s6988_s8 + $0x230] ss:$8 sps:$4 sm:$0xff]   ;;  %v5268_v27 = vld [vmem:[%s6988_s8 + $0x244] ss:$8 sps:$4 sm:$0xff]  }
 0x3d8   : > { %2529 = vst.msk [vmem:[#allocation2 + $0x8] sm:$0xfe] %vm1790_vm6, %v2525_v29 }
 0x3d9   : > { %2531 = vst.msk [vmem:[#allocation2 + $0x18] sm:$0x1] %vm1794_vm7, %v2525_v29  ;;  %v5266_v29 = vld [vmem:[%s6988_s8 + $0x240] ss:$8 sps:$4 sm:$0xff]  }
 0x3da   : > { %v2532_v30 = vld [vmem:[#allocation2] sm:$0xff] }
 0x3db   : > { %v2534_v31 = vld [vmem:[#allocation2 + $0x10] sm:$0x3] }
 0x3dc   : > { %v6474_v32 = vpack.c.bf16 %v2534_v31, %v2532_v30  ;;  %v5271_v30 = vld [vmem:[%s6988_s8 + $0x254] ss:$8 sps:$4 sm:$0xff]   ;;  %v5269_v31 = vld [vmem:[%s6988_s8 + $0x250] ss:$8 sps:$4 sm:$0xff]  }
 0x3de   : > { %v2602_v35 = vshll.u32 %v6474_v32, 16  ;;  %v2600_v43 = vshrl.u32 %v6474_v32, 16 }
 0x3df   : > { %v2533_v33 = vld [vmem:[#allocation2 + $0x8] sm:$0xff] }
 0x3e0   : > { %v2535_v34 = vld [vmem:[#allocation2 + $0x18] sm:$0x3]  ;;  %v2604_v39 = vrot.slane %v2602_v35, 1  ;;  %v5277_v35 = vld [vmem:[%s6988_s8 + $0x274] ss:$8 sps:$4 sm:$0xff]  }
 0x3e1   : > { %v6477_v36 = vpack.c.bf16 %v2535_v34, %v2533_v33  ;;  %v5274_v33 = vld [vmem:[%s6988_s8 + $0x264] ss:$8 sps:$4 sm:$0xff]   ;;  %v5272_v34 = vld [vmem:[%s6988_s8 + $0x260] ss:$8 sps:$4 sm:$0xff]  }
 0x3e2   : > { %v2605_v28 = vor.u32 %v2604_v39, %v2600_v43  ;;  %v5278_v39 = vld [vmem:[%s6988_s8 + $0x280] ss:$8 sps:$4 sm:$0xff]   ;;  %v5286_v43 = vld [vmem:[%s6988_s8 + $0x2a4] ss:$8 sps:$4 sm:$0xff]  }
 0x3e3   : > { %v2609_v38 = vshll.u32 %v6477_v36, 16  ;;  %v2607_v40 = vshrl.u32 %v6477_v36, 16  ;;  %v3035_v13 = vrot.slane %v6477_v36, 1 }
 0x3e5   : > { %v2611_v42 = vrot.slane %v2609_v38, 1  ;;  %v5280_v38 = vld [vmem:[%s6988_s8 + $0x284] ss:$8 sps:$4 sm:$0xff]  }
 0x3e7   : > { %v2612_v44 = vor.u32 %v2611_v42, %v2607_v40  ;;  %v5283_v40 = vld [vmem:[%s6988_s8 + $0x294] ss:$8 sps:$4 sm:$0xff]   ;;  %v5281_v42 = vld [vmem:[%s6988_s8 + $0x290] ss:$8 sps:$4 sm:$0xff]  }
 0x3e9   : > { %4506 = vmatprep.mubr.msk.bf16.mxu1 %vm433_vm1, %v2612_v44  ;;  %v5284_v44 = vld [vmem:[%s6988_s8 + $0x2a0] ss:$8 sps:$4 sm:$0xff]  }
 0x3ea   : > { %2800 = vmatmul.mubr.bf16.vlgmr.msra.gmra.mrb[8].mxu1 %v2605_v28  ;;  %v5287_v28 = vld [vmem:[%s6988_s8 + $0x2b0] ss:$8 sps:$4 sm:$0xff]  }
 0x3eb   : > { %2961 = vmatpush1.bf16.msra.mxu1 %v5203_v45  ;;  %4537 = vmatprep.mubr.msk.bf16.mxu1 %vm433_vm1, %v6477_v36  ;;  %v5275_v36 = vld [vmem:[%s6988_s8 + $0x270] ss:$8 sps:$4 sm:$0xff]   ;;  %v5289_v45 = vld [vmem:[%s6988_s8 + $0x2b4] ss:$8 sps:$4 sm:$0xff]  }
 0x3ec   : > { %2962 = vmatprep.subr.bf16.mxu1 %v5208_v46  ;;  %v5292_v46 = vld [vmem:[%s6988_s8 + $0x2c4] ss:$8 sps:$4 sm:$0xff]  }
 0x3ef   : > { %2963 = vmatpush1.bf16.msra.mxu1 %v5206_v9  ;;  %v5290_v9 = vld [vmem:[%s6988_s8 + $0x2c0] ss:$8 sps:$4 sm:$0xff]  }
 0x3f0   : > { %2964 = vmatprep.subr.bf16.mxu1 %v5211_v47  ;;  %v3034_v47 = vrot.slane %v6474_v32, 1 }
 0x3f3   : > { %2965 = vmatpush1.bf16.msra.mxu1 %v5209_v48 }
 0x3f4   : > { %2966 = vmatprep.subr.bf16.mxu1 %v5214_v49 }
 0x3f7   : > { %2967 = vmatpush1.bf16.msra.mxu1 %v5212_v50 }
 0x3f8   : > { %2968 = vmatprep.subr.bf16.mxu1 %v5217_v51  ;;  %v5293_v51 = vld [vmem:[%s6990_s10] ss:$8 sps:$4 sm:$0xff]  }
 0x3fb   : > { %2969 = vmatpush1.bf16.msra.mxu1 %v5215_v52  ;;  %v5295_v52 = vld [vmem:[%s6990_s10 + $0x4] ss:$8 sps:$4 sm:$0xff]  }
 0x3fc   : > { %2970 = vmatprep.subr.bf16.mxu1 %v5220_v53  ;;  %3691 = vmatprep.subr.bf16.mxu0 %v5295_v52  ;;  %v5370_v52 = vld [vmem:[%s6990_s10 + $0xd4] ss:$8 sps:$4 sm:$0xff]  }
 0x3fd   : > { %3692 = vmatpush1.bf16.msra.mxu0 %v5293_v51  ;;  %v5368_v51 = vld [vmem:[%s6990_s10 + $0xd0] ss:$8 sps:$4 sm:$0xff]  }
 0x3ff   : > { %2971 = vmatpush1.bf16.msra.mxu1 %v5218_v10  ;;  %v5298_v10 = vld [vmem:[%s6990_s10 + $0x14] ss:$8 sps:$4 sm:$0xff]  }
 0x400   : > { %2972 = vmatprep.subr.bf16.mxu1 %v5223_v55  ;;  %v5301_v55 = vld [vmem:[%s6990_s10 + $0xf4] ss:$8 sps:$4 sm:$0xff]   ;;  %3693 = vmatprep.subr.bf16.mxu0 %v5298_v10  ;;  %v5371_v10 = vld [vmem:[%s6990_s10 + $0x1b0] ss:$8 sps:$4 sm:$0xff]  }
 0x403   : > { %2973 = vmatpush1.bf16.msra.mxu1 %v5221_v56  ;;  %v5296_v56 = vld [vmem:[%s6990_s10 + $0x10] ss:$8 sps:$4 sm:$0xff]  }
 0x404   : > { %2974 = vmatprep.subr.bf16.mxu1 %v5226_v57  ;;  %v5307_v57 = vld [vmem:[%s6990_s10 + $0x104] ss:$8 sps:$4 sm:$0xff]   ;;  %3694 = vmatpush1.bf16.msra.mxu0 %v5296_v56 }
 0x407   : > { %2975 = vmatpush1.bf16.msra.mxu1 %v5224_v37  ;;  %v5304_v37 = vld [vmem:[%s6990_s10 + $0x24] ss:$8 sps:$4 sm:$0xff]  }
 0x408   : > { %2976 = vmatprep.subr.bf16.mxu1 %v5229_v41  ;;  %v5305_v41 = vld [vmem:[%s6990_s10 + $0x100] ss:$8 sps:$4 sm:$0xff]   ;;  %3695 = vmatprep.subr.bf16.mxu0 %v5304_v37  ;;  %v5379_v37 = vld [vmem:[%s6990_s10 + $0x1c4] ss:$8 sps:$4 sm:$0xff]  }
 0x40b   : > { %2977 = vmatpush1.bf16.msra.mxu1 %v5227_v58  ;;  %v5313_v58 = vld [vmem:[%s6990_s10 + $0x114] ss:$8 sps:$4 sm:$0xff]  }
 0x40c   : > { %2978 = vmatprep.subr.bf16.mxu1 %v5232_v61  ;;  %v5302_v61 = vld [vmem:[%s6990_s10 + $0x20] ss:$8 sps:$4 sm:$0xff]  }
 0x40d   : > { %3696 = vmatpush1.bf16.msra.mxu0 %v5302_v61 }
 0x40f   : > { %2979 = vmatpush1.bf16.msra.mxu1 %v5230_v63  ;;  %v5310_v63 = vld [vmem:[%s6990_s10 + $0x34] ss:$8 sps:$4 sm:$0xff]  }
 0x410   : > { %2980 = vmatprep.subr.bf16.mxu1 %v5235_v0  ;;  %v5311_v0 = vld [vmem:[%s6990_s10 + $0x110] ss:$8 sps:$4 sm:$0xff]   ;;  %3697 = vmatprep.subr.bf16.mxu0 %v5310_v63 }
 0x413   : > { %2981 = vmatpush1.bf16.msra.mxu1 %v5233_v1  ;;  %v5319_v1 = vld [vmem:[%s6990_s10 + $0x124] ss:$8 sps:$4 sm:$0xff]  }
 0x414   : > { %2982 = vmatprep.subr.bf16.mxu1 %v5238_v54  ;;  %v5308_v54 = vld [vmem:[%s6990_s10 + $0x30] ss:$8 sps:$4 sm:$0xff]  }
 0x415   : > { %3698 = vmatpush1.bf16.msra.mxu0 %v5308_v54 }
 0x417   : > { %2983 = vmatpush1.bf16.msra.mxu1 %v5236_v2  ;;  %v5316_v2 = vld [vmem:[%s6990_s10 + $0x44] ss:$8 sps:$4 sm:$0xff]  }
 0x418   : > { %2984 = vmatprep.subr.bf16.mxu1 %v5241_v3  ;;  %v5317_v3 = vld [vmem:[%s6990_s10 + $0x120] ss:$8 sps:$4 sm:$0xff]   ;;  %3699 = vmatprep.subr.bf16.mxu0 %v5316_v2 }
 0x419   : > { %v5377_v2 = vld [vmem:[%s6990_s10 + $0x1c0] ss:$8 sps:$4 sm:$0xff]  }
 0x41b   : > { %2985 = vmatpush1.bf16.msra.mxu1 %v5239_v4  ;;  %v5325_v4 = vld [vmem:[%s6990_s10 + $0x134] ss:$8 sps:$4 sm:$0xff]  }
 0x41c   : > { %2986 = vmatprep.subr.bf16.mxu1 %v5244_v5  ;;  %v5314_v5 = vld [vmem:[%s6990_s10 + $0x40] ss:$8 sps:$4 sm:$0xff]  }
 0x41d   : > { %3700 = vmatpush1.bf16.msra.mxu0 %v5314_v5 }
 0x41f   : > { %2987 = vmatpush1.bf16.msra.mxu1 %v5242_v59  ;;  %v5322_v59 = vld [vmem:[%s6990_s10 + $0x54] ss:$8 sps:$4 sm:$0xff]  }
 0x420   : > { %2988 = vmatprep.subr.bf16.mxu1 %v5247_v6  ;;  %v5323_v6 = vld [vmem:[%s6990_s10 + $0x130] ss:$8 sps:$4 sm:$0xff]   ;;  %3701 = vmatprep.subr.bf16.mxu0 %v5322_v59 }
 0x423   : > { %2989 = vmatpush1.bf16.msra.mxu1 %v5245_v7  ;;  %v5331_v7 = vld [vmem:[%s6990_s10 + $0x144] ss:$8 sps:$4 sm:$0xff]  }
 0x424   : > { %3190 = vmatprep.subr.bf16.mxu1 %v5250_v8  ;;  %v5320_v8 = vld [vmem:[%s6990_s10 + $0x50] ss:$8 sps:$4 sm:$0xff]  }
 0x425   : > { %3702 = vmatpush1.bf16.msra.mxu0 %v5320_v8  ;;  %v5380_v8 = vld [vmem:[%s6990_s10 + $0x1d0] ss:$8 sps:$4 sm:$0xff]  }
 0x426   : > { %2993 = vmatmul.mubr.bf16.vlgmr.msra.gmra.mrb[12].mxu1 %v6474_v32  ;;  %v5299_v32 = vld [vmem:[%s6990_s10 + $0xf0] ss:$8 sps:$4 sm:$0xff]  }
 0x427   : > { %3191 = vmatpush1.bf16.msra.mxu1 %v5248_v11  ;;  %4598 = vmatprep.mubr.msk.bf16.mxu1 %vm433_vm1, %v3035_v13  ;;  %v5328_v11 = vld [vmem:[%s6990_s10 + $0x64] ss:$8 sps:$4 sm:$0xff]   ;;  %v5337_v13 = vld [vmem:[%s6990_s10 + $0x154] ss:$8 sps:$4 sm:$0xff]  }
 0x428   : > { %3192 = vmatprep.subr.bf16.mxu1 %v5253_v12  ;;  %v5329_v12 = vld [vmem:[%s6990_s10 + $0x140] ss:$8 sps:$4 sm:$0xff]   ;;  %3703 = vmatprep.subr.bf16.mxu0 %v5328_v11  ;;  %v5385_v11 = vld [vmem:[%s6990_s10 + $0x1e4] ss:$8 sps:$4 sm:$0xff]  }
 0x42b   : > { %3193 = vmatpush1.bf16.msra.mxu1 %v5251_v15  ;;  %v5326_v15 = vld [vmem:[%s6990_s10 + $0x60] ss:$8 sps:$4 sm:$0xff]  }
 0x42c   : > { %3194 = vmatprep.subr.bf16.mxu1 %v5256_v16  ;;  %v5334_v16 = vld [vmem:[%s6990_s10 + $0x74] ss:$8 sps:$4 sm:$0xff]   ;;  %3704 = vmatpush1.bf16.msra.mxu0 %v5326_v15 }
 0x42d   : > { %3705 = vmatprep.subr.bf16.mxu0 %v5334_v16 }
 0x42f   : > { %3195 = vmatpush1.bf16.msra.mxu1 %v5254_v19  ;;  %v5335_v19 = vld [vmem:[%s6990_s10 + $0x150] ss:$8 sps:$4 sm:$0xff]  }
 0x430   : > { %3196 = vmatprep.subr.bf16.mxu1 %v5259_v21  ;;  %v5343_v21 = vld [vmem:[%s6990_s10 + $0x164] ss:$8 sps:$4 sm:$0xff]  }
 0x433   : > { %3197 = vmatpush1.bf16.msra.mxu1 %v5257_v22  ;;  %v5332_v22 = vld [vmem:[%s6990_s10 + $0x70] ss:$8 sps:$4 sm:$0xff]  }
 0x434   : > { %3198 = vmatprep.subr.bf16.mxu1 %v5262_v23  ;;  %v5340_v23 = vld [vmem:[%s6990_s10 + $0x84] ss:$8 sps:$4 sm:$0xff]   ;;  %3706 = vmatpush1.bf16.msra.mxu0 %v5332_v22 }
 0x435   : > { %3707 = vmatprep.subr.bf16.mxu0 %v5340_v23 }
 0x437   : > { %3199 = vmatpush1.bf16.msra.mxu1 %v5260_v24  ;;  %v5341_v24 = vld [vmem:[%s6990_s10 + $0x160] ss:$8 sps:$4 sm:$0xff]  }
 0x438   : > { %3200 = vmatprep.subr.bf16.mxu1 %v5265_v25  ;;  %v5349_v25 = vld [vmem:[%s6990_s10 + $0x174] ss:$8 sps:$4 sm:$0xff]  }
 0x43b   : > { %3201 = vmatpush1.bf16.msra.mxu1 %v5263_v26  ;;  %v5338_v26 = vld [vmem:[%s6990_s10 + $0x80] ss:$8 sps:$4 sm:$0xff]  }
 0x43c   : > { %3202 = vmatprep.subr.bf16.mxu1 %v5268_v27  ;;  %v5346_v27 = vld [vmem:[%s6990_s10 + $0x94] ss:$8 sps:$4 sm:$0xff]   ;;  %3708 = vmatpush1.bf16.msra.mxu0 %v5338_v26 }
 0x43d   : > { %3709 = vmatprep.subr.bf16.mxu0 %v5346_v27 }
 0x43f   : > { %3203 = vmatpush1.bf16.msra.mxu1 %v5266_v29  ;;  %v5347_v29 = vld [vmem:[%s6990_s10 + $0x170] ss:$8 sps:$4 sm:$0xff]  }
 0x440   : > { %3204 = vmatprep.subr.bf16.mxu1 %v5271_v30  ;;  %v5355_v30 = vld [vmem:[%s6990_s10 + $0x184] ss:$8 sps:$4 sm:$0xff]  }
 0x443   : > { %3205 = vmatpush1.bf16.msra.mxu1 %v5269_v31  ;;  %v5344_v31 = vld [vmem:[%s6990_s10 + $0x90] ss:$8 sps:$4 sm:$0xff]  }
 0x444   : > { %3206 = vmatprep.subr.bf16.mxu1 %v5274_v33  ;;  %v5352_v33 = vld [vmem:[%s6990_s10 + $0xa4] ss:$8 sps:$4 sm:$0xff]   ;;  %3710 = vmatpush1.bf16.msra.mxu0 %v5344_v31 }
 0x445   : > { %3711 = vmatprep.subr.bf16.mxu0 %v5352_v33 }
 0x447   : > { %3207 = vmatpush1.bf16.msra.mxu1 %v5272_v34  ;;  %v5353_v34 = vld [vmem:[%s6990_s10 + $0x180] ss:$8 sps:$4 sm:$0xff]  }
 0x448   : > { %3208 = vmatprep.subr.bf16.mxu1 %v5277_v35  ;;  %v5361_v35 = vld [vmem:[%s6990_s10 + $0x194] ss:$8 sps:$4 sm:$0xff]  }
 0x44b   : > { %3209 = vmatpush1.bf16.msra.mxu1 %v5275_v36  ;;  %v5350_v36 = vld [vmem:[%s6990_s10 + $0xa0] ss:$8 sps:$4 sm:$0xff]  }
 0x44c   : > { %3210 = vmatprep.subr.bf16.mxu1 %v5280_v38  ;;  %v5358_v38 = vld [vmem:[%s6990_s10 + $0xb4] ss:$8 sps:$4 sm:$0xff]   ;;  %3712 = vmatpush1.bf16.msra.mxu0 %v5350_v36 }
 0x44d   : > { %3713 = vmatprep.subr.bf16.mxu0 %v5358_v38  ;;  %v5388_v36 = vld [vmem:[%s6990_s10 + $0x1f4] ss:$8 sps:$4 sm:$0xff]  }
 0x44f   : > { %3211 = vmatpush1.bf16.msra.mxu1 %v5278_v39  ;;  %v5359_v39 = vld [vmem:[%s6990_s10 + $0x190] ss:$8 sps:$4 sm:$0xff]  }
 0x450   : > { %3212 = vmatprep.subr.bf16.mxu1 %v5283_v40  ;;  %v5356_v40 = vld [vmem:[%s6990_s10 + $0xb0] ss:$8 sps:$4 sm:$0xff]  }
 0x451   : > { %3714 = vmatpush1.bf16.msra.mxu0 %v5356_v40  ;;  %v5391_v40 = vld [vmem:[%s6990_s10 + $0x204] ss:$8 sps:$4 sm:$0xff]  }
 0x453   : > { %3213 = vmatpush1.bf16.msra.mxu1 %v5281_v42 }
 0x454   : > { %3214 = vmatprep.subr.bf16.mxu1 %v5286_v43 }
 0x457   : > { %3215 = vmatpush1.bf16.msra.mxu1 %v5284_v44 }
 0x458   : > { %3216 = vmatprep.subr.bf16.mxu1 %v5289_v45 }
 0x45b   : > { %3217 = vmatpush1.bf16.msra.mxu1 %v5287_v28 }
 0x45c   : > { %3218 = vmatprep.subr.bf16.mxu1 %v5292_v46 }
 0x45f   : > { %3219 = vmatpush1.bf16.msra.mxu1 %v5290_v9  ;;  %v5364_v9 = vld [vmem:[%s6990_s10 + $0xc4] ss:$8 sps:$4 sm:$0xff]  }
 0x460   : > { %3498 = vmatprep.subr.bf16.mxu1 %v5301_v55  ;;  %3715 = vmatprep.subr.bf16.mxu0 %v5364_v9  ;;  %v5376_v55 = vld [vmem:[%s6990_s10 + $0xe4] ss:$8 sps:$4 sm:$0xff]   ;;  %v5398_v9 = vld [vmem:[%s6990_s10 + $0x230] ss:$8 sps:$4 sm:$0xff]  }
 0x462   : > { %3223 = vmatmul.mubr.bf16.vlgmr.msra.gmra.mrb[16].mxu1 %v3034_v47  ;;  %v2515_v47 = vld [vmem:[%s6989_s9] sm:$0x3] }
 0x463   : > { %3499 = vmatpush1.bf16.msra.mxu1 %v5299_v32  ;;  %v5373_v32 = vld [vmem:[%s6990_s10 + $0x1b4] ss:$8 sps:$4 sm:$0xff]  }
 0x464   : > { %3500 = vmatprep.subr.bf16.mxu1 %v5307_v57  ;;  %v3241_v57 = vrot.slane %v2515_v47, %v6118_v62 }
 0x467   : > { %3501 = vmatpush1.bf16.msra.mxu1 %v5305_v41 }
 0x468   : > { %3502 = vmatprep.subr.bf16.mxu1 %v5313_v58 }
 0x46b   : > { %3503 = vmatpush1.bf16.msra.mxu1 %v5311_v0  ;;  %v5374_v0 = vld [vmem:[%s6990_s10 + $0xe0] ss:$8 sps:$4 sm:$0xff]  }
 0x46c   : > { %3504 = vmatprep.subr.bf16.mxu1 %v5319_v1 }
 0x46f   : > { %3505 = vmatpush1.bf16.msra.mxu1 %v5317_v3 }
 0x470   : > { %3506 = vmatprep.subr.bf16.mxu1 %v5325_v4 }
 0x473   : > { %3507 = vmatpush1.bf16.msra.mxu1 %v5323_v6 }
 0x474   : > { %3508 = vmatprep.subr.bf16.mxu1 %v5331_v7  ;;  %v5382_v7 = vld [vmem:[%s6990_s10 + $0x1d4] ss:$8 sps:$4 sm:$0xff]  }
 0x477   : > { %3509 = vmatpush1.bf16.msra.mxu1 %v5329_v12 }
 0x478   : > { %3510 = vmatprep.subr.bf16.mxu1 %v5337_v13 }
 0x47b   : > { %3511 = vmatpush1.bf16.msra.mxu1 %v5335_v19 }
 0x47c   : > { %3512 = vmatprep.subr.bf16.mxu1 %v5343_v21 }
 0x47f   : > { %3513 = vmatpush1.bf16.msra.mxu1 %v5341_v24 }
 0x480   : > { %3514 = vmatprep.subr.bf16.mxu1 %v5349_v25 }
 0x483   : > { %3515 = vmatpush1.bf16.msra.mxu1 %v5347_v29 }
 0x484   : > { %3516 = vmatprep.subr.bf16.mxu1 %v5355_v30 }
 0x487   : > { %3517 = vmatpush1.bf16.msra.mxu1 %v5353_v34  ;;  %v5383_v34 = vld [vmem:[%s6990_s10 + $0x1e0] ss:$8 sps:$4 sm:$0xff]  }
 0x488   : > { %3518 = vmatprep.subr.bf16.mxu1 %v5361_v35 }
 0x48b   : > { %3519 = vmatpush1.bf16.msra.mxu1 %v5359_v39  ;;  %v5386_v39 = vld [vmem:[%s6990_s10 + $0x1f0] ss:$8 sps:$4 sm:$0xff]  }
 0x4bd   : > { %v6666_v48 = vpop.f32.mrb[8].mxu1 }
 0x4be   : > { %v6668_v49 = vpop.f32.mrb[9].mxu1 }
 0x4bf   : > { %v2805_v50 = vpop.f32.mrb[10].mxu1 }
 0x4c0   : > { %v2806_v53 = vpop.f32.mrb[11].mxu1  ;;  %v5362_v50 = vld [vmem:[%s6990_s10 + $0xc0] ss:$8 sps:$4 sm:$0xff]  }
 0x4c1   : > { %3716 = vmatpush1.bf16.msra.mxu0 %v5362_v50  ;;  %v3237_v53 = vrot.slane %v2515_v47, %v6113_v60  ;;  %v5403_v47 = vld [vmem:[%s6990_s10 + $0x244] ss:$8 sps:$4 sm:$0xff]   ;;  %v5401_v50 = vld [vmem:[%s6990_s10 + $0x240] ss:$8 sps:$4 sm:$0xff]  }
 0x4c2   : > { %3717 = vmatprep.subr.bf16.mxu0 %v5370_v52  ;;  %v5407_v52 = vld [vmem:[%s6990_s10 + $0x260] ss:$8 sps:$4 sm:$0xff]  }
 0x4c5   : > { %3718 = vmatpush1.bf16.msra.mxu0 %v5368_v51  ;;  %v5409_v51 = vld [vmem:[%s6990_s10 + $0x264] ss:$8 sps:$4 sm:$0xff]  }
 0x4c6   : > { %3719 = vmatprep.subr.bf16.mxu0 %v5376_v55  ;;  %v5413_v55 = vld [vmem:[%s6990_s10 + $0x280] ss:$8 sps:$4 sm:$0xff]  }
 0x4c9   : > { %3720 = vmatpush1.bf16.msra.mxu0 %v5374_v0  ;;  %v5425_v0 = vld [vmem:[%s6990_s10 + $0x2c0] ss:$8 sps:$4 sm:$0xff]  }
 0x4f9   : > { %v2994_v42 = vpop.f32.mrb[12].mxu1 }
 0x4fa   : > { %v2995_v43 = vadd.f32 %v2994_v42, %v6666_v48  ;;  %v2996_v44 = vpop.f32.mrb[13].mxu1  ;;  %v5367_v48 = vld [vmem:[%s6990_s10 + $0x1a4] ss:$8 sps:$4 sm:$0xff]   ;;  %v5389_v42 = vld [vmem:[%s6990_s10 + $0x200] ss:$8 sps:$4 sm:$0xff]  }
 0x4fb   : > { %v2997_v45 = vadd.f32 %v2996_v44, %v6668_v49  ;;  %v2998_v28 = vpop.f32.mrb[14].mxu1  ;;  %v5365_v49 = vld [vmem:[%s6990_s10 + $0x1a0] ss:$8 sps:$4 sm:$0xff]   ;;  %3520 = vmatprep.subr.bf16.mxu1 %v5367_v48  ;;  %v5392_v44 = vld [vmem:[%s6990_s10 + $0x210] ss:$8 sps:$4 sm:$0xff]  }
 0x4fc   : > { %v2999_v46 = vpop.f32.mrb[15].mxu1  ;;  %3521 = vmatpush1.bf16.msra.mxu1 %v5365_v49  ;;  %v5395_v28 = vld [vmem:[%s6990_s10 + $0x220] ss:$8 sps:$4 sm:$0xff]   ;;  %v5406_v48 = vld [vmem:[%s6990_s10 + $0x254] ss:$8 sps:$4 sm:$0xff]  }
 0x4fd   : > { %3522 = vmatprep.subr.bf16.mxu1 %v5373_v32  ;;  %v5400_v46 = vld [vmem:[%s6990_s10 + $0x234] ss:$8 sps:$4 sm:$0xff]   ;;  %v5404_v49 = vld [vmem:[%s6990_s10 + $0x250] ss:$8 sps:$4 sm:$0xff]   ;;  %v5415_v32 = vld [vmem:[%s6990_s10 + $0x284] ss:$8 sps:$4 sm:$0xff]  }
 0x500   : > { %3523 = vmatpush1.bf16.msra.mxu1 %v5371_v10  ;;  %v5410_v10 = vld [vmem:[%s6990_s10 + $0x270] ss:$8 sps:$4 sm:$0xff]  }
 0x501   : > { %3524 = vmatprep.subr.bf16.mxu1 %v5379_v37  ;;  %v5421_v37 = vld [vmem:[%s6990_s10 + $0x2a4] ss:$8 sps:$4 sm:$0xff]  }
 0x504   : > { %3525 = vmatpush1.bf16.msra.mxu1 %v5377_v2 }
 0x505   : > { %3526 = vmatprep.subr.bf16.mxu1 %v5382_v7 }
 0x508   : > { %3527 = vmatpush1.bf16.msra.mxu1 %v5380_v8 }
 0x509   : > { %3921 = vmatprep.subr.bf16.mxu1 %v5385_v11 }
 0x535   : > { %v3224_v56 = vpop.f32.mrb[16].mxu1 }
 0x536   : > { %v3231_v41 = vadd.f32 %v3224_v56, %v2995_v43  ;;  %v3226_v58 = vpop.f32.mrb[17].mxu1  ;;  %v5394_v43 = vld [vmem:[%s6990_s10 + $0x214] ss:$8 sps:$4 sm:$0xff]  }
 0x537   : > { %v3232_v61 = vadd.f32 %v3226_v58, %v2997_v45  ;;  %v3228_v63 = vpop.f32.mrb[18].mxu1  ;;  %v5397_v45 = vld [vmem:[%s6990_s10 + $0x224] ss:$8 sps:$4 sm:$0xff]   ;;  %v5418_v56 = vld [vmem:[%s6990_s10 + $0x294] ss:$8 sps:$4 sm:$0xff]  }
 0x538   : > { %v3244_v1 = vadd.f32 %v3237_v53, %v3231_v41  ;;  %v3229_v54 = vpop.f32.mrb[19].mxu1  ;;  %v5412_v53 = vld [vmem:[%s6990_s10 + $0x274] ss:$8 sps:$4 sm:$0xff]   ;;  %v5419_v41 = vld [vmem:[%s6990_s10 + $0x2a0] ss:$8 sps:$4 sm:$0xff]  }
 0x539   : > { %v3245_v3 = vadd.f32 %v3241_v57, %v3232_v61  ;;  %v5416_v57 = vld [vmem:[%s6990_s10 + $0x290] ss:$8 sps:$4 sm:$0xff]   ;;  %v5424_v58 = vld [vmem:[%s6990_s10 + $0x2b4] ss:$8 sps:$4 sm:$0xff]   ;;  %v5427_v63 = vld [vmem:[%s6990_s10 + $0x2c4] ss:$8 sps:$4 sm:$0xff]  }
 0x53a   : > { %v3246_v4 = vmax.f32 %v3244_v1, 0.0  ;;  %v5422_v61 = vld [vmem:[%s6990_s10 + $0x2b0] ss:$8 sps:$4 sm:$0xff]  }
 0x53b   : > { %v3247_v5 = vmax.f32 %v3245_v3, 0.0 }
 0x53c   : > { %v3250_v59 = vrot.slane %v3246_v4, 7 }
 0x53d   : > { %v3251_v6 = vrot.slane %v3247_v5, 7 }
 0x53e   : > { %3252 = vrot.lane.b32.xlu0 %v3250_v59, %s5438_s29 }
 0x53f   : > { %3254 = vrot.lane.b32.xlu1 %v3251_v6, %s5438_s29 }
 0x5b0   : > { %v3253_v12 = vpop.permute.xlu0 %3252 }
 0x5b1   : > { %3259 = vst.msk [vmem:[#allocation2] sm:$0xfe] %vm1788_vm3, %v3253_v12  ;;  %v3255_v13 = vpop.permute.xlu1 %3254 }
 0x5b2   : > { %3261 = vst.msk [vmem:[#allocation2 + $0x10] sm:$0x1] %vm1792_vm4, %v3253_v12  ;;  %v3256_v15 = vsel %vm1784_vm5, %v3253_v12, %v3255_v13  ;;  %v2516_v12 = vld [vmem:[%s6991_s11] sm:$0x3] }
 0x5b3   : > { %3260 = vst.msk [vmem:[#allocation2 + $0x8] sm:$0xfe] %vm1790_vm6, %v3256_v15  ;;  %v3968_v13 = vrot.slane %v2516_v12, %v6113_v60 }
 0x5b4   : > { %3262 = vst.msk [vmem:[#allocation2 + $0x18] sm:$0x1] %vm1794_vm7, %v3256_v15 }
 0x5b8   : > { %v3263_v16 = vld [vmem:[#allocation2] sm:$0xff] }
 0x5b9   : > { %v3265_v19 = vld [vmem:[#allocation2 + $0x10] sm:$0x3] }
 0x5ba   : > { %v6867_v21 = vpack.c.bf16 %v3265_v19, %v3263_v16  ;;  %v3264_v22 = vld [vmem:[#allocation2 + $0x8] sm:$0xff]  ;;  %v3972_v16 = vrot.slane %v2516_v12, %v6118_v62 }
 0x5bb   : > { %v3266_v23 = vld [vmem:[#allocation2 + $0x18] sm:$0x3] }
 0x5bc   : > { %v3268_v24 = vpack.c.bf16 %v3266_v23, %v3264_v22  ;;  %v3333_v25 = vshll.u32 %v6867_v21, 16  ;;  %v3331_v31 = vshrl.u32 %v6867_v21, 16  ;;  %v3765_v1 = vrot.slane %v6867_v21, 1 }
 0x5be   : > { %4690 = vmatprep.mubr.msk.bf16.mxu0 %vm433_vm1, %v3268_v24  ;;  %v3340_v26 = vshll.u32 %v3268_v24, 16  ;;  %v3335_v27 = vrot.slane %v3333_v25, 1  ;;  %v3338_v29 = vshrl.u32 %v3268_v24, 16  ;;  %v3766_v38 = vrot.slane %v3268_v24, 1 }
 0x5bf   : > { %3724 = vmatmul.mubr.bf16.vlgmr.msra.gmra.mrb[20].mxu0 %v6867_v21 }
 0x5c0   : > { %v3342_v30 = vrot.slane %v3340_v26, 1  ;;  %v3336_v35 = vor.u32 %v3335_v27, %v3331_v31 }
 0x5c2   : > { %v3343_v33 = vor.u32 %v3342_v30, %v3338_v29 }
 0x5c4   : > { %4659 = vmatprep.mubr.msk.bf16.mxu1 %vm433_vm1, %v3343_v33 }
 0x5c5   : > { %3531 = vmatmul.mubr.bf16.vlgmr.msra.gmra.mrb[20].mxu1 %v3336_v35 }
 0x5c6   : > { %3922 = vmatpush1.bf16.msra.mxu1 %v5383_v34  ;;  %4751 = vmatprep.mubr.msk.bf16.mxu1 %vm433_vm1, %v3766_v38 }
 0x5c7   : > { %3923 = vmatprep.subr.bf16.mxu1 %v5388_v36 }
 0x5ca   : > { %3924 = vmatpush1.bf16.msra.mxu1 %v5386_v39 }
 0x5cb   : > { %3925 = vmatprep.subr.bf16.mxu1 %v5391_v40 }
 0x5ce   : > { %3926 = vmatpush1.bf16.msra.mxu1 %v5389_v42 }
 0x5cf   : > { %3927 = vmatprep.subr.bf16.mxu1 %v5394_v43 }
 0x5d2   : > { %3928 = vmatpush1.bf16.msra.mxu1 %v5392_v44 }
 0x5d3   : > { %3929 = vmatprep.subr.bf16.mxu1 %v5397_v45 }
 0x5d6   : > { %3930 = vmatpush1.bf16.msra.mxu1 %v5395_v28 }
 0x5d7   : > { %3931 = vmatprep.subr.bf16.mxu1 %v5400_v46 }
 0x5da   : > { %3932 = vmatpush1.bf16.msra.mxu1 %v5398_v9 }
 0x5db   : > { %3933 = vmatprep.subr.bf16.mxu1 %v5403_v47 }
 0x5de   : > { %3934 = vmatpush1.bf16.msra.mxu1 %v5401_v50 }
 0x5df   : > { %3935 = vmatprep.subr.bf16.mxu1 %v5406_v48 }
 0x5e2   : > { %3936 = vmatpush1.bf16.msra.mxu1 %v5404_v49 }
 0x5e3   : > { %3937 = vmatprep.subr.bf16.mxu1 %v5409_v51 }
 0x5e6   : > { %3938 = vmatpush1.bf16.msra.mxu1 %v5407_v52 }
 0x5e7   : > { %3939 = vmatprep.subr.bf16.mxu1 %v5412_v53 }
 0x5ea   : > { %3940 = vmatpush1.bf16.msra.mxu1 %v5410_v10 }
 0x5eb   : > { %3941 = vmatprep.subr.bf16.mxu1 %v5415_v32 }
 0x5ee   : > { %3942 = vmatpush1.bf16.msra.mxu1 %v5413_v55 }
 0x5ef   : > { %3943 = vmatprep.subr.bf16.mxu1 %v5418_v56 }
 0x5f2   : > { %3944 = vmatpush1.bf16.msra.mxu1 %v5416_v57 }
 0x5f3   : > { %3945 = vmatprep.subr.bf16.mxu1 %v5421_v37 }
 0x5f6   : > { %3946 = vmatpush1.bf16.msra.mxu1 %v5419_v41 }
 0x5f7   : > { %3947 = vmatprep.subr.bf16.mxu1 %v5424_v58 }
 0x5fa   : > { %3948 = vmatpush1.bf16.msra.mxu1 %v5422_v61 }
 0x5fb   : > { %3949 = vmatprep.subr.bf16.mxu1 %v5427_v63 }
 0x5fe   : > { %3950 = vmatpush1.bf16.msra.mxu1 %v5425_v0 }
 0x601   : > { %3954 = vmatmul.mubr.bf16.vlgmr.msra.gmra.mrb[24].mxu1 %v3765_v1 }
 0x692   : > { %v3725_v54 = vpop.f32.mrb[20].mxu0 }
 0x693   : > { %v3727_v2 = vpop.f32.mrb[21].mxu0 }
 0x694   : > { %v3729_v3 = vpop.f32.mrb[22].mxu0 }
 0x695   : > { %v3730_v4 = vpop.f32.mrb[23].mxu0 }
 0x698   : > { %v3532_v5 = vpop.f32.mrb[20].mxu1 }
 0x699   : > { %v3726_v59 = vadd.f32 %v3725_v54, %v3532_v5  ;;  %v3534_v6 = vpop.f32.mrb[21].mxu1 }
 0x69a   : > { %v3728_v7 = vadd.f32 %v3727_v2, %v3534_v6  ;;  %v3536_v8 = vpop.f32.mrb[22].mxu1 }
 0x69b   : > { %v3537_v11 = vpop.f32.mrb[23].mxu1 }
 0x6d4   : > { %v3955_v15 = vpop.f32.mrb[24].mxu1 }
 0x6d5   : > { %v3962_v19 = vadd.f32 %v3955_v15, %v3726_v59  ;;  %v3957_v21 = vpop.f32.mrb[25].mxu1 }
 0x6d6   : > { %v3963_v22 = vadd.f32 %v3957_v21, %v3728_v7  ;;  %v3959_v23 = vpop.f32.mrb[26].mxu1 }
 0x6d7   : > { %v3975_v24 = vadd.f32 %v3968_v13, %v3962_v19  ;;  %v3960_v25 = vpop.f32.mrb[27].mxu1 }
 0x6d8   : > { %v3976_v26 = vadd.f32 %v3972_v16, %v3963_v22 }
 0x6d9   : > { %v3977_v27 = vadd.f32 %v3975_v24, %v2513_v18 }
 0x6da   : > { %v3978_v60 = vadd.f32 %v3976_v26, %v2514_v20 }
 0x6db   : > { %v3979_v29 = vmax.f32 %v3977_v27, 0.0 }
 0x6dc   : > { %v3980_v62 = vmax.f32 %v3978_v60, 0.0 }
 0x6dd   : > { %3981 = vst [vmem:[%s430_s24] sm:$0xff] %v3979_v29 }
 0x6de   : > { %3982 = vst.msk [vmem:[%s430_s24 + $0x8] sm:$0xff] %vm998_vm0, %v3980_v62 }
 0x6df PF: > { %s22_s21 = sadd.s32 1, %s5434_s21  }
 0x6e0   : > { %p19_p4 = scmp.ge.s32.totalorder %s22_s21, 4  }
 0x6e2   :  { %21 = sbr.rel (!%p19_p4) target bundleno = 1 (0x1), region = 108 }

// kernel: forward.5
= control target key start
LH: loop header
LB: loop body
LE: loop exit
PB: predicated region body
PF: predicated region fallthrough
CT: control target
= control target key end

     0   :  { %s4220_s29 = smov 0   ;;  %s5175_s0 = inlined_call_operand.vmem [shape: f32[2,5,480], index: 0, kind: input, shape index: {}]   ;;  %s5176_s1 = inlined_call_operand.vmem [shape: f32[2,4,96], index: 1, kind: input, shape index: {}]   ;;  %s5177_s2 = inlined_call_operand.vmem [shape: bf16[2,480,128], index: 2, kind: input, shape index: {}]   ;;  %s5178_s3 = inlined_call_operand.vmem [shape: f32[1,128], index: 3, kind: input, shape index: {}]   ;;  %s5179_s4 = inlined_call_operand.vmem [shape: bf16[1,96,128], index: 4, kind: input, shape index: {}]   ;;  %s5180_s5 = inlined_call_operand.vmem [shape: f32[1,128], index: 5, kind: input, shape index: {}]   ;;  %s5181_s6 = inlined_call_operand.vmem [shape: bf16[3,192,128], index: 6, kind: input, shape index: {}]   ;;  %s5182_s7 = inlined_call_operand.vmem [shape: f32[1,128], index: 7, kind: input, shape index: {}]   ;;  %s5183_s8 = inlined_call_operand.vmem [shape: bf16[3,192,128], index: 8, kind: input, shape index: {}]   ;;  %s5184_s9 = inlined_call_operand.vmem [shape: f32[1,128], index: 9, kind: input, shape index: {}]   ;;  %s5185_s10 = inlined_call_operand.vmem [shape: bf16[3,192,128], index: 10, kind: input, shape index: {}]   ;;  %s5186_s11 = inlined_call_operand.vmem [shape: f32[1,128], index: 11, kind: input, shape index: {}]   ;;  %s5187_s12 = inlined_call_operand.vmem [shape: bf16[1,128,128], index: 12, kind: input, shape index: {}]   ;;  %s5188_s13 = inlined_call_operand.vmem [shape: bf16[3,192,16], index: 13, kind: input, shape index: {}]   ;;  %s5189_s14 = inlined_call_operand.vmem [shape: f32[2,4,16], index: 14, kind: output, shape index: {}]  }
   0x1 LB: > { %s3286_s30 = sadd.s32 4294967295, %s4139_s29   ;;  %p3290_p0 = scmp.ge.s32.totalorder %s4139_s29, 1  ;;  %s4139_s29 = sphi %s4220_s29, %s24_s29  }
   0x2   : > { %p421_p1 = scmp.lt.s32.totalorder %s4139_s29, 3 }
   0x4   : > { %p422_p2 = pnand %p3290_p0, %p421_p1 }
   0x5   : > { %v3915_v0 = vld [vmem:[%s5177_s2 + $0x130] sm:$0xff] (!%p422_p2)   ;;  %v4141_v1 = vmov (!%p422_p2), 0   ;;  %v3918_v4 = vld [vmem:[%s5177_s2 + $0x138] sm:$0xff] (!%p422_p2)   ;;  %v3921_v7 = vld [vmem:[%s5177_s2 + $0x140] sm:$0xff] (!%p422_p2)   ;;  %p470_p3 = scmp.lt.s32.totalorder (!%p422_p2), %s3286_s30, 1  ;;  %vm828_vm0 = vcmask (!%p422_p2), 785408  }
   0x6   : > { %425 = sbr.rel (%p422_p2) target bundleno = 2241 (0x8c1), region = 76  ;;  %872 = vmatprep.subr.bf16.mxu1 (!%p422_p2), %v4141_v1  ;;  %v3916_v2 = vld [vmem:[%s5177_s2 + $0x170] sm:$0xff] (!%p422_p2)   ;;  %3788 = vmatprep.subr.bf16.mxu0 (!%p422_p2), %v3915_v0  ;;  %v3919_v5 = vld [vmem:[%s5177_s2 + $0x178] sm:$0xff] (!%p422_p2)   ;;  %v3922_v8 = vld [vmem:[%s5177_s2 + $0x180] sm:$0xff] (!%p422_p2)   ;;  %vm4143_vm1 = vmmov (!%p422_p2), 0   ;;  %vm485_vm2 = vcmask (!%p422_p2), 521216  }
   0x7   : > { %v3917_v3 = vld [vmem:[%s5177_s2 + $0xf0] sm:$0xff] (!%p422_p2)   ;;  %873 = vmatpush1.bf16.msra.mxu1 (!%p422_p2), %v3916_v2  ;;  %v3920_v6 = vld [vmem:[%s5177_s2 + $0xf8] sm:$0xff] (!%p422_p2)   ;;  %v3923_v9 = vld [vmem:[%s5177_s2 + $0x100] sm:$0xff] (!%p422_p2)   ;;  %s4144_s27 = smov (!%p422_p2), 32   ;;  %vm1287_vm3 = vcmask (!%p422_p2), 1044737   ;;  %vm1289_vm4 = vcmask (!%p422_p2), 258049  }
   0x8   : > { %3789 = vmatpush3.bf16.msra.mxu0 (!%p422_p2), %v3917_v3  ;;  %874 = vmatprep.subr.bf16.mxu1 (!%p422_p2), %v4141_v1  ;;  %v3924_v10 = vld [vmem:[%s5177_s2 + $0x148] sm:$0xff] (!%p422_p2)   ;;  %v3927_v13 = vld [vmem:[%s5177_s2 + $0x150] sm:$0xff] (!%p422_p2)   ;;  %v3930_v16 = vld [vmem:[%s5177_s2 + $0x158] sm:$0xff] (!%p422_p2)   ;;  %vm1432_vm5 = vcmask (!%p422_p2), 523264   ;;  %vm3219_vm6 = vcmask (!%p422_p2), 125952  }
   0x9   : > { %3790 = vmatprep.subr.bf16.mxu0 (!%p422_p2), %v3918_v4  ;;  %v3925_v11 = vld [vmem:[%s5177_s2 + $0x188] sm:$0xff] (!%p422_p2)   ;;  %v3928_v14 = vld [vmem:[%s5177_s2 + $0x190] sm:$0xff] (!%p422_p2)   ;;  %v3931_v17 = vld [vmem:[%s5177_s2 + $0x198] sm:$0xff] (!%p422_p2)  }
   0xa   : > { %v3926_v12 = vld [vmem:[%s5177_s2 + $0x108] sm:$0xff] (!%p422_p2)   ;;  %v3929_v15 = vld [vmem:[%s5177_s2 + $0x110] sm:$0xff] (!%p422_p2)   ;;  %v3932_v18 = vld [vmem:[%s5177_s2 + $0x118] sm:$0xff] (!%p422_p2)  }
   0xb   : > { %875 = vmatpush1.bf16.msra.mxu1 (!%p422_p2), %v3919_v5  ;;  %v3933_v19 = vld [vmem:[%s5177_s2 + $0x160] sm:$0xff] (!%p422_p2)   ;;  %v3936_v23 = vld [vmem:[%s5177_s2 + $0x168] sm:$0xff] (!%p422_p2)   ;;  %v3939_v36 = vld [vmem:[%s5177_s2 + $0x1b0] sm:$0xff] (!%p422_p2)  }
   0xc   : > { %3791 = vmatpush3.bf16.msra.mxu0 (!%p422_p2), %v3920_v6  ;;  %876 = vmatprep.subr.bf16.mxu1 (!%p422_p2), %v4141_v1  ;;  %v3934_v20 = vld [vmem:[%s5177_s2 + $0x1a0] sm:$0xff] (!%p422_p2)   ;;  %v3937_v26 = vld [vmem:[%s5177_s2 + $0x1a8] sm:$0xff] (!%p422_p2)   ;;  %v3942_v41 = vld [vmem:[%s5177_s2 + $0x1b8] sm:$0xff] (!%p422_p2)  }
   0xd   : > { %3792 = vmatprep.subr.bf16.mxu0 %v3921_v7  ;;  %s5191_s30 = smov (!%p470_p3, %s3286_s30), 1  ;;  %v3935_v21 = vld [vmem:[%s5177_s2 + $0x120] sm:$0xff]   ;;  %v3938_v27 = vld [vmem:[%s5177_s2 + $0x128] sm:$0xff]   ;;  %v3946_v43 = vld [vmem:[%s5177_s2 + $0x50] sm:$0xff]  }
   0xe   : > { %s3787_s19 = sshll.u32 %s5191_s30, 5  ;;  %v3940_v32 = vld [vmem:[%s5177_s2 + $0x40] sm:$0xff]   ;;  %v3943_v40 = vld [vmem:[%s5177_s2 + $0x48] sm:$0xff]   ;;  %v3947_v45 = vld [vmem:[%s5177_s2 + $0x10] sm:$0xff]   ;;  %s3293_s17 = sshll.u32 %s5191_s30, 2 }
   0xf   : > { %877 = vmatpush1.bf16.msra.mxu1 %v3922_v8  ;;  %s4301_s28 = scalar_lea.vmem %s5175_s0, %s3787_s19  ;;  %v3941_v38 = vld [vmem:[%s5177_s2] sm:$0xff]   ;;  %v3944_v42 = vld [vmem:[%s5177_s2 + $0x8] sm:$0xff]   ;;  %v3949_v46 = vld [vmem:[%s5177_s2 + $0x58] sm:$0xff]   ;;  %s478_s22 = scalar_lea.vmem %s5176_s1, %s3293_s17 }
  0x10   : > { %3793 = vmatpush3.bf16.msra.mxu0 %v3923_v9  ;;  %878 = vmatprep.subr.bf16.mxu1 %v4141_v1  ;;  %v488_v22 = vld [vmem:[%s4301_s28 + $0x8] sm:$0x1f]  ;;  %v487_v25 = vld [vmem:[%s4301_s28] sm:$0x1f]  ;;  %v490_v48 = vld [vmem:[%s4301_s28 + $0x18] sm:$0x1f]  ;;  %s482_s25 = scalar_lea.vmem %s5189_s14, %s3293_s17 }
  0x11   : > { %3794 = vmatprep.subr.bf16.mxu0 %v3924_v10  ;;  %v493_v24 = vpack.c.bf16 %v488_v22, %v488_v22  ;;  %v4321_v30 = vpack.c.bf16 %v487_v25, %v487_v25  ;;  %v3945_v44 = vld [vmem:[%s5177_s2 + $0x1c0] sm:$0xff]   ;;  %v3948_v47 = vld [vmem:[%s5177_s2 + $0x1c8] sm:$0xff]   ;;  %v489_v49 = vld [vmem:[%s4301_s28 + $0x10] sm:$0x1f]  ;;  %v495_v51 = vpack.c.bf16 %v490_v48, %v490_v48 }
  0x12   : > { %v3950_v50 = vld [vmem:[%s5177_s2 + $0x18] sm:$0xff]   ;;  %v4368_v52 = vpack.c.bf16 %v489_v49, %v489_v49  ;;  %v3952_v53 = vld [vmem:[%s5177_s2 + $0x60] sm:$0xff]   ;;  %v3951_v57 = vld [vmem:[%s5177_s2 + $0x1d0] sm:$0xff]  }
  0x13   : > { %879 = vmatpush1.bf16.msra.mxu1 %v3925_v11  ;;  %v625_v28 = vshrl.u32 %v493_v24, 16  ;;  %v627_v29 = vshll.u32 %v493_v24, 16  ;;  %v618_v33 = vshrl.u32 %v4321_v30, 16  ;;  %v620_v34 = vshll.u32 %v4321_v30, 16  ;;  %v3953_v58 = vld [vmem:[%s5177_s2 + $0x20] sm:$0xff]   ;;  %v3955_v59 = vld [vmem:[%s5177_s2 + $0x68] sm:$0xff]  }
  0x14   : > { %3795 = vmatpush3.bf16.msra.mxu0 %v3926_v12  ;;  %880 = vmatprep.subr.bf16.mxu1 %v4141_v1  ;;  %v639_v54 = vshrl.u32 %v495_v51, 16  ;;  %v641_v55 = vshll.u32 %v495_v51, 16  ;;  %v634_v56 = vshll.u32 %v4368_v52, 16  ;;  %v632_v62 = vshrl.u32 %v4368_v52, 16  ;;  %v3954_v0 = vld [vmem:[%s5177_s2 + $0x1d8] sm:$0xff]   ;;  %v3956_v2 = vld [vmem:[%s5177_s2 + $0x28] sm:$0xff]  }
  0x15   : > { %3796 = vmatprep.subr.bf16.mxu0 %v3927_v13  ;;  %v629_v31 = vrot.slane %v627_v29, 1  ;;  %v622_v37 = vrot.slane %v620_v34, 1  ;;  %v3957_v3 = vld [vmem:[%s5177_s2 + $0x70] sm:$0xff]   ;;  %v3958_v5 = vld [vmem:[%s5177_s2 + $0x80] sm:$0xff]   ;;  %v3960_v7 = vld [vmem:[%s5177_s2 + $0x78] sm:$0xff]  }
  0x16   : > { %v643_v60 = vrot.slane %v641_v55, 1  ;;  %v636_v63 = vrot.slane %v634_v56, 1  ;;  %v3959_v6 = vld [vmem:[%s5177_s2 + $0x30] sm:$0xff]   ;;  %v3961_v8 = vld [vmem:[%s5177_s2 + $0x88] sm:$0xff]   ;;  %v3962_v9 = vld [vmem:[%s5177_s2 + $0x38] sm:$0xff]  }
  0x17   : > { %881 = vmatpush1.bf16.msra.mxu1 %v3928_v14  ;;  %v630_v35 = vor.u32 %v629_v31, %v625_v28  ;;  %v623_v39 = vor.u32 %v622_v37, %v618_v33  ;;  %v3963_v10 = vld [vmem:[%s5177_s2 + $0x90] sm:$0xff]   ;;  %v3964_v11 = vld [vmem:[%s5177_s2 + $0x98] sm:$0xff]   ;;  %v3965_v12 = vld [vmem:[%s5177_s2 + $0xa0] sm:$0xff]  }
  0x18   : > { %3797 = vmatpush3.bf16.msra.mxu0 %v3929_v15  ;;  %882 = vmatprep.subr.bf16.mxu1 %v4141_v1  ;;  %v644_v61 = vor.u32 %v643_v60, %v639_v54  ;;  %v637_v4 = vor.u32 %v636_v63, %v632_v62  ;;  %v3966_v13 = vld [vmem:[%s5177_s2 + $0xa8] sm:$0xff]   ;;  %v3967_v14 = vld [vmem:[%s5177_s2 + $0xb0] sm:$0xff]   ;;  %v3968_v15 = vld [vmem:[%s5177_s2 + $0xb8] sm:$0xff]  }
  0x19   : > { %3798 = vmatprep.subr.bf16.mxu0 %v3930_v16  ;;  %864 = vmatprep.mubr.bf16.mxu0 %v630_v35  ;;  %v3969_v16 = vld [vmem:[%s5177_s2 + $0xc0] sm:$0xff]   ;;  %v3976_v25 = vld [vmem:[%s5179_s4 + $0x8] sm:$0xff]   ;;  %v3984_v28 = vld [vmem:[%s5181_s6 + $0x10] sm:$0xff]  }
  0x1a   : > { %3385 = vmatprep.mubr.msk.bf16.mxu1 %vm828_vm0, %v644_v61  ;;  %v3975_v22 = vld [vmem:[%s5179_s4] sm:$0xff]   ;;  %v3978_v29 = vld [vmem:[%s5179_s4 + $0x18] sm:$0xff]   ;;  %v3981_v33 = vld [vmem:[%s5179_s4 + $0x28] sm:$0xff]  }
  0x1b   : > { %883 = vmatpush1.bf16.msra.mxu1 %v3931_v17  ;;  %v3970_v17 = vld [vmem:[%s5177_s2 + $0xc8] sm:$0xff]   ;;  %v3979_v31 = vld [vmem:[%s5179_s4 + $0x20] sm:$0xff]  }
  0x1c   : > { %3799 = vmatpush3.bf16.msra.mxu0 %v3932_v18  ;;  %884 = vmatprep.subr.bf16.mxu1 %v4141_v1  ;;  %v3971_v18 = vld [vmem:[%s5177_s2 + $0xd0] sm:$0xff]   ;;  %v1182_v34 = vld [vmem:[%s478_s22] sm:$0xf]  ;;  %v3990_v35 = vld [vmem:[%s5181_s6 + $0x28] sm:$0xff]  }
  0x1d   : > { %3800 = vmatprep.subr.bf16.mxu0 %v3933_v19  ;;  %v3972_v19 = vld [vmem:[%s5177_s2 + $0xd8] sm:$0xff]   ;;  %v3983_v37 = vld [vmem:[%s5181_s6 + $0x60] sm:$0xff]  }
  0x1f   : > { %885 = vmatpush1.bf16.msra.mxu1 %v3934_v20  ;;  %v3973_v20 = vld [vmem:[%s5177_s2 + $0xe0] sm:$0xff]  }
  0x20   : > { %3801 = vmatpush3.bf16.msra.mxu0 %v3935_v21  ;;  %886 = vmatprep.subr.bf16.mxu1 %v4141_v1  ;;  %v3974_v21 = vld [vmem:[%s5177_s2 + $0xe8] sm:$0xff]  }
  0x21   : > { %3802 = vmatprep.subr.bf16.mxu0 %v3936_v23  ;;  %v4142_v23 = vmov 0.0  }
  0x22   : > { %484 = vst [vmem:[#allocation2] sm:$0x3f] %v4142_v23  ;;  %486 = vst.msk [vmem:[#allocation2 + $0x8] sm:$0x3f] %vm485_vm2, %v4142_v23 }
  0x23   : > { %887 = vmatpush1.bf16.msra.mxu1 %v3937_v26  ;;  %v3982_v26 = vld [vmem:[%s5181_s6 + $0x8] sm:$0xff]  }
  0x24   : > { %3803 = vmatpush3.bf16.msra.mxu0 %v3938_v27  ;;  %888 = vmatprep.subr.bf16.mxu1 %v4141_v1  ;;  %v3977_v27 = vld [vmem:[%s5179_s4 + $0x10] sm:$0xff]  }
  0x25   : > { %3810 = vmatprep.subr.bf16.mxu0 %v3940_v32  ;;  %v3988_v32 = vld [vmem:[%s5181_s6 + $0x20] sm:$0xff]  }
  0x27   : > { %889 = vmatpush1.bf16.msra.mxu1 %v3939_v36  ;;  %865 = vmatmul.mubr.bf16.vlgmr.msra.gmra.mrb[0].mxu0 %v623_v39  ;;  %v1184_v36 = vpack.c.bf16 %v1182_v34, %v1182_v34  ;;  %v3985_v39 = vld [vmem:[%s5181_s6 + $0x68] sm:$0xff]   ;;  %v4007_v34 = vld [vmem:[%s5181_s6 + $0xd0] sm:$0xff]  }
  0x28   : > { %3811 = vmatpush3.bf16.msra.mxu0 %v3941_v38  ;;  %890 = vmatprep.subr.bf16.mxu1 %v4141_v1  ;;  %v3992_v38 = vld [vmem:[%s5181_s6 + $0x30] sm:$0xff]  }
  0x29   : > { %3812 = vmatprep.subr.bf16.mxu0 %v3943_v40  ;;  %1126 = vmatprep.mubr.bf16.mxu0 %v493_v24  ;;  %v3980_v24 = vld [vmem:[%s5181_s6] sm:$0xff]   ;;  %v3994_v40 = vld [vmem:[%s5181_s6 + $0x38] sm:$0xff]  }
  0x2b   : > { %891 = vmatpush1.bf16.msra.mxu1 %v3942_v41  ;;  %v3987_v41 = vld [vmem:[%s5181_s6 + $0x70] sm:$0xff]  }
  0x2c   : > { %3813 = vmatpush3.bf16.msra.mxu0 %v3944_v42  ;;  %892 = vmatprep.subr.bf16.mxu1 %v4141_v1  ;;  %v3996_v42 = vld [vmem:[%s5181_s6 + $0x40] sm:$0xff]  }
  0x2d   : > { %3814 = vmatprep.subr.bf16.mxu0 %v3946_v43  ;;  %v3989_v43 = vld [vmem:[%s5181_s6 + $0x78] sm:$0xff]  }
  0x2f   : > { %893 = vmatpush1.bf16.msra.mxu1 %v3945_v44  ;;  %v3998_v44 = vld [vmem:[%s5181_s6 + $0x48] sm:$0xff]  }
  0x30   : > { %3815 = vmatpush3.bf16.msra.mxu0 %v3947_v45  ;;  %894 = vmatprep.subr.bf16.mxu1 %v4141_v1  ;;  %v3991_v45 = vld [vmem:[%s5181_s6 + $0x80] sm:$0xff]  }
  0x31   : > { %3816 = vmatprep.subr.bf16.mxu0 %v3949_v46 }
  0x33   : > { %895 = vmatpush1.bf16.msra.mxu1 %v3948_v47 }
  0x34   : > { %3817 = vmatpush3.bf16.msra.mxu0 %v3950_v50  ;;  %896 = vmatprep.subr.bf16.mxu1 %v4141_v1  ;;  %v3993_v50 = vld [vmem:[%s5181_s6 + $0x88] sm:$0xff]  }
  0x35   : > { %3818 = vmatprep.subr.bf16.mxu0 %v3952_v53  ;;  %v3997_v53 = vld [vmem:[%s5181_s6 + $0x98] sm:$0xff]  }
  0x37   : > { %897 = vmatpush1.bf16.msra.mxu1 %v3951_v57 }
  0x38   : > { %3819 = vmatpush3.bf16.msra.mxu0 %v3953_v58  ;;  %898 = vmatprep.subr.bf16.mxu1 %v4141_v1 }
  0x39   : > { %3820 = vmatprep.subr.bf16.mxu0 %v3955_v59 }
  0x3b   : > { %899 = vmatpush1.bf16.msra.mxu1 %v3954_v0 }
  0x3c   : > { %3821 = vmatpush3.bf16.msra.mxu0 %v3956_v2  ;;  %1134 = vmatprep.subr.bf16.mxu1 %v4141_v1  ;;  %v3999_v2 = vld [vmem:[%s5181_s6 + $0xa0] sm:$0xff]  }
  0x3d   : > { %3822 = vmatprep.subr.bf16.mxu0 %v3957_v3  ;;  %v4000_v3 = vld [vmem:[%s5181_s6 + $0x50] sm:$0xff]  }
  0x3e   : > { %905 = vmatmul.mubr.bf16.vlgmr.msra.gmra.mrb[0].mxu1 %v637_v4  ;;  %v4001_v4 = vld [vmem:[%s5181_s6 + $0xa8] sm:$0xff]  }
  0x3f   : > { %1135 = vmatpush1.bf16.msra.mxu1 %v3958_v5  ;;  %3416 = vmatprep.mubr.msk.bf16.mxu1 %vm828_vm0, %v495_v51  ;;  %v4002_v5 = vld [vmem:[%s5181_s6 + $0x58] sm:$0xff]  }
  0x40   : > { %3823 = vmatpush3.bf16.msra.mxu0 %v3959_v6  ;;  %1136 = vmatprep.subr.bf16.mxu1 %v4141_v1 }
  0x41   : > { %3824 = vmatprep.subr.bf16.mxu0 %v3960_v7  ;;  %v3417_v7 = vld [vmem:[%s5178_s3] ss:$0 sm:$0xff] }
  0x43   : > { %1137 = vmatpush1.bf16.msra.mxu1 %v3961_v8 }
  0x44   : > { %3825 = vmatpush3.bf16.msra.mxu0 %v3962_v9  ;;  %1138 = vmatprep.subr.bf16.mxu1 %v4141_v1 }
  0x45   : > { %1550 = vmatprep.subr.bf16.mxu0 %v4141_v1 }
  0x47   : > { %1127 = vmatmul.mubr.bf16.vlgmr.msra.gmra.mrb[4].mxu0 %v4321_v30  ;;  %1139 = vmatpush1.bf16.msra.mxu1 %v3963_v10  ;;  %v3986_v30 = vld [vmem:[%s5181_s6 + $0x18] sm:$0xff]  }
  0x48   : > { %1140 = vmatprep.subr.bf16.mxu1 %v4141_v1  ;;  %1551 = vmatpush1.bf16.msra.mxu0 %v3980_v24 }
  0x49   : > { %1552 = vmatprep.subr.bf16.mxu0 %v4141_v1 }
  0x4b   : > { %1141 = vmatpush1.bf16.msra.mxu1 %v3964_v11  ;;  %v4003_v11 = vld [vmem:[%s5181_s6 + $0xb0] sm:$0xff]  }
  0x4c   : > { %1142 = vmatprep.subr.bf16.mxu1 %v4141_v1  ;;  %1553 = vmatpush1.bf16.msra.mxu0 %v3982_v26 }
  0x4d   : > { %1554 = vmatprep.subr.bf16.mxu0 %v4141_v1 }
  0x4f   : > { %1143 = vmatpush1.bf16.msra.mxu1 %v3965_v12 }
  0x50   : > { %1144 = vmatprep.subr.bf16.mxu1 %v4141_v1  ;;  %1555 = vmatpush1.bf16.msra.mxu0 %v3984_v28 }
  0x51   : > { %1556 = vmatprep.subr.bf16.mxu0 %v4141_v1 }
  0x53   : > { %1145 = vmatpush1.bf16.msra.mxu1 %v3966_v13 }
  0x54   : > { %1146 = vmatprep.subr.bf16.mxu1 %v4141_v1  ;;  %1557 = vmatpush1.bf16.msra.mxu0 %v3986_v30 }
  0x55   : > { %1558 = vmatprep.subr.bf16.mxu0 %v4141_v1 }
  0x57   : > { %1147 = vmatpush1.bf16.msra.mxu1 %v3967_v14 }
  0x58   : > { %1148 = vmatprep.subr.bf16.mxu1 %v4141_v1  ;;  %1559 = vmatpush1.bf16.msra.mxu0 %v3988_v32 }
  0x59   : > { %1560 = vmatprep.subr.bf16.mxu0 %v4141_v1 }
  0x5b   : > { %1149 = vmatpush1.bf16.msra.mxu1 %v3968_v15 }
  0x5c   : > { %1150 = vmatprep.subr.bf16.mxu1 %v4141_v1  ;;  %1561 = vmatpush1.bf16.msra.mxu0 %v3990_v35  ;;  %v4008_v35 = vld [vmem:[%s5181_s6 + $0xd8] sm:$0xff]  }
  0x5d   : > { %1562 = vmatprep.subr.bf16.mxu0 %v4141_v1 }
  0x5f   : > { %1151 = vmatpush1.bf16.msra.mxu1 %v3969_v16  ;;  %v4005_v16 = vld [vmem:[%s5181_s6 + $0xb8] sm:$0xff]  }
  0x60   : > { %1152 = vmatprep.subr.bf16.mxu1 %v4141_v1  ;;  %1563 = vmatpush1.bf16.msra.mxu0 %v3992_v38  ;;  %v4011_v38 = vld [vmem:[%s5181_s6 + $0xf0] sm:$0xff]  }
  0x61   : > { %1564 = vmatprep.subr.bf16.mxu0 %v4141_v1 }
  0x63   : > { %1153 = vmatpush1.bf16.msra.mxu1 %v3970_v17 }
  0x64   : > { %1154 = vmatprep.subr.bf16.mxu1 %v4141_v1  ;;  %1565 = vmatpush1.bf16.msra.mxu0 %v3994_v40  ;;  %v4013_v40 = vld [vmem:[%s5181_s6 + $0x100] sm:$0xff]  }
  0x65   : > { %1566 = vmatprep.subr.bf16.mxu0 %v4141_v1 }
  0x67   : > { %1155 = vmatpush1.bf16.msra.mxu1 %v3971_v18 }
  0x68   : > { %1156 = vmatprep.subr.bf16.mxu1 %v4141_v1  ;;  %1567 = vmatpush1.bf16.msra.mxu0 %v3996_v42  ;;  %v4015_v42 = vld [vmem:[%s5181_s6 + $0x110] sm:$0xff]  }
  0x69   : > { %1568 = vmatprep.subr.bf16.mxu0 %v4141_v1 }
  0x6b   : > { %1157 = vmatpush1.bf16.msra.mxu1 %v3972_v19 }
  0x6c   : > { %1158 = vmatprep.subr.bf16.mxu1 %v4141_v1  ;;  %1569 = vmatpush1.bf16.msra.mxu0 %v3998_v44 }
  0x6d   : > { %1570 = vmatprep.subr.bf16.mxu0 %v4141_v1 }
  0x6f   : > { %1159 = vmatpush1.bf16.msra.mxu1 %v3973_v20 }
  0x70   : > { %1160 = vmatprep.subr.bf16.mxu1 %v4141_v1  ;;  %1571 = vmatpush1.bf16.msra.mxu0 %v4000_v3 }
  0x71   : > { %1572 = vmatprep.subr.bf16.mxu0 %v4141_v1 }
  0x73   : > { %1161 = vmatpush1.bf16.msra.mxu1 %v3974_v21 }
  0x74   : > { %3848 = vmatprep.subr.bf16.mxu1 %v4142_v23  ;;  %1573 = vmatpush1.bf16.msra.mxu0 %v4002_v5 }
  0x75   : > { %1695 = vmatprep.subr.bf16.mxu0 %v4141_v1 }
  0x76   : > { %1167 = vmatmul.mubr.bf16.vlgmr.msra.gmra.mrb[4].mxu1 %v4368_v52  ;;  %v3995_v52 = vld [vmem:[%s5181_s6 + $0x90] sm:$0xff]  }
  0x77   : > { %3860 = vmatprep.mubr.msk.bf16.mxu1 %vm4143_vm1, %v4142_v23  ;;  %3849 = vmatpush3.bf16.msra.mxu1 %v3975_v22  ;;  %v4004_v22 = vld [vmem:[%s5181_s6 + $0xc0] sm:$0xff]  }
  0x78   : > { %3850 = vmatprep.subr.bf16.mxu1 %v4142_v23 }
  0x7b   : > { %3851 = vmatpush3.bf16.msra.mxu1 %v3976_v25 }
  0x7c   : > { %3852 = vmatprep.subr.bf16.mxu1 %v4142_v23 }
  0x7f   : > { %3853 = vmatpush3.bf16.msra.mxu1 %v3977_v27  ;;  %v4006_v27 = vld [vmem:[%s5181_s6 + $0xc8] sm:$0xff]  }
  0x80   : > { %3854 = vmatprep.subr.bf16.mxu1 %v4142_v23 }
  0x83   : > { %3855 = vmatpush3.bf16.msra.mxu1 %v3978_v29 }
  0x84   : > { %3856 = vmatprep.subr.bf16.mxu1 %v4142_v23 }
  0x87   : > { %3857 = vmatpush3.bf16.msra.mxu1 %v3979_v31 }
  0x88   : > { %3858 = vmatprep.subr.bf16.mxu1 %v4142_v23 }
  0x8b   : > { %3859 = vmatpush3.bf16.msra.mxu1 %v3981_v33 }
  0x8c   : > { %1436 = vmatprep.subr.bf16.mxu1 %v4141_v1 }
  0x8e   : > { %3861 = vmatmul.mubr.msk.bf16.vlgmr.msra.gmra.mrb[8].mxu1 %vm828_vm0, %v1184_v36  ;;  %v4009_v36 = vld [vmem:[%s5181_s6 + $0xe0] sm:$0xff]  }
  0x8f   : > { %1437 = vmatpush1.bf16.msra.mxu1 %v3983_v37  ;;  %v4010_v37 = vld [vmem:[%s5181_s6 + $0xe8] sm:$0xff]  }
  0x90   : > { %1438 = vmatprep.subr.bf16.mxu1 %v4141_v1 }
  0x93   : > { %1439 = vmatpush1.bf16.msra.mxu1 %v3985_v39  ;;  %v4012_v39 = vld [vmem:[%s5181_s6 + $0xf8] sm:$0xff]  }
  0x94   : > { %1440 = vmatprep.subr.bf16.mxu1 %v4141_v1 }
  0x97   : > { %1441 = vmatpush1.bf16.msra.mxu1 %v3987_v41  ;;  %v4014_v41 = vld [vmem:[%s5181_s6 + $0x108] sm:$0xff]  }
  0x98   : > { %1442 = vmatprep.subr.bf16.mxu1 %v4141_v1 }
  0x9b   : > { %1443 = vmatpush1.bf16.msra.mxu1 %v3989_v43  ;;  %v4016_v43 = vld [vmem:[%s5181_s6 + $0x118] sm:$0xff]  }
  0x9c   : > { %1444 = vmatprep.subr.bf16.mxu1 %v4141_v1 }
  0x9f   : > { %1445 = vmatpush1.bf16.msra.mxu1 %v3991_v45  ;;  %v4017_v45 = vld [vmem:[%s5183_s8 + $0x60] sm:$0xff]  }
  0xa0   : > { %1446 = vmatprep.subr.bf16.mxu1 %v4141_v1 }
  0xa3   : > { %1447 = vmatpush1.bf16.msra.mxu1 %v3993_v50  ;;  %v4022_v50 = vld [vmem:[%s5183_s8 + $0x88] sm:$0xff]  }
  0xa4   : > { %1448 = vmatprep.subr.bf16.mxu1 %v4141_v1 }
  0xa7   : > { %1449 = vmatpush1.bf16.msra.mxu1 %v3995_v52  ;;  %v4024_v52 = vld [vmem:[%s5183_s8 + $0x98] sm:$0xff]  }
  0xa8   : > { %1450 = vmatprep.subr.bf16.mxu1 %v4141_v1 }
  0xab   : > { %1451 = vmatpush1.bf16.msra.mxu1 %v3997_v53 }
  0xac   : > { %1452 = vmatprep.subr.bf16.mxu1 %v4141_v1 }
  0xaf   : > { %1453 = vmatpush1.bf16.msra.mxu1 %v3999_v2 }
  0xb0   : > { %1454 = vmatprep.subr.bf16.mxu1 %v4141_v1 }
  0xb3   : > { %1455 = vmatpush1.bf16.msra.mxu1 %v4001_v4 }
  0xb4   : > { %1456 = vmatprep.subr.bf16.mxu1 %v4141_v1 }
  0xb7   : > { %1457 = vmatpush1.bf16.msra.mxu1 %v4003_v11 }
  0xb8   : > { %1458 = vmatprep.subr.bf16.mxu1 %v4141_v1 }
  0xbb   : > { %1459 = vmatpush1.bf16.msra.mxu1 %v4005_v16 }
  0xbc   : > { %1897 = vmatprep.subr.bf16.mxu1 %v4141_v1 }
  0xfa   : > { %v3804_v46 = vpop.f32.mrb[0].mxu0 }
  0xfb   : > { %v3805_v47 = vpop.f32.mrb[1].mxu0 }
  0xfc   : > { %v3806_v48 = vadd.f32 %v3805_v47, %v3804_v46  ;;  %v3807_v49 = vpop.f32.mrb[2].mxu0  ;;  %v4018_v46 = vld [vmem:[%s5183_s8 + $0x68] sm:$0xff]   ;;  %v4019_v47 = vld [vmem:[%s5183_s8 + $0x70] sm:$0xff]  }
  0xfd   : > { %v3808_v51 = vpop.f32.mrb[3].mxu0  ;;  %v4021_v49 = vld [vmem:[%s5183_s8 + $0x80] sm:$0xff]  }
  0xfe   : > { %v4023_v51 = vld [vmem:[%s5183_s8 + $0x90] sm:$0xff]  }
 0x111   : > { %v906_v54 = vpop.f32.mrb[0].mxu1 }
 0x112   : > { %v907_v55 = vadd.f32 %v3806_v48, %v906_v54  ;;  %v908_v56 = vpop.f32.mrb[1].mxu1  ;;  %v4020_v48 = vld [vmem:[%s5183_s8 + $0x78] sm:$0xff]  }
 0x113   : > { %v909_v57 = vpop.f32.mrb[2].mxu1 }
 0x114   : > { %v910_v58 = vpop.f32.mrb[3].mxu1  ;;  %v3418_v57 = vld [vmem:[%s5180_s5] ss:$0 sm:$0xff] }
 0x115   : > { %v3513_v58 = vld [vmem:[%s5182_s7] ss:$0 sm:$0xff] }
 0x11a   : > { %v3826_v59 = vpop.f32.mrb[4].mxu0 }
 0x11b   : > { %v3827_v60 = vpop.f32.mrb[5].mxu0 }
 0x11c   : > { %v3828_v61 = vadd.f32 %v3827_v60, %v3826_v59  ;;  %v3829_v62 = vpop.f32.mrb[6].mxu0  ;;  %v4025_v59 = vld [vmem:[%s5183_s8 + $0xa0] sm:$0xff]   ;;  %v3884_v60 = vadd.f32 %v3513_v58, %v3418_v57 }
 0x11d   : > { %v3830_v63 = vpop.f32.mrb[7].mxu0  ;;  %v4060_v57 = vld [vmem:[%s5185_s10 + $0x20] sm:$0xff]  }
 0x11e   : > { %v1129_v0 = vadd.f32 %v3828_v61, %v907_v55  ;;  %v4026_v61 = vld [vmem:[%s5183_s8 + $0xa8] sm:$0xff]   ;;  %v4027_v63 = vld [vmem:[%s5183_s8 + $0xb0] sm:$0xff]   ;;  %v4063_v58 = vld [vmem:[%s5185_s10 + $0x80] sm:$0xff]  }
 0x149   : > { %v1168_v6 = vpop.f32.mrb[4].mxu1 }
 0x14a   : > { %v1169_v8 = vadd.f32 %v1168_v6, %v1129_v0  ;;  %v1170_v9 = vpop.f32.mrb[5].mxu1 }
 0x14b   : > { %v1171_v10 = vpop.f32.mrb[6].mxu1 }
 0x14c   : > { %v1172_v12 = vpop.f32.mrb[7].mxu1  ;;  %v1180_v13 = vadd.f32 %v3417_v7, %v1169_v8  ;;  %v4028_v7 = vld [vmem:[%s5183_s8 + $0xb8] sm:$0xff]  }
 0x14e   : > { %v1181_v14 = vmax.f32 %v1180_v13, 0.0 }
 0x150   : > { %v1283_v15 = vrot.slane %v1181_v14, 7 }
 0x152   : > { %1284 = vrot.lane.b32.xlu0 %v1283_v15, %s4144_s27 }
 0x1c4   : > { %v1285_v17 = vpop.permute.xlu0 %1284 }
 0x1c5   : > { %1288 = vst.msk [vmem:[#allocation2] sm:$0x1e] %vm1287_vm3, %v1285_v17 }
 0x1c6   : > { %1290 = vst.msk [vmem:[#allocation2 + $0x8] sm:$0x1e] %vm1289_vm4, %v1285_v17 }
 0x1cc   : > { %v1291_v19 = vld [vmem:[#allocation2] sm:$0x3f] }
 0x1cd   : > { %v1292_v18 = vld [vmem:[#allocation2 + $0x8] sm:$0x3f]  ;;  %v1294_v21 = vpack.c.bf16 %v1291_v19, %v1291_v19 }
 0x1ce   : > { %v1295_v20 = vpack.c.bf16 %v1292_v18, %v1292_v18 }
 0x1cf   : > { %v1348_v26 = vshll.u32 %v1294_v21, 16  ;;  %v1346_v30 = vshrl.u32 %v1294_v21, 16  ;;  %v1617_v44 = vrot.slane %v1294_v21, 1 }
 0x1d0   : > { %3475 = vmatprep.mubr.msk.bf16.mxu0 %vm1432_vm5, %v1295_v20  ;;  %v1618_v24 = vrot.slane %v1295_v20, 1  ;;  %v1355_v25 = vshll.u32 %v1295_v20, 16  ;;  %v1353_v28 = vshrl.u32 %v1295_v20, 16 }
 0x1d1   : > { %1583 = vmatmul.mubr.bf16.vlgmr.msra.gmra.mrb[8].mxu0 %v1294_v21  ;;  %v1350_v31 = vrot.slane %v1348_v26, 1  ;;  %v4032_v26 = vld [vmem:[%s5183_s8 + $0x18] sm:$0xff]  }
 0x1d2   : > { %1696 = vmatpush1.bf16.msra.mxu0 %v4004_v22  ;;  %3512 = vmatprep.mubr.msk.bf16.mxu0 %vm1432_vm5, %v1618_v24  ;;  %v1357_v29 = vrot.slane %v1355_v25, 1  ;;  %v4029_v22 = vld [vmem:[%s5183_s8] sm:$0xff]   ;;  %v4030_v24 = vld [vmem:[%s5183_s8 + $0x8] sm:$0xff]   ;;  %v4031_v25 = vld [vmem:[%s5183_s8 + $0x10] sm:$0xff]  }
 0x1d3   : > { %1697 = vmatprep.subr.bf16.mxu0 %v4141_v1  ;;  %v1351_v33 = vor.u32 %v1350_v31, %v1346_v30  ;;  %v4036_v30 = vld [vmem:[%s5183_s8 + $0x38] sm:$0xff]   ;;  %v4037_v31 = vld [vmem:[%s5183_s8 + $0x40] sm:$0xff]  }
 0x1d4   : > { %v1358_v32 = vor.u32 %v1357_v29, %v1353_v28  ;;  %v4034_v28 = vld [vmem:[%s5183_s8 + $0x28] sm:$0xff]   ;;  %v4035_v29 = vld [vmem:[%s5183_s8 + $0x30] sm:$0xff]  }
 0x1d6   : > { %1698 = vmatpush1.bf16.msra.mxu0 %v4006_v27  ;;  %3462 = vmatprep.mubr.msk.bf16.mxu1 %vm1432_vm5, %v1358_v32  ;;  %v4033_v27 = vld [vmem:[%s5183_s8 + $0x20] sm:$0xff]   ;;  %v4038_v32 = vld [vmem:[%s5183_s8 + $0x48] sm:$0xff]  }
 0x1d7   : > { %1469 = vmatmul.mubr.bf16.vlgmr.msra.gmra.mrb[8].mxu1 %v1351_v33  ;;  %1699 = vmatprep.subr.bf16.mxu0 %v4141_v1  ;;  %v4039_v33 = vld [vmem:[%s5183_s8 + $0x50] sm:$0xff]  }
 0x1d8   : > { %1898 = vmatpush1.bf16.msra.mxu1 %v4017_v45  ;;  %v4050_v45 = vld [vmem:[%s5183_s8 + $0x108] sm:$0xff]  }
 0x1d9   : > { %1899 = vmatprep.subr.bf16.mxu1 %v4141_v1 }
 0x1da   : > { %1700 = vmatpush1.bf16.msra.mxu0 %v4007_v34  ;;  %v4040_v34 = vld [vmem:[%s5183_s8 + $0x58] sm:$0xff]  }
 0x1db   : > { %1701 = vmatprep.subr.bf16.mxu0 %v4141_v1 }
 0x1dc   : > { %1900 = vmatpush1.bf16.msra.mxu1 %v4018_v46  ;;  %v4051_v46 = vld [vmem:[%s5183_s8 + $0x110] sm:$0xff]  }
 0x1dd   : > { %1901 = vmatprep.subr.bf16.mxu1 %v4141_v1 }
 0x1de   : > { %1702 = vmatpush1.bf16.msra.mxu0 %v4008_v35  ;;  %v4041_v35 = vld [vmem:[%s5183_s8 + $0xc0] sm:$0xff]  }
 0x1df   : > { %1703 = vmatprep.subr.bf16.mxu0 %v4141_v1 }
 0x1e0   : > { %1902 = vmatpush1.bf16.msra.mxu1 %v4019_v47  ;;  %v4052_v47 = vld [vmem:[%s5183_s8 + $0x118] sm:$0xff]  }
 0x1e1   : > { %1903 = vmatprep.subr.bf16.mxu1 %v4141_v1 }
 0x1e2   : > { %1704 = vmatpush1.bf16.msra.mxu0 %v4009_v36 }
 0x1e3   : > { %1705 = vmatprep.subr.bf16.mxu0 %v4141_v1 }
 0x1e4   : > { %1904 = vmatpush1.bf16.msra.mxu1 %v4020_v48 }
 0x1e5   : > { %1905 = vmatprep.subr.bf16.mxu1 %v4141_v1 }
 0x1e6   : > { %1706 = vmatpush1.bf16.msra.mxu0 %v4010_v37  ;;  %v4042_v37 = vld [vmem:[%s5183_s8 + $0xc8] sm:$0xff]  }
 0x1e7   : > { %1707 = vmatprep.subr.bf16.mxu0 %v4141_v1 }
 0x1e8   : > { %1906 = vmatpush1.bf16.msra.mxu1 %v4021_v49  ;;  %v4053_v49 = vld [vmem:[%s5185_s10] sm:$0xff]  }
 0x1e9   : > { %1907 = vmatprep.subr.bf16.mxu1 %v4141_v1 }
 0x1ea   : > { %1708 = vmatpush1.bf16.msra.mxu0 %v4011_v38  ;;  %v4043_v38 = vld [vmem:[%s5183_s8 + $0xd0] sm:$0xff]  }
 0x1eb   : > { %1709 = vmatprep.subr.bf16.mxu0 %v4141_v1 }
 0x1ec   : > { %1908 = vmatpush1.bf16.msra.mxu1 %v4022_v50  ;;  %v4055_v50 = vld [vmem:[%s5185_s10 + $0x60] sm:$0xff]  }
 0x1ed   : > { %1909 = vmatprep.subr.bf16.mxu1 %v4141_v1 }
 0x1ee   : > { %1710 = vmatpush1.bf16.msra.mxu0 %v4012_v39  ;;  %v4044_v39 = vld [vmem:[%s5183_s8 + $0xd8] sm:$0xff]  }
 0x1ef   : > { %1711 = vmatprep.subr.bf16.mxu0 %v4141_v1 }
 0x1f0   : > { %1910 = vmatpush1.bf16.msra.mxu1 %v4023_v51  ;;  %v4054_v51 = vld [vmem:[%s5185_s10 + $0x8] sm:$0xff]  }
 0x1f1   : > { %1911 = vmatprep.subr.bf16.mxu1 %v4141_v1 }
 0x1f2   : > { %1712 = vmatpush1.bf16.msra.mxu0 %v4013_v40  ;;  %v4045_v40 = vld [vmem:[%s5183_s8 + $0xe0] sm:$0xff]  }
 0x1f3   : > { %1713 = vmatprep.subr.bf16.mxu0 %v4141_v1 }
 0x1f4   : > { %1912 = vmatpush1.bf16.msra.mxu1 %v4024_v52  ;;  %v4057_v52 = vld [vmem:[%s5185_s10 + $0x68] sm:$0xff]  }
 0x1f5   : > { %1913 = vmatprep.subr.bf16.mxu1 %v4141_v1 }
 0x1f6   : > { %1714 = vmatpush1.bf16.msra.mxu0 %v4014_v41  ;;  %v4046_v41 = vld [vmem:[%s5183_s8 + $0xe8] sm:$0xff]  }
 0x1f7   : > { %1715 = vmatprep.subr.bf16.mxu0 %v4141_v1 }
 0x1f8   : > { %1914 = vmatpush1.bf16.msra.mxu1 %v4025_v59  ;;  %v4062_v59 = vld [vmem:[%s5185_s10 + $0x28] sm:$0xff]  }
 0x1f9   : > { %1915 = vmatprep.subr.bf16.mxu1 %v4141_v1 }
 0x1fa   : > { %1716 = vmatpush1.bf16.msra.mxu0 %v4015_v42  ;;  %v4047_v42 = vld [vmem:[%s5183_s8 + $0xf0] sm:$0xff]  }
 0x1fb   : > { %1717 = vmatprep.subr.bf16.mxu0 %v4141_v1 }
 0x1fc   : > { %1916 = vmatpush1.bf16.msra.mxu1 %v4026_v61  ;;  %v4064_v61 = vld [vmem:[%s5185_s10 + $0x30] sm:$0xff]  }
 0x1fd   : > { %1917 = vmatprep.subr.bf16.mxu1 %v4141_v1 }
 0x1fe   : > { %1718 = vmatpush1.bf16.msra.mxu0 %v4016_v43  ;;  %v4048_v43 = vld [vmem:[%s5183_s8 + $0xf8] sm:$0xff]  }
 0x1ff   : > { %2355 = vmatprep.subr.bf16.mxu0 %v4141_v1 }
 0x200   : > { %1918 = vmatpush1.bf16.msra.mxu1 %v4027_v63 }
 0x201   : > { %1728 = vmatmul.mubr.bf16.vlgmr.msra.gmra.mrb[8].mxu0 %v1617_v44  ;;  %1919 = vmatprep.subr.bf16.mxu1 %v4141_v1  ;;  %v4049_v44 = vld [vmem:[%s5183_s8 + $0x100] sm:$0xff]  }
 0x202   : > { %2356 = vmatpush1.bf16.msra.mxu0 %v4055_v50  ;;  %v4082_v50 = vld [vmem:[%s5185_s10 + $0xe8] sm:$0xff]  }
 0x203   : > { %2357 = vmatprep.subr.bf16.mxu0 %v4141_v1 }
 0x204   : > { %1920 = vmatpush1.bf16.msra.mxu1 %v4028_v7  ;;  %v4069_v7 = vld [vmem:[%s5185_s10 + $0x98] sm:$0xff]  }
 0x205   : > { %2011 = vmatprep.subr.bf16.mxu1 %v4141_v1 }
 0x206   : > { %2358 = vmatpush1.bf16.msra.mxu0 %v4057_v52  ;;  %v4084_v52 = vld [vmem:[%s5185_s10 + $0xf8] sm:$0xff]  }
 0x207   : > { %2359 = vmatprep.subr.bf16.mxu0 %v4141_v1 }
 0x2aa   : > { %v1470_v53 = vpop.f32.mrb[8].mxu1 }
 0x2ab   : > { %v1472_v54 = vpop.f32.mrb[9].mxu1  ;;  %v3885_v62 = vadd.f32 %v3884_v60, %v1470_v53  ;;  %v4056_v53 = vld [vmem:[%s5185_s10 + $0x10] sm:$0xff]   ;;  %v4065_v60 = vld [vmem:[%s5185_s10 + $0x88] sm:$0xff]  }
 0x2ac   : > { %v1473_v55 = vpop.f32.mrb[10].mxu1  ;;  %v4059_v54 = vld [vmem:[%s5185_s10 + $0x70] sm:$0xff]  }
 0x2ad   : > { %v1474_v56 = vpop.f32.mrb[11].mxu1  ;;  %v4058_v55 = vld [vmem:[%s5185_s10 + $0x18] sm:$0xff]   ;;  %2360 = vmatpush1.bf16.msra.mxu0 %v4059_v54  ;;  %v4086_v54 = vld [vmem:[%s5185_s10 + $0x108] sm:$0xff]  }
 0x2ae   : > { %v4061_v56 = vld [vmem:[%s5185_s10 + $0x78] sm:$0xff]   ;;  %2361 = vmatprep.subr.bf16.mxu0 %v4141_v1 }
 0x2b1   : > { %2362 = vmatpush1.bf16.msra.mxu0 %v4061_v56  ;;  %v4088_v56 = vld [vmem:[%s5185_s10 + $0x118] sm:$0xff]  }
 0x2b2   : > { %2363 = vmatprep.subr.bf16.mxu0 %v4141_v1 }
 0x2b5   : > { %2364 = vmatpush1.bf16.msra.mxu0 %v4063_v58  ;;  %v4089_v58 = vld [vmem:[%s5187_s12] sm:$0xff]  }
 0x2b6   : > { %2365 = vmatprep.subr.bf16.mxu0 %v4141_v1 }
 0x2b9   : > { %2366 = vmatpush1.bf16.msra.mxu0 %v4065_v60  ;;  %v4091_v60 = vld [vmem:[%s5187_s12 + $0x10] sm:$0xff]  }
 0x2ba   : > { %2367 = vmatprep.subr.bf16.mxu0 %v4141_v1 }
 0x2d4   : > { %v1729_v0 = vpop.f32.mrb[8].mxu0 }
 0x2d5   : > { %v4703_v2 = vadd.f32 %v3885_v62, %v1729_v0  ;;  %v1731_v3 = vpop.f32.mrb[9].mxu0  ;;  %v4067_v62 = vld [vmem:[%s5185_s10 + $0x90] sm:$0xff]  }
 0x2d6   : > { %v1732_v4 = vpop.f32.mrb[10].mxu0  ;;  %2368 = vmatpush1.bf16.msra.mxu0 %v4067_v62  ;;  %v4093_v62 = vld [vmem:[%s5187_s12 + $0x20] sm:$0xff]  }
 0x2d7   : > { %v1744_v5 = vmax.f32 %v4703_v2, 0.0  ;;  %v1733_v6 = vpop.f32.mrb[11].mxu0  ;;  %2369 = vmatprep.subr.bf16.mxu0 %v4141_v1  ;;  %v4099_v2 = vld [vmem:[%s5188_s13 + $0x70] sm:$0xff]  }
 0x2d8   : > { %v4066_v6 = vld [vmem:[%s5185_s10 + $0x38] sm:$0xff]  }
 0x2d9   : > { %v1748_v8 = vrot.slane %v1744_v5, 7 }
 0x2da   : > { %2370 = vmatpush1.bf16.msra.mxu0 %v4069_v7 }
 0x2db   : > { %1749 = vrot.lane.b32.xlu0 %v1748_v8, %s4144_s27  ;;  %v4068_v8 = vld [vmem:[%s5185_s10 + $0x40] sm:$0xff]   ;;  %2371 = vmatprep.subr.bf16.mxu0 %v4141_v1 }
 0x34d   : > { %v1750_v9 = vpop.permute.xlu0 %1749 }
 0x34e   : > { %1752 = vst.msk [vmem:[#allocation2] sm:$0x1e] %vm1287_vm3, %v1750_v9 }
 0x34f   : > { %1753 = vst.msk [vmem:[#allocation2 + $0x8] sm:$0x1e] %vm1289_vm4, %v1750_v9 }
 0x355   : > { %v1754_v11 = vld [vmem:[#allocation2] sm:$0x3f] }
 0x356   : > { %v1755_v10 = vld [vmem:[#allocation2 + $0x8] sm:$0x3f]  ;;  %v4716_v13 = vpack.c.bf16 %v1754_v11, %v1754_v11 }
 0x357   : > { %v1757_v12 = vpack.c.bf16 %v1755_v10, %v1755_v10 }
 0x358   : > { %v1810_v15 = vshll.u32 %v4716_v13, 16  ;;  %v1808_v18 = vshrl.u32 %v4716_v13, 16  ;;  %v2078_v48 = vrot.slane %v4716_v13, 1 }
 0x359   : > { %v1817_v14 = vshll.u32 %v1757_v12, 16  ;;  %v1815_v16 = vshrl.u32 %v1757_v12, 16  ;;  %v2079_v36 = vrot.slane %v1757_v12, 1 }
 0x35a   : > { %v1812_v19 = vrot.slane %v1810_v15, 1  ;;  %v4071_v15 = vld [vmem:[%s5185_s10 + $0xa0] sm:$0xff]  }
 0x35b   : > { %v1819_v17 = vrot.slane %v1817_v14, 1  ;;  %v4070_v14 = vld [vmem:[%s5185_s10 + $0x48] sm:$0xff]   ;;  %2372 = vmatpush1.bf16.msra.mxu0 %v4071_v15 }
 0x35c   : > { %v1813_v21 = vor.u32 %v1812_v19, %v1808_v18  ;;  %2373 = vmatprep.subr.bf16.mxu0 %v4141_v1  ;;  %v3601_v19 = vld [vmem:[%s5184_s9] ss:$0 sm:$0xff] }
 0x35d   : > { %v1820_v20 = vor.u32 %v1819_v17, %v1815_v16  ;;  %v4072_v16 = vld [vmem:[%s5185_s10 + $0x50] sm:$0xff]   ;;  %v4073_v17 = vld [vmem:[%s5185_s10 + $0xa8] sm:$0xff]  }
 0x35f   : > { %3550 = vmatprep.mubr.msk.bf16.mxu1 %vm1432_vm5, %v1820_v20  ;;  %v4074_v20 = vld [vmem:[%s5185_s10 + $0x58] sm:$0xff]   ;;  %2374 = vmatpush1.bf16.msra.mxu0 %v4073_v17 }
 0x360   : > { %1930 = vmatmul.mubr.bf16.vlgmr.msra.gmra.mrb[12].mxu1 %v1813_v21  ;;  %2375 = vmatprep.subr.bf16.mxu0 %v4141_v1 }
 0x361   : > { %2012 = vmatpush1.bf16.msra.mxu1 %v4029_v22  ;;  %3563 = vmatprep.mubr.msk.bf16.mxu1 %vm1432_vm5, %v1757_v12 }
 0x362   : > { %2013 = vmatprep.subr.bf16.mxu1 %v4141_v1 }
 0x365   : > { %2014 = vmatpush1.bf16.msra.mxu1 %v4030_v24  ;;  %v4075_v24 = vld [vmem:[%s5185_s10 + $0xb0] sm:$0xff]  }
 0x366   : > { %2015 = vmatprep.subr.bf16.mxu1 %v4141_v1  ;;  %2376 = vmatpush1.bf16.msra.mxu0 %v4075_v24  ;;  %v4097_v24 = vld [vmem:[%s5188_s13 + $0x60] sm:$0xff]  }
 0x367   : > { %2377 = vmatprep.subr.bf16.mxu0 %v4141_v1 }
 0x369   : > { %2016 = vmatpush1.bf16.msra.mxu1 %v4031_v25 }
 0x36a   : > { %2017 = vmatprep.subr.bf16.mxu1 %v4141_v1 }
 0x36d   : > { %2018 = vmatpush1.bf16.msra.mxu1 %v4032_v26 }
 0x36e   : > { %2019 = vmatprep.subr.bf16.mxu1 %v4141_v1 }
 0x371   : > { %2020 = vmatpush1.bf16.msra.mxu1 %v4033_v27 }
 0x372   : > { %2021 = vmatprep.subr.bf16.mxu1 %v4141_v1 }
 0x375   : > { %2022 = vmatpush1.bf16.msra.mxu1 %v4034_v28 }
 0x376   : > { %2023 = vmatprep.subr.bf16.mxu1 %v4141_v1 }
 0x379   : > { %2024 = vmatpush1.bf16.msra.mxu1 %v4035_v29 }
 0x37a   : > { %2025 = vmatprep.subr.bf16.mxu1 %v4141_v1 }
 0x37d   : > { %2026 = vmatpush1.bf16.msra.mxu1 %v4036_v30  ;;  %v4076_v30 = vld [vmem:[%s5185_s10 + $0xb8] sm:$0xff]  }
 0x37e   : > { %2027 = vmatprep.subr.bf16.mxu1 %v4141_v1  ;;  %2378 = vmatpush1.bf16.msra.mxu0 %v4076_v30  ;;  %v4105_v30 = vld [vmem:[%s5188_s13 + $0xa0] sm:$0xff]  }
 0x37f   : > { %2614 = vmatprep.subr.bf16.mxu0 %v4141_v1 }
 0x381   : > { %2028 = vmatpush1.bf16.msra.mxu1 %v4037_v31 }
 0x382   : > { %2029 = vmatprep.subr.bf16.mxu1 %v4141_v1 }
 0x385   : > { %2030 = vmatpush1.bf16.msra.mxu1 %v4038_v32 }
 0x386   : > { %2031 = vmatprep.subr.bf16.mxu1 %v4141_v1 }
 0x389   : > { %2032 = vmatpush1.bf16.msra.mxu1 %v4039_v33 }
 0x38a   : > { %2033 = vmatprep.subr.bf16.mxu1 %v4141_v1 }
 0x38d   : > { %2034 = vmatpush1.bf16.msra.mxu1 %v4040_v34 }
 0x38e   : > { %2156 = vmatprep.subr.bf16.mxu1 %v4141_v1 }
 0x390   : > { %2044 = vmatmul.mubr.bf16.vlgmr.msra.gmra.mrb[16].mxu1 %v4716_v13 }
 0x391   : > { %2157 = vmatpush1.bf16.msra.mxu1 %v4041_v35  ;;  %3600 = vmatprep.mubr.msk.bf16.mxu1 %vm1432_vm5, %v2079_v36 }
 0x392   : > { %2158 = vmatprep.subr.bf16.mxu1 %v4141_v1 }
 0x395   : > { %2159 = vmatpush1.bf16.msra.mxu1 %v4042_v37 }
 0x396   : > { %2160 = vmatprep.subr.bf16.mxu1 %v4141_v1 }
 0x399   : > { %2161 = vmatpush1.bf16.msra.mxu1 %v4043_v38 }
 0x39a   : > { %2162 = vmatprep.subr.bf16.mxu1 %v4141_v1 }
 0x39d   : > { %2163 = vmatpush1.bf16.msra.mxu1 %v4044_v39 }
 0x39e   : > { %2164 = vmatprep.subr.bf16.mxu1 %v4141_v1 }
 0x3a1   : > { %2165 = vmatpush1.bf16.msra.mxu1 %v4045_v40 }
 0x3a2   : > { %2166 = vmatprep.subr.bf16.mxu1 %v4141_v1 }
 0x3a5   : > { %2167 = vmatpush1.bf16.msra.mxu1 %v4046_v41 }
 0x3a6   : > { %2168 = vmatprep.subr.bf16.mxu1 %v4141_v1 }
 0x3a9   : > { %2169 = vmatpush1.bf16.msra.mxu1 %v4047_v42 }
 0x3aa   : > { %2170 = vmatprep.subr.bf16.mxu1 %v4141_v1 }
 0x3ad   : > { %2171 = vmatpush1.bf16.msra.mxu1 %v4048_v43 }
 0x3ae   : > { %2172 = vmatprep.subr.bf16.mxu1 %v4141_v1 }
 0x3b1   : > { %2173 = vmatpush1.bf16.msra.mxu1 %v4049_v44  ;;  %v4077_v44 = vld [vmem:[%s5185_s10 + $0xc0] sm:$0xff]  }
 0x3b2   : > { %2174 = vmatprep.subr.bf16.mxu1 %v4141_v1 }
 0x3b5   : > { %2175 = vmatpush1.bf16.msra.mxu1 %v4050_v45 }
 0x3b6   : > { %2176 = vmatprep.subr.bf16.mxu1 %v4141_v1 }
 0x3b9   : > { %2177 = vmatpush1.bf16.msra.mxu1 %v4051_v46  ;;  %v4078_v46 = vld [vmem:[%s5185_s10 + $0xc8] sm:$0xff]  }
 0x3ba   : > { %2178 = vmatprep.subr.bf16.mxu1 %v4141_v1 }
 0x3bd   : > { %2179 = vmatpush1.bf16.msra.mxu1 %v4052_v47  ;;  %v4079_v47 = vld [vmem:[%s5185_s10 + $0xd0] sm:$0xff]  }
 0x3be   : > { %2469 = vmatprep.subr.bf16.mxu1 %v4141_v1 }
 0x3c0   : > { %2189 = vmatmul.mubr.bf16.vlgmr.msra.gmra.mrb[20].mxu1 %v2078_v48  ;;  %v4080_v48 = vld [vmem:[%s5185_s10 + $0xd8] sm:$0xff]  }
 0x3c1   : > { %2470 = vmatpush1.bf16.msra.mxu1 %v4053_v49  ;;  %v4081_v49 = vld [vmem:[%s5185_s10 + $0xe0] sm:$0xff]  }
 0x3c2   : > { %2471 = vmatprep.subr.bf16.mxu1 %v4141_v1 }
 0x3c5   : > { %2472 = vmatpush1.bf16.msra.mxu1 %v4054_v51  ;;  %v4083_v51 = vld [vmem:[%s5185_s10 + $0xf0] sm:$0xff]  }
 0x3c6   : > { %2473 = vmatprep.subr.bf16.mxu1 %v4141_v1 }
 0x3c9   : > { %2474 = vmatpush1.bf16.msra.mxu1 %v4056_v53  ;;  %v4085_v53 = vld [vmem:[%s5185_s10 + $0x100] sm:$0xff]  }
 0x3ca   : > { %2475 = vmatprep.subr.bf16.mxu1 %v4141_v1 }
 0x3cd   : > { %2476 = vmatpush1.bf16.msra.mxu1 %v4058_v55  ;;  %v4087_v55 = vld [vmem:[%s5185_s10 + $0x110] sm:$0xff]  }
 0x3ce   : > { %2477 = vmatprep.subr.bf16.mxu1 %v4141_v1 }
 0x3d1   : > { %2478 = vmatpush1.bf16.msra.mxu1 %v4060_v57 }
 0x3d2   : > { %2479 = vmatprep.subr.bf16.mxu1 %v4141_v1 }
 0x3d5   : > { %2480 = vmatpush1.bf16.msra.mxu1 %v4062_v59  ;;  %v4090_v59 = vld [vmem:[%s5187_s12 + $0x8] sm:$0xff]  }
 0x3d6   : > { %2481 = vmatprep.subr.bf16.mxu1 %v4141_v1 }
 0x3d9   : > { %2482 = vmatpush1.bf16.msra.mxu1 %v4064_v61  ;;  %v4092_v61 = vld [vmem:[%s5187_s12 + $0x18] sm:$0xff]  }
 0x3da   : > { %2483 = vmatprep.subr.bf16.mxu1 %v4141_v1 }
 0x3dd   : > { %2484 = vmatpush1.bf16.msra.mxu1 %v4066_v6 }
 0x3de   : > { %2485 = vmatprep.subr.bf16.mxu1 %v4141_v1 }
 0x3e1   : > { %2486 = vmatpush1.bf16.msra.mxu1 %v4068_v8 }
 0x3e2   : > { %2487 = vmatprep.subr.bf16.mxu1 %v4141_v1 }
 0x3e5   : > { %2488 = vmatpush1.bf16.msra.mxu1 %v4070_v14  ;;  %v3689_v14 = vld [vmem:[%s5186_s11] ss:$0 sm:$0xff] }
 0x3e6   : > { %2489 = vmatprep.subr.bf16.mxu1 %v4141_v1 }
 0x3e9   : > { %2490 = vmatpush1.bf16.msra.mxu1 %v4072_v16 }
 0x3ea   : > { %2491 = vmatprep.subr.bf16.mxu1 %v4141_v1 }
 0x3ed   : > { %2492 = vmatpush1.bf16.msra.mxu1 %v4074_v20 }
 0x3ee   : > { %3864 = vmatprep.subr.bf16.mxu1 %v4142_v23 }
 0x433   : > { %v1931_v63 = vpop.f32.mrb[12].mxu1 }
 0x434   : > { %v1933_v0 = vpop.f32.mrb[13].mxu1 }
 0x435   : > { %v1934_v3 = vpop.f32.mrb[14].mxu1  ;;  %v4095_v0 = vld [vmem:[%s5187_s12 + $0x30] sm:$0xff]  }
 0x436   : > { %v1935_v4 = vpop.f32.mrb[15].mxu1  ;;  %v4096_v3 = vld [vmem:[%s5187_s12 + $0x38] sm:$0xff]  }
 0x463   : > { %v2045_v9 = vpop.f32.mrb[16].mxu1 }
 0x464   : > { %v2046_v10 = vadd.f32 %v2045_v9, %v1931_v63  ;;  %v2047_v11 = vpop.f32.mrb[17].mxu1  ;;  %v4094_v63 = vld [vmem:[%s5187_s12 + $0x28] sm:$0xff]  }
 0x465   : > { %v2048_v12 = vpop.f32.mrb[18].mxu1 }
 0x466   : > { %v2049_v13 = vpop.f32.mrb[19].mxu1 }
 0x493   : > { %v2190_v18 = vpop.f32.mrb[20].mxu1 }
 0x494   : > { %v2196_v21 = vadd.f32 %v2190_v18, %v2046_v10  ;;  %v2192_v22 = vpop.f32.mrb[21].mxu1 }
 0x495   : > { %v2193_v25 = vpop.f32.mrb[22].mxu1 }
 0x496   : > { %v2194_v26 = vpop.f32.mrb[23].mxu1  ;;  %v2203_v27 = vadd.f32 %v3601_v19, %v2196_v21  ;;  %v4098_v25 = vld [vmem:[%s5188_s13 + $0x68] sm:$0xff]  }
 0x497   : > { %v4101_v26 = vld [vmem:[%s5188_s13 + $0x80] sm:$0xff]  }
 0x498   : > { %v2204_v28 = vmax.f32 %v2203_v27, 0.0  ;;  %v4102_v27 = vld [vmem:[%s5188_s13 + $0x88] sm:$0xff]  }
 0x49a   : > { %v2206_v29 = vrot.slane %v2204_v28, 7  ;;  %v4103_v28 = vld [vmem:[%s5188_s13 + $0x90] sm:$0xff]  }
 0x49c   : > { %2207 = vrot.lane.b32.xlu1 %v2206_v29, %s4144_s27  ;;  %v4104_v29 = vld [vmem:[%s5188_s13 + $0x98] sm:$0xff]  }
 0x50e   : > { %v2208_v31 = vpop.permute.xlu1 %2207 }
 0x50f   : > { %2210 = vst.msk [vmem:[#allocation2] sm:$0x1e] %vm1287_vm3, %v2208_v31 }
 0x510   : > { %2211 = vst.msk [vmem:[#allocation2 + $0x8] sm:$0x1e] %vm1289_vm4, %v2208_v31  ;;  %v4106_v31 = vld [vmem:[%s5188_s13 + $0xa8] sm:$0xff]  }
 0x516   : > { %v2212_v33 = vld [vmem:[#allocation2] sm:$0x3f] }
 0x517   : > { %v2213_v32 = vld [vmem:[#allocation2 + $0x8] sm:$0x3f]  ;;  %v2214_v35 = vpack.c.bf16 %v2212_v33, %v2212_v33  ;;  %v4108_v33 = vld [vmem:[%s5188_s13 + $0xb8] sm:$0xff]  }
 0x518   : > { %v2215_v34 = vpack.c.bf16 %v2213_v32, %v2213_v32  ;;  %v4107_v32 = vld [vmem:[%s5188_s13 + $0xb0] sm:$0xff]  }
 0x519   : > { %v2268_v37 = vshll.u32 %v2214_v35, 16  ;;  %v2266_v40 = vshrl.u32 %v2214_v35, 16  ;;  %v2536_v57 = vrot.slane %v2214_v35, 1 }
 0x51a   : > { %3651 = vmatprep.mubr.msk.bf16.mxu1 %vm1432_vm5, %v2215_v34  ;;  %v2275_v36 = vshll.u32 %v2215_v34, 16  ;;  %v2273_v38 = vshrl.u32 %v2215_v34, 16  ;;  %v2537_v45 = vrot.slane %v2215_v34, 1 }
 0x51b   : > { %2502 = vmatmul.mubr.bf16.vlgmr.msra.gmra.mrb[24].mxu1 %v2214_v35  ;;  %v2270_v41 = vrot.slane %v2268_v37, 1 }
 0x51c   : > { %v2277_v39 = vrot.slane %v2275_v36, 1  ;;  %3880 = vmatprep.mubr.msk.bf16.mxu1 %vm4143_vm1, %v4142_v23  ;;  %3865 = vmatpush3.bf16.msra.mxu1 %v4089_v58  ;;  %v4115_v58 = vld [vmem:[%s5188_s13 + $0x30] sm:$0xff]  }
 0x51d   : > { %v2271_v43 = vor.u32 %v2270_v41, %v2266_v40  ;;  %3866 = vmatprep.subr.bf16.mxu1 %v4142_v23 }
 0x51e   : > { %v2278_v42 = vor.u32 %v2277_v39, %v2273_v38 }
 0x520   : > { %3638 = vmatprep.mubr.msk.bf16.mxu0 %vm1432_vm5, %v2278_v42  ;;  %3867 = vmatpush3.bf16.msra.mxu1 %v4090_v59  ;;  %v4116_v59 = vld [vmem:[%s5188_s13 + $0x38] sm:$0xff]  }
 0x521   : > { %2388 = vmatmul.mubr.bf16.vlgmr.msra.gmra.mrb[12].mxu0 %v2271_v43  ;;  %3868 = vmatprep.subr.bf16.mxu1 %v4142_v23 }
 0x522   : > { %2615 = vmatpush1.bf16.msra.mxu0 %v4077_v44  ;;  %3688 = vmatprep.mubr.msk.bf16.mxu0 %vm1432_vm5, %v2537_v45 }
 0x523   : > { %2616 = vmatprep.subr.bf16.mxu0 %v4141_v1 }
 0x524   : > { %3869 = vmatpush3.bf16.msra.mxu1 %v4091_v60  ;;  %v4117_v60 = vld [vmem:[%s5188_s13 + $0x40] sm:$0xff]  }
 0x525   : > { %3870 = vmatprep.subr.bf16.mxu1 %v4142_v23 }
 0x526   : > { %2617 = vmatpush1.bf16.msra.mxu0 %v4078_v46 }
 0x527   : > { %2618 = vmatprep.subr.bf16.mxu0 %v4141_v1 }
 0x528   : > { %3871 = vmatpush3.bf16.msra.mxu1 %v4092_v61  ;;  %v4118_v61 = vld [vmem:[%s5188_s13 + $0x48] sm:$0xff]  }
 0x529   : > { %3872 = vmatprep.subr.bf16.mxu1 %v4142_v23 }
 0x52a   : > { %2619 = vmatpush1.bf16.msra.mxu0 %v4079_v47 }
 0x52b   : > { %2620 = vmatprep.subr.bf16.mxu0 %v4141_v1 }
 0x52c   : > { %3873 = vmatpush3.bf16.msra.mxu1 %v4093_v62  ;;  %v4119_v62 = vld [vmem:[%s5188_s13 + $0x50] sm:$0xff]  }
 0x52d   : > { %3874 = vmatprep.subr.bf16.mxu1 %v4142_v23 }
 0x52e   : > { %2621 = vmatpush1.bf16.msra.mxu0 %v4080_v48 }
 0x52f   : > { %2622 = vmatprep.subr.bf16.mxu0 %v4141_v1 }
 0x530   : > { %3875 = vmatpush3.bf16.msra.mxu1 %v4094_v63  ;;  %v4120_v63 = vld [vmem:[%s5188_s13 + $0x58] sm:$0xff]  }
 0x531   : > { %3876 = vmatprep.subr.bf16.mxu1 %v4142_v23 }
 0x532   : > { %2623 = vmatpush1.bf16.msra.mxu0 %v4081_v49 }
 0x533   : > { %2624 = vmatprep.subr.bf16.mxu0 %v4141_v1 }
 0x534   : > { %3877 = vmatpush3.bf16.msra.mxu1 %v4095_v0  ;;  %v4121_v0 = vld [vmem:[%s5188_s13 + $0xc0] sm:$0xff]  }
 0x535   : > { %3878 = vmatprep.subr.bf16.mxu1 %v4142_v23 }
 0x536   : > { %2625 = vmatpush1.bf16.msra.mxu0 %v4082_v50 }
 0x537   : > { %2626 = vmatprep.subr.bf16.mxu0 %v4141_v1 }
 0x538   : > { %3879 = vmatpush3.bf16.msra.mxu1 %v4096_v3 }
 0x53a   : > { %2627 = vmatpush1.bf16.msra.mxu0 %v4083_v51 }
 0x53b   : > { %2628 = vmatprep.subr.bf16.mxu0 %v4141_v1 }
 0x53e   : > { %2629 = vmatpush1.bf16.msra.mxu0 %v4084_v52  ;;  %v4109_v52 = vld [vmem:[%s5188_s13] sm:$0xff]  }
 0x53f   : > { %2630 = vmatprep.subr.bf16.mxu0 %v4141_v1 }
 0x542   : > { %2631 = vmatpush1.bf16.msra.mxu0 %v4085_v53  ;;  %v4110_v53 = vld [vmem:[%s5188_s13 + $0x8] sm:$0xff]  }
 0x543   : > { %2632 = vmatprep.subr.bf16.mxu0 %v4141_v1 }
 0x546   : > { %2633 = vmatpush1.bf16.msra.mxu0 %v4086_v54  ;;  %v4111_v54 = vld [vmem:[%s5188_s13 + $0x10] sm:$0xff]  }
 0x547   : > { %2634 = vmatprep.subr.bf16.mxu0 %v4141_v1 }
 0x54a   : > { %2635 = vmatpush1.bf16.msra.mxu0 %v4087_v55  ;;  %v4112_v55 = vld [vmem:[%s5188_s13 + $0x18] sm:$0xff]  }
 0x54b   : > { %2636 = vmatprep.subr.bf16.mxu0 %v4141_v1 }
 0x54e   : > { %2637 = vmatpush1.bf16.msra.mxu0 %v4088_v56  ;;  %v4113_v56 = vld [vmem:[%s5188_s13 + $0x20] sm:$0xff]  }
 0x54f   : > { %2919 = vmatprep.subr.bf16.mxu0 %v4141_v1 }
 0x551   : > { %2647 = vmatmul.mubr.bf16.vlgmr.msra.gmra.mrb[16].mxu0 %v2536_v57  ;;  %v4114_v57 = vld [vmem:[%s5188_s13 + $0x28] sm:$0xff]  }
 0x552   : > { %2920 = vmatpush1.bf16.msra.mxu0 %v4097_v24 }
 0x553   : > { %2921 = vmatprep.subr.bf16.mxu0 %v4141_v1 }
 0x556   : > { %2922 = vmatpush1.bf16.msra.mxu0 %v4098_v25 }
 0x557   : > { %2923 = vmatprep.subr.bf16.mxu0 %v4141_v1 }
 0x55a   : > { %2924 = vmatpush1.bf16.msra.mxu0 %v4099_v2 }
 0x55b   : > { %2925 = vmatprep.subr.bf16.mxu0 %v4141_v1 }
 0x5ee   : > { %v2503_v4 = vpop.f32.mrb[24].mxu1 }
 0x5ef   : > { %v2505_v6 = vpop.f32.mrb[25].mxu1 }
 0x5f0   : > { %v2506_v7 = vpop.f32.mrb[26].mxu1  ;;  %v4123_v6 = vld [vmem:[%s5188_s13 + $0xd0] sm:$0xff]  }
 0x5f1   : > { %v2507_v8 = vpop.f32.mrb[27].mxu1  ;;  %v4124_v7 = vld [vmem:[%s5188_s13 + $0xd8] sm:$0xff]  }
 0x5f2   : > { %v4125_v8 = vld [vmem:[%s5188_s13 + $0xe0] sm:$0xff]  }
 0x5f4   : > { %v2389_v9 = vpop.f32.mrb[12].mxu0 }
 0x5f5   : > { %v2504_v10 = vadd.f32 %v2503_v4, %v2389_v9  ;;  %v2391_v11 = vpop.f32.mrb[13].mxu0  ;;  %v4122_v4 = vld [vmem:[%s5188_s13 + $0xc8] sm:$0xff]  }
 0x5f6   : > { %v2392_v12 = vpop.f32.mrb[14].mxu0  ;;  %v4126_v9 = vld [vmem:[%s5188_s13 + $0xe8] sm:$0xff]   ;;  %v4128_v11 = vld [vmem:[%s5188_s13 + $0xf8] sm:$0xff]  }
 0x5f7   : > { %v2393_v13 = vpop.f32.mrb[15].mxu0  ;;  %v4129_v12 = vld [vmem:[%s5188_s13 + $0x100] sm:$0xff]  }
 0x5f8   : > { %v4130_v13 = vld [vmem:[%s5188_s13 + $0x108] sm:$0xff]  }
 0x624   : > { %v2648_v15 = vpop.f32.mrb[16].mxu0 }
 0x625   : > { %v2654_v23 = vadd.f32 %v2648_v15, %v2504_v10  ;;  %v2650_v16 = vpop.f32.mrb[17].mxu0  ;;  %v4127_v10 = vld [vmem:[%s5188_s13 + $0xf0] sm:$0xff]   ;;  %v4132_v15 = vld [vmem:[%s5188_s13 + $0x118] sm:$0xff]  }
 0x626   : > { %v2651_v17 = vpop.f32.mrb[18].mxu0 }
 0x627   : > { %v2661_v18 = vadd.f32 %v3689_v14, %v2654_v23  ;;  %v2652_v19 = vpop.f32.mrb[19].mxu0  ;;  %v4131_v14 = vld [vmem:[%s5188_s13 + $0x110] sm:$0xff]  }
 0x629   : > { %v2662_v20 = vadd.f32 %v2661_v18, %v1744_v5  ;;  %v4100_v5 = vld [vmem:[%s5188_s13 + $0x78] sm:$0xff]  }
 0x62a   : > { %2926 = vmatpush1.bf16.msra.mxu0 %v4100_v5 }
 0x62b   : > { %v2663_v21 = vmax.f32 %v2662_v20, 0.0  ;;  %2927 = vmatprep.subr.bf16.mxu0 %v4141_v1 }
 0x62d   : > { %v2664_v22 = vpack.c.bf16 %v2663_v21, %v2663_v21 }
 0x62e   : > { %2928 = vmatpush1.bf16.msra.mxu0 %v4101_v26 }
 0x62f   : > { %3881 = vmatmul.mubr.bf16.vlgmr.msra.gmra.mrb[28].mxu1 %v2664_v22  ;;  %2929 = vmatprep.subr.bf16.mxu0 %v4141_v1 }
 0x632   : > { %2930 = vmatpush1.bf16.msra.mxu0 %v4102_v27 }
 0x633   : > { %2931 = vmatprep.subr.bf16.mxu0 %v4141_v1 }
 0x636   : > { %2932 = vmatpush1.bf16.msra.mxu0 %v4103_v28 }
 0x637   : > { %2933 = vmatprep.subr.bf16.mxu0 %v4141_v1 }
 0x63a   : > { %2934 = vmatpush1.bf16.msra.mxu0 %v4104_v29 }
 0x63b   : > { %2935 = vmatprep.subr.bf16.mxu0 %v4141_v1 }
 0x63e   : > { %2936 = vmatpush1.bf16.msra.mxu0 %v4105_v30 }
 0x63f   : > { %2937 = vmatprep.subr.bf16.mxu0 %v4141_v1 }
 0x642   : > { %2938 = vmatpush1.bf16.msra.mxu0 %v4106_v31 }
 0x643   : > { %2939 = vmatprep.subr.bf16.mxu0 %v4141_v1 }
 0x646   : > { %2940 = vmatpush1.bf16.msra.mxu0 %v4107_v32 }
 0x647   : > { %2941 = vmatprep.subr.bf16.mxu0 %v4141_v1 }
 0x64a   : > { %2942 = vmatpush1.bf16.msra.mxu0 %v4108_v33 }
 0x64b   : > { %3033 = vmatprep.subr.bf16.mxu0 %v4141_v1 }
 0x702   : > { %v2763_v34 = vpop.f32.mrb[28].mxu1 }
 0x703   : > { %v2770_v35 = vrot.slane %v2763_v34, 7  ;;  %v3882_v36 = vpop.f32.mrb[29].mxu1 }
 0x704   : > { %v2766_v37 = vpop.f32.mrb[30].mxu1 }
 0x705   : > { %2771 = vrot.lane.b32.xlu1 %v2770_v35, %s4144_s27  ;;  %v3883_v38 = vpop.f32.mrb[31].mxu1 }
 0x777   : > { %v2772_v39 = vpop.permute.xlu1 %2771 }
 0x778   : > { %2774 = vst.msk [vmem:[#allocation2] sm:$0x1e] %vm1287_vm3, %v2772_v39 }
 0x779   : > { %2775 = vst.msk [vmem:[#allocation2 + $0x8] sm:$0x1e] %vm1289_vm4, %v2772_v39 }
 0x77f   : > { %v2776_v41 = vld [vmem:[#allocation2] sm:$0x3f] }
 0x780   : > { %v2777_v40 = vld [vmem:[#allocation2 + $0x8] sm:$0x3f]  ;;  %v5063_v43 = vpack.c.bf16 %v2776_v41, %v2776_v41 }
 0x781   : > { %v2779_v42 = vpack.c.bf16 %v2777_v40, %v2777_v40 }
 0x782   : > { %v2832_v45 = vshll.u32 %v5063_v43, 16  ;;  %v2830_v48 = vshrl.u32 %v5063_v43, 16  ;;  %v3100_v23 = vrot.slane %v5063_v43, 1 }
 0x783   : > { %v2839_v44 = vshll.u32 %v2779_v42, 16  ;;  %v2837_v46 = vshrl.u32 %v2779_v42, 16  ;;  %v3101_v3 = vrot.slane %v2779_v42, 1 }
 0x784   : > { %v2834_v49 = vrot.slane %v2832_v45, 1 }
 0x785   : > { %v2841_v47 = vrot.slane %v2839_v44, 1 }
 0x786   : > { %v2835_v51 = vor.u32 %v2834_v49, %v2830_v48 }
 0x787   : > { %v2842_v50 = vor.u32 %v2841_v47, %v2837_v46 }
 0x789   : > { %3734 = vmatprep.mubr.msk.bf16.mxu0 %vm1432_vm5, %v2842_v50 }
 0x78a   : > { %2952 = vmatmul.mubr.bf16.vlgmr.msra.gmra.mrb[20].mxu0 %v2835_v51 }
 0x78b   : > { %3034 = vmatpush1.bf16.msra.mxu0 %v4109_v52  ;;  %3747 = vmatprep.mubr.msk.bf16.mxu0 %vm1432_vm5, %v2779_v42 }
 0x78c   : > { %3035 = vmatprep.subr.bf16.mxu0 %v4141_v1 }
 0x78f   : > { %3036 = vmatpush1.bf16.msra.mxu0 %v4110_v53 }
 0x790   : > { %3037 = vmatprep.subr.bf16.mxu0 %v4141_v1 }
 0x793   : > { %3038 = vmatpush1.bf16.msra.mxu0 %v4111_v54 }
 0x794   : > { %3039 = vmatprep.subr.bf16.mxu0 %v4141_v1 }
 0x797   : > { %3040 = vmatpush1.bf16.msra.mxu0 %v4112_v55 }
 0x798   : > { %3041 = vmatprep.subr.bf16.mxu0 %v4141_v1 }
 0x79b   : > { %3042 = vmatpush1.bf16.msra.mxu0 %v4113_v56 }
 0x79c   : > { %3043 = vmatprep.subr.bf16.mxu0 %v4141_v1 }
 0x79f   : > { %3044 = vmatpush1.bf16.msra.mxu0 %v4114_v57 }
 0x7a0   : > { %3045 = vmatprep.subr.bf16.mxu0 %v4141_v1 }
 0x7a3   : > { %3046 = vmatpush1.bf16.msra.mxu0 %v4115_v58 }
 0x7a4   : > { %3047 = vmatprep.subr.bf16.mxu0 %v4141_v1 }
 0x7a7   : > { %3048 = vmatpush1.bf16.msra.mxu0 %v4116_v59 }
 0x7a8   : > { %3049 = vmatprep.subr.bf16.mxu0 %v4141_v1 }
 0x7ab   : > { %3050 = vmatpush1.bf16.msra.mxu0 %v4117_v60 }
 0x7ac   : > { %3051 = vmatprep.subr.bf16.mxu0 %v4141_v1 }
 0x7af   : > { %3052 = vmatpush1.bf16.msra.mxu0 %v4118_v61 }
 0x7b0   : > { %3053 = vmatprep.subr.bf16.mxu0 %v4141_v1 }
 0x7b3   : > { %3054 = vmatpush1.bf16.msra.mxu0 %v4119_v62 }
 0x7b4   : > { %3055 = vmatprep.subr.bf16.mxu0 %v4141_v1 }
 0x7b7   : > { %3056 = vmatpush1.bf16.msra.mxu0 %v4120_v63 }
 0x7b8   : > { %3178 = vmatprep.subr.bf16.mxu0 %v4141_v1 }
 0x7ba   : > { %3066 = vmatmul.mubr.bf16.vlgmr.msra.gmra.mrb[20].mxu0 %v5063_v43 }
 0x7bb   : > { %3179 = vmatpush1.bf16.msra.mxu0 %v4121_v0  ;;  %3784 = vmatprep.mubr.msk.bf16.mxu0 %vm1432_vm5, %v3101_v3 }
 0x7bc   : > { %3180 = vmatprep.subr.bf16.mxu0 %v4141_v1 }
 0x7bf   : > { %3181 = vmatpush1.bf16.msra.mxu0 %v4122_v4 }
 0x7c0   : > { %3182 = vmatprep.subr.bf16.mxu0 %v4141_v1 }
 0x7c3   : > { %3183 = vmatpush1.bf16.msra.mxu0 %v4123_v6 }
 0x7c4   : > { %3184 = vmatprep.subr.bf16.mxu0 %v4141_v1 }
 0x7c7   : > { %3185 = vmatpush1.bf16.msra.mxu0 %v4124_v7 }
 0x7c8   : > { %3186 = vmatprep.subr.bf16.mxu0 %v4141_v1 }
 0x7cb   : > { %3187 = vmatpush1.bf16.msra.mxu0 %v4125_v8 }
 0x7cc   : > { %3188 = vmatprep.subr.bf16.mxu0 %v4141_v1 }
 0x7cf   : > { %3189 = vmatpush1.bf16.msra.mxu0 %v4126_v9 }
 0x7d0   : > { %3190 = vmatprep.subr.bf16.mxu0 %v4141_v1 }
 0x7d3   : > { %3191 = vmatpush1.bf16.msra.mxu0 %v4127_v10 }
 0x7d4   : > { %3192 = vmatprep.subr.bf16.mxu0 %v4141_v1 }
 0x7d7   : > { %3193 = vmatpush1.bf16.msra.mxu0 %v4128_v11 }
 0x7d8   : > { %3194 = vmatprep.subr.bf16.mxu0 %v4141_v1 }
 0x7db   : > { %3195 = vmatpush1.bf16.msra.mxu0 %v4129_v12 }
 0x7dc   : > { %3196 = vmatprep.subr.bf16.mxu0 %v4141_v1 }
 0x7df   : > { %3197 = vmatpush1.bf16.msra.mxu0 %v4130_v13 }
 0x7e0   : > { %3198 = vmatprep.subr.bf16.mxu0 %v4141_v1 }
 0x7e3   : > { %3199 = vmatpush1.bf16.msra.mxu0 %v4131_v14 }
 0x7e4   : > { %3200 = vmatprep.subr.bf16.mxu0 %v4141_v1 }
 0x7e7   : > { %3201 = vmatpush1.bf16.msra.mxu0 %v4132_v15 }
 0x7ea   : > { %3211 = vmatmul.mubr.bf16.vlgmr.msra.gmra.mrb[20].mxu0 %v3100_v23 }
 0x8bd   : > { %v3212_v16 = vpop.f32.mrb[20].mxu0 }
 0x8be   : > { %3220 = vst.msk [vmem:[%s482_s25] sm:$0xf] %vm3219_vm6, %v3212_v16  ;;  %v3214_v17 = vpop.f32.mrb[21].mxu0 }
 0x8bf   : > { %v3215_v18 = vpop.f32.mrb[22].mxu0 }
 0x8c0   : > { %v3216_v19 = vpop.f32.mrb[23].mxu0 }
 0x8c1 PF: > { %s24_s29 = sadd.s32 1, %s4139_s29  }
 0x8c2   : > { %p21_p4 = scmp.ge.s32.totalorder %s24_s29, 4  }
 0x8c4   :  { %23 = sbr.rel (!%p21_p4) target bundleno = 1 (0x1), region = 118 }

</bundles_post_ra>
